<compile_context>
chip_gen: v6e
topology: v6e:2x2x1
jax: 0.10.0
libtpu: 0.0.40
codegen_flags: <defaults>
</compile_context>

<pallas_src>
import functools

import jax
import jax.numpy as jnp
from jax.experimental import pallas as pl
from jax.experimental.pallas import tpu as pltpu

# Full-precision f32 matmuls everywhere so the Pallas kernel and the XLA
# reference agree to float32 roundoff (DEFAULT truncates to bf16 on the MXU).
jax.config.update("jax_default_matmul_precision", "highest")
MM_PREC = jax.lax.Precision.HIGHEST

EPS = 1e-6


# -----------------------------------------------------------------------------
# Fully fused IDCNN forward kernel (one batch element per grid step).
# All tensors live in VMEM in channels-major (filters, S) layout, S = 128 lanes.
# -----------------------------------------------------------------------------
def _idcnn_fused_kernel(x_ref, lw_ref, lb_ref,
                        w0_ref, b0_ref, w1_ref, b1_ref, w2_ref, b2_ref,
                        ln_a_s_ref, ln_a_b_ref, ln_b_s_ref, ln_b_b_ref,
                        o_ref, *, seq, eps, num_block):
    f32 = jnp.float32
    S = seq
    inv_n = 1.0 / S
    inv_nm1 = 1.0 / (S - 1)

    def shift_right(h, d):
        # out[:, t] = h[:, t - d], zeros for t < d   (tap k=0 of the conv)
        z = jnp.zeros((h.shape[0], d), f32)
        return jnp.concatenate([z, h[:, :S - d]], axis=1)

    def shift_left(h, d):
        # out[:, t] = h[:, t + d], zeros for t >= S - d   (tap k=2)
        z = jnp.zeros((h.shape[0], d), f32)
        return jnp.concatenate([h[:, d:], z], axis=1)

    def conv(h, w_ref, b_ref, dilation, relu):
        # 'same' dilated conv, K=3:  y[:, t] = b + sum_k W_k @ h[:, t + (k-1)*d]
        # Taps stacked along sublanes -> one (C_out, 3*C_in) @ (3*C_in, S) MXU matmul.
        taps = jnp.concatenate(
            [shift_right(h, dilation), h, shift_left(h, dilation)], axis=0)
        y = jnp.dot(w_ref[...].astype(f32), taps,
                    preferred_element_type=f32, precision=MM_PREC)
        y = y + b_ref[...].astype(f32)          # (C_out, 1) lane-broadcast
        if relu:
            y = jnp.maximum(y, 0.0)
        return y

    def layernorm(h, s_ref, b_ref):
        # torch LayerNorm as written:  a*(x-mean)/(std_unbiased + eps) + b
        # Single-pass stats (sum & sum-of-squares), exact divide (no approx vrcp).
        s1 = jnp.sum(h, axis=-1, keepdims=True)
        s2 = jnp.sum(h * h, axis=-1, keepdims=True)
        mean = s1 * inv_n
        var = jnp.maximum((s2 - S * mean * mean) * inv_nm1, 0.0)
        std = jnp.sqrt(var)
        return (s_ref[...].astype(f32) * ((h - mean) / (std + eps))
                + b_ref[...].astype(f32))

    def net(h):  # shared-weight block: conv0 -> ReLU -> LN -> conv1 -> conv2(d=2)
        h = conv(h, w0_ref, b0_ref, 1, relu=True)
        h = layernorm(h, ln_a_s_ref, ln_a_b_ref)
        h = conv(h, w1_ref, b1_ref, 1, relu=False)
        h = conv(h, w2_ref, b2_ref, 2, relu=False)
        return h

    # linear, computed directly in transposed (filters, S) layout
    x = x_ref[0].astype(f32)                                    # (in, S)
    emb = jnp.dot(lw_ref[...].astype(f32), x,
                  preferred_element_type=f32, precision=MM_PREC)
    emb = emb + lb_ref[...].astype(f32)                         # (filters, S)

    h = net(emb)                                                # block0
    h = layernorm(jnp.maximum(h, 0.0), ln_b_s_ref, ln_b_b_ref)  # idcnn ReLU + LN
    for _ in range(num_block - 1):                              # blocks 1..3
        h = net(h)

    # gated residual epilogue:  emb + h * sigmoid(h)
    sig = 1.0 / (1.0 + jnp.exp(-h))
    o_ref[0] = (emb + h * sig).astype(o_ref.dtype)


def _flatten_conv_w(w):
    # torch (C_out, C_in, K) -> (C_out, K*C_in), tap-major, matching the
    # in-kernel taps = concat([tap_k0, tap_k1, tap_k2], axis=0) layout.
    c_out, c_in, k = w.shape
    return jnp.transpose(w, (0, 2, 1)).reshape(c_out, k * c_in)


@jax.jit
def idcnn_forward(params, embeddings, length):
    del length                                  # unused by the PyTorch forward
    bsz, seq, in_sz = embeddings.shape
    filters = params["lin_w"].shape[1]

    # Tiny wrapper-side layout prep only (weights ~12 KB, input ~16 KB):
    x_t = jnp.transpose(embeddings, (0, 2, 1))                  # (B, in, S)
    lin_wt = jnp.transpose(params["lin_w"], (1, 0))             # (filters, in)
    lin_b = params["lin_b"].reshape(filters, 1)
    w0 = _flatten_conv_w(params["conv0_w"]); b0 = params["conv0_b"].reshape(filters, 1)
    w1 = _flatten_conv_w(params["conv1_w"]); b1 = params["conv1_b"].reshape(filters, 1)
    w2 = _flatten_conv_w(params["conv2_w"]); b2 = params["conv2_b"].reshape(filters, 1)
    ln_a_s = params["ln_a_scale"].reshape(1, seq)
    ln_a_b = params["ln_a_bias"].reshape(1, seq)
    ln_b_s = params["ln_b_scale"].reshape(1, seq)
    ln_b_b = params["ln_b_bias"].reshape(1, seq)

    def full(shape):          # whole-array block, constant index across the grid
        return pl.BlockSpec(shape, lambda b, _s=shape: (0,) * len(_s))

    kern = functools.partial(_idcnn_fused_kernel, seq=seq, eps=EPS, num_block=4)

    out_t = pl.pallas_call(
        kern,
        out_shape=jax.ShapeDtypeStruct((bsz, filters, seq), embeddings.dtype),
        grid_spec=pltpu.PrefetchScalarGridSpec(
            num_scalar_prefetch=0,
            grid=(bsz,),                        # batch axis -> megacore on v7x
            in_specs=[
                pl.BlockSpec((1, in_sz, seq), lambda b: (b, 0, 0)),
                full((filters, in_sz)), full((filters, 1)),
                full((filters, 3 * filters)), full((filters, 1)),
                full((filters, 3 * filters)), full((filters, 1)),
                full((filters, 3 * filters)), full((filters, 1)),
                full((1, seq)), full((1, seq)), full((1, seq)), full((1, seq)),
            ],
            out_specs=pl.BlockSpec((1, filters, seq), lambda b: (b, 0, 0)),
        ),
        compiler_params=pltpu.CompilerParams(
            dimension_semantics=("parallel",),
            vmem_limit_bytes=32 * 1024 * 1024),
    )(x_t, lin_wt, lin_b, w0, b0, w1, b1, w2, b2, ln_a_s, ln_a_b, ln_b_s, ln_b_b)

    return jnp.transpose(out_t, (0, 2, 1))                      # (B, S, filters)


# -----------------------------------------------------------------------------
# Pure-JAX reference (mirrors the PyTorch semantics exactly, full precision)
# -----------------------------------------------------------------------------
def _layer_norm_ref(x, a, b, eps=EPS):
    n = x.shape[-1]
    mean = jnp.mean(x, axis=-1, keepdims=True)
    std = jnp.sqrt(jnp.sum((x - mean) ** 2, axis=-1, keepdims=True) / (n - 1))
    return a * (x - mean) / (std + eps) + b


def _conv1d_ref(x, w, b, dilation):
    ksize = w.shape[-1]
    pad = ksize // 2 + dilation - 1
    y = jax.lax.conv_general_dilated(
        x, w, window_strides=(1,), padding=[(pad, pad)],
        rhs_dilation=(dilation,), dimension_numbers=("NCH", "OIH", "NCH"),
        precision=MM_PREC)
    return y + b[None, :, None]


@jax.jit
def idcnn_forward_ref(params, embeddings, length):
    del length
    emb = jnp.dot(embeddings, params["lin_w"], precision=MM_PREC) + params["lin_b"]
    emb1 = emb
    h = jnp.transpose(emb, (0, 2, 1))

    def net(z):
        z = jnp.maximum(_conv1d_ref(z, params["conv0_w"], params["conv0_b"], 1), 0.0)
        z = _layer_norm_ref(z, params["ln_a_scale"], params["ln_a_bias"])
        z = _conv1d_ref(z, params["conv1_w"], params["conv1_b"], 1)
        z = _conv1d_ref(z, params["conv2_w"], params["conv2_b"], 2)
        return z

    h = net(h)
    h = _layer_norm_ref(jnp.maximum(h, 0.0),
                        params["ln_b_scale"], params["ln_b_bias"])
    h = net(h)
    h = net(h)
    h = net(h)
    out = jnp.transpose(h, (0, 2, 1))
    return emb1 + out * jax.nn.sigmoid(out)


if __name__ == "__main__":
    key = jax.random.PRNGKey(0)
    # LayerNorm(128) is applied over the sequence axis, so seq must be 128;
    # keep the other dims small.
    batch, seq, input_size, filters, ksize = 2, 128, 16, 32, 3

    keys = jax.random.split(key, 12)

    def uinit(k, shape, fan_in):
        lim = 1.0 / (fan_in ** 0.5)
        return jax.random.uniform(k, shape, jnp.float32, -lim, lim)

    params = {
        "lin_w": uinit(keys[0], (input_size, filters), input_size),
        "lin_b": uinit(keys[1], (filters,), input_size),
        "conv0_w": uinit(keys[2], (filters, filters, ksize), filters * ksize),
        "conv0_b": uinit(keys[3], (filters,), filters * ksize),
        "conv1_w": uinit(keys[4], (filters, filters, ksize), filters * ksize),
        "conv1_b": uinit(keys[5], (filters,), filters * ksize),
        "conv2_w": uinit(keys[6], (filters, filters, ksize), filters * ksize),
        "conv2_b": uinit(keys[7], (filters,), filters * ksize),
        # LayerNorm(128) params init to ones/zeros in torch; perturb them here so
        # the test exercises the scale/bias broadcast along the sequence axis.
        "ln_a_scale": 1.0 + 0.1 * jax.random.normal(keys[9], (seq,), jnp.float32),
        "ln_a_bias": 0.05 * jax.random.normal(keys[10], (seq,), jnp.float32),
        "ln_b_scale": 1.0 + 0.1 * jax.random.normal(keys[11], (seq,), jnp.float32),
        "ln_b_bias": 0.05 * jax.random.normal(keys[8], (seq,), jnp.float32),
    }

    embeddings = jax.random.normal(keys[8], (batch, seq, input_size), jnp.float32)
    length = jnp.full((batch,), seq, jnp.int32)   # accepted but unused (as in torch)

    out = jax.block_until_ready(idcnn_forward(params, embeddings, length))
    ref = jax.block_until_ready(idcnn_forward_ref(params, embeddings, length))

    assert out.shape == (batch, seq, filters)
    assert bool(jnp.all(jnp.isfinite(out)))
    err = float(jnp.max(jnp.abs(out - ref)))
    assert err < 2e-3, f"IDCNN forward mismatch vs reference (max abs err {err})"

    print("KERNEL_OK")
</pallas_src>

<mosaic_0001>
module attributes {stable_mosaic.version = 11 : i64} {
  func.func @_idcnn_fused_kernel(%arg0: i32, %arg1: memref<1x16x128xf32, #tpu.memory_space<vmem>>, %arg2: memref<32x16xf32, #tpu.memory_space<vmem>>, %arg3: memref<32x1xf32, #tpu.memory_space<vmem>>, %arg4: memref<32x96xf32, #tpu.memory_space<vmem>>, %arg5: memref<32x1xf32, #tpu.memory_space<vmem>>, %arg6: memref<32x96xf32, #tpu.memory_space<vmem>>, %arg7: memref<32x1xf32, #tpu.memory_space<vmem>>, %arg8: memref<32x96xf32, #tpu.memory_space<vmem>>, %arg9: memref<32x1xf32, #tpu.memory_space<vmem>>, %arg10: memref<1x128xf32, #tpu.memory_space<vmem>>, %arg11: memref<1x128xf32, #tpu.memory_space<vmem>>, %arg12: memref<1x128xf32, #tpu.memory_space<vmem>>, %arg13: memref<1x128xf32, #tpu.memory_space<vmem>>, %arg14: memref<1x32x128xf32, #tpu.memory_space<vmem>>) attributes {dimension_semantics = [#tpu.dimension_semantics<parallel>], iteration_bounds = array<i64: 2>, scalar_prefetch = 0 : i64, scratch_operands = 0 : i64, tpu.core_type = #tpu.core_type<tc>, window_params = [{transform_indices = @transform_0, window_bounds = array<i64: 1, 16, 128>}, {pipeline_mode = #tpu.pipeline_mode<synchronous>, transform_indices = @transform_1, window_bounds = array<i64: 32, 16>}, {pipeline_mode = #tpu.pipeline_mode<synchronous>, transform_indices = @transform_2, window_bounds = array<i64: 32, 1>}, {pipeline_mode = #tpu.pipeline_mode<synchronous>, transform_indices = @transform_3, window_bounds = array<i64: 32, 96>}, {pipeline_mode = #tpu.pipeline_mode<synchronous>, transform_indices = @transform_4, window_bounds = array<i64: 32, 1>}, {pipeline_mode = #tpu.pipeline_mode<synchronous>, transform_indices = @transform_5, window_bounds = array<i64: 32, 96>}, {pipeline_mode = #tpu.pipeline_mode<synchronous>, transform_indices = @transform_6, window_bounds = array<i64: 32, 1>}, {pipeline_mode = #tpu.pipeline_mode<synchronous>, transform_indices = @transform_7, window_bounds = array<i64: 32, 96>}, {pipeline_mode = #tpu.pipeline_mode<synchronous>, transform_indices = @transform_8, window_bounds = array<i64: 32, 1>}, {pipeline_mode = #tpu.pipeline_mode<synchronous>, transform_indices = @transform_9, window_bounds = array<i64: 1, 128>}, {pipeline_mode = #tpu.pipeline_mode<synchronous>, transform_indices = @transform_10, window_bounds = array<i64: 1, 128>}, {pipeline_mode = #tpu.pipeline_mode<synchronous>, transform_indices = @transform_11, window_bounds = array<i64: 1, 128>}, {pipeline_mode = #tpu.pipeline_mode<synchronous>, transform_indices = @transform_12, window_bounds = array<i64: 1, 128>}, {transform_indices = @transform_13, window_bounds = array<i64: 1, 32, 128>}]} {
    %c0 = arith.constant 0 : index
    %c0_0 = arith.constant 0 : index
    %c0_1 = arith.constant 0 : index
    %0 = vector.load %arg1[%c0, %c0_0, %c0_1] : memref<1x16x128xf32, #tpu.memory_space<vmem>>, vector<1x16x128xf32>
    %1 = vector.shape_cast %0 : vector<1x16x128xf32> to vector<16x128xf32>
    %c0_2 = arith.constant 0 : index
    %c0_3 = arith.constant 0 : index
    %2 = vector.load %arg2[%c0_2, %c0_3] : memref<32x16xf32, #tpu.memory_space<vmem>>, vector<32x16xf32>
    %cst = arith.constant dense<0.000000e+00> : vector<32x128xf32>
    %3 = tpu.matmul %2, %1, %cst {dimension_numbers = #tpu.dot_dimension_numbers<[1], [0], [0], [1], [0, 0, 1, 1], [], []>, precision = #tpu.contract_precision<fp32>} : vector<32x16xf32>, vector<16x128xf32>, vector<32x128xf32> -> vector<32x128xf32>
    %c0_4 = arith.constant 0 : index
    %c0_5 = arith.constant 0 : index
    %4 = vector.load %arg3[%c0_4, %c0_5] : memref<32x1xf32, #tpu.memory_space<vmem>>, vector<32x1xf32>
    %5 = vector.broadcast %4 : vector<32x1xf32> to vector<32x128xf32>
    %6 = arith.addf %3, %5 : vector<32x128xf32>
    %cst_6 = arith.constant 0.000000e+00 : f32
    %7 = vector.broadcast %cst_6 : f32 to vector<32x1xf32>
    %8 = vector.extract_strided_slice %6 {offsets = [0, 0], sizes = [32, 127], strides = [1, 1]} : vector<32x128xf32> to vector<32x127xf32>
    %9 = tpu.concatenate %7, %8 in 1 : vector<32x1xf32>, vector<32x127xf32> -> vector<32x128xf32>
    %cst_7 = arith.constant 0.000000e+00 : f32
    %10 = vector.broadcast %cst_7 : f32 to vector<32x1xf32>
    %11 = vector.extract_strided_slice %6 {offsets = [0, 1], sizes = [32, 127], strides = [1, 1]} : vector<32x128xf32> to vector<32x127xf32>
    %12 = tpu.concatenate %11, %10 in 1 : vector<32x127xf32>, vector<32x1xf32> -> vector<32x128xf32>
    %13 = tpu.concatenate %9, %6, %12 in 0 : vector<32x128xf32>, vector<32x128xf32>, vector<32x128xf32> -> vector<96x128xf32>
    %c0_8 = arith.constant 0 : index
    %c0_9 = arith.constant 0 : index
    %14 = vector.load %arg4[%c0_8, %c0_9] : memref<32x96xf32, #tpu.memory_space<vmem>>, vector<32x96xf32>
    %cst_10 = arith.constant dense<0.000000e+00> : vector<32x128xf32>
    %15 = tpu.matmul %14, %13, %cst_10 {dimension_numbers = #tpu.dot_dimension_numbers<[1], [0], [0], [1], [0, 0, 1, 1], [], []>, precision = #tpu.contract_precision<fp32>} : vector<32x96xf32>, vector<96x128xf32>, vector<32x128xf32> -> vector<32x128xf32>
    %c0_11 = arith.constant 0 : index
    %c0_12 = arith.constant 0 : index
    %16 = vector.load %arg5[%c0_11, %c0_12] : memref<32x1xf32, #tpu.memory_space<vmem>>, vector<32x1xf32>
    %17 = vector.broadcast %16 : vector<32x1xf32> to vector<32x128xf32>
    %18 = arith.addf %15, %17 : vector<32x128xf32>
    %cst_13 = arith.constant 0.000000e+00 : f32
    %19 = vector.broadcast %cst_13 : f32 to vector<32x128xf32>
    %20 = arith.maximumf %18, %19 : vector<32x128xf32>
    %cst_14 = arith.constant dense<0.000000e+00> : vector<32xf32>
    %21 = vector.multi_reduction <add>, %20, %cst_14 [1] : vector<32x128xf32> to vector<32xf32>
    %22 = vector.shape_cast %21 : vector<32xf32> to vector<32x1xf32>
    %23 = arith.mulf %20, %20 : vector<32x128xf32>
    %cst_15 = arith.constant dense<0.000000e+00> : vector<32xf32>
    %24 = vector.multi_reduction <add>, %23, %cst_15 [1] : vector<32x128xf32> to vector<32xf32>
    %25 = vector.shape_cast %24 : vector<32xf32> to vector<32x1xf32>
    %cst_16 = arith.constant 7.812500e-03 : f32
    %26 = vector.broadcast %cst_16 : f32 to vector<32x1xf32>
    %27 = arith.mulf %22, %26 : vector<32x1xf32>
    %cst_17 = arith.constant 1.280000e+02 : f32
    %28 = vector.broadcast %cst_17 : f32 to vector<32x1xf32>
    %29 = arith.mulf %28, %27 : vector<32x1xf32>
    %30 = arith.mulf %29, %27 : vector<32x1xf32>
    %31 = arith.subf %25, %30 : vector<32x1xf32>
    %cst_18 = arith.constant 0.00787401571 : f32
    %32 = vector.broadcast %cst_18 : f32 to vector<32x1xf32>
    %33 = arith.mulf %31, %32 : vector<32x1xf32>
    %cst_19 = arith.constant 0.000000e+00 : f32
    %34 = vector.broadcast %cst_19 : f32 to vector<32x1xf32>
    %35 = arith.maximumf %33, %34 : vector<32x1xf32>
    %36 = math.sqrt %35 : vector<32x1xf32>
    %c0_20 = arith.constant 0 : index
    %c0_21 = arith.constant 0 : index
    %37 = vector.load %arg10[%c0_20, %c0_21] : memref<1x128xf32, #tpu.memory_space<vmem>>, vector<1x128xf32>
    %38 = vector.broadcast %27 : vector<32x1xf32> to vector<32x128xf32>
    %39 = arith.subf %20, %38 : vector<32x128xf32>
    %cst_22 = arith.constant 9.99999997E-7 : f32
    %40 = vector.broadcast %cst_22 : f32 to vector<32x1xf32>
    %41 = arith.addf %36, %40 : vector<32x1xf32>
    %42 = vector.broadcast %41 : vector<32x1xf32> to vector<32x128xf32>
    %43 = arith.divf %39, %42 : vector<32x128xf32>
    %44 = vector.broadcast %37 : vector<1x128xf32> to vector<32x128xf32>
    %45 = arith.mulf %44, %43 : vector<32x128xf32>
    %c0_23 = arith.constant 0 : index
    %c0_24 = arith.constant 0 : index
    %46 = vector.load %arg11[%c0_23, %c0_24] : memref<1x128xf32, #tpu.memory_space<vmem>>, vector<1x128xf32>
    %47 = vector.broadcast %46 : vector<1x128xf32> to vector<32x128xf32>
    %48 = arith.addf %45, %47 : vector<32x128xf32>
    %cst_25 = arith.constant 0.000000e+00 : f32
    %49 = vector.broadcast %cst_25 : f32 to vector<32x1xf32>
    %50 = vector.extract_strided_slice %48 {offsets = [0, 0], sizes = [32, 127], strides = [1, 1]} : vector<32x128xf32> to vector<32x127xf32>
    %51 = tpu.concatenate %49, %50 in 1 : vector<32x1xf32>, vector<32x127xf32> -> vector<32x128xf32>
    %cst_26 = arith.constant 0.000000e+00 : f32
    %52 = vector.broadcast %cst_26 : f32 to vector<32x1xf32>
    %53 = vector.extract_strided_slice %48 {offsets = [0, 1], sizes = [32, 127], strides = [1, 1]} : vector<32x128xf32> to vector<32x127xf32>
    %54 = tpu.concatenate %53, %52 in 1 : vector<32x127xf32>, vector<32x1xf32> -> vector<32x128xf32>
    %55 = tpu.concatenate %51, %48, %54 in 0 : vector<32x128xf32>, vector<32x128xf32>, vector<32x128xf32> -> vector<96x128xf32>
    %c0_27 = arith.constant 0 : index
    %c0_28 = arith.constant 0 : index
    %56 = vector.load %arg6[%c0_27, %c0_28] : memref<32x96xf32, #tpu.memory_space<vmem>>, vector<32x96xf32>
    %cst_29 = arith.constant dense<0.000000e+00> : vector<32x128xf32>
    %57 = tpu.matmul %56, %55, %cst_29 {dimension_numbers = #tpu.dot_dimension_numbers<[1], [0], [0], [1], [0, 0, 1, 1], [], []>, precision = #tpu.contract_precision<fp32>} : vector<32x96xf32>, vector<96x128xf32>, vector<32x128xf32> -> vector<32x128xf32>
    %c0_30 = arith.constant 0 : index
    %c0_31 = arith.constant 0 : index
    %58 = vector.load %arg7[%c0_30, %c0_31] : memref<32x1xf32, #tpu.memory_space<vmem>>, vector<32x1xf32>
    %59 = vector.broadcast %58 : vector<32x1xf32> to vector<32x128xf32>
    %60 = arith.addf %57, %59 : vector<32x128xf32>
    %cst_32 = arith.constant 0.000000e+00 : f32
    %61 = vector.broadcast %cst_32 : f32 to vector<32x2xf32>
    %62 = vector.extract_strided_slice %60 {offsets = [0, 0], sizes = [32, 126], strides = [1, 1]} : vector<32x128xf32> to vector<32x126xf32>
    %63 = tpu.concatenate %61, %62 in 1 : vector<32x2xf32>, vector<32x126xf32> -> vector<32x128xf32>
    %cst_33 = arith.constant 0.000000e+00 : f32
    %64 = vector.broadcast %cst_33 : f32 to vector<32x2xf32>
    %65 = vector.extract_strided_slice %60 {offsets = [0, 2], sizes = [32, 126], strides = [1, 1]} : vector<32x128xf32> to vector<32x126xf32>
    %66 = tpu.concatenate %65, %64 in 1 : vector<32x126xf32>, vector<32x2xf32> -> vector<32x128xf32>
    %67 = tpu.concatenate %63, %60, %66 in 0 : vector<32x128xf32>, vector<32x128xf32>, vector<32x128xf32> -> vector<96x128xf32>
    %c0_34 = arith.constant 0 : index
    %c0_35 = arith.constant 0 : index
    %68 = vector.load %arg8[%c0_34, %c0_35] : memref<32x96xf32, #tpu.memory_space<vmem>>, vector<32x96xf32>
    %cst_36 = arith.constant dense<0.000000e+00> : vector<32x128xf32>
    %69 = tpu.matmul %68, %67, %cst_36 {dimension_numbers = #tpu.dot_dimension_numbers<[1], [0], [0], [1], [0, 0, 1, 1], [], []>, precision = #tpu.contract_precision<fp32>} : vector<32x96xf32>, vector<96x128xf32>, vector<32x128xf32> -> vector<32x128xf32>
    %c0_37 = arith.constant 0 : index
    %c0_38 = arith.constant 0 : index
    %70 = vector.load %arg9[%c0_37, %c0_38] : memref<32x1xf32, #tpu.memory_space<vmem>>, vector<32x1xf32>
    %71 = vector.broadcast %70 : vector<32x1xf32> to vector<32x128xf32>
    %72 = arith.addf %69, %71 : vector<32x128xf32>
    %cst_39 = arith.constant 0.000000e+00 : f32
    %73 = vector.broadcast %cst_39 : f32 to vector<32x128xf32>
    %74 = arith.maximumf %72, %73 : vector<32x128xf32>
    %cst_40 = arith.constant dense<0.000000e+00> : vector<32xf32>
    %75 = vector.multi_reduction <add>, %74, %cst_40 [1] : vector<32x128xf32> to vector<32xf32>
    %76 = vector.shape_cast %75 : vector<32xf32> to vector<32x1xf32>
    %77 = arith.mulf %74, %74 : vector<32x128xf32>
    %cst_41 = arith.constant dense<0.000000e+00> : vector<32xf32>
    %78 = vector.multi_reduction <add>, %77, %cst_41 [1] : vector<32x128xf32> to vector<32xf32>
    %79 = vector.shape_cast %78 : vector<32xf32> to vector<32x1xf32>
    %cst_42 = arith.constant 7.812500e-03 : f32
    %80 = vector.broadcast %cst_42 : f32 to vector<32x1xf32>
    %81 = arith.mulf %76, %80 : vector<32x1xf32>
    %cst_43 = arith.constant 1.280000e+02 : f32
    %82 = vector.broadcast %cst_43 : f32 to vector<32x1xf32>
    %83 = arith.mulf %82, %81 : vector<32x1xf32>
    %84 = arith.mulf %83, %81 : vector<32x1xf32>
    %85 = arith.subf %79, %84 : vector<32x1xf32>
    %cst_44 = arith.constant 0.00787401571 : f32
    %86 = vector.broadcast %cst_44 : f32 to vector<32x1xf32>
    %87 = arith.mulf %85, %86 : vector<32x1xf32>
    %cst_45 = arith.constant 0.000000e+00 : f32
    %88 = vector.broadcast %cst_45 : f32 to vector<32x1xf32>
    %89 = arith.maximumf %87, %88 : vector<32x1xf32>
    %90 = math.sqrt %89 : vector<32x1xf32>
    %c0_46 = arith.constant 0 : index
    %c0_47 = arith.constant 0 : index
    %91 = vector.load %arg12[%c0_46, %c0_47] : memref<1x128xf32, #tpu.memory_space<vmem>>, vector<1x128xf32>
    %92 = vector.broadcast %81 : vector<32x1xf32> to vector<32x128xf32>
    %93 = arith.subf %74, %92 : vector<32x128xf32>
    %cst_48 = arith.constant 9.99999997E-7 : f32
    %94 = vector.broadcast %cst_48 : f32 to vector<32x1xf32>
    %95 = arith.addf %90, %94 : vector<32x1xf32>
    %96 = vector.broadcast %95 : vector<32x1xf32> to vector<32x128xf32>
    %97 = arith.divf %93, %96 : vector<32x128xf32>
    %98 = vector.broadcast %91 : vector<1x128xf32> to vector<32x128xf32>
    %99 = arith.mulf %98, %97 : vector<32x128xf32>
    %c0_49 = arith.constant 0 : index
    %c0_50 = arith.constant 0 : index
    %100 = vector.load %arg13[%c0_49, %c0_50] : memref<1x128xf32, #tpu.memory_space<vmem>>, vector<1x128xf32>
    %101 = vector.broadcast %100 : vector<1x128xf32> to vector<32x128xf32>
    %102 = arith.addf %99, %101 : vector<32x128xf32>
    %cst_51 = arith.constant 0.000000e+00 : f32
    %103 = vector.broadcast %cst_51 : f32 to vector<32x1xf32>
    %104 = vector.extract_strided_slice %102 {offsets = [0, 0], sizes = [32, 127], strides = [1, 1]} : vector<32x128xf32> to vector<32x127xf32>
    %105 = tpu.concatenate %103, %104 in 1 : vector<32x1xf32>, vector<32x127xf32> -> vector<32x128xf32>
    %cst_52 = arith.constant 0.000000e+00 : f32
    %106 = vector.broadcast %cst_52 : f32 to vector<32x1xf32>
    %107 = vector.extract_strided_slice %102 {offsets = [0, 1], sizes = [32, 127], strides = [1, 1]} : vector<32x128xf32> to vector<32x127xf32>
    %108 = tpu.concatenate %107, %106 in 1 : vector<32x127xf32>, vector<32x1xf32> -> vector<32x128xf32>
    %109 = tpu.concatenate %105, %102, %108 in 0 : vector<32x128xf32>, vector<32x128xf32>, vector<32x128xf32> -> vector<96x128xf32>
    %c0_53 = arith.constant 0 : index
    %c0_54 = arith.constant 0 : index
    %110 = vector.load %arg4[%c0_53, %c0_54] : memref<32x96xf32, #tpu.memory_space<vmem>>, vector<32x96xf32>
    %cst_55 = arith.constant dense<0.000000e+00> : vector<32x128xf32>
    %111 = tpu.matmul %110, %109, %cst_55 {dimension_numbers = #tpu.dot_dimension_numbers<[1], [0], [0], [1], [0, 0, 1, 1], [], []>, precision = #tpu.contract_precision<fp32>} : vector<32x96xf32>, vector<96x128xf32>, vector<32x128xf32> -> vector<32x128xf32>
    %c0_56 = arith.constant 0 : index
    %c0_57 = arith.constant 0 : index
    %112 = vector.load %arg5[%c0_56, %c0_57] : memref<32x1xf32, #tpu.memory_space<vmem>>, vector<32x1xf32>
    %113 = vector.broadcast %112 : vector<32x1xf32> to vector<32x128xf32>
    %114 = arith.addf %111, %113 : vector<32x128xf32>
    %cst_58 = arith.constant 0.000000e+00 : f32
    %115 = vector.broadcast %cst_58 : f32 to vector<32x128xf32>
    %116 = arith.maximumf %114, %115 : vector<32x128xf32>
    %cst_59 = arith.constant dense<0.000000e+00> : vector<32xf32>
    %117 = vector.multi_reduction <add>, %116, %cst_59 [1] : vector<32x128xf32> to vector<32xf32>
    %118 = vector.shape_cast %117 : vector<32xf32> to vector<32x1xf32>
    %119 = arith.mulf %116, %116 : vector<32x128xf32>
    %cst_60 = arith.constant dense<0.000000e+00> : vector<32xf32>
    %120 = vector.multi_reduction <add>, %119, %cst_60 [1] : vector<32x128xf32> to vector<32xf32>
    %121 = vector.shape_cast %120 : vector<32xf32> to vector<32x1xf32>
    %cst_61 = arith.constant 7.812500e-03 : f32
    %122 = vector.broadcast %cst_61 : f32 to vector<32x1xf32>
    %123 = arith.mulf %118, %122 : vector<32x1xf32>
    %cst_62 = arith.constant 1.280000e+02 : f32
    %124 = vector.broadcast %cst_62 : f32 to vector<32x1xf32>
    %125 = arith.mulf %124, %123 : vector<32x1xf32>
    %126 = arith.mulf %125, %123 : vector<32x1xf32>
    %127 = arith.subf %121, %126 : vector<32x1xf32>
    %cst_63 = arith.constant 0.00787401571 : f32
    %128 = vector.broadcast %cst_63 : f32 to vector<32x1xf32>
    %129 = arith.mulf %127, %128 : vector<32x1xf32>
    %cst_64 = arith.constant 0.000000e+00 : f32
    %130 = vector.broadcast %cst_64 : f32 to vector<32x1xf32>
    %131 = arith.maximumf %129, %130 : vector<32x1xf32>
    %132 = math.sqrt %131 : vector<32x1xf32>
    %c0_65 = arith.constant 0 : index
    %c0_66 = arith.constant 0 : index
    %133 = vector.load %arg10[%c0_65, %c0_66] : memref<1x128xf32, #tpu.memory_space<vmem>>, vector<1x128xf32>
    %134 = vector.broadcast %123 : vector<32x1xf32> to vector<32x128xf32>
    %135 = arith.subf %116, %134 : vector<32x128xf32>
    %cst_67 = arith.constant 9.99999997E-7 : f32
    %136 = vector.broadcast %cst_67 : f32 to vector<32x1xf32>
    %137 = arith.addf %132, %136 : vector<32x1xf32>
    %138 = vector.broadcast %137 : vector<32x1xf32> to vector<32x128xf32>
    %139 = arith.divf %135, %138 : vector<32x128xf32>
    %140 = vector.broadcast %133 : vector<1x128xf32> to vector<32x128xf32>
    %141 = arith.mulf %140, %139 : vector<32x128xf32>
    %c0_68 = arith.constant 0 : index
    %c0_69 = arith.constant 0 : index
    %142 = vector.load %arg11[%c0_68, %c0_69] : memref<1x128xf32, #tpu.memory_space<vmem>>, vector<1x128xf32>
    %143 = vector.broadcast %142 : vector<1x128xf32> to vector<32x128xf32>
    %144 = arith.addf %141, %143 : vector<32x128xf32>
    %cst_70 = arith.constant 0.000000e+00 : f32
    %145 = vector.broadcast %cst_70 : f32 to vector<32x1xf32>
    %146 = vector.extract_strided_slice %144 {offsets = [0, 0], sizes = [32, 127], strides = [1, 1]} : vector<32x128xf32> to vector<32x127xf32>
    %147 = tpu.concatenate %145, %146 in 1 : vector<32x1xf32>, vector<32x127xf32> -> vector<32x128xf32>
    %cst_71 = arith.constant 0.000000e+00 : f32
    %148 = vector.broadcast %cst_71 : f32 to vector<32x1xf32>
    %149 = vector.extract_strided_slice %144 {offsets = [0, 1], sizes = [32, 127], strides = [1, 1]} : vector<32x128xf32> to vector<32x127xf32>
    %150 = tpu.concatenate %149, %148 in 1 : vector<32x127xf32>, vector<32x1xf32> -> vector<32x128xf32>
    %151 = tpu.concatenate %147, %144, %150 in 0 : vector<32x128xf32>, vector<32x128xf32>, vector<32x128xf32> -> vector<96x128xf32>
    %c0_72 = arith.constant 0 : index
    %c0_73 = arith.constant 0 : index
    %152 = vector.load %arg6[%c0_72, %c0_73] : memref<32x96xf32, #tpu.memory_space<vmem>>, vector<32x96xf32>
    %cst_74 = arith.constant dense<0.000000e+00> : vector<32x128xf32>
    %153 = tpu.matmul %152, %151, %cst_74 {dimension_numbers = #tpu.dot_dimension_numbers<[1], [0], [0], [1], [0, 0, 1, 1], [], []>, precision = #tpu.contract_precision<fp32>} : vector<32x96xf32>, vector<96x128xf32>, vector<32x128xf32> -> vector<32x128xf32>
    %c0_75 = arith.constant 0 : index
    %c0_76 = arith.constant 0 : index
    %154 = vector.load %arg7[%c0_75, %c0_76] : memref<32x1xf32, #tpu.memory_space<vmem>>, vector<32x1xf32>
    %155 = vector.broadcast %154 : vector<32x1xf32> to vector<32x128xf32>
    %156 = arith.addf %153, %155 : vector<32x128xf32>
    %cst_77 = arith.constant 0.000000e+00 : f32
    %157 = vector.broadcast %cst_77 : f32 to vector<32x2xf32>
    %158 = vector.extract_strided_slice %156 {offsets = [0, 0], sizes = [32, 126], strides = [1, 1]} : vector<32x128xf32> to vector<32x126xf32>
    %159 = tpu.concatenate %157, %158 in 1 : vector<32x2xf32>, vector<32x126xf32> -> vector<32x128xf32>
    %cst_78 = arith.constant 0.000000e+00 : f32
    %160 = vector.broadcast %cst_78 : f32 to vector<32x2xf32>
    %161 = vector.extract_strided_slice %156 {offsets = [0, 2], sizes = [32, 126], strides = [1, 1]} : vector<32x128xf32> to vector<32x126xf32>
    %162 = tpu.concatenate %161, %160 in 1 : vector<32x126xf32>, vector<32x2xf32> -> vector<32x128xf32>
    %163 = tpu.concatenate %159, %156, %162 in 0 : vector<32x128xf32>, vector<32x128xf32>, vector<32x128xf32> -> vector<96x128xf32>
    %c0_79 = arith.constant 0 : index
    %c0_80 = arith.constant 0 : index
    %164 = vector.load %arg8[%c0_79, %c0_80] : memref<32x96xf32, #tpu.memory_space<vmem>>, vector<32x96xf32>
    %cst_81 = arith.constant dense<0.000000e+00> : vector<32x128xf32>
    %165 = tpu.matmul %164, %163, %cst_81 {dimension_numbers = #tpu.dot_dimension_numbers<[1], [0], [0], [1], [0, 0, 1, 1], [], []>, precision = #tpu.contract_precision<fp32>} : vector<32x96xf32>, vector<96x128xf32>, vector<32x128xf32> -> vector<32x128xf32>
    %c0_82 = arith.constant 0 : index
    %c0_83 = arith.constant 0 : index
    %166 = vector.load %arg9[%c0_82, %c0_83] : memref<32x1xf32, #tpu.memory_space<vmem>>, vector<32x1xf32>
    %167 = vector.broadcast %166 : vector<32x1xf32> to vector<32x128xf32>
    %168 = arith.addf %165, %167 : vector<32x128xf32>
    %cst_84 = arith.constant 0.000000e+00 : f32
    %169 = vector.broadcast %cst_84 : f32 to vector<32x1xf32>
    %170 = vector.extract_strided_slice %168 {offsets = [0, 0], sizes = [32, 127], strides = [1, 1]} : vector<32x128xf32> to vector<32x127xf32>
    %171 = tpu.concatenate %169, %170 in 1 : vector<32x1xf32>, vector<32x127xf32> -> vector<32x128xf32>
    %cst_85 = arith.constant 0.000000e+00 : f32
    %172 = vector.broadcast %cst_85 : f32 to vector<32x1xf32>
    %173 = vector.extract_strided_slice %168 {offsets = [0, 1], sizes = [32, 127], strides = [1, 1]} : vector<32x128xf32> to vector<32x127xf32>
    %174 = tpu.concatenate %173, %172 in 1 : vector<32x127xf32>, vector<32x1xf32> -> vector<32x128xf32>
    %175 = tpu.concatenate %171, %168, %174 in 0 : vector<32x128xf32>, vector<32x128xf32>, vector<32x128xf32> -> vector<96x128xf32>
    %c0_86 = arith.constant 0 : index
    %c0_87 = arith.constant 0 : index
    %176 = vector.load %arg4[%c0_86, %c0_87] : memref<32x96xf32, #tpu.memory_space<vmem>>, vector<32x96xf32>
    %cst_88 = arith.constant dense<0.000000e+00> : vector<32x128xf32>
    %177 = tpu.matmul %176, %175, %cst_88 {dimension_numbers = #tpu.dot_dimension_numbers<[1], [0], [0], [1], [0, 0, 1, 1], [], []>, precision = #tpu.contract_precision<fp32>} : vector<32x96xf32>, vector<96x128xf32>, vector<32x128xf32> -> vector<32x128xf32>
    %c0_89 = arith.constant 0 : index
    %c0_90 = arith.constant 0 : index
    %178 = vector.load %arg5[%c0_89, %c0_90] : memref<32x1xf32, #tpu.memory_space<vmem>>, vector<32x1xf32>
    %179 = vector.broadcast %178 : vector<32x1xf32> to vector<32x128xf32>
    %180 = arith.addf %177, %179 : vector<32x128xf32>
    %cst_91 = arith.constant 0.000000e+00 : f32
    %181 = vector.broadcast %cst_91 : f32 to vector<32x128xf32>
    %182 = arith.maximumf %180, %181 : vector<32x128xf32>
    %cst_92 = arith.constant dense<0.000000e+00> : vector<32xf32>
    %183 = vector.multi_reduction <add>, %182, %cst_92 [1] : vector<32x128xf32> to vector<32xf32>
    %184 = vector.shape_cast %183 : vector<32xf32> to vector<32x1xf32>
    %185 = arith.mulf %182, %182 : vector<32x128xf32>
    %cst_93 = arith.constant dense<0.000000e+00> : vector<32xf32>
    %186 = vector.multi_reduction <add>, %185, %cst_93 [1] : vector<32x128xf32> to vector<32xf32>
    %187 = vector.shape_cast %186 : vector<32xf32> to vector<32x1xf32>
    %cst_94 = arith.constant 7.812500e-03 : f32
    %188 = vector.broadcast %cst_94 : f32 to vector<32x1xf32>
    %189 = arith.mulf %184, %188 : vector<32x1xf32>
    %cst_95 = arith.constant 1.280000e+02 : f32
    %190 = vector.broadcast %cst_95 : f32 to vector<32x1xf32>
    %191 = arith.mulf %190, %189 : vector<32x1xf32>
    %192 = arith.mulf %191, %189 : vector<32x1xf32>
    %193 = arith.subf %187, %192 : vector<32x1xf32>
    %cst_96 = arith.constant 0.00787401571 : f32
    %194 = vector.broadcast %cst_96 : f32 to vector<32x1xf32>
    %195 = arith.mulf %193, %194 : vector<32x1xf32>
    %cst_97 = arith.constant 0.000000e+00 : f32
    %196 = vector.broadcast %cst_97 : f32 to vector<32x1xf32>
    %197 = arith.maximumf %195, %196 : vector<32x1xf32>
    %198 = math.sqrt %197 : vector<32x1xf32>
    %c0_98 = arith.constant 0 : index
    %c0_99 = arith.constant 0 : index
    %199 = vector.load %arg10[%c0_98, %c0_99] : memref<1x128xf32, #tpu.memory_space<vmem>>, vector<1x128xf32>
    %200 = vector.broadcast %189 : vector<32x1xf32> to vector<32x128xf32>
    %201 = arith.subf %182, %200 : vector<32x128xf32>
    %cst_100 = arith.constant 9.99999997E-7 : f32
    %202 = vector.broadcast %cst_100 : f32 to vector<32x1xf32>
    %203 = arith.addf %198, %202 : vector<32x1xf32>
    %204 = vector.broadcast %203 : vector<32x1xf32> to vector<32x128xf32>
    %205 = arith.divf %201, %204 : vector<32x128xf32>
    %206 = vector.broadcast %199 : vector<1x128xf32> to vector<32x128xf32>
    %207 = arith.mulf %206, %205 : vector<32x128xf32>
    %c0_101 = arith.constant 0 : index
    %c0_102 = arith.constant 0 : index
    %208 = vector.load %arg11[%c0_101, %c0_102] : memref<1x128xf32, #tpu.memory_space<vmem>>, vector<1x128xf32>
    %209 = vector.broadcast %208 : vector<1x128xf32> to vector<32x128xf32>
    %210 = arith.addf %207, %209 : vector<32x128xf32>
    %cst_103 = arith.constant 0.000000e+00 : f32
    %211 = vector.broadcast %cst_103 : f32 to vector<32x1xf32>
    %212 = vector.extract_strided_slice %210 {offsets = [0, 0], sizes = [32, 127], strides = [1, 1]} : vector<32x128xf32> to vector<32x127xf32>
    %213 = tpu.concatenate %211, %212 in 1 : vector<32x1xf32>, vector<32x127xf32> -> vector<32x128xf32>
    %cst_104 = arith.constant 0.000000e+00 : f32
    %214 = vector.broadcast %cst_104 : f32 to vector<32x1xf32>
    %215 = vector.extract_strided_slice %210 {offsets = [0, 1], sizes = [32, 127], strides = [1, 1]} : vector<32x128xf32> to vector<32x127xf32>
    %216 = tpu.concatenate %215, %214 in 1 : vector<32x127xf32>, vector<32x1xf32> -> vector<32x128xf32>
    %217 = tpu.concatenate %213, %210, %216 in 0 : vector<32x128xf32>, vector<32x128xf32>, vector<32x128xf32> -> vector<96x128xf32>
    %c0_105 = arith.constant 0 : index
    %c0_106 = arith.constant 0 : index
    %218 = vector.load %arg6[%c0_105, %c0_106] : memref<32x96xf32, #tpu.memory_space<vmem>>, vector<32x96xf32>
    %cst_107 = arith.constant dense<0.000000e+00> : vector<32x128xf32>
    %219 = tpu.matmul %218, %217, %cst_107 {dimension_numbers = #tpu.dot_dimension_numbers<[1], [0], [0], [1], [0, 0, 1, 1], [], []>, precision = #tpu.contract_precision<fp32>} : vector<32x96xf32>, vector<96x128xf32>, vector<32x128xf32> -> vector<32x128xf32>
    %c0_108 = arith.constant 0 : index
    %c0_109 = arith.constant 0 : index
    %220 = vector.load %arg7[%c0_108, %c0_109] : memref<32x1xf32, #tpu.memory_space<vmem>>, vector<32x1xf32>
    %221 = vector.broadcast %220 : vector<32x1xf32> to vector<32x128xf32>
    %222 = arith.addf %219, %221 : vector<32x128xf32>
    %cst_110 = arith.constant 0.000000e+00 : f32
    %223 = vector.broadcast %cst_110 : f32 to vector<32x2xf32>
    %224 = vector.extract_strided_slice %222 {offsets = [0, 0], sizes = [32, 126], strides = [1, 1]} : vector<32x128xf32> to vector<32x126xf32>
    %225 = tpu.concatenate %223, %224 in 1 : vector<32x2xf32>, vector<32x126xf32> -> vector<32x128xf32>
    %cst_111 = arith.constant 0.000000e+00 : f32
    %226 = vector.broadcast %cst_111 : f32 to vector<32x2xf32>
    %227 = vector.extract_strided_slice %222 {offsets = [0, 2], sizes = [32, 126], strides = [1, 1]} : vector<32x128xf32> to vector<32x126xf32>
    %228 = tpu.concatenate %227, %226 in 1 : vector<32x126xf32>, vector<32x2xf32> -> vector<32x128xf32>
    %229 = tpu.concatenate %225, %222, %228 in 0 : vector<32x128xf32>, vector<32x128xf32>, vector<32x128xf32> -> vector<96x128xf32>
    %c0_112 = arith.constant 0 : index
    %c0_113 = arith.constant 0 : index
    %230 = vector.load %arg8[%c0_112, %c0_113] : memref<32x96xf32, #tpu.memory_space<vmem>>, vector<32x96xf32>
    %cst_114 = arith.constant dense<0.000000e+00> : vector<32x128xf32>
    %231 = tpu.matmul %230, %229, %cst_114 {dimension_numbers = #tpu.dot_dimension_numbers<[1], [0], [0], [1], [0, 0, 1, 1], [], []>, precision = #tpu.contract_precision<fp32>} : vector<32x96xf32>, vector<96x128xf32>, vector<32x128xf32> -> vector<32x128xf32>
    %c0_115 = arith.constant 0 : index
    %c0_116 = arith.constant 0 : index
    %232 = vector.load %arg9[%c0_115, %c0_116] : memref<32x1xf32, #tpu.memory_space<vmem>>, vector<32x1xf32>
    %233 = vector.broadcast %232 : vector<32x1xf32> to vector<32x128xf32>
    %234 = arith.addf %231, %233 : vector<32x128xf32>
    %cst_117 = arith.constant 0.000000e+00 : f32
    %235 = vector.broadcast %cst_117 : f32 to vector<32x1xf32>
    %236 = vector.extract_strided_slice %234 {offsets = [0, 0], sizes = [32, 127], strides = [1, 1]} : vector<32x128xf32> to vector<32x127xf32>
    %237 = tpu.concatenate %235, %236 in 1 : vector<32x1xf32>, vector<32x127xf32> -> vector<32x128xf32>
    %cst_118 = arith.constant 0.000000e+00 : f32
    %238 = vector.broadcast %cst_118 : f32 to vector<32x1xf32>
    %239 = vector.extract_strided_slice %234 {offsets = [0, 1], sizes = [32, 127], strides = [1, 1]} : vector<32x128xf32> to vector<32x127xf32>
    %240 = tpu.concatenate %239, %238 in 1 : vector<32x127xf32>, vector<32x1xf32> -> vector<32x128xf32>
    %241 = tpu.concatenate %237, %234, %240 in 0 : vector<32x128xf32>, vector<32x128xf32>, vector<32x128xf32> -> vector<96x128xf32>
    %c0_119 = arith.constant 0 : index
    %c0_120 = arith.constant 0 : index
    %242 = vector.load %arg4[%c0_119, %c0_120] : memref<32x96xf32, #tpu.memory_space<vmem>>, vector<32x96xf32>
    %cst_121 = arith.constant dense<0.000000e+00> : vector<32x128xf32>
    %243 = tpu.matmul %242, %241, %cst_121 {dimension_numbers = #tpu.dot_dimension_numbers<[1], [0], [0], [1], [0, 0, 1, 1], [], []>, precision = #tpu.contract_precision<fp32>} : vector<32x96xf32>, vector<96x128xf32>, vector<32x128xf32> -> vector<32x128xf32>
    %c0_122 = arith.constant 0 : index
    %c0_123 = arith.constant 0 : index
    %244 = vector.load %arg5[%c0_122, %c0_123] : memref<32x1xf32, #tpu.memory_space<vmem>>, vector<32x1xf32>
    %245 = vector.broadcast %244 : vector<32x1xf32> to vector<32x128xf32>
    %246 = arith.addf %243, %245 : vector<32x128xf32>
    %cst_124 = arith.constant 0.000000e+00 : f32
    %247 = vector.broadcast %cst_124 : f32 to vector<32x128xf32>
    %248 = arith.maximumf %246, %247 : vector<32x128xf32>
    %cst_125 = arith.constant dense<0.000000e+00> : vector<32xf32>
    %249 = vector.multi_reduction <add>, %248, %cst_125 [1] : vector<32x128xf32> to vector<32xf32>
    %250 = vector.shape_cast %249 : vector<32xf32> to vector<32x1xf32>
    %251 = arith.mulf %248, %248 : vector<32x128xf32>
    %cst_126 = arith.constant dense<0.000000e+00> : vector<32xf32>
    %252 = vector.multi_reduction <add>, %251, %cst_126 [1] : vector<32x128xf32> to vector<32xf32>
    %253 = vector.shape_cast %252 : vector<32xf32> to vector<32x1xf32>
    %cst_127 = arith.constant 7.812500e-03 : f32
    %254 = vector.broadcast %cst_127 : f32 to vector<32x1xf32>
    %255 = arith.mulf %250, %254 : vector<32x1xf32>
    %cst_128 = arith.constant 1.280000e+02 : f32
    %256 = vector.broadcast %cst_128 : f32 to vector<32x1xf32>
    %257 = arith.mulf %256, %255 : vector<32x1xf32>
    %258 = arith.mulf %257, %255 : vector<32x1xf32>
    %259 = arith.subf %253, %258 : vector<32x1xf32>
    %cst_129 = arith.constant 0.00787401571 : f32
    %260 = vector.broadcast %cst_129 : f32 to vector<32x1xf32>
    %261 = arith.mulf %259, %260 : vector<32x1xf32>
    %cst_130 = arith.constant 0.000000e+00 : f32
    %262 = vector.broadcast %cst_130 : f32 to vector<32x1xf32>
    %263 = arith.maximumf %261, %262 : vector<32x1xf32>
    %264 = math.sqrt %263 : vector<32x1xf32>
    %c0_131 = arith.constant 0 : index
    %c0_132 = arith.constant 0 : index
    %265 = vector.load %arg10[%c0_131, %c0_132] : memref<1x128xf32, #tpu.memory_space<vmem>>, vector<1x128xf32>
    %266 = vector.broadcast %255 : vector<32x1xf32> to vector<32x128xf32>
    %267 = arith.subf %248, %266 : vector<32x128xf32>
    %cst_133 = arith.constant 9.99999997E-7 : f32
    %268 = vector.broadcast %cst_133 : f32 to vector<32x1xf32>
    %269 = arith.addf %264, %268 : vector<32x1xf32>
    %270 = vector.broadcast %269 : vector<32x1xf32> to vector<32x128xf32>
    %271 = arith.divf %267, %270 : vector<32x128xf32>
    %272 = vector.broadcast %265 : vector<1x128xf32> to vector<32x128xf32>
    %273 = arith.mulf %272, %271 : vector<32x128xf32>
    %c0_134 = arith.constant 0 : index
    %c0_135 = arith.constant 0 : index
    %274 = vector.load %arg11[%c0_134, %c0_135] : memref<1x128xf32, #tpu.memory_space<vmem>>, vector<1x128xf32>
    %275 = vector.broadcast %274 : vector<1x128xf32> to vector<32x128xf32>
    %276 = arith.addf %273, %275 : vector<32x128xf32>
    %cst_136 = arith.constant 0.000000e+00 : f32
    %277 = vector.broadcast %cst_136 : f32 to vector<32x1xf32>
    %278 = vector.extract_strided_slice %276 {offsets = [0, 0], sizes = [32, 127], strides = [1, 1]} : vector<32x128xf32> to vector<32x127xf32>
    %279 = tpu.concatenate %277, %278 in 1 : vector<32x1xf32>, vector<32x127xf32> -> vector<32x128xf32>
    %cst_137 = arith.constant 0.000000e+00 : f32
    %280 = vector.broadcast %cst_137 : f32 to vector<32x1xf32>
    %281 = vector.extract_strided_slice %276 {offsets = [0, 1], sizes = [32, 127], strides = [1, 1]} : vector<32x128xf32> to vector<32x127xf32>
    %282 = tpu.concatenate %281, %280 in 1 : vector<32x127xf32>, vector<32x1xf32> -> vector<32x128xf32>
    %283 = tpu.concatenate %279, %276, %282 in 0 : vector<32x128xf32>, vector<32x128xf32>, vector<32x128xf32> -> vector<96x128xf32>
    %c0_138 = arith.constant 0 : index
    %c0_139 = arith.constant 0 : index
    %284 = vector.load %arg6[%c0_138, %c0_139] : memref<32x96xf32, #tpu.memory_space<vmem>>, vector<32x96xf32>
    %cst_140 = arith.constant dense<0.000000e+00> : vector<32x128xf32>
    %285 = tpu.matmul %284, %283, %cst_140 {dimension_numbers = #tpu.dot_dimension_numbers<[1], [0], [0], [1], [0, 0, 1, 1], [], []>, precision = #tpu.contract_precision<fp32>} : vector<32x96xf32>, vector<96x128xf32>, vector<32x128xf32> -> vector<32x128xf32>
    %c0_141 = arith.constant 0 : index
    %c0_142 = arith.constant 0 : index
    %286 = vector.load %arg7[%c0_141, %c0_142] : memref<32x1xf32, #tpu.memory_space<vmem>>, vector<32x1xf32>
    %287 = vector.broadcast %286 : vector<32x1xf32> to vector<32x128xf32>
    %288 = arith.addf %285, %287 : vector<32x128xf32>
    %cst_143 = arith.constant 0.000000e+00 : f32
    %289 = vector.broadcast %cst_143 : f32 to vector<32x2xf32>
    %290 = vector.extract_strided_slice %288 {offsets = [0, 0], sizes = [32, 126], strides = [1, 1]} : vector<32x128xf32> to vector<32x126xf32>
    %291 = tpu.concatenate %289, %290 in 1 : vector<32x2xf32>, vector<32x126xf32> -> vector<32x128xf32>
    %cst_144 = arith.constant 0.000000e+00 : f32
    %292 = vector.broadcast %cst_144 : f32 to vector<32x2xf32>
    %293 = vector.extract_strided_slice %288 {offsets = [0, 2], sizes = [32, 126], strides = [1, 1]} : vector<32x128xf32> to vector<32x126xf32>
    %294 = tpu.concatenate %293, %292 in 1 : vector<32x126xf32>, vector<32x2xf32> -> vector<32x128xf32>
    %295 = tpu.concatenate %291, %288, %294 in 0 : vector<32x128xf32>, vector<32x128xf32>, vector<32x128xf32> -> vector<96x128xf32>
    %c0_145 = arith.constant 0 : index
    %c0_146 = arith.constant 0 : index
    %296 = vector.load %arg8[%c0_145, %c0_146] : memref<32x96xf32, #tpu.memory_space<vmem>>, vector<32x96xf32>
    %cst_147 = arith.constant dense<0.000000e+00> : vector<32x128xf32>
    %297 = tpu.matmul %296, %295, %cst_147 {dimension_numbers = #tpu.dot_dimension_numbers<[1], [0], [0], [1], [0, 0, 1, 1], [], []>, precision = #tpu.contract_precision<fp32>} : vector<32x96xf32>, vector<96x128xf32>, vector<32x128xf32> -> vector<32x128xf32>
    %c0_148 = arith.constant 0 : index
    %c0_149 = arith.constant 0 : index
    %298 = vector.load %arg9[%c0_148, %c0_149] : memref<32x1xf32, #tpu.memory_space<vmem>>, vector<32x1xf32>
    %299 = vector.broadcast %298 : vector<32x1xf32> to vector<32x128xf32>
    %300 = arith.addf %297, %299 : vector<32x128xf32>
    %cst_150 = arith.constant 0.000000e+00 : f32
    %301 = vector.broadcast %cst_150 : f32 to vector<32x128xf32>
    %302 = arith.subf %301, %300 : vector<32x128xf32>
    %303 = math.exp %302 : vector<32x128xf32>
    %cst_151 = arith.constant 1.000000e+00 : f32
    %304 = vector.broadcast %cst_151 : f32 to vector<32x128xf32>
    %305 = arith.addf %304, %303 : vector<32x128xf32>
    %cst_152 = arith.constant 1.000000e+00 : f32
    %306 = vector.broadcast %cst_152 : f32 to vector<32x128xf32>
    %307 = arith.divf %306, %305 : vector<32x128xf32>
    %308 = arith.mulf %300, %307 : vector<32x128xf32>
    %309 = arith.addf %6, %308 : vector<32x128xf32>
    %c0_153 = arith.constant 0 : index
    %c0_154 = arith.constant 0 : index
    %c0_155 = arith.constant 0 : index
    %310 = vector.load %arg14[%c0_153, %c0_154, %c0_155] : memref<1x32x128xf32, #tpu.memory_space<vmem>>, vector<1x32x128xf32>
    %311 = vector.shape_cast %310 : vector<1x32x128xf32> to vector<32x128xf32>
    %312 = vector.shape_cast %309 : vector<32x128xf32> to vector<1x32x128xf32>
    tpu.vector_store %arg14[%c0_153, %c0_154, %c0_155], %312 {strides = array<i32>} : memref<1x32x128xf32, #tpu.memory_space<vmem>>, vector<1x32x128xf32>,
    return
  }
  func.func @transform_0(%arg0: i32) -> (i32, i32, i32) {
    %c0_i32 = arith.constant 0 : i32
    %c0_i32_0 = arith.constant 0 : i32
    %c0_i32_1 = arith.constant 0 : i32
    return %arg0, %c0_i32, %c0_i32_0 : i32, i32, i32
  }
  func.func @transform_1(%arg0: i32) -> (i32, i32) {
    %c0_i32 = arith.constant 0 : i32
    %c0_i32_0 = arith.constant 0 : i32
    %c0_i32_1 = arith.constant 0 : i32
    return %c0_i32, %c0_i32_0 : i32, i32
  }
  func.func @transform_2(%arg0: i32) -> (i32, i32) {
    %c0_i32 = arith.constant 0 : i32
    %c0_i32_0 = arith.constant 0 : i32
    %c0_i32_1 = arith.constant 0 : i32
    return %c0_i32, %c0_i32_0 : i32, i32
  }
  func.func @transform_3(%arg0: i32) -> (i32, i32) {
    %c0_i32 = arith.constant 0 : i32
    %c0_i32_0 = arith.constant 0 : i32
    %c0_i32_1 = arith.constant 0 : i32
    return %c0_i32, %c0_i32_0 : i32, i32
  }
  func.func @transform_4(%arg0: i32) -> (i32, i32) {
    %c0_i32 = arith.constant 0 : i32
    %c0_i32_0 = arith.constant 0 : i32
    %c0_i32_1 = arith.constant 0 : i32
    return %c0_i32, %c0_i32_0 : i32, i32
  }
  func.func @transform_5(%arg0: i32) -> (i32, i32) {
    %c0_i32 = arith.constant 0 : i32
    %c0_i32_0 = arith.constant 0 : i32
    %c0_i32_1 = arith.constant 0 : i32
    return %c0_i32, %c0_i32_0 : i32, i32
  }
  func.func @transform_6(%arg0: i32) -> (i32, i32) {
    %c0_i32 = arith.constant 0 : i32
    %c0_i32_0 = arith.constant 0 : i32
    %c0_i32_1 = arith.constant 0 : i32
    return %c0_i32, %c0_i32_0 : i32, i32
  }
  func.func @transform_7(%arg0: i32) -> (i32, i32) {
    %c0_i32 = arith.constant 0 : i32
    %c0_i32_0 = arith.constant 0 : i32
    %c0_i32_1 = arith.constant 0 : i32
    return %c0_i32, %c0_i32_0 : i32, i32
  }
  func.func @transform_8(%arg0: i32) -> (i32, i32) {
    %c0_i32 = arith.constant 0 : i32
    %c0_i32_0 = arith.constant 0 : i32
    %c0_i32_1 = arith.constant 0 : i32
    return %c0_i32, %c0_i32_0 : i32, i32
  }
  func.func @transform_9(%arg0: i32) -> (i32, i32) {
    %c0_i32 = arith.constant 0 : i32
    %c0_i32_0 = arith.constant 0 : i32
    %c0_i32_1 = arith.constant 0 : i32
    return %c0_i32, %c0_i32_0 : i32, i32
  }
  func.func @transform_10(%arg0: i32) -> (i32, i32) {
    %c0_i32 = arith.constant 0 : i32
    %c0_i32_0 = arith.constant 0 : i32
    %c0_i32_1 = arith.constant 0 : i32
    return %c0_i32, %c0_i32_0 : i32, i32
  }
  func.func @transform_11(%arg0: i32) -> (i32, i32) {
    %c0_i32 = arith.constant 0 : i32
    %c0_i32_0 = arith.constant 0 : i32
    %c0_i32_1 = arith.constant 0 : i32
    return %c0_i32, %c0_i32_0 : i32, i32
  }
  func.func @transform_12(%arg0: i32) -> (i32, i32) {
    %c0_i32 = arith.constant 0 : i32
    %c0_i32_0 = arith.constant 0 : i32
    %c0_i32_1 = arith.constant 0 : i32
    return %c0_i32, %c0_i32_0 : i32, i32
  }
  func.func @transform_13(%arg0: i32) -> (i32, i32, i32) {
    %c0_i32 = arith.constant 0 : i32
    %c0_i32_0 = arith.constant 0 : i32
    %c0_i32_1 = arith.constant 0 : i32
    return %arg0, %c0_i32, %c0_i32_0 : i32, i32, i32
  }
}

</mosaic_0001>

<bundles_post_ra>
// kernel: idcnn_forward.1
= control target key start
LH: loop header
LB: loop body
LE: loop exit
PB: predicated region body
PF: predicated region fallthrough
CT: control target
= control target key end

     0   :  { %s18726_s0 = inlined_call_operand.vmem [shape: f32[2,16,128], index: 0, kind: input, shape index: {}]   ;;  %s18727_s1 = inlined_call_operand.vmem [shape: f32[32,16], index: 1, kind: input, shape index: {}]   ;;  %s18728_s2 = inlined_call_operand.vmem [shape: f32[32,1], index: 2, kind: input, shape index: {}]   ;;  %s18729_s3 = inlined_call_operand.vmem [shape: f32[32,96], index: 3, kind: input, shape index: {}]   ;;  %s18730_s4 = inlined_call_operand.vmem [shape: f32[32,1], index: 4, kind: input, shape index: {}]   ;;  %s18731_s5 = inlined_call_operand.vmem [shape: f32[32,96], index: 5, kind: input, shape index: {}]   ;;  %s18732_s6 = inlined_call_operand.vmem [shape: f32[32,1], index: 6, kind: input, shape index: {}]   ;;  %s18733_s7 = inlined_call_operand.vmem [shape: f32[32,96], index: 7, kind: input, shape index: {}]   ;;  %s18734_s8 = inlined_call_operand.vmem [shape: f32[32,1], index: 8, kind: input, shape index: {}]   ;;  %s18735_s9 = inlined_call_operand.vmem [shape: f32[1,128], index: 9, kind: input, shape index: {}]   ;;  %s18736_s10 = inlined_call_operand.vmem [shape: f32[1,128], index: 10, kind: input, shape index: {}]   ;;  %s18737_s11 = inlined_call_operand.vmem [shape: f32[1,128], index: 11, kind: input, shape index: {}]   ;;  %s18738_s12 = inlined_call_operand.vmem [shape: f32[1,128], index: 12, kind: input, shape index: {}]   ;;  %s18739_s13 = inlined_call_operand.hbm [shape: f32[2,32,128], index: 13, kind: output, shape index: {}]  }
   0x1   :  { %18846 = sst [smem:[#allocation51_spill]] %s18726_s0 }
   0x2   :  { %18847 = sst [smem:[#allocation52_spill]] %s18727_s1 }
   0x3   :  { %18848 = sst [smem:[#allocation53_spill]] %s18728_s2 }
   0x4   :  { %18 = vsyncpa [#allocation3], 0 }
   0x5   :  { %20 = vsyncpa [#allocation3 + $0x1], 0  ;;  %s14599_s25 = smov 0   ;;  %s14601_s26 = smov 0  }
   0x6   :  { %s14603_s27 = smov 0   ;;  %s14605_s28 = smov 0  }
   0x7 LB: > { %s14620_s29 = sadd.s32 4294967295, %s14519_s28   ;;  %s10883_s30 = sadd.s32 4294967294, %s14519_s28   ;;  %s14519_s28 = sphi %s14605_s28, %s19028_s28   ;;  %s14515_s27 = sphi %s14603_s27, %s19027_s27   ;;  %s14511_s26 = sphi %s14601_s26, %s19026_s26   ;;  %s14507_s25 = sphi %s14599_s25, %s19025_s25  }
   0x8   : > { %s14624_s14 = sadd.s32 1, %s14519_s28   ;;  %s311_s15 = sadd.s32 1, %s14515_s27 }
   0x9   : > { %s308_s16 = ssub.s32 %s14519_s28, %s14624_s14  ;;  %p321_p0 = scmp.ne.s32.totalorder %s14515_s27, %s14511_s26 }
   0xa   : > { %p309_p1 = scmp.eq.s32.totalorder %s308_s16, 0  ;;  %p322_p2 = scmp.eq.s32.totalorder %s14620_s29, 1 }
   0xb   : > { %p327_p3 = scmp.ne.s32.totalorder %s14511_s26, %s14507_s25  ;;  %p328_p4 = scmp.eq.s32.totalorder %s10883_s30, 1 }
   0xc   : > { %s14635_s17 = scalar_select %p309_p1, %s14515_s27, %s311_s15  }
   0xd   : > { %p14637_p5 = por %p322_p2, %p321_p0  ;;  %p14641_p6 = por %p328_p4, %p327_p3 }
   0xe   : > { %p10886_p7 = scmp.ge.s32.totalorder %s14519_s28, 1  ;;  %p390_p8 = scmp.lt.s32.totalorder %s14519_s28, 3 }
  0x10   : > { %p391_p9 = pnand %p10886_p7, %p390_p8 }
  0x12   : > { %394 = sbr.rel (%p391_p9) target bundleno = 6148 (0x1804), region = 72 }
  0x17   : > { %p434_p10 = scmp.lt.s32.totalorder %s14620_s29, 1  ;;  %s18851_s1 = sld [smem:[#allocation52_spill]]  ;;  %vm469_vm0 = vcmask 130048   ;;  %v14521_v7 = vmov 0   ;;  %vm1136_vm1 = vcmask 785408   ;;  %vm1103_vm2 = vcmask 1039360  }
  0x18   : > { %14356 = vset.pattern.permute.xlu1 %v14521_v7  ;;  %s18852_s2 = sld [smem:[#allocation53_spill]]  ;;  %14355 = vset.pattern.permute.xlu0 %v14521_v7  ;;  %s18780_s20 = smov 1   ;;  %vm1086_vm3 = vcmask 7168   ;;  %vm2808_vm12 = vcmask 1031168   ;;  %vm2791_vm13 = vcmask 15360  }
  0x19   : > { %s435_s24 = scalar_select %p434_p10, %s14620_s29, 1 }
  0x1a   : > { %s18853_s0 = sld [smem:[#allocation51_spill]]  ;;  %s18778_s23 = smov 126  }
  0x1b   : > { %s10899_s21 = sshll.u32 %s435_s24, 4  ;;  %s18740_s24 = smov 127  }
  0x1c   : > { %s14525_s16 = smov 2   ;;  %s18938_s15 = smov 126  }
  0x1d   : > { %v441_v0 = vld [vmem:[%s18851_s1] sm:$0xff]  ;;  %v442_v1 = vld [vmem:[%s18851_s1 + $0x8] sm:$0xff]  ;;  %v443_v2 = vld [vmem:[%s18851_s1 + $0x10] sm:$0xff]  ;;  %s14526_s22 = smov [#allocation2]  }
  0x1e   : > { %v471_v3 = vsel %vm469_vm0, %v441_v0, 0  ;;  %v474_v4 = vsel %vm469_vm0, %v442_v1, 0  ;;  %v477_v5 = vsel %vm469_vm0, %v443_v2, 0  ;;  %v444_v6 = vld [vmem:[%s18851_s1 + $0x18] sm:$0xff]  ;;  %v446_v8 = vld [vmem:[%s18852_s2 + $0x8] sm:$0xff]  ;;  %v445_v15 = vld [vmem:[%s18852_s2] sm:$0xff] }
  0x1f   : > { %v448_v9 = vld [vmem:[%s18852_s2 + $0x18] sm:$0xff]  ;;  %v14672_v10 = vand.u32 4294901760, %v471_v3  ;;  %v14674_v11 = vand.u32 4294901760, %v474_v4  ;;  %v14676_v12 = vand.u32 4294901760, %v477_v5  ;;  %v480_v13 = vsel %vm469_vm0, %v444_v6, 0  ;;  %456 = vperm.xlu1 %14356, %v446_v8   ;;  %v447_v16 = vld [vmem:[%s18852_s2 + $0x10] sm:$0xff] }
  0x20   : > { %466 = vperm.xlu0 %14355, %v448_v9   ;;  %v14679_v14 = vand.u32 4294901760, %v480_v13  ;;  %s438_s30 = scalar_lea.vmem %s18853_s0, %s10899_s21  ;;  %s18901_s0 = smov 1  }
  0x21   : > { %v550_v17 = vsub.f32 %v471_v3, %v14672_v10  ;;  %v14689_v18 = vsub.f32 %v474_v4, %v14674_v11  ;;  %v14692_v19 = vsub.f32 %v477_v5, %v14676_v12  ;;  %12103 = vmatprep.mubr.f32.mxu1 %v14672_v10  ;;  %v440_v21 = vld [vmem:[%s438_s30 + $0x8] sm:$0xff]  ;;  %v439_v22 = vld [vmem:[%s438_s30] sm:$0xff]  ;;  %s18875_s30 = smov 127   ;;  %s10900_s1 = sshll.u32 %s14620_s29, 9 }
  0x22   : > { %v14699_v20 = vsub.f32 %v480_v13, %v14679_v14  ;;  %v511_v26 = vand.u32 4294901760, %v440_v21  ;;  %v514_v27 = vand.u32 4294901760, %v439_v22 }
  0x23   : > { %v551_v23 = vand.u32 4294901760, %v550_v17  ;;  %v561_v24 = vand.u32 4294901760, %v14689_v18  ;;  %v571_v25 = vand.u32 4294901760, %v14692_v19  ;;  %451 = vperm.xlu1 %14356, %v445_v15  }
  0x24   : > { %461 = vperm.xlu0 %14355, %v447_v16   ;;  %v581_v28 = vand.u32 4294901760, %v14699_v20  ;;  %12089 = vmatprep.subr.mxu0 %v511_v26  ;;  %v619_v32 = vsub.f32 %v440_v21, %v511_v26  ;;  %v626_v34 = vsub.f32 %v439_v22, %v514_v27 }
  0x25   : > { %v552_v29 = vsub.f32 %v550_v17, %v551_v23  ;;  %v562_v30 = vsub.f32 %v14689_v18, %v561_v24  ;;  %v572_v31 = vsub.f32 %v14692_v19, %v571_v25  ;;  %12090 = vmatpush3.msra.mxu0 %v511_v26 }
  0x26   : > { %v582_v33 = vsub.f32 %v14699_v20, %v581_v28  ;;  %12091 = vmatprep.subr.mxu0 %v514_v27  ;;  %v620_v38 = vand.u32 4294901760, %v619_v32  ;;  %v627_v39 = vand.u32 4294901760, %v626_v34 }
  0x27   : > { %v553_v35 = vand.u32 4294901760, %v552_v29  ;;  %v563_v36 = vand.u32 4294901760, %v562_v30  ;;  %v573_v37 = vand.u32 4294901760, %v572_v31  ;;  %12092 = vmatpush3.msra.mxu0 %v514_v27 }
  0x28   : > { %v621_v40 = vsub.f32 %v619_v32, %v620_v38  ;;  %v583_v41 = vand.u32 4294901760, %v582_v33  ;;  %v628_v42 = vsub.f32 %v626_v34, %v627_v39  ;;  %12109 = vmatprep.subr.mxu0 %v619_v32 }
  0x29   : > { %12093 = vmatprep.mubr.f32.mxu0 %v553_v35 }
  0x2a   : > { %12094 = vmatmul.mubr.f32.vlgmr.msra.gmra.mxu0 %v563_v36  ;;  %v622_v43 = vand.u32 4294901760, %v621_v40  ;;  %v629_v44 = vand.u32 4294901760, %v628_v42  ;;  %v1113_v42 = vld [vmem:[%s18730_s4 + $0x8] sm:$0xff] }
  0x2b   : > { %12096 = vmatprep.mubr.f32.mxu0 %v573_v37  ;;  %12110 = vmatpush3.msra.mxu0 %v619_v32  ;;  %v1108_v32 = vld [vmem:[%s18729_s3] sm:$0xff] }
  0x2c   : > { %12111 = vmatprep.subr.mxu0 %v626_v34  ;;  %12099 = vmatprep.subr.mxu1 %v622_v43 }
  0x2d   : > { %12112 = vmatpush3.msra.mxu0 %v626_v34  ;;  %12100 = vmatpush3.msra.mxu1 %v622_v43  ;;  %v1138_v34 = vsel %vm1136_vm1, %v1108_v32, 0  ;;  %v1112_v43 = vld [vmem:[%s18730_s4] sm:$0xff] }
  0x2e   : > { %12097 = vmatmul.mubr.f32.gmra.mxu0 %v583_v41  ;;  %12101 = vmatprep.subr.mxu1 %v629_v44  ;;  %v14741_v35 = vand.u32 4294901760, %v1138_v34  ;;  %v1114_v41 = vld [vmem:[%s18730_s4 + $0x10] sm:$0xff] }
  0x2f   : > { %12113 = vmatprep.mubr.f32.mxu0 %v550_v17  ;;  %12129 = vmatprep.subr.mxu0 %v620_v38 }
  0x30   : > { %12102 = vmatpush3.msra.mxu1 %v629_v44  ;;  %v14746_v36 = vsub.f32 %v1138_v34, %v14741_v35 }
  0x31   : > { %12104 = vmatmul.mubr.f32.vlgmr.msra.gmra.mxu1 %v14674_v11  ;;  %12119 = vmatprep.subr.mxu1 %v511_v26 }
  0x32   : > { %12120 = vmatpush3.msra.mxu1 %v511_v26  ;;  %12114 = vmatmul.mubr.f32.vlgmr.msra.gmra.mxu0 %v14689_v18  ;;  %18858 = vst [vmem:[#allocation9_spill] sm:$0xff] %v14746_v36  ;;  %v14752_v37 = vand.u32 4294901760, %v14746_v36 }
  0x33   : > { %12106 = vmatprep.mubr.f32.mxu1 %v14676_v12  ;;  %12121 = vmatprep.subr.mxu1 %v514_v27 }
  0x34   : > { %12116 = vmatprep.mubr.f32.mxu0 %v14692_v19  ;;  %12122 = vmatpush3.msra.mxu1 %v514_v27  ;;  %18859 = vst [vmem:[#allocation10_spill] sm:$0xff] %v14752_v37 }
  0x35   : > { %12107 = vmatmul.mubr.f32.gmra.mxu1 %v14679_v14  ;;  %12130 = vmatpush3.msra.mxu0 %v620_v38  ;;  %v1229_v38 = vsub.f32 %v14746_v36, %v14752_v37 }
  0x36   : > { %12117 = vmatmul.mubr.f32.gmra.mxu0 %v14699_v20  ;;  %12123 = vmatprep.mubr.f32.mxu1 %v551_v23 }
  0x37   : > { %12131 = vmatprep.subr.mxu0 %v627_v39  ;;  %12139 = vmatprep.subr.mxu1 %v511_v26  ;;  %v14763_v40 = vand.u32 4294901760, %v1229_v38 }
  0x38   : > { %12132 = vmatpush3.msra.mxu0 %v627_v39  ;;  %12133 = vmatprep.mubr.f32.mxu0 %v14672_v10  ;;  %v1115_v39 = vld [vmem:[%s18730_s4 + $0x18] sm:$0xff] }
  0x39   : > { %12124 = vmatmul.mubr.f32.vlgmr.msra.gmra.mxu1 %v561_v24 }
  0x3a   : > { %12140 = vmatpush3.msra.mxu1 %v511_v26  ;;  %12134 = vmatmul.mubr.f32.vlgmr.msra.gmra.mxu0 %v14674_v11 }
  0x3b   : > { %12126 = vmatprep.mubr.f32.mxu1 %v571_v25  ;;  %12141 = vmatprep.subr.mxu1 %v514_v27 }
  0x3c   : > { %12136 = vmatprep.mubr.f32.mxu0 %v14676_v12  ;;  %12142 = vmatpush3.msra.mxu1 %v514_v27 }
  0x3d   : > { %12127 = vmatmul.mubr.f32.gmra.mxu1 %v581_v28 }
  0x3e   : > { %12137 = vmatmul.mubr.f32.gmra.mxu0 %v14679_v14  ;;  %12143 = vmatprep.mubr.f32.mxu1 %v14672_v10 }
  0x3f   : > { %12173 = vmatprep.mubr.f32.mxu0 %v14763_v40 }
  0x41   : > { %12144 = vmatmul.mubr.f32.vlgmr.msra.gmra.mxu1 %v14674_v11 }
  0x42   : > { %12146 = vmatprep.mubr.f32.mxu1 %v14676_v12 }
  0x45   : > { %12147 = vmatmul.mubr.f32.gmra.mxu1 %v14679_v14 }
  0x46   : > { %12203 = vmatprep.mubr.f32.mxu1 %v14741_v35 }
  0x9a   : > { %v457_v54 = vpop.permute.xlu1 %456 }
  0x9b   : > { %v467_v49 = vpop.permute.xlu0 %466 }
  0x9e   : > { %v452_v2 = vpop.permute.xlu1 %451 }
  0x9f   : > { %v462_v58 = vpop.permute.xlu0 %461 }
  0xea   : > { %v12095_v45 = vpop.f32.mrf.mxu0 }
  0xeb   : > { %v566_v62 = vadd.f32 %v12095_v45, %v457_v54 }
  0xec   : > { %v555_v46 = vpop.f32.mrf.mxu0 }
  0xed   : > { %v556_v7 = vadd.f32 %v555_v46, %v452_v2  ;;  %v1109_v46 = vld [vmem:[%s18729_s3 + $0x8] sm:$0xff] }
  0xee   : > { %v12098_v47 = vpop.f32.mrf.mxu0 }
  0xef   : > { %v586_v56 = vadd.f32 %v12098_v47, %v467_v49 }
  0xf0   : > { %v575_v48 = vpop.f32.mrf.mxu0 }
  0xf1   : > { %v12105_v50 = vpop.f32.mrf.mxu1  ;;  %v576_v63 = vadd.f32 %v575_v48, %v462_v58 }
  0xf2   : > { %v12115_v51 = vpop.f32.mrf.mxu0  ;;  %v673_v8 = vadd.f32 %v12105_v50, %v566_v62 }
  0xf3   : > { %v666_v52 = vpop.f32.mrf.mxu1 }
  0xf4   : > { %v760_v53 = vpop.f32.mrf.mxu0  ;;  %v667_v12 = vadd.f32 %v666_v52, %v556_v7  ;;  %v768_v16 = vadd.f32 %v12115_v51, %v673_v8 }
  0xf5   : > { %v12108_v55 = vpop.f32.mrf.mxu1 }
  0xf6   : > { %v12118_v57 = vpop.f32.mrf.mxu0  ;;  %v685_v0 = vadd.f32 %v12108_v55, %v586_v56  ;;  %v761_v20 = vadd.f32 %v760_v53, %v667_v12  ;;  %v1141_v55 = vsel %vm1136_vm1, %v1109_v46, 0 }
  0xf7   : > { %v678_v59 = vpop.f32.mrf.mxu1 }
  0xf8   : > { %v774_v60 = vpop.f32.mrf.mxu0  ;;  %v679_v4 = vadd.f32 %v678_v59, %v576_v63  ;;  %v782_v9 = vadd.f32 %v12118_v57, %v685_v0  ;;  %v1110_v0 = vld [vmem:[%s18729_s3 + $0x10] sm:$0xff] }
  0xf9   : > { %v12125_v61 = vpop.f32.mrf.mxu1 }
  0xfa   : > { %v12135_v1 = vpop.f32.mrf.mxu0  ;;  %v775_v13 = vadd.f32 %v774_v60, %v679_v4  ;;  %v865_v21 = vadd.f32 %v12125_v61, %v768_v16 }
  0xfb   : > { %v856_v3 = vpop.f32.mrf.mxu1 }
  0xfc   : > { %v957_v5 = vpop.f32.mrf.mxu0  ;;  %v857_v24 = vadd.f32 %v856_v3, %v761_v20  ;;  %v964_v28 = vadd.f32 %v12135_v1, %v865_v21  ;;  %v14825_v3 = vand.u32 4294901760, %v1141_v55 }
  0xfd   : > { %v12128_v6 = vpop.f32.mrf.mxu1 }
  0xfe   : > { %v12138_v11 = vpop.f32.mrf.mxu0  ;;  %v881_v14 = vadd.f32 %v12128_v6, %v782_v9  ;;  %v958_v30 = vadd.f32 %v957_v5, %v857_v24  ;;  %18860 = vst [vmem:[#allocation11_spill] sm:$0xff] %v14825_v3  ;;  %v1111_v9 = vld [vmem:[%s18729_s3 + $0x18] sm:$0xff] }
  0xff   : > { %v872_v10 = vpop.f32.mrf.mxu1 }
 0x100   : > { %v873_v17 = vadd.f32 %v872_v10, %v775_v13  ;;  %v969_v18 = vpop.f32.mrf.mxu0  ;;  %v976_v22 = vadd.f32 %v12138_v11, %v881_v14  ;;  %v1144_v13 = vsel %vm1136_vm1, %v1110_v0, 0 }
 0x101   : > { %v12145_v15 = vpop.f32.mrf.mxu1 }
 0x102   : > { %v970_v25 = vadd.f32 %v969_v18, %v873_v17  ;;  %v14727_v31 = vadd.f32 %v12145_v15, %v964_v28  ;;  %v14876_v28 = vand.u32 4294901760, %v1144_v13 }
 0x103   : > { %v1048_v19 = vpop.f32.mrf.mxu1 }
 0x104   : > { %18856 = vst [vmem:[#allocation7_spill] sm:$0xff] %v14727_v31  ;;  %v14734_v33 = vadd.f32 %v1048_v19, %v958_v30  ;;  %v14785_v50 = vand.u32 4294901760, %v14727_v31  ;;  %18862 = vst [vmem:[#allocation13_spill] sm:$0xff] %v14876_v28 }
 0x105   : > { %v12148_v23 = vpop.f32.mrf.mxu1 }
 0x106   : > { %v14721_v26 = vadd.f32 %v12148_v23, %v976_v22  ;;  %18857 = vst [vmem:[#allocation8_spill] sm:$0xff] %v14734_v33  ;;  %v14796_v56 = vand.u32 4294901760, %v14734_v33  ;;  %v14823_v2 = vsub.f32 %v14727_v31, %v14785_v50  ;;  %v1147_v22 = vsel %vm1136_vm1, %v1111_v9, 0 }
 0x107   : > { %v1060_v27 = vpop.f32.mrf.mxu1 }
 0x108   : > { %18854 = vst [vmem:[#allocation5_spill] sm:$0xff] %v14721_v26  ;;  %v14723_v29 = vadd.f32 %v1060_v27, %v970_v25  ;;  %1097 = vrot.lane.b32.xlu0 %v14721_v26, %s18740_s24  ;;  %v14780_v47 = vand.u32 4294901760, %v14721_v26  ;;  %v14849_v12 = vsub.f32 %v14734_v33, %v14796_v56  ;;  %v14874_v27 = vsub.f32 %v1141_v55, %v14825_v3 }
 0x10a   : > { %18855 = vst [vmem:[#allocation6_spill] sm:$0xff] %v14723_v29  ;;  %1095 = vrot.lane.b32.xlu1 %v14723_v29, %s18740_s24  ;;  %v14799_v57 = vand.u32 4294901760, %v14723_v29  ;;  %v14814_v63 = vsub.f32 %v14721_v26, %v14780_v47  ;;  %18861 = vst [vmem:[#allocation12_spill] sm:$0xff] %v14874_v27  ;;  %v14906_v55 = vand.u32 4294901760, %v14874_v27 }
 0x10c   : > { %1093 = vrot.lane.b32.xlu0 %v14727_v31, %s18740_s24  ;;  %v14845_v11 = vsub.f32 %v14723_v29, %v14799_v57  ;;  %v14859_v18 = vand.u32 4294901760, %v14814_v63  ;;  %18864 = vst [vmem:[#allocation15_spill] sm:$0xff] %v14906_v55 }
 0x10e   : > { %1091 = vrot.lane.b32.xlu1 %v14734_v33, %s18740_s24  ;;  %v14885_v38 = vand.u32 4294901760, %v14845_v11  ;;  %s18683_s24 = scalar_lea.hbm %s18739_s13, %s10900_s1 }
 0x110   : > { %1080 = vrot.lane.b32.xlu0 %v14721_v26, %s18780_s20  ;;  %v1313_v0 = vsub.f32 %v14845_v11, %v14885_v38 }
 0x112   : > { %1078 = vrot.lane.b32.xlu1 %v14723_v29, %s18780_s20 }
 0x114   : > { %1076 = vrot.lane.b32.xlu0 %v14727_v31, %s18780_s20 }
 0x116   : > { %1074 = vrot.lane.b32.xlu1 %v14734_v33, %s18780_s20 }
 0x118   : > { %1133 = vperm.xlu0 %14355, %v1115_v39  }
 0x11a   : > { %1128 = vperm.xlu1 %14356, %v1114_v41  }
 0x11c   : > { %1123 = vperm.xlu0 %14355, %v1113_v42   ;;  %v1306_v42 = vsub.f32 %v14814_v63, %v14859_v18 }
 0x11e   : > { %1118 = vperm.xlu1 %14356, %v1112_v43   ;;  %v14893_v43 = vand.u32 4294901760, %v14823_v2 }
 0x17a   : > { %v1098_v44 = vpop.permute.xlu0 %1097 }
 0x17b   : > { %v1107_v45 = vsel %vm1103_vm2, %v1098_v44, 0.0  ;;  %v14895_v44 = vand.u32 4294901760, %v1147_v22 }
 0x17c   : > { %v14782_v48 = vand.u32 4294901760, %v1107_v45  ;;  %v1096_v49 = vpop.permute.xlu1 %1095 }
 0x17d   : > { %v1106_v51 = vsel %vm1103_vm2, %v1096_v49, 0.0  ;;  %18863 = vst [vmem:[#allocation14_spill] sm:$0xff] %v14895_v44 }
 0x17e   : > { %v14789_v52 = vsub.f32 %v1107_v45, %v14782_v48  ;;  %v14791_v53 = vand.u32 4294901760, %v1106_v51  ;;  %12149 = vmatprep.subr.mxu0 %v14782_v48  ;;  %v1094_v54 = vpop.permute.xlu0 %1093 }
 0x17f   : > { %v1105_v58 = vsel %vm1103_vm2, %v1094_v54, 0.0  ;;  %12150 = vmatpush3.msra.mxu0 %v14782_v48 }
 0x180   : > { %v14804_v59 = vsub.f32 %v1106_v51, %v14791_v53  ;;  %v14806_v60 = vand.u32 4294901760, %v1105_v58  ;;  %12151 = vmatprep.subr.mxu0 %v14791_v53  ;;  %v1092_v61 = vpop.permute.xlu1 %1091  ;;  %v14810_v62 = vand.u32 4294901760, %v14789_v52 }
 0x181   : > { %v1104_v1 = vsel %vm1103_vm2, %v1092_v61, 0.0  ;;  %12152 = vmatpush3.msra.mxu0 %v14791_v53 }
 0x182   : > { %v14828_v4 = vsub.f32 %v1105_v58, %v14806_v60  ;;  %v14830_v5 = vand.u32 4294901760, %v1104_v1  ;;  %v1081_v6 = vpop.permute.xlu0 %1080  ;;  %12153 = vmatprep.subr.mxu0 %v14806_v60  ;;  %v1278_v7 = vsub.f32 %v14789_v52, %v14810_v62  ;;  %v14836_v8 = vand.u32 4294901760, %v14804_v59 }
 0x183   : > { %v1090_v10 = vsel %vm1086_vm3, 0.0, %v1081_v6  ;;  %12154 = vmatpush3.msra.mxu0 %v14806_v60  ;;  %v14909_v58 = vsub.f32 %v1144_v13, %v14876_v28  ;;  %v1320_v13 = vsub.f32 %v14823_v2, %v14893_v43 }
 0x184   : > { %v14853_v14 = vsub.f32 %v1104_v1, %v14830_v5  ;;  %12155 = vmatprep.subr.mxu0 %v14830_v5  ;;  %v1079_v15 = vpop.permute.xlu1 %1078  ;;  %v1279_v16 = vand.u32 4294901760, %v1278_v7  ;;  %v1285_v17 = vsub.f32 %v14804_v59, %v14836_v8  ;;  %v14861_v19 = vand.u32 4294901760, %v1090_v10 }
 0x185   : > { %v1089_v20 = vsel %vm1086_vm3, 0.0, %v1079_v15  ;;  %12156 = vmatpush3.msra.mxu0 %v14830_v5  ;;  %v14866_v21 = vand.u32 4294901760, %v14828_v4  ;;  %18865 = vst [vmem:[#allocation16_spill] sm:$0xff] %v14909_v58  ;;  %v14918_v1 = vand.u32 4294901760, %v14849_v12  ;;  %v14924_v7 = vsub.f32 %v1147_v22, %v14895_v44 }
 0x186   : > { %12179 = vmatprep.subr.mxu1 %v1279_v16  ;;  %v1077_v23 = vpop.permute.xlu0 %1076  ;;  %12157 = vmatprep.subr.mxu0 %v14780_v47  ;;  %v1286_v24 = vand.u32 4294901760, %v1285_v17  ;;  %v14871_v25 = vand.u32 4294901760, %v14853_v14  ;;  %v14878_v30 = vand.u32 4294901760, %v1089_v20  ;;  %v14898_v45 = vsub.f32 %v1090_v10, %v14861_v19 }
 0x187   : > { %v1088_v32 = vsel %vm1086_vm3, 0.0, %v1077_v23  ;;  %12158 = vmatpush3.msra.mxu0 %v14780_v47  ;;  %12180 = vmatpush3.msra.mxu1 %v1279_v16  ;;  %v1292_v34 = vsub.f32 %v14828_v4, %v14866_v21  ;;  %18866 = vst [vmem:[#allocation17_spill] sm:$0xff] %v14924_v7  ;;  %v1307_v10 = vand.u32 4294901760, %v1306_v42  ;;  %v1239_v16 = vsub.f32 %v14874_v27, %v14906_v55 }
 0x188   : > { %12159 = vmatprep.subr.mxu0 %v14799_v57  ;;  %12181 = vmatprep.subr.mxu1 %v1286_v24  ;;  %v1075_v39 = vpop.permute.xlu1 %1074  ;;  %v1299_v41 = vsub.f32 %v14853_v14, %v14871_v25  ;;  %v14900_v46 = vand.u32 4294901760, %v1088_v32  ;;  %v14912_v61 = vsub.f32 %v1089_v20, %v14878_v30  ;;  %v14933_v15 = vand.u32 4294901760, %v14898_v45 }
 0x189   : > { %v1087_v49 = vsel %vm1086_vm3, 0.0, %v1075_v39  ;;  %12160 = vmatpush3.msra.mxu0 %v14799_v57  ;;  %12182 = vmatpush3.msra.mxu1 %v1286_v24  ;;  %v1293_v51 = vand.u32 4294901760, %v1292_v34  ;;  %v14939_v17 = vand.u32 4294901760, %v14909_v58  ;;  %v1314_v20 = vand.u32 4294901760, %v1313_v0 }
 0x18a   : > { %12161 = vmatprep.subr.mxu0 %v14785_v50  ;;  %v1300_v54 = vand.u32 4294901760, %v1299_v41  ;;  %v14920_v6 = vand.u32 4294901760, %v1087_v49  ;;  %v14927_v9 = vsub.f32 %v1088_v32, %v14900_v46  ;;  %v1327_v22 = vsub.f32 %v14849_v12, %v14918_v1 }
 0x18b   : > { %12183 = vmatprep.subr.mxu1 %v1293_v51  ;;  %12162 = vmatpush3.msra.mxu0 %v14785_v50  ;;  %18867 = vst [vmem:[#allocation18_spill] sm:$0xff] %v14939_v17  ;;  %v14945_v23 = vand.u32 4294901760, %v14912_v61  ;;  %v14952_v32 = vand.u32 4294901760, %v14924_v7  ;;  %v1321_v34 = vand.u32 4294901760, %v1320_v13  ;;  %v1334_v39 = vsub.f32 %v14898_v45, %v14933_v15 }
 0x18c   : > { %12184 = vmatpush3.msra.mxu1 %v1293_v51  ;;  %12163 = vmatprep.subr.mxu0 %v14796_v56  ;;  %v14948_v24 = vsub.f32 %v1087_v49, %v14920_v6  ;;  %v14958_v41 = vand.u32 4294901760, %v14927_v9  ;;  %v14961_v42 = vand.u32 4294901760, %v1239_v16  ;;  %v1249_v49 = vsub.f32 %v14909_v58, %v14939_v17 }
 0x18d   : > { %12185 = vmatprep.subr.mxu1 %v1300_v54  ;;  %12164 = vmatpush3.msra.mxu0 %v14796_v56  ;;  %18868 = vst [vmem:[#allocation19_spill] sm:$0xff] %v14952_v32  ;;  %v1328_v51 = vand.u32 4294901760, %v1327_v22  ;;  %v1259_v0 = vsub.f32 %v14924_v7, %v14952_v32  ;;  %v1335_v13 = vand.u32 4294901760, %v1334_v39 }
 0x18e   : > { %12186 = vmatpush3.msra.mxu1 %v1300_v54  ;;  %12165 = vmatprep.subr.mxu0 %v14861_v19  ;;  %v1341_v54 = vsub.f32 %v14912_v61, %v14945_v23  ;;  %v1348_v16 = vsub.f32 %v14927_v9, %v14958_v41 }
 0x18f   : > { %12187 = vmatprep.subr.mxu1 %v1307_v10  ;;  %12166 = vmatpush3.msra.mxu0 %v14861_v19 }
 0x190   : > { %12188 = vmatpush3.msra.mxu1 %v1307_v10  ;;  %12167 = vmatprep.subr.mxu0 %v14878_v30  ;;  %v14972_v10 = vand.u32 4294901760, %v14948_v24  ;;  %v1342_v22 = vand.u32 4294901760, %v1341_v54 }
 0x191   : > { %12189 = vmatprep.subr.mxu1 %v1314_v20  ;;  %12168 = vmatpush3.msra.mxu0 %v14878_v30 }
 0x192   : > { %12190 = vmatpush3.msra.mxu1 %v1314_v20  ;;  %12169 = vmatprep.subr.mxu0 %v14900_v46  ;;  %v14978_v20 = vand.u32 4294901760, %v1249_v49  ;;  %v1355_v39 = vsub.f32 %v14948_v24, %v14972_v10 }
 0x193   : > { %12191 = vmatprep.subr.mxu1 %v1321_v34  ;;  %12170 = vmatpush3.msra.mxu0 %v14900_v46 }
 0x194   : > { %12192 = vmatpush3.msra.mxu1 %v1321_v34  ;;  %12171 = vmatprep.subr.mxu0 %v14920_v6  ;;  %18869 = vst [vmem:[#allocation20_spill] sm:$0xff] %v14978_v20  ;;  %v14982_v34 = vand.u32 4294901760, %v1259_v0 }
 0x195   : > { %12193 = vmatprep.subr.mxu1 %v1328_v51  ;;  %12172 = vmatpush3.msra.mxu0 %v14920_v6 }
 0x196   : > { %12194 = vmatpush3.msra.mxu1 %v1328_v51  ;;  %12174 = vmatmul.mubr.f32.vlgmr.msra.gmra.mxu0 %v14961_v42  ;;  %18870 = vst [vmem:[#allocation21_spill] sm:$0xff] %v14982_v34  ;;  %v1349_v51 = vand.u32 4294901760, %v1348_v16 }
 0x197   : > { %12195 = vmatprep.subr.mxu1 %v1335_v13  ;;  %12209 = vmatprep.subr.mxu0 %v14789_v52 }
 0x198   : > { %12196 = vmatpush3.msra.mxu1 %v1335_v13  ;;  %12210 = vmatpush3.msra.mxu0 %v14789_v52  ;;  %v1356_v52 = vand.u32 4294901760, %v1355_v39 }
 0x199   : > { %12197 = vmatprep.subr.mxu1 %v1342_v22  ;;  %12211 = vmatprep.subr.mxu0 %v14804_v59 }
 0x19a   : > { %12176 = vmatprep.mubr.f32.mxu0 %v14978_v20  ;;  %12198 = vmatpush3.msra.mxu1 %v1342_v22 }
 0x19b   : > { %12212 = vmatpush3.msra.mxu0 %v14804_v59  ;;  %12199 = vmatprep.subr.mxu1 %v1349_v51 }
 0x19c   : > { %12177 = vmatmul.mubr.f32.gmra.mxu0 %v14982_v34  ;;  %12213 = vmatprep.subr.mxu0 %v14828_v4 }
 0x19d   : > { %12200 = vmatpush3.msra.mxu1 %v1349_v51  ;;  %12214 = vmatpush3.msra.mxu0 %v14828_v4 }
 0x19e   : > { %12201 = vmatprep.subr.mxu1 %v1356_v52  ;;  %12215 = vmatprep.subr.mxu0 %v14853_v14 }
 0x19f   : > { %12202 = vmatpush3.msra.mxu1 %v1356_v52  ;;  %12216 = vmatpush3.msra.mxu0 %v14853_v14 }
 0x1a0   : > { %12204 = vmatmul.mubr.f32.vlgmr.msra.gmra.mxu1 %v14825_v3  ;;  %12217 = vmatprep.subr.mxu0 %v14814_v63 }
 0x1a1   : > { %12239 = vmatprep.subr.mxu1 %v14782_v48  ;;  %12218 = vmatpush3.msra.mxu0 %v14814_v63  ;;  %v15101_v63 = vpop.permute.xlu0 %1133 }
 0x1a2   : > { %12240 = vmatpush3.msra.mxu1 %v14782_v48  ;;  %12219 = vmatprep.subr.mxu0 %v14845_v11  ;;  %18871 = vst [vmem:[#allocation22_spill] sm:$0xff] %v15101_v63 }
 0x1a3   : > { %12241 = vmatprep.subr.mxu1 %v14791_v53  ;;  %12206 = vmatprep.mubr.f32.mxu1 %v14876_v28 }
 0x1a4   : > { %12220 = vmatpush3.msra.mxu0 %v14845_v11  ;;  %12242 = vmatpush3.msra.mxu1 %v14791_v53 }
 0x1a5   : > { %12207 = vmatmul.mubr.f32.gmra.mxu1 %v14895_v44  ;;  %12221 = vmatprep.subr.mxu0 %v14823_v2  ;;  %v15105_v11 = vpop.permute.xlu0 %1123 }
 0x1a6   : > { %12243 = vmatprep.subr.mxu1 %v14806_v60  ;;  %12222 = vmatpush3.msra.mxu0 %v14823_v2  ;;  %18873 = vst [vmem:[#allocation24_spill] sm:$0xff] %v15105_v11 }
 0x1a7   : > { %12244 = vmatpush3.msra.mxu1 %v14806_v60  ;;  %12223 = vmatprep.subr.mxu0 %v14849_v12 }
 0x1a8   : > { %12245 = vmatprep.subr.mxu1 %v14830_v5  ;;  %12224 = vmatpush3.msra.mxu0 %v14849_v12 }
 0x1a9   : > { %12246 = vmatpush3.msra.mxu1 %v14830_v5  ;;  %12225 = vmatprep.subr.mxu0 %v14898_v45 }
 0x1aa   : > { %12247 = vmatprep.subr.mxu1 %v14780_v47  ;;  %12226 = vmatpush3.msra.mxu0 %v14898_v45 }
 0x1ab   : > { %12248 = vmatpush3.msra.mxu1 %v14780_v47  ;;  %12227 = vmatprep.subr.mxu0 %v14912_v61 }
 0x1ac   : > { %12249 = vmatprep.subr.mxu1 %v14799_v57  ;;  %12228 = vmatpush3.msra.mxu0 %v14912_v61 }
 0x1ad   : > { %12250 = vmatpush3.msra.mxu1 %v14799_v57  ;;  %12229 = vmatprep.subr.mxu0 %v14927_v9 }
 0x1ae   : > { %12251 = vmatprep.subr.mxu1 %v14785_v50  ;;  %12230 = vmatpush3.msra.mxu0 %v14927_v9 }
 0x1af   : > { %12252 = vmatpush3.msra.mxu1 %v14785_v50  ;;  %12231 = vmatprep.subr.mxu0 %v14948_v24 }
 0x1b0   : > { %12253 = vmatprep.subr.mxu1 %v14796_v56  ;;  %12232 = vmatpush3.msra.mxu0 %v14948_v24 }
 0x1b1   : > { %12233 = vmatprep.mubr.f32.mxu0 %v14746_v36  ;;  %12254 = vmatpush3.msra.mxu1 %v14796_v56 }
 0x1b2   : > { %12234 = vmatmul.mubr.f32.vlgmr.msra.gmra.mxu0 %v14874_v27  ;;  %12255 = vmatprep.subr.mxu1 %v14861_v19 }
 0x1b3   : > { %12269 = vmatprep.subr.mxu0 %v14810_v62  ;;  %12256 = vmatpush3.msra.mxu1 %v14861_v19 }
 0x1b4   : > { %12270 = vmatpush3.msra.mxu0 %v14810_v62  ;;  %12257 = vmatprep.subr.mxu1 %v14878_v30 }
 0x1b5   : > { %12271 = vmatprep.subr.mxu0 %v14836_v8  ;;  %12236 = vmatprep.mubr.f32.mxu0 %v14909_v58 }
 0x1b6   : > { %12258 = vmatpush3.msra.mxu1 %v14878_v30  ;;  %12272 = vmatpush3.msra.mxu0 %v14836_v8  ;;  %v15103_v8 = vpop.permute.xlu1 %1128 }
 0x1b7   : > { %12237 = vmatmul.mubr.f32.gmra.mxu0 %v14924_v7  ;;  %12259 = vmatprep.subr.mxu1 %v14900_v46  ;;  %18872 = vst [vmem:[#allocation23_spill] sm:$0xff] %v15103_v8 }
 0x1b8   : > { %12273 = vmatprep.subr.mxu0 %v14866_v21  ;;  %12260 = vmatpush3.msra.mxu1 %v14900_v46 }
 0x1b9   : > { %12274 = vmatpush3.msra.mxu0 %v14866_v21  ;;  %12261 = vmatprep.subr.mxu1 %v14920_v6 }
 0x1ba   : > { %12275 = vmatprep.subr.mxu0 %v14871_v25  ;;  %12262 = vmatpush3.msra.mxu1 %v14920_v6  ;;  %v15109_v45 = vpop.permute.xlu1 %1118 }
 0x1bb   : > { %12263 = vmatprep.mubr.f32.mxu1 %v14752_v37  ;;  %12276 = vmatpush3.msra.mxu0 %v14871_v25  ;;  %18874 = vst [vmem:[#allocation25_spill] sm:$0xff] %v15109_v45 }
 0x1bc   : > { %12264 = vmatmul.mubr.f32.vlgmr.msra.gmra.mxu1 %v14906_v55  ;;  %12277 = vmatprep.subr.mxu0 %v14859_v18 }
 0x1bd   : > { %12299 = vmatprep.subr.mxu1 %v14782_v48  ;;  %12278 = vmatpush3.msra.mxu0 %v14859_v18 }
 0x1be   : > { %12300 = vmatpush3.msra.mxu1 %v14782_v48  ;;  %12279 = vmatprep.subr.mxu0 %v14885_v38 }
 0x1bf   : > { %12301 = vmatprep.subr.mxu1 %v14791_v53  ;;  %12266 = vmatprep.mubr.f32.mxu1 %v14939_v17 }
 0x1c0   : > { %12280 = vmatpush3.msra.mxu0 %v14885_v38  ;;  %12302 = vmatpush3.msra.mxu1 %v14791_v53 }
 0x1c1   : > { %12267 = vmatmul.mubr.f32.gmra.mxu1 %v14952_v32  ;;  %12281 = vmatprep.subr.mxu0 %v14893_v43 }
 0x1c2   : > { %12303 = vmatprep.subr.mxu1 %v14806_v60  ;;  %12282 = vmatpush3.msra.mxu0 %v14893_v43 }
 0x1c3   : > { %12304 = vmatpush3.msra.mxu1 %v14806_v60  ;;  %12283 = vmatprep.subr.mxu0 %v14918_v1 }
 0x1c4   : > { %12305 = vmatprep.subr.mxu1 %v14830_v5  ;;  %12284 = vmatpush3.msra.mxu0 %v14918_v1 }
 0x1c5   : > { %12306 = vmatpush3.msra.mxu1 %v14830_v5  ;;  %12285 = vmatprep.subr.mxu0 %v14933_v15 }
 0x1c6   : > { %12307 = vmatprep.subr.mxu1 %v14780_v47  ;;  %12286 = vmatpush3.msra.mxu0 %v14933_v15 }
 0x1c7   : > { %12308 = vmatpush3.msra.mxu1 %v14780_v47  ;;  %12287 = vmatprep.subr.mxu0 %v14945_v23 }
 0x1c8   : > { %12309 = vmatprep.subr.mxu1 %v14799_v57  ;;  %12288 = vmatpush3.msra.mxu0 %v14945_v23 }
 0x1c9   : > { %12310 = vmatpush3.msra.mxu1 %v14799_v57  ;;  %12289 = vmatprep.subr.mxu0 %v14958_v41 }
 0x1ca   : > { %12311 = vmatprep.subr.mxu1 %v14785_v50  ;;  %12290 = vmatpush3.msra.mxu0 %v14958_v41 }
 0x1cb   : > { %12312 = vmatpush3.msra.mxu1 %v14785_v50  ;;  %12291 = vmatprep.subr.mxu0 %v14972_v10 }
 0x1cc   : > { %12313 = vmatprep.subr.mxu1 %v14796_v56  ;;  %12292 = vmatpush3.msra.mxu0 %v14972_v10 }
 0x1cd   : > { %12293 = vmatprep.mubr.f32.mxu0 %v14741_v35  ;;  %12314 = vmatpush3.msra.mxu1 %v14796_v56 }
 0x1ce   : > { %12294 = vmatmul.mubr.f32.vlgmr.msra.gmra.mxu0 %v14825_v3  ;;  %12315 = vmatprep.subr.mxu1 %v14861_v19 }
 0x1cf   : > { %12316 = vmatpush3.msra.mxu1 %v14861_v19  ;;  %12296 = vmatprep.mubr.f32.mxu0 %v14876_v28 }
 0x1d0   : > { %12317 = vmatprep.subr.mxu1 %v14878_v30  ;;  %12323 = vmatprep.mubr.f32.mxu1 %v14741_v35 }
 0x1d1   : > { %12318 = vmatpush3.msra.mxu1 %v14878_v30 }
 0x1d2   : > { %12297 = vmatmul.mubr.f32.gmra.mxu0 %v14895_v44  ;;  %12319 = vmatprep.subr.mxu1 %v14900_v46 }
 0x1d3   : > { %12320 = vmatpush3.msra.mxu1 %v14900_v46 }
 0x1d4   : > { %12321 = vmatprep.subr.mxu1 %v14920_v6 }
 0x1d5   : > { %12322 = vmatpush3.msra.mxu1 %v14920_v6 }
 0x1d6   : > { %12324 = vmatmul.mubr.f32.vlgmr.msra.gmra.mxu1 %v14825_v3 }
 0x1d7   : > { %12326 = vmatprep.mubr.f32.mxu1 %v14876_v28 }
 0x1da   : > { %12327 = vmatmul.mubr.f32.gmra.mxu1 %v14895_v44 }
 0x256   : > { %v12175_v47 = vpop.f32.mrf.mxu0 }
 0x257   : > { %v1243_v18 = vadd.f32 %v12175_v47, %v15105_v11 }
 0x258   : > { %v1232_v48 = vpop.f32.mrf.mxu0 }
 0x259   : > { %v1233_v46 = vadd.f32 %v1232_v48, %v15109_v45 }
 0x25c   : > { %v12178_v50 = vpop.f32.mrf.mxu0 }
 0x25d   : > { %v1263_v38 = vadd.f32 %v12178_v50, %v15101_v63 }
 0x25e   : > { %v1252_v56 = vpop.f32.mrf.mxu0 }
 0x25f   : > { %v1253_v61 = vadd.f32 %v1252_v56, %v15103_v8 }
 0x260   : > { %v12205_v53 = vpop.f32.mrf.mxu1 }
 0x261   : > { %v1400_v21 = vadd.f32 %v12205_v53, %v1243_v18 }
 0x262   : > { %v1393_v57 = vpop.f32.mrf.mxu1 }
 0x263   : > { %v1394_v23 = vadd.f32 %v1393_v57, %v1233_v46 }
 0x265   : > { %v12208_v60 = vpop.f32.mrf.mxu1 }
 0x266   : > { %v1412_v1 = vadd.f32 %v12208_v60, %v1263_v38 }
 0x267   : > { %v1405_v2 = vpop.f32.mrf.mxu1 }
 0x268   : > { %v1406_v24 = vadd.f32 %v1405_v2, %v1253_v61 }
 0x272   : > { %v12235_v59 = vpop.f32.mrf.mxu0 }
 0x273   : > { %v1515_v43 = vadd.f32 %v12235_v59, %v1400_v21 }
 0x274   : > { %v1507_v62 = vpop.f32.mrf.mxu0 }
 0x275   : > { %v1508_v0 = vadd.f32 %v1507_v62, %v1394_v23 }
 0x277   : > { %v12238_v4 = vpop.f32.mrf.mxu0 }
 0x278   : > { %v1529_v41 = vadd.f32 %v12238_v4, %v1412_v1 }
 0x279   : > { %v1521_v12 = vpop.f32.mrf.mxu0 }
 0x27a   : > { %v1522_v10 = vadd.f32 %v1521_v12, %v1406_v24 }
 0x27c   : > { %v12265_v5 = vpop.f32.mrf.mxu1 }
 0x27d   : > { %v1622_v6 = vadd.f32 %v12265_v5, %v1515_v43 }
 0x27e   : > { %v1613_v14 = vpop.f32.mrf.mxu1 }
 0x27f   : > { %v1614_v51 = vadd.f32 %v1613_v14, %v1508_v0 }
 0x281   : > { %v12268_v25 = vpop.f32.mrf.mxu1 }
 0x282   : > { %v1638_v13 = vadd.f32 %v12268_v25, %v1529_v41 }
 0x283   : > { %v1629_v9 = vpop.f32.mrf.mxu1 }
 0x284   : > { %v1630_v52 = vadd.f32 %v1629_v9, %v1522_v10 }
 0x28e   : > { %v12295_v19 = vpop.f32.mrf.mxu0 }
 0x28f   : > { %v1751_v49 = vadd.f32 %v12295_v19, %v1622_v6 }
 0x290   : > { %v1744_v30 = vpop.f32.mrf.mxu0 }
 0x291   : > { %v1745_v53 = vadd.f32 %v1744_v30, %v1614_v51 }
 0x292   : > { %v12298_v15 = vpop.f32.mrf.mxu0 }
 0x293   : > { %v1763_v47 = vadd.f32 %v12298_v15, %v1638_v13 }
 0x294   : > { %v1756_v22 = vpop.f32.mrf.mxu0 }
 0x295   : > { %v1757_v56 = vadd.f32 %v1756_v22, %v1630_v52 }
 0x296   : > { %v12325_v54 = vpop.f32.mrf.mxu1 }
 0x297   : > { %v1852_v16 = vadd.f32 %v12325_v54, %v1751_v49 }
 0x298   : > { %v1845_v39 = vpop.f32.mrf.mxu1 }
 0x299   : > { %v15113_v48 = vmax.f32 %v1852_v16, 0.0  ;;  %v1846_v60 = vadd.f32 %v1845_v39, %v1745_v53 }
 0x29a   : > { %v12328_v50 = vpop.f32.mrf.mxu1 }
 0x29b   : > { %v1864_v59 = vadd.f32 %v12328_v50, %v1763_v47  ;;  %1873 = vadd.xlane.f32.xlu0 %v15113_v48  ;;  %v15121_v5 = vmax.f32 %v1846_v60, 0.0  ;;  %v1880_v18 = vmul.f32 %v15113_v48, %v15113_v48 }
 0x29c   : > { %v1857_v57 = vpop.f32.mrf.mxu1 }
 0x29d   : > { %v15116_v2 = vmax.f32 %v1864_v59, 0.0  ;;  %v1858_v62 = vadd.f32 %v1857_v57, %v1757_v56  ;;  %v1879_v19 = vmul.f32 %v15121_v5, %v15121_v5 }
 0x29f   : > { %v15118_v4 = vmax.f32 %v1858_v62, 0.0  ;;  %1877 = vadd.xlane.f32.xlu0 %v15116_v2  ;;  %v1882_v12 = vmul.f32 %v15116_v2, %v15116_v2 }
 0x2a1   : > { %1875 = vadd.xlane.f32.xlu1 %v15118_v4  ;;  %v1881_v14 = vmul.f32 %v15118_v4, %v15118_v4 }
 0x2a3   : > { %1871 = vadd.xlane.f32.xlu0 %v15121_v5 }
 0x2a5   : > { %1889 = vadd.xlane.f32.xlu1 %v1882_v12 }
 0x2a7   : > { %1887 = vadd.xlane.f32.xlu0 %v1881_v14 }
 0x2a9   : > { %1885 = vadd.xlane.f32.xlu1 %v1880_v18 }
 0x2ab   : > { %1883 = vadd.xlane.f32.xlu0 %v1879_v19 }
 0x324   : > { %v1874_v21 = vpop.xlane.xlu0 %1873 }
 0x325   : > { %v15133_v30 = vmul.f32 0.0078125, %v1874_v21 }
 0x327   : > { %v1896_v23 = vmul.f32 128.0, %v15133_v30 }
 0x328   : > { %v1878_v25 = vpop.xlane.xlu0 %1877 }
 0x329   : > { %v15135_v38 = vmul.f32 0.0078125, %v1878_v25  ;;  %v1900_v16 = vmul.f32 %v1896_v23, %v15133_v30 }
 0x32a   : > { %v1876_v43 = vpop.xlane.xlu1 %1875 }
 0x32b   : > { %v15137_v46 = vmul.f32 0.0078125, %v1876_v43  ;;  %v1898_v61 = vmul.f32 128.0, %v15135_v38 }
 0x32c   : > { %v1872_v1 = vpop.xlane.xlu0 %1871 }
 0x32d   : > { %v15140_v6 = vmul.f32 0.0078125, %v1872_v1  ;;  %v1902_v9 = vmul.f32 %v1898_v61, %v15135_v38  ;;  %v1897_v15 = vmul.f32 128.0, %v15137_v46 }
 0x32e   : > { %v1890_v24 = vpop.xlane.xlu1 %1889 }
 0x32f   : > { %v1906_v41 = vsub.f32 %v1890_v24, %v1902_v9  ;;  %v1901_v49 = vmul.f32 %v1897_v15, %v15137_v46  ;;  %v1895_v0 = vmul.f32 128.0, %v15140_v6 }
 0x330   : > { %v1888_v54 = vpop.xlane.xlu0 %1887 }
 0x331   : > { %v1910_v10 = vmul.f32 0.007874016, %v1906_v41  ;;  %v1905_v13 = vsub.f32 %v1888_v54, %v1901_v49  ;;  %v1899_v47 = vmul.f32 %v1895_v0, %v15140_v6 }
 0x332   : > { %v1886_v22 = vpop.xlane.xlu1 %1885 }
 0x333   : > { %v1914_v39 = vmax.f32 %v1910_v10, 0.0  ;;  %v1909_v51 = vmul.f32 0.007874016, %v1905_v13  ;;  %v1904_v52 = vsub.f32 %v1886_v22, %v1900_v16 }
 0x334   : > { %v1884_v50 = vpop.xlane.xlu0 %1883 }
 0x335   : > { %14357 = vrsqrt.f32 %v1914_v39  ;;  %v1913_v53 = vmax.f32 %v1909_v51, 0.0  ;;  %v1908_v56 = vmul.f32 0.007874016, %v1904_v52  ;;  %v1903_v59 = vsub.f32 %v1884_v50, %v1899_v47 }
 0x336   : > { %vm1938_vm4 = vcmp.eq.f32.partialorder %v1914_v39, inf  ;;  %v1941_v18 = vand.u32 2147483648, %v1914_v39  ;;  %vm1940_vm5 = vcmp.eq.f32.partialorder %v1914_v39, 0.0  ;;  %v1947_v47 = vsub.f32 %v15116_v2, %v15135_v38 }
 0x337   : > { %14359 = vrsqrt.f32 %v1913_v53  ;;  %v1912_v57 = vmax.f32 %v1908_v56, 0.0  ;;  %v1907_v60 = vmul.f32 0.007874016, %v1903_v59  ;;  %vm1931_vm6 = vcmp.eq.f32.partialorder %v1913_v53, inf }
 0x338   : > { %v1934_v1 = vand.u32 2147483648, %v1913_v53  ;;  %vm1933_vm7 = vcmp.eq.f32.partialorder %v1913_v53, 0.0  ;;  %v1946_v59 = vsub.f32 %v15118_v4, %v15137_v46 }
 0x339   : > { %14361 = vrsqrt.f32 %v1912_v57  ;;  %v1911_v62 = vmax.f32 %v1907_v60, 0.0  ;;  %vm1924_vm8 = vcmp.eq.f32.partialorder %v1912_v57, inf  ;;  %v1927_v49 = vand.u32 2147483648, %v1912_v57 }
 0x33a   : > { %vm1926_vm9 = vcmp.eq.f32.partialorder %v1912_v57, 0.0 }
 0x33b   : > { %14363 = vrsqrt.f32 %v1911_v62  ;;  %vm1917_vm10 = vcmp.eq.f32.partialorder %v1911_v62, inf  ;;  %v1920_v22 = vand.u32 2147483648, %v1911_v62  ;;  %vm1919_vm11 = vcmp.eq.f32.partialorder %v1911_v62, 0.0 }
 0x342   : > { %v14358_v12 = vpop.eup %14357 }
 0x343   : > { %v1937_v14 = vmul.f32 %v14358_v12, %v1914_v39 }
 0x344   : > { %v14360_v19 = vpop.eup %14359 }
 0x345   : > { %v1939_v21 = vsel %vm1938_vm4, %v1914_v39, %v1937_v14  ;;  %v1930_v43 = vmul.f32 %v14360_v19, %v1913_v53  ;;  %v1945_v14 = vsub.f32 %v15113_v48, %v15133_v30  ;;  %v2017_v48 = vld [vmem:[%s18731_s5] sm:$0xff] }
 0x346   : > { %v1942_v25 = vsel %vm1940_vm5, %v1941_v18, %v1939_v21  ;;  %v14362_v9 = vpop.eup %14361  ;;  %v1944_v21 = vsub.f32 %v15121_v5, %v15140_v6  ;;  %v2046_v5 = vsel %vm1136_vm1, %v2017_v48, 0 }
 0x347   : > { %v1951_v61 = vadd.f32 1e-06, %v1942_v25  ;;  %v1932_v15 = vsel %vm1931_vm6, %v1913_v53, %v1930_v43  ;;  %v1923_v24 = vmul.f32 %v14362_v9, %v1912_v57  ;;  %v10890_v53 = vld [vmem:[%s18735_s9] ss:$0 sm:$0xff]  ;;  %v15176_v6 = vand.u32 4294901760, %v2046_v5 }
 0x348   : > { %v1935_v23 = vsel %vm1933_vm7, %v1934_v1, %v1932_v15  ;;  %v14364_v54 = vpop.eup %14363  ;;  %v2024_v15 = vld [vmem:[%s18732_s6 + $0x18] sm:$0xff] }
 0x349   : > { %14365 = vrcp.f32 %v1951_v61  ;;  %v1950_v41 = vadd.f32 1e-06, %v1935_v23  ;;  %v1925_v0 = vsel %vm1924_vm8, %v1912_v57, %v1923_v24  ;;  %v1916_v13 = vmul.f32 %v14364_v54, %v1911_v62  ;;  %v10891_v57 = vld [vmem:[%s18736_s10] ss:$0 sm:$0xff]  ;;  %18876 = vst [vmem:[#allocation26_spill] sm:$0xff] %v15176_v6  ;;  %12383 = vmatprep.mubr.f32.mxu1 %v15176_v6  ;;  %v2023_v54 = vld [vmem:[%s18732_s6 + $0x10] sm:$0xff] }
 0x34a   : > { %v1928_v10 = vsel %vm1926_vm9, %v1927_v49, %v1925_v0  ;;  %v15181_v9 = vsub.f32 %v2046_v5, %v15176_v6  ;;  %v2021_v0 = vld [vmem:[%s18732_s6] sm:$0xff] }
 0x34b   : > { %14367 = vrcp.f32 %v1950_v41  ;;  %v1949_v16 = vadd.f32 1e-06, %v1928_v10  ;;  %v1918_v39 = vsel %vm1917_vm10, %v1911_v62, %v1916_v13  ;;  %v2022_v41 = vld [vmem:[%s18732_s6 + $0x8] sm:$0xff] }
 0x34c   : > { %v1921_v51 = vsel %vm1919_vm11, %v1920_v22, %v1918_v39  ;;  %18877 = vst [vmem:[#allocation27_spill] sm:$0xff] %v15181_v9  ;;  %v15190_v23 = vand.u32 4294901760, %v15181_v9 }
 0x34d   : > { %14369 = vrcp.f32 %v1949_v16  ;;  %v1948_v52 = vadd.f32 1e-06, %v1921_v51 }
 0x34e   : > { %18878 = vst [vmem:[#allocation28_spill] sm:$0xff] %v15190_v23  ;;  %v2137_v24 = vsub.f32 %v15181_v9, %v15190_v23 }
 0x34f   : > { %14371 = vrcp.f32 %v1948_v52 }
 0x350   : > { %v15198_v49 = vand.u32 4294901760, %v2137_v24 }
 0x352   : > { %18879 = vst [vmem:[#allocation29_spill] sm:$0xff] %v15198_v49  ;;  %12353 = vmatprep.mubr.f32.mxu0 %v15198_v49 }
 0x356   : > { %v14366_v50 = vpop.eup %14365 }
 0x357   : > { %v1959_v56 = vmul.f32 %v14366_v50, %v1947_v47 }
 0x358   : > { %v14368_v60 = vpop.eup %14367 }
 0x359   : > { %v1969_v62 = vmul.f32 %v10890_v53, %v1959_v56  ;;  %v1957_v12 = vmul.f32 %v14368_v60, %v1946_v59 }
 0x35a   : > { %v14370_v38 = vpop.eup %14369 }
 0x35b   : > { %v1980_v2 = vadd.f32 %v10891_v57, %v1969_v62  ;;  %v1968_v18 = vmul.f32 %v10890_v53, %v1957_v12  ;;  %v1955_v19 = vmul.f32 %v14370_v38, %v1945_v14 }
 0x35c   : > { %v14372_v46 = vpop.eup %14371 }
 0x35d   : > { %2007 = vrot.lane.b32.xlu1 %v1980_v2, %s18875_s30  ;;  %v1979_v4 = vadd.f32 %v10891_v57, %v1968_v18  ;;  %v1967_v25 = vmul.f32 %v10890_v53, %v1955_v19  ;;  %v1953_v43 = vmul.f32 %v14372_v46, %v1944_v21  ;;  %v15217_v52 = vand.u32 4294901760, %v1980_v2 }
 0x35f   : > { %2005 = vrot.lane.b32.xlu0 %v1979_v4, %s18875_s30  ;;  %v15165_v61 = vadd.f32 %v10891_v57, %v1967_v25  ;;  %v1966_v1 = vmul.f32 %v10890_v53, %v1953_v43  ;;  %v15219_v47 = vand.u32 4294901760, %v1979_v4  ;;  %v2018_v53 = vld [vmem:[%s18731_s5 + $0x8] sm:$0xff]  ;;  %v15248_v21 = vsub.f32 %v1980_v2, %v15217_v52  ;;  %v2019_v25 = vld [vmem:[%s18731_s5 + $0x10] sm:$0xff] }
 0x360   : > { %v2049_v38 = vsel %vm1136_vm1, %v2018_v53, 0 }
 0x361   : > { %2003 = vrot.lane.b32.xlu1 %v15165_v61, %s18875_s30  ;;  %v15174_v30 = vadd.f32 %v10891_v57, %v1966_v1  ;;  %v15242_v18 = vand.u32 4294901760, %v15165_v61  ;;  %v15251_v46 = vsub.f32 %v1979_v4, %v15219_v47  ;;  %v15268_v24 = vand.u32 4294901760, %v2049_v38 }
 0x363   : > { %1991 = vrot.lane.b32.xlu0 %v1980_v2, %s18780_s20  ;;  %v15257_v43 = vand.u32 4294901760, %v15174_v30  ;;  %18880 = vst [vmem:[#allocation30_spill] sm:$0xff] %v15268_v24  ;;  %v15283_v53 = vand.u32 4294901760, %v15251_v46 }
 0x365   : > { %2001 = vrot.lane.b32.xlu1 %v15174_v30, %s18875_s30 }
 0x367   : > { %1987 = vrot.lane.b32.xlu0 %v15165_v61, %s18780_s20 }
 0x369   : > { %1989 = vrot.lane.b32.xlu1 %v1979_v4, %s18780_s20 }
 0x36b   : > { %2042 = vperm.xlu0 %14355, %v2024_v15  }
 0x36d   : > { %1985 = vrot.lane.b32.xlu1 %v15174_v30, %s18780_s20 }
 0x36f   : > { %2032 = vperm.xlu0 %14355, %v2022_v41   ;;  %v2020_v41 = vld [vmem:[%s18731_s5 + $0x18] sm:$0xff] }
 0x371   : > { %2037 = vperm.xlu1 %14356, %v2023_v54  }
 0x375   : > { %2027 = vperm.xlu1 %14356, %v2021_v0  }
 0x3cf   : > { %v2008_v10 = vpop.permute.xlu1 %2007 }
 0x3d0   : > { %v2016_v13 = vsel %vm1103_vm2, %v2008_v10, 0.0  ;;  %v2052_v10 = vsel %vm1136_vm1, %v2019_v25, 0 }
 0x3d1   : > { %v15210_v16 = vand.u32 4294901760, %v2016_v13  ;;  %v2006_v22 = vpop.permute.xlu0 %2005 }
 0x3d2   : > { %v2015_v51 = vsel %vm1103_vm2, %v2006_v22, 0.0 }
 0x3d3   : > { %v15213_v39 = vsub.f32 %v2016_v13, %v15210_v16  ;;  %12329 = vmatprep.subr.mxu0 %v15210_v16  ;;  %v15221_v50 = vand.u32 4294901760, %v2015_v51  ;;  %v2004_v56 = vpop.permute.xlu1 %2003 }
 0x3d4   : > { %12330 = vmatpush3.msra.mxu0 %v15210_v16  ;;  %v2014_v60 = vsel %vm1103_vm2, %v2004_v56, 0.0  ;;  %v15287_v56 = vsub.f32 %v15165_v61, %v15242_v18  ;;  %v15302_v61 = vsub.f32 %v15174_v30, %v15257_v43 }
 0x3d5   : > { %v15228_v59 = vand.u32 4294901760, %v15213_v39  ;;  %v15231_v57 = vsub.f32 %v2015_v51, %v15221_v50  ;;  %12331 = vmatprep.subr.mxu0 %v15221_v50  ;;  %v1992_v62 = vpop.permute.xlu0 %1991  ;;  %v15235_v12 = vand.u32 4294901760, %v2014_v60  ;;  %v15280_v51 = vand.u32 4294901760, %v15248_v21 }
 0x3d6   : > { %12332 = vmatpush3.msra.mxu0 %v15221_v50  ;;  %v2000_v2 = vsel %vm1086_vm3, 0.0, %v1992_v62  ;;  %v15344_v49 = vand.u32 4294901760, %v15302_v61 }
 0x3d7   : > { %v2186_v14 = vsub.f32 %v15213_v39, %v15228_v59  ;;  %v15245_v19 = vand.u32 4294901760, %v15231_v57  ;;  %v15260_v1 = vsub.f32 %v2014_v60, %v15235_v12  ;;  %v2002_v48 = vpop.permute.xlu1 %2001  ;;  %12333 = vmatprep.subr.mxu0 %v15235_v12  ;;  %v15289_v60 = vand.u32 4294901760, %v2000_v2 }
 0x3d8   : > { %v2013_v15 = vsel %vm1103_vm2, %v2002_v48, 0.0  ;;  %12334 = vmatpush3.msra.mxu0 %v15235_v12  ;;  %v2055_v48 = vsel %vm1136_vm1, %v2020_v41, 0 }
 0x3d9   : > { %v2187_v5 = vand.u32 4294901760, %v2186_v14  ;;  %v2193_v4 = vsub.f32 %v15231_v57, %v15245_v19  ;;  %v15273_v54 = vand.u32 4294901760, %v2013_v15  ;;  %v15276_v0 = vand.u32 4294901760, %v15260_v1  ;;  %v1988_v13 = vpop.permute.xlu0 %1987 }
 0x3da   : > { %v1998_v29 = vsel %vm1086_vm3, 0.0, %v1988_v13  ;;  %v15317_v30 = vand.u32 4294901760, %v2055_v48 }
 0x3db   : > { %12359 = vmatprep.subr.mxu1 %v2187_v5  ;;  %v2194_v22 = vand.u32 4294901760, %v2193_v4  ;;  %v15292_v62 = vsub.f32 %v2013_v15, %v15273_v54  ;;  %v1990_v14 = vpop.permute.xlu1 %1989  ;;  %12335 = vmatprep.subr.mxu0 %v15273_v54  ;;  %v2200_v25 = vsub.f32 %v15260_v1, %v15276_v0  ;;  %v15305_v15 = vsub.f32 %v2049_v38, %v15268_v24 }
 0x3dc   : > { %12360 = vmatpush3.msra.mxu1 %v2187_v5  ;;  %v1999_v5 = vsel %vm1086_vm3, 0.0, %v1990_v14  ;;  %12336 = vmatpush3.msra.mxu0 %v15273_v54  ;;  %v15307_v4 = vand.u32 4294901760, %v2052_v10  ;;  %18883 = vst [vmem:[#allocation33_spill] sm:$0xff] %v15317_v30  ;;  %v15320_v38 = vsub.f32 %v2000_v2, %v15289_v60  ;;  %v15330_v31 = vand.u32 4294901760, %v1998_v29 }
 0x3dd   : > { %12361 = vmatprep.subr.mxu1 %v2194_v22  ;;  %18881 = vst [vmem:[#allocation31_spill] sm:$0xff] %v15305_v15  ;;  %v15310_v26 = vand.u32 4294901760, %v1999_v5  ;;  %12337 = vmatprep.subr.mxu0 %v15217_v52  ;;  %v2201_v41 = vand.u32 4294901760, %v2200_v25  ;;  %v15314_v14 = vand.u32 4294901760, %v15292_v62  ;;  %v15328_v25 = vand.u32 4294901760, %v15287_v56 }
 0x3de   : > { %18882 = vst [vmem:[#allocation32_spill] sm:$0xff] %v15307_v4  ;;  %12362 = vmatpush3.msra.mxu1 %v2194_v22  ;;  %12338 = vmatpush3.msra.mxu0 %v15217_v52  ;;  %v2214_v22 = vsub.f32 %v15248_v21, %v15280_v51  ;;  %v2221_v2 = vsub.f32 %v15251_v46, %v15283_v53 }
 0x3df   : > { %v1986_v33 = vpop.permute.xlu1 %1985  ;;  %12339 = vmatprep.subr.mxu0 %v15219_v47  ;;  %12363 = vmatprep.subr.mxu1 %v2201_v41  ;;  %v2207_v13 = vsub.f32 %v15292_v62, %v15314_v14  ;;  %v15337_v45 = vsub.f32 %v2052_v10, %v15307_v4  ;;  %v15340_v63 = vsub.f32 %v1999_v5, %v15310_v26 }
 0x3e0   : > { %v1997_v8 = vsel %vm1086_vm3, 0.0, %v1986_v33  ;;  %12340 = vmatpush3.msra.mxu0 %v15219_v47  ;;  %12364 = vmatpush3.msra.mxu1 %v2201_v41  ;;  %v15347_v33 = vand.u32 4294901760, %v15305_v15  ;;  %v15353_v41 = vsub.f32 %v2055_v48, %v15317_v30  ;;  %v2215_v10 = vand.u32 4294901760, %v2214_v22 }
 0x3e1   : > { %18884 = vst [vmem:[#allocation34_spill] sm:$0xff] %v15337_v45  ;;  %12341 = vmatprep.subr.mxu0 %v15242_v18  ;;  %v2208_v11 = vand.u32 4294901760, %v2207_v13  ;;  %v15349_v32 = vand.u32 4294901760, %v1997_v8  ;;  %v2228_v5 = vsub.f32 %v15287_v56, %v15328_v25  ;;  %v15359_v13 = vand.u32 4294901760, %v15320_v38 }
 0x3e2   : > { %18885 = vst [vmem:[#allocation35_spill] sm:$0xff] %v15347_v33  ;;  %12342 = vmatpush3.msra.mxu0 %v15242_v18  ;;  %18886 = vst [vmem:[#allocation36_spill] sm:$0xff] %v15353_v41  ;;  %v15362_v17 = vsub.f32 %v1998_v29, %v15330_v31  ;;  %v15366_v55 = vand.u32 4294901760, %v15337_v45  ;;  %v2222_v48 = vand.u32 4294901760, %v2221_v2  ;;  %v2235_v22 = vsub.f32 %v15302_v61, %v15344_v49 }
 0x3e3   : > { %12343 = vmatprep.subr.mxu0 %v15257_v43  ;;  %12365 = vmatprep.subr.mxu1 %v2208_v11  ;;  %v2147_v37 = vsub.f32 %v15305_v15, %v15347_v33  ;;  %v15374_v7 = vand.u32 4294901760, %v15340_v63  ;;  %v15377_v29 = vsub.f32 %v1997_v8, %v15349_v32  ;;  %v2229_v2 = vand.u32 4294901760, %v2228_v5 }
 0x3e4   : > { %12344 = vmatpush3.msra.mxu0 %v15257_v43  ;;  %12366 = vmatpush3.msra.mxu1 %v2208_v11  ;;  %18887 = vst [vmem:[#allocation37_spill] sm:$0xff] %v15366_v55  ;;  %v15381_v11 = vand.u32 4294901760, %v15353_v41  ;;  %v2242_v58 = vsub.f32 %v15320_v38, %v15359_v13  ;;  %v2157_v8 = vsub.f32 %v15337_v45, %v15366_v55  ;;  %v15390_v27 = vand.u32 4294901760, %v15362_v17 }
 0x3e5   : > { %12345 = vmatprep.subr.mxu0 %v15289_v60  ;;  %12367 = vmatprep.subr.mxu1 %v2215_v10  ;;  %v15393_v36 = vand.u32 4294901760, %v2147_v37  ;;  %v2249_v5 = vsub.f32 %v15340_v63, %v15374_v7  ;;  %v15401_v44 = vand.u32 4294901760, %v15377_v29 }
 0x3e6   : > { %12346 = vmatpush3.msra.mxu0 %v15289_v60  ;;  %12368 = vmatpush3.msra.mxu1 %v2215_v10  ;;  %18888 = vst [vmem:[#allocation38_spill] sm:$0xff] %v15381_v11  ;;  %v2236_v10 = vand.u32 4294901760, %v2235_v22  ;;  %v2243_v28 = vand.u32 4294901760, %v2242_v58  ;;  %v15405_v37 = vand.u32 4294901760, %v2157_v8  ;;  %v2256_v22 = vsub.f32 %v15362_v17, %v15390_v27 }
 0x3e7   : > { %12347 = vmatprep.subr.mxu0 %v15310_v26  ;;  %12369 = vmatprep.subr.mxu1 %v2222_v48  ;;  %18889 = vst [vmem:[#allocation39_spill] sm:$0xff] %v15393_v36  ;;  %v2263_v58 = vsub.f32 %v15377_v29, %v15401_v44 }
 0x3e8   : > { %12348 = vmatpush3.msra.mxu0 %v15310_v26  ;;  %12370 = vmatpush3.msra.mxu1 %v2222_v48  ;;  %v2167_v48 = vsub.f32 %v15353_v41, %v15381_v11  ;;  %18890 = vst [vmem:[#allocation40_spill] sm:$0xff] %v15405_v37  ;;  %v2257_v8 = vand.u32 4294901760, %v2256_v22 }
 0x3e9   : > { %12349 = vmatprep.subr.mxu0 %v15330_v31  ;;  %12371 = vmatprep.subr.mxu1 %v2229_v2 }
 0x3ea   : > { %12350 = vmatpush3.msra.mxu0 %v15330_v31  ;;  %12372 = vmatpush3.msra.mxu1 %v2229_v2  ;;  %v2250_v2 = vand.u32 4294901760, %v2249_v5  ;;  %v15411_v3 = vand.u32 4294901760, %v2167_v48 }
 0x3eb   : > { %12351 = vmatprep.subr.mxu0 %v15349_v32  ;;  %12373 = vmatprep.subr.mxu1 %v2236_v10 }
 0x3ec   : > { %12352 = vmatpush3.msra.mxu0 %v15349_v32  ;;  %12374 = vmatpush3.msra.mxu1 %v2236_v10  ;;  %18891 = vst [vmem:[#allocation41_spill] sm:$0xff] %v15411_v3 }
 0x3ed   : > { %12354 = vmatmul.mubr.f32.vlgmr.msra.gmra.mxu0 %v15393_v36  ;;  %12375 = vmatprep.subr.mxu1 %v2243_v28 }
 0x3ee   : > { %12389 = vmatprep.subr.mxu0 %v15213_v39  ;;  %12376 = vmatpush3.msra.mxu1 %v2243_v28  ;;  %v2264_v28 = vand.u32 4294901760, %v2263_v58 }
 0x3ef   : > { %12390 = vmatpush3.msra.mxu0 %v15213_v39  ;;  %12377 = vmatprep.subr.mxu1 %v2250_v2 }
 0x3f0   : > { %12391 = vmatprep.subr.mxu0 %v15231_v57  ;;  %12356 = vmatprep.mubr.f32.mxu0 %v15405_v37 }
 0x3f1   : > { %12378 = vmatpush3.msra.mxu1 %v2250_v2  ;;  %12392 = vmatpush3.msra.mxu0 %v15231_v57 }
 0x3f2   : > { %12357 = vmatmul.mubr.f32.gmra.mxu0 %v15411_v3  ;;  %12379 = vmatprep.subr.mxu1 %v2257_v8 }
 0x3f3   : > { %12393 = vmatprep.subr.mxu0 %v15260_v1  ;;  %12380 = vmatpush3.msra.mxu1 %v2257_v8 }
 0x3f4   : > { %12394 = vmatpush3.msra.mxu0 %v15260_v1  ;;  %12381 = vmatprep.subr.mxu1 %v2264_v28 }
 0x3f5   : > { %12395 = vmatprep.subr.mxu0 %v15292_v62  ;;  %12382 = vmatpush3.msra.mxu1 %v2264_v28 }
 0x3f6   : > { %12396 = vmatpush3.msra.mxu0 %v15292_v62  ;;  %12384 = vmatmul.mubr.f32.vlgmr.msra.gmra.mxu1 %v15268_v24 }
 0x3f7   : > { %12397 = vmatprep.subr.mxu0 %v15248_v21  ;;  %12419 = vmatprep.subr.mxu1 %v15210_v16 }
 0x3f8   : > { %12398 = vmatpush3.msra.mxu0 %v15248_v21  ;;  %12420 = vmatpush3.msra.mxu1 %v15210_v16 }
 0x3f9   : > { %12399 = vmatprep.subr.mxu0 %v15251_v46  ;;  %12421 = vmatprep.subr.mxu1 %v15221_v50 }
 0x3fa   : > { %12386 = vmatprep.mubr.f32.mxu1 %v15307_v4  ;;  %12400 = vmatpush3.msra.mxu0 %v15251_v46 }
 0x3fb   : > { %12422 = vmatpush3.msra.mxu1 %v15221_v50  ;;  %12401 = vmatprep.subr.mxu0 %v15287_v56 }
 0x3fc   : > { %12387 = vmatmul.mubr.f32.gmra.mxu1 %v15317_v30  ;;  %12423 = vmatprep.subr.mxu1 %v15235_v12 }
 0x3fd   : > { %12402 = vmatpush3.msra.mxu0 %v15287_v56  ;;  %12424 = vmatpush3.msra.mxu1 %v15235_v12 }
 0x3fe   : > { %12403 = vmatprep.subr.mxu0 %v15302_v61  ;;  %12425 = vmatprep.subr.mxu1 %v15273_v54 }
 0x3ff   : > { %12404 = vmatpush3.msra.mxu0 %v15302_v61  ;;  %12426 = vmatpush3.msra.mxu1 %v15273_v54 }
 0x400   : > { %12405 = vmatprep.subr.mxu0 %v15320_v38  ;;  %12427 = vmatprep.subr.mxu1 %v15217_v52 }
 0x401   : > { %12406 = vmatpush3.msra.mxu0 %v15320_v38  ;;  %12428 = vmatpush3.msra.mxu1 %v15217_v52 }
 0x402   : > { %12407 = vmatprep.subr.mxu0 %v15340_v63  ;;  %12429 = vmatprep.subr.mxu1 %v15219_v47 }
 0x403   : > { %12408 = vmatpush3.msra.mxu0 %v15340_v63  ;;  %12430 = vmatpush3.msra.mxu1 %v15219_v47 }
 0x404   : > { %12409 = vmatprep.subr.mxu0 %v15362_v17  ;;  %12431 = vmatprep.subr.mxu1 %v15242_v18 }
 0x405   : > { %12410 = vmatpush3.msra.mxu0 %v15362_v17  ;;  %12432 = vmatpush3.msra.mxu1 %v15242_v18 }
 0x406   : > { %12411 = vmatprep.subr.mxu0 %v15377_v29  ;;  %12433 = vmatprep.subr.mxu1 %v15257_v43 }
 0x407   : > { %12412 = vmatpush3.msra.mxu0 %v15377_v29  ;;  %12413 = vmatprep.mubr.f32.mxu0 %v15181_v9 }
 0x408   : > { %12434 = vmatpush3.msra.mxu1 %v15257_v43  ;;  %12414 = vmatmul.mubr.f32.vlgmr.msra.gmra.mxu0 %v15305_v15 }
 0x409   : > { %12435 = vmatprep.subr.mxu1 %v15289_v60  ;;  %12449 = vmatprep.subr.mxu0 %v15228_v59 }
 0x40a   : > { %12436 = vmatpush3.msra.mxu1 %v15289_v60  ;;  %12450 = vmatpush3.msra.mxu0 %v15228_v59  ;;  %v15531_v59 = vpop.permute.xlu0 %2042 }
 0x40b   : > { %12437 = vmatprep.subr.mxu1 %v15310_v26  ;;  %12451 = vmatprep.subr.mxu0 %v15245_v19  ;;  %18892 = vst [vmem:[#allocation42_spill] sm:$0xff] %v15531_v59 }
 0x40c   : > { %12416 = vmatprep.mubr.f32.mxu0 %v15337_v45  ;;  %12438 = vmatpush3.msra.mxu1 %v15310_v26 }
 0x40d   : > { %12452 = vmatpush3.msra.mxu0 %v15245_v19  ;;  %12439 = vmatprep.subr.mxu1 %v15330_v31 }
 0x40e   : > { %12417 = vmatmul.mubr.f32.gmra.mxu0 %v15353_v41  ;;  %12453 = vmatprep.subr.mxu0 %v15276_v0  ;;  %v15536_v46 = vpop.permute.xlu0 %2032 }
 0x40f   : > { %12440 = vmatpush3.msra.mxu1 %v15330_v31  ;;  %12454 = vmatpush3.msra.mxu0 %v15276_v0  ;;  %18894 = vst [vmem:[#allocation44_spill] sm:$0xff] %v15536_v46 }
 0x410   : > { %12441 = vmatprep.subr.mxu1 %v15349_v32  ;;  %12455 = vmatprep.subr.mxu0 %v15314_v14 }
 0x411   : > { %12442 = vmatpush3.msra.mxu1 %v15349_v32  ;;  %12443 = vmatprep.mubr.f32.mxu1 %v15190_v23 }
 0x412   : > { %12456 = vmatpush3.msra.mxu0 %v15314_v14  ;;  %12444 = vmatmul.mubr.f32.vlgmr.msra.gmra.mxu1 %v15347_v33 }
 0x413   : > { %12457 = vmatprep.subr.mxu0 %v15280_v51  ;;  %12479 = vmatprep.subr.mxu1 %v15210_v16 }
 0x414   : > { %12458 = vmatpush3.msra.mxu0 %v15280_v51  ;;  %12480 = vmatpush3.msra.mxu1 %v15210_v16 }
 0x415   : > { %12459 = vmatprep.subr.mxu0 %v15283_v53  ;;  %12481 = vmatprep.subr.mxu1 %v15221_v50 }
 0x416   : > { %12446 = vmatprep.mubr.f32.mxu1 %v15366_v55  ;;  %12460 = vmatpush3.msra.mxu0 %v15283_v53 }
 0x417   : > { %12482 = vmatpush3.msra.mxu1 %v15221_v50  ;;  %12461 = vmatprep.subr.mxu0 %v15328_v25 }
 0x418   : > { %12447 = vmatmul.mubr.f32.gmra.mxu1 %v15381_v11  ;;  %12483 = vmatprep.subr.mxu1 %v15235_v12 }
 0x419   : > { %12462 = vmatpush3.msra.mxu0 %v15328_v25  ;;  %12484 = vmatpush3.msra.mxu1 %v15235_v12  ;;  %v15533_v12 = vpop.permute.xlu1 %2037 }
 0x41a   : > { %12463 = vmatprep.subr.mxu0 %v15344_v49  ;;  %12485 = vmatprep.subr.mxu1 %v15273_v54  ;;  %18893 = vst [vmem:[#allocation43_spill] sm:$0xff] %v15533_v12 }
 0x41b   : > { %12464 = vmatpush3.msra.mxu0 %v15344_v49  ;;  %12486 = vmatpush3.msra.mxu1 %v15273_v54 }
 0x41c   : > { %12465 = vmatprep.subr.mxu0 %v15359_v13  ;;  %12487 = vmatprep.subr.mxu1 %v15217_v52 }
 0x41d   : > { %12466 = vmatpush3.msra.mxu0 %v15359_v13  ;;  %12488 = vmatpush3.msra.mxu1 %v15217_v52 }
 0x41e   : > { %12467 = vmatprep.subr.mxu0 %v15374_v7  ;;  %12489 = vmatprep.subr.mxu1 %v15219_v47 }
 0x41f   : > { %12468 = vmatpush3.msra.mxu0 %v15374_v7  ;;  %12490 = vmatpush3.msra.mxu1 %v15219_v47 }
 0x420   : > { %12469 = vmatprep.subr.mxu0 %v15390_v27  ;;  %12491 = vmatprep.subr.mxu1 %v15242_v18 }
 0x421   : > { %12470 = vmatpush3.msra.mxu0 %v15390_v27  ;;  %12492 = vmatpush3.msra.mxu1 %v15242_v18 }
 0x422   : > { %12471 = vmatprep.subr.mxu0 %v15401_v44  ;;  %12493 = vmatprep.subr.mxu1 %v15257_v43 }
 0x423   : > { %12472 = vmatpush3.msra.mxu0 %v15401_v44  ;;  %12473 = vmatprep.mubr.f32.mxu0 %v15176_v6 }
 0x424   : > { %12494 = vmatpush3.msra.mxu1 %v15257_v43  ;;  %12474 = vmatmul.mubr.f32.vlgmr.msra.gmra.mxu0 %v15268_v24 }
 0x425   : > { %12495 = vmatprep.subr.mxu1 %v15289_v60  ;;  %12476 = vmatprep.mubr.f32.mxu0 %v15307_v4 }
 0x426   : > { %12496 = vmatpush3.msra.mxu1 %v15289_v60  ;;  %12503 = vmatprep.mubr.f32.mxu1 %v15176_v6  ;;  %v15540_v60 = vpop.permute.xlu1 %2027 }
 0x427   : > { %12497 = vmatprep.subr.mxu1 %v15310_v26  ;;  %18895 = vst [vmem:[#allocation45_spill] sm:$0xff] %v15540_v60 }
 0x428   : > { %12498 = vmatpush3.msra.mxu1 %v15310_v26  ;;  %12477 = vmatmul.mubr.f32.gmra.mxu0 %v15317_v30 }
 0x429   : > { %12499 = vmatprep.subr.mxu1 %v15330_v31 }
 0x42a   : > { %12500 = vmatpush3.msra.mxu1 %v15330_v31 }
 0x42b   : > { %12501 = vmatprep.subr.mxu1 %v15349_v32 }
 0x42c   : > { %12502 = vmatpush3.msra.mxu1 %v15349_v32 }
 0x42d   : > { %12504 = vmatmul.mubr.f32.vlgmr.msra.gmra.mxu1 %v15268_v24 }
 0x42e   : > { %12506 = vmatprep.mubr.f32.mxu1 %v15307_v4 }
 0x431   : > { %12507 = vmatmul.mubr.f32.gmra.mxu1 %v15317_v30 }
 0x4ad   : > { %v12355_v27 = vpop.f32.mrf.mxu0 }
 0x4ae   : > { %v2151_v51 = vadd.f32 %v12355_v27, %v15536_v46 }
 0x4af   : > { %v2140_v44 = vpop.f32.mrf.mxu0 }
 0x4b0   : > { %v2141_v61 = vadd.f32 %v2140_v44, %v15540_v60 }
 0x4b2   : > { %v12358_v7 = vpop.f32.mrf.mxu0 }
 0x4b3   : > { %v2171_v21 = vadd.f32 %v12358_v7, %v15531_v59 }
 0x4b4   : > { %v2160_v17 = vpop.f32.mrf.mxu0 }
 0x4b5   : > { %v2161_v43 = vadd.f32 %v2160_v17, %v15533_v12 }
 0x4b6   : > { %v12385_v26 = vpop.f32.mrf.mxu1 }
 0x4b7   : > { %v2308_v14 = vadd.f32 %v12385_v26, %v2151_v51 }
 0x4b8   : > { %v2301_v63 = vpop.f32.mrf.mxu1 }
 0x4b9   : > { %v2302_v10 = vadd.f32 %v2301_v63, %v2141_v61  ;;  %v2813_v63 = vld [vmem:[%s18733_s7] sm:$0xff] }
 0x4bc   : > { %v12388_v16 = vpop.f32.mrf.mxu1 }
 0x4bd   : > { %v2320_v1 = vadd.f32 %v12388_v16, %v2171_v21  ;;  %v2818_v21 = vld [vmem:[%s18734_s8 + $0x8] sm:$0xff] }
 0x4be   : > { %v2313_v31 = vpop.f32.mrf.mxu1 }
 0x4bf   : > { %v2314_v53 = vadd.f32 %v2313_v31, %v2161_v43  ;;  %v2817_v43 = vld [vmem:[%s18734_s8] sm:$0xff] }
 0x4c8   : > { %v12415_v49 = vpop.f32.mrf.mxu0 }
 0x4c9   : > { %v2423_v5 = vadd.f32 %v12415_v49, %v2308_v14  ;;  %v2842_v49 = vsel %vm1136_vm1, %v2813_v63, 0 }
 0x4ca   : > { %v2415_v39 = vpop.f32.mrf.mxu0 }
 0x4cb   : > { %v2416_v58 = vadd.f32 %v2415_v39, %v2302_v10 }
 0x4ce   : > { %v12418_v52 = vpop.f32.mrf.mxu0 }
 0x4cf   : > { %v2437_v56 = vadd.f32 %v12418_v52, %v2320_v1  ;;  %v15553_v52 = vand.u32 4294901760, %v2842_v49 }
 0x4d0   : > { %v2429_v50 = vpop.f32.mrf.mxu0 }
 0x4d1   : > { %v2430_v38 = vadd.f32 %v2429_v50, %v2314_v53  ;;  %12563 = vmatprep.mubr.f32.mxu1 %v15553_v52 }
 0x4d2   : > { %v12445_v47 = vpop.f32.mrf.mxu1 }
 0x4d3   : > { %v2530_v8 = vadd.f32 %v12445_v47, %v2423_v5  ;;  %v15557_v47 = vsub.f32 %v2842_v49, %v15553_v52 }
 0x4d4   : > { %v2521_v32 = vpop.f32.mrf.mxu1 }
 0x4d5   : > { %v2522_v17 = vadd.f32 %v2521_v32, %v2416_v58  ;;  %v15562_v50 = vand.u32 4294901760, %v15557_v47 }
 0x4d7   : > { %v2933_v32 = vsub.f32 %v15557_v47, %v15562_v50 }
 0x4d8   : > { %v12448_v18 = vpop.f32.mrf.mxu1 }
 0x4d9   : > { %v2546_v25 = vadd.f32 %v12448_v18, %v2437_v56  ;;  %v15572_v18 = vand.u32 4294901760, %v2933_v32  ;;  %v2816_v32 = vld [vmem:[%s18733_s7 + $0x18] sm:$0xff] }
 0x4da   : > { %v2537_v54 = vpop.f32.mrf.mxu1 }
 0x4db   : > { %v2538_v48 = vadd.f32 %v2537_v54, %v2430_v38  ;;  %18896 = vst [vmem:[#allocation46_spill] sm:$0xff] %v15572_v18  ;;  %12533 = vmatprep.mubr.f32.mxu0 %v15572_v18 }
 0x4e4   : > { %v12475_v57 = vpop.f32.mrf.mxu0 }
 0x4e5   : > { %v2659_v16 = vadd.f32 %v12475_v57, %v2530_v8  ;;  %v2820_v57 = vld [vmem:[%s18734_s8 + $0x18] sm:$0xff] }
 0x4e6   : > { %v2652_v19 = vpop.f32.mrf.mxu0 }
 0x4e7   : > { %v2653_v44 = vadd.f32 %v2652_v19, %v2522_v17  ;;  %v2819_v19 = vld [vmem:[%s18734_s8 + $0x10] sm:$0xff] }
 0x4e8   : > { %v12478_v0 = vpop.f32.mrf.mxu0 }
 0x4e9   : > { %v2671_v22 = vadd.f32 %v12478_v0, %v2546_v25  ;;  %v2814_v0 = vld [vmem:[%s18733_s7 + $0x8] sm:$0xff] }
 0x4ea   : > { %v2664_v13 = vpop.f32.mrf.mxu0 }
 0x4eb   : > { %v2665_v28 = vadd.f32 %v2664_v13, %v2538_v48  ;;  %v2845_v13 = vsel %vm1136_vm1, %v2814_v0, 0 }
 0x4ec   : > { %v15630_v17 = vand.u32 4294901760, %v2845_v13 }
 0x4ed   : > { %v12505_v62 = vpop.f32.mrf.mxu1 }
 0x4ee   : > { %v2760_v26 = vadd.f32 %v12505_v62, %v2659_v16 }
 0x4ef   : > { %v2753_v29 = vpop.f32.mrf.mxu1 }
 0x4f0   : > { %v2754_v39 = vadd.f32 %v2753_v29, %v2653_v44  ;;  %v15593_v62 = vand.u32 4294901760, %v2760_v26 }
 0x4f1   : > { %v12508_v2 = vpop.f32.mrf.mxu1 }
 0x4f2   : > { %v2772_v27 = vadd.f32 %v12508_v2, %v2671_v22  ;;  %v15603_v29 = vand.u32 4294901760, %v2754_v39 }
 0x4f3   : > { %v2765_v7 = vpop.f32.mrf.mxu1 }
 0x4f4   : > { %v15543_v31 = vadd.f32 %v2765_v7, %v2665_v28  ;;  %2802 = vrot.lane.b32.xlu0 %v2772_v27, %s18778_s23  ;;  %v15589_v51 = vand.u32 4294901760, %v2772_v27  ;;  %v2815_v28 = vld [vmem:[%s18733_s7 + $0x10] sm:$0xff]  ;;  %v15626_v7 = vsub.f32 %v2760_v26, %v15593_v62 }
 0x4f6   : > { %2800 = vrot.lane.b32.xlu1 %v15543_v31, %s18778_s23  ;;  %v15606_v10 = vand.u32 4294901760, %v15543_v31  ;;  %v15611_v48 = vsub.f32 %v2772_v27, %v15589_v51 }
 0x4f8   : > { %2798 = vrot.lane.b32.xlu0 %v2760_v26, %s18778_s23 }
 0x4fa   : > { %2796 = vrot.lane.b32.xlu1 %v2754_v39, %s18778_s23 }
 0x4fc   : > { %2785 = vrot.lane.b32.xlu0 %v2772_v27, %s14525_s16 }
 0x4fe   : > { %2783 = vrot.lane.b32.xlu1 %v15543_v31, %s14525_s16 }
 0x500   : > { %2781 = vrot.lane.b32.xlu0 %v2760_v26, %s14525_s16 }
 0x502   : > { %2779 = vrot.lane.b32.xlu1 %v2754_v39, %s14525_s16 }
 0x504   : > { %2838 = vperm.xlu0 %14355, %v2820_v57   ;;  %v15647_v57 = vsub.f32 %v2754_v39, %v15603_v29 }
 0x506   : > { %2833 = vperm.xlu1 %14356, %v2819_v19   ;;  %v15651_v19 = vsub.f32 %v15543_v31, %v15606_v10 }
 0x508   : > { %2828 = vperm.xlu0 %14355, %v2818_v21  }
 0x50a   : > { %2823 = vperm.xlu1 %14356, %v2817_v43   ;;  %v2848_v43 = vsel %vm1136_vm1, %v2815_v28, 0 }
 0x566   : > { %v2803_v1 = vpop.permute.xlu0 %2802 }
 0x567   : > { %v2812_v54 = vsel %vm2808_vm12, %v2803_v1, 0.0 }
 0x568   : > { %v15591_v53 = vand.u32 4294901760, %v2812_v54  ;;  %v2801_v56 = vpop.permute.xlu1 %2800 }
 0x569   : > { %v2811_v61 = vsel %vm2808_vm12, %v2801_v56, 0.0  ;;  %v15663_v56 = vand.u32 4294901760, %v15611_v48 }
 0x56a   : > { %v15597_v14 = vsub.f32 %v2812_v54, %v15591_v53  ;;  %v15599_v38 = vand.u32 4294901760, %v2811_v61  ;;  %12509 = vmatprep.subr.mxu0 %v15591_v53  ;;  %v2799_v25 = vpop.permute.xlu0 %2798 }
 0x56b   : > { %v2810_v5 = vsel %vm2808_vm12, %v2799_v25, 0.0  ;;  %12510 = vmatpush3.msra.mxu0 %v15591_v53  ;;  %v3010_v12 = vsub.f32 %v15611_v48, %v15663_v56 }
 0x56c   : > { %v15614_v22 = vsub.f32 %v2811_v61, %v15599_v38  ;;  %v15616_v2 = vand.u32 4294901760, %v2810_v5  ;;  %v2797_v58 = vpop.permute.xlu1 %2796  ;;  %12511 = vmatprep.subr.mxu0 %v15599_v38  ;;  %v15620_v8 = vand.u32 4294901760, %v15597_v14 }
 0x56d   : > { %v2809_v27 = vsel %vm2808_vm12, %v2797_v58, 0.0  ;;  %12512 = vmatpush3.msra.mxu0 %v15599_v38 }
 0x56e   : > { %v15633_v16 = vsub.f32 %v2810_v5, %v15616_v2  ;;  %v15635_v44 = vand.u32 4294901760, %v2809_v27  ;;  %12513 = vmatprep.subr.mxu0 %v15616_v2  ;;  %v2786_v63 = vpop.permute.xlu0 %2785  ;;  %v2982_v49 = vsub.f32 %v15597_v14, %v15620_v8  ;;  %v15641_v26 = vand.u32 4294901760, %v15614_v22 }
 0x56f   : > { %v2795_v21 = vsel %vm2791_vm13, 0.0, %v2786_v63  ;;  %12514 = vmatpush3.msra.mxu0 %v15616_v2  ;;  %v2851_v5 = vsel %vm1136_vm1, %v2816_v32, 0  ;;  %v15678_v63 = vsub.f32 %v2845_v13, %v15630_v17 }
 0x570   : > { %v15657_v1 = vsub.f32 %v2809_v27, %v15635_v44  ;;  %v2784_v54 = vpop.permute.xlu1 %2783  ;;  %12515 = vmatprep.subr.mxu0 %v15635_v44  ;;  %v2983_v0 = vand.u32 4294901760, %v2982_v49  ;;  %v2989_v39 = vsub.f32 %v15614_v22, %v15641_v26  ;;  %v15665_v31 = vand.u32 4294901760, %v2795_v21 }
 0x571   : > { %v2794_v61 = vsel %vm2791_vm13, 0.0, %v2784_v54  ;;  %12516 = vmatpush3.msra.mxu0 %v15635_v44  ;;  %v15670_v25 = vand.u32 4294901760, %v15633_v16  ;;  %v15680_v49 = vand.u32 4294901760, %v2848_v43  ;;  %v15710_v23 = vand.u32 4294901760, %v15678_v63 }
 0x572   : > { %12517 = vmatprep.subr.mxu0 %v15589_v51  ;;  %12539 = vmatprep.subr.mxu1 %v2983_v0  ;;  %v2782_v58 = vpop.permute.xlu0 %2781  ;;  %v2990_v28 = vand.u32 4294901760, %v2989_v39  ;;  %v15675_v27 = vand.u32 4294901760, %v15657_v1  ;;  %v15682_v54 = vand.u32 4294901760, %v2794_v61  ;;  %v15689_v39 = vand.u32 4294901760, %v15651_v19 }
 0x573   : > { %v2793_v60 = vsel %vm2791_vm13, 0.0, %v2782_v58  ;;  %12518 = vmatpush3.msra.mxu0 %v15589_v51  ;;  %12540 = vmatpush3.msra.mxu1 %v2983_v0  ;;  %v2996_v32 = vsub.f32 %v15633_v16, %v15670_v25  ;;  %v15697_v58 = vand.u32 4294901760, %v15626_v7  ;;  %v15699_v0 = vand.u32 4294901760, %v2851_v5 }
 0x574   : > { %v2780_v46 = vpop.permute.xlu1 %2779  ;;  %12519 = vmatprep.subr.mxu0 %v15606_v10  ;;  %12541 = vmatprep.subr.mxu1 %v2990_v28  ;;  %v3003_v13 = vsub.f32 %v15657_v1, %v15675_v27  ;;  %v15702_v59 = vsub.f32 %v2795_v21, %v15665_v31  ;;  %v15704_v18 = vand.u32 4294901760, %v2793_v60  ;;  %v15713_v41 = vsub.f32 %v2848_v43, %v15680_v49 }
 0x575   : > { %v2792_v11 = vsel %vm2791_vm13, 0.0, %v2780_v46  ;;  %12520 = vmatpush3.msra.mxu0 %v15606_v10  ;;  %12542 = vmatpush3.msra.mxu1 %v2990_v28  ;;  %v2997_v55 = vand.u32 4294901760, %v2996_v32  ;;  %v15716_v21 = vsub.f32 %v2794_v61, %v15682_v54  ;;  %v3017_v46 = vsub.f32 %v15651_v19, %v15689_v39 }
 0x576   : > { %12521 = vmatprep.subr.mxu0 %v15593_v62  ;;  %v3004_v33 = vand.u32 4294901760, %v3003_v13  ;;  %v15722_v28 = vand.u32 4294901760, %v15647_v57  ;;  %v15724_v32 = vand.u32 4294901760, %v2792_v11  ;;  %v15728_v43 = vsub.f32 %v2851_v5, %v15699_v0 }
 0x577   : > { %12543 = vmatprep.subr.mxu1 %v2997_v55  ;;  %12522 = vmatpush3.msra.mxu0 %v15593_v62  ;;  %v15731_v61 = vsub.f32 %v2793_v60, %v15704_v18  ;;  %v3011_v13 = vand.u32 4294901760, %v3010_v12  ;;  %v3024_v45 = vsub.f32 %v15626_v7, %v15697_v58  ;;  %v15737_v15 = vand.u32 4294901760, %v15702_v59 }
 0x578   : > { %12544 = vmatpush3.msra.mxu1 %v2997_v55  ;;  %12523 = vmatprep.subr.mxu0 %v15603_v29  ;;  %v2943_v55 = vsub.f32 %v15678_v63, %v15710_v23  ;;  %v15743_v5 = vand.u32 4294901760, %v15713_v41  ;;  %v3018_v60 = vand.u32 4294901760, %v3017_v46  ;;  %v3031_v12 = vsub.f32 %v15647_v57, %v15722_v28 }
 0x579   : > { %12545 = vmatprep.subr.mxu1 %v3004_v33  ;;  %12524 = vmatpush3.msra.mxu0 %v15603_v29  ;;  %v15749_v9 = vand.u32 4294901760, %v15716_v21  ;;  %v15756_v30 = vand.u32 4294901760, %v15728_v43  ;;  %v3025_v4 = vand.u32 4294901760, %v3024_v45  ;;  %v3038_v46 = vsub.f32 %v15702_v59, %v15737_v15 }
 0x57a   : > { %12546 = vmatpush3.msra.mxu1 %v3004_v33  ;;  %12525 = vmatprep.subr.mxu0 %v15665_v31  ;;  %v15752_v33 = vsub.f32 %v2792_v11, %v15724_v32  ;;  %v15762_v24 = vand.u32 4294901760, %v15731_v61  ;;  %v15765_v11 = vand.u32 4294901760, %v2943_v55  ;;  %v3032_v3 = vand.u32 4294901760, %v3031_v12 }
 0x57b   : > { %12547 = vmatprep.subr.mxu1 %v3011_v13  ;;  %12526 = vmatpush3.msra.mxu0 %v15665_v31  ;;  %v3045_v45 = vsub.f32 %v15716_v21, %v15749_v9  ;;  %v3039_v55 = vand.u32 4294901760, %v3038_v46 }
 0x57c   : > { %12548 = vmatpush3.msra.mxu1 %v3011_v13  ;;  %12527 = vmatprep.subr.mxu0 %v15682_v54  ;;  %v2953_v13 = vsub.f32 %v15713_v41, %v15743_v5  ;;  %v15776_v37 = vand.u32 4294901760, %v15752_v33  ;;  %v3052_v36 = vsub.f32 %v15731_v61, %v15762_v24 }
 0x57d   : > { %12549 = vmatprep.subr.mxu1 %v3018_v60  ;;  %12528 = vmatpush3.msra.mxu0 %v15682_v54 }
 0x57e   : > { %12550 = vmatpush3.msra.mxu1 %v3018_v60  ;;  %12529 = vmatprep.subr.mxu0 %v15704_v18  ;;  %v2963_v60 = vsub.f32 %v15728_v43, %v15756_v30  ;;  %v15782_v12 = vand.u32 4294901760, %v2953_v13  ;;  %v3059_v46 = vsub.f32 %v15752_v33, %v15776_v37 }
 0x57f   : > { %12551 = vmatprep.subr.mxu1 %v3025_v4  ;;  %12530 = vmatpush3.msra.mxu0 %v15704_v18 }
 0x580   : > { %12552 = vmatpush3.msra.mxu1 %v3025_v4  ;;  %12531 = vmatprep.subr.mxu0 %v15724_v32  ;;  %v3046_v4 = vand.u32 4294901760, %v3045_v45  ;;  %v15786_v6 = vand.u32 4294901760, %v2963_v60 }
 0x581   : > { %12553 = vmatprep.subr.mxu1 %v3032_v3  ;;  %12532 = vmatpush3.msra.mxu0 %v15724_v32 }
 0x582   : > { %12554 = vmatpush3.msra.mxu1 %v3032_v3  ;;  %12534 = vmatmul.mubr.f32.vlgmr.msra.gmra.mxu0 %v15765_v11  ;;  %v3053_v3 = vand.u32 4294901760, %v3052_v36 }
 0x583   : > { %12555 = vmatprep.subr.mxu1 %v3039_v55  ;;  %12569 = vmatprep.subr.mxu0 %v15597_v14 }
 0x584   : > { %12556 = vmatpush3.msra.mxu1 %v3039_v55  ;;  %12570 = vmatpush3.msra.mxu0 %v15597_v14  ;;  %v3060_v14 = vand.u32 4294901760, %v3059_v46 }
 0x585   : > { %12557 = vmatprep.subr.mxu1 %v3046_v4  ;;  %12571 = vmatprep.subr.mxu0 %v15614_v22 }
 0x586   : > { %12536 = vmatprep.mubr.f32.mxu0 %v15782_v12  ;;  %12558 = vmatpush3.msra.mxu1 %v3046_v4 }
 0x587   : > { %12572 = vmatpush3.msra.mxu0 %v15614_v22  ;;  %12559 = vmatprep.subr.mxu1 %v3053_v3 }
 0x588   : > { %12537 = vmatmul.mubr.f32.gmra.mxu0 %v15786_v6  ;;  %12573 = vmatprep.subr.mxu0 %v15633_v16 }
 0x589   : > { %12560 = vmatpush3.msra.mxu1 %v3053_v3  ;;  %12574 = vmatpush3.msra.mxu0 %v15633_v16 }
 0x58a   : > { %12561 = vmatprep.subr.mxu1 %v3060_v14  ;;  %12575 = vmatprep.subr.mxu0 %v15657_v1 }
 0x58b   : > { %12562 = vmatpush3.msra.mxu1 %v3060_v14  ;;  %12576 = vmatpush3.msra.mxu0 %v15657_v1 }
 0x58c   : > { %12564 = vmatmul.mubr.f32.vlgmr.msra.gmra.mxu1 %v15630_v17  ;;  %12577 = vmatprep.subr.mxu0 %v15611_v48 }
 0x58d   : > { %12599 = vmatprep.subr.mxu1 %v15591_v53  ;;  %12578 = vmatpush3.msra.mxu0 %v15611_v48  ;;  %v15909_v48 = vpop.permute.xlu1 %2833 }
 0x58e   : > { %12600 = vmatpush3.msra.mxu1 %v15591_v53  ;;  %12579 = vmatprep.subr.mxu0 %v15651_v19  ;;  %18898 = vst [vmem:[#allocation48_spill] sm:$0xff] %v15909_v48 }
 0x58f   : > { %12601 = vmatprep.subr.mxu1 %v15599_v38  ;;  %12566 = vmatprep.mubr.f32.mxu1 %v15680_v49 }
 0x590   : > { %12580 = vmatpush3.msra.mxu0 %v15651_v19  ;;  %12602 = vmatpush3.msra.mxu1 %v15599_v38 }
 0x591   : > { %12567 = vmatmul.mubr.f32.gmra.mxu1 %v15699_v0  ;;  %12581 = vmatprep.subr.mxu0 %v15626_v7 }
 0x592   : > { %12603 = vmatprep.subr.mxu1 %v15616_v2  ;;  %12582 = vmatpush3.msra.mxu0 %v15626_v7 }
 0x593   : > { %12604 = vmatpush3.msra.mxu1 %v15616_v2  ;;  %12583 = vmatprep.subr.mxu0 %v15647_v57 }
 0x594   : > { %12605 = vmatprep.subr.mxu1 %v15635_v44  ;;  %12584 = vmatpush3.msra.mxu0 %v15647_v57 }
 0x595   : > { %12606 = vmatpush3.msra.mxu1 %v15635_v44  ;;  %12585 = vmatprep.subr.mxu0 %v15702_v59 }
 0x596   : > { %12607 = vmatprep.subr.mxu1 %v15589_v51  ;;  %12586 = vmatpush3.msra.mxu0 %v15702_v59 }
 0x597   : > { %12608 = vmatpush3.msra.mxu1 %v15589_v51  ;;  %12587 = vmatprep.subr.mxu0 %v15716_v21 }
 0x598   : > { %12609 = vmatprep.subr.mxu1 %v15606_v10  ;;  %12588 = vmatpush3.msra.mxu0 %v15716_v21 }
 0x599   : > { %12610 = vmatpush3.msra.mxu1 %v15606_v10  ;;  %12589 = vmatprep.subr.mxu0 %v15731_v61 }
 0x59a   : > { %12611 = vmatprep.subr.mxu1 %v15593_v62  ;;  %12590 = vmatpush3.msra.mxu0 %v15731_v61 }
 0x59b   : > { %12612 = vmatpush3.msra.mxu1 %v15593_v62  ;;  %12591 = vmatprep.subr.mxu0 %v15752_v33 }
 0x59c   : > { %12613 = vmatprep.subr.mxu1 %v15603_v29  ;;  %12592 = vmatpush3.msra.mxu0 %v15752_v33 }
 0x59d   : > { %12593 = vmatprep.mubr.f32.mxu0 %v15557_v47  ;;  %12614 = vmatpush3.msra.mxu1 %v15603_v29 }
 0x59e   : > { %12594 = vmatmul.mubr.f32.vlgmr.msra.gmra.mxu0 %v15678_v63  ;;  %12615 = vmatprep.subr.mxu1 %v15665_v31 }
 0x59f   : > { %12629 = vmatprep.subr.mxu0 %v15620_v8  ;;  %12616 = vmatpush3.msra.mxu1 %v15665_v31 }
 0x5a0   : > { %12630 = vmatpush3.msra.mxu0 %v15620_v8  ;;  %12617 = vmatprep.subr.mxu1 %v15682_v54 }
 0x5a1   : > { %12631 = vmatprep.subr.mxu0 %v15641_v26  ;;  %12596 = vmatprep.mubr.f32.mxu0 %v15713_v41 }
 0x5a2   : > { %12618 = vmatpush3.msra.mxu1 %v15682_v54  ;;  %12632 = vmatpush3.msra.mxu0 %v15641_v26 }
 0x5a3   : > { %12597 = vmatmul.mubr.f32.gmra.mxu0 %v15728_v43  ;;  %12619 = vmatprep.subr.mxu1 %v15704_v18 }
 0x5a4   : > { %12633 = vmatprep.subr.mxu0 %v15670_v25  ;;  %12620 = vmatpush3.msra.mxu1 %v15704_v18 }
 0x5a5   : > { %12634 = vmatpush3.msra.mxu0 %v15670_v25  ;;  %12621 = vmatprep.subr.mxu1 %v15724_v32 }
 0x5a6   : > { %12635 = vmatprep.subr.mxu0 %v15675_v27  ;;  %12622 = vmatpush3.msra.mxu1 %v15724_v32 }
 0x5a7   : > { %12623 = vmatprep.mubr.f32.mxu1 %v15562_v50  ;;  %12636 = vmatpush3.msra.mxu0 %v15675_v27 }
 0x5a8   : > { %12624 = vmatmul.mubr.f32.vlgmr.msra.gmra.mxu1 %v15710_v23  ;;  %12637 = vmatprep.subr.mxu0 %v15663_v56 }
 0x5a9   : > { %12659 = vmatprep.subr.mxu1 %v15591_v53  ;;  %12638 = vmatpush3.msra.mxu0 %v15663_v56  ;;  %v15915_v56 = vpop.permute.xlu1 %2823 }
 0x5aa   : > { %12660 = vmatpush3.msra.mxu1 %v15591_v53  ;;  %12639 = vmatprep.subr.mxu0 %v15689_v39  ;;  %18900 = vst [vmem:[#allocation50_spill] sm:$0xff] %v15915_v56 }
 0x5ab   : > { %12661 = vmatprep.subr.mxu1 %v15599_v38  ;;  %12626 = vmatprep.mubr.f32.mxu1 %v15743_v5 }
 0x5ac   : > { %12640 = vmatpush3.msra.mxu0 %v15689_v39  ;;  %12662 = vmatpush3.msra.mxu1 %v15599_v38 }
 0x5ad   : > { %12627 = vmatmul.mubr.f32.gmra.mxu1 %v15756_v30  ;;  %12641 = vmatprep.subr.mxu0 %v15697_v58 }
 0x5ae   : > { %12663 = vmatprep.subr.mxu1 %v15616_v2  ;;  %12642 = vmatpush3.msra.mxu0 %v15697_v58 }
 0x5af   : > { %12664 = vmatpush3.msra.mxu1 %v15616_v2  ;;  %12643 = vmatprep.subr.mxu0 %v15722_v28 }
 0x5b0   : > { %12665 = vmatprep.subr.mxu1 %v15635_v44  ;;  %12644 = vmatpush3.msra.mxu0 %v15722_v28 }
 0x5b1   : > { %12666 = vmatpush3.msra.mxu1 %v15635_v44  ;;  %12645 = vmatprep.subr.mxu0 %v15737_v15 }
 0x5b2   : > { %12667 = vmatprep.subr.mxu1 %v15589_v51  ;;  %12646 = vmatpush3.msra.mxu0 %v15737_v15 }
 0x5b3   : > { %12668 = vmatpush3.msra.mxu1 %v15589_v51  ;;  %12647 = vmatprep.subr.mxu0 %v15749_v9 }
 0x5b4   : > { %12669 = vmatprep.subr.mxu1 %v15606_v10  ;;  %12648 = vmatpush3.msra.mxu0 %v15749_v9 }
 0x5b5   : > { %12670 = vmatpush3.msra.mxu1 %v15606_v10  ;;  %12649 = vmatprep.subr.mxu0 %v15762_v24 }
 0x5b6   : > { %12671 = vmatprep.subr.mxu1 %v15593_v62  ;;  %12650 = vmatpush3.msra.mxu0 %v15762_v24 }
 0x5b7   : > { %12672 = vmatpush3.msra.mxu1 %v15593_v62  ;;  %12651 = vmatprep.subr.mxu0 %v15776_v37  ;;  %v15907_v62 = vpop.permute.xlu0 %2838 }
 0x5b8   : > { %12673 = vmatprep.subr.mxu1 %v15603_v29  ;;  %12652 = vmatpush3.msra.mxu0 %v15776_v37  ;;  %18897 = vst [vmem:[#allocation47_spill] sm:$0xff] %v15907_v62 }
 0x5b9   : > { %12653 = vmatprep.mubr.f32.mxu0 %v15553_v52  ;;  %12674 = vmatpush3.msra.mxu1 %v15603_v29 }
 0x5ba   : > { %12654 = vmatmul.mubr.f32.vlgmr.msra.gmra.mxu0 %v15630_v17  ;;  %12675 = vmatprep.subr.mxu1 %v15665_v31 }
 0x5bb   : > { %12676 = vmatpush3.msra.mxu1 %v15665_v31  ;;  %12656 = vmatprep.mubr.f32.mxu0 %v15680_v49  ;;  %v15911_v22 = vpop.permute.xlu0 %2828 }
 0x5bc   : > { %12677 = vmatprep.subr.mxu1 %v15682_v54  ;;  %12683 = vmatprep.mubr.f32.mxu1 %v15553_v52  ;;  %18899 = vst [vmem:[#allocation49_spill] sm:$0xff] %v15911_v22 }
 0x5bd   : > { %12678 = vmatpush3.msra.mxu1 %v15682_v54 }
 0x5be   : > { %12657 = vmatmul.mubr.f32.gmra.mxu0 %v15699_v0  ;;  %12679 = vmatprep.subr.mxu1 %v15704_v18 }
 0x5bf   : > { %12680 = vmatpush3.msra.mxu1 %v15704_v18  ;;  %12713 = vmatprep.mubr.f32.mxu0 %v14763_v40 }
 0x5c0   : > { %12681 = vmatprep.subr.mxu1 %v15724_v32 }
 0x5c1   : > { %12682 = vmatpush3.msra.mxu1 %v15724_v32 }
 0x5c2   : > { %12684 = vmatmul.mubr.f32.vlgmr.msra.gmra.mxu1 %v15630_v17 }
 0x5c3   : > { %12686 = vmatprep.mubr.f32.mxu1 %v15680_v49 }
 0x5c6   : > { %12687 = vmatmul.mubr.f32.gmra.mxu1 %v15699_v0 }
 0x5c7   : > { %12743 = vmatprep.mubr.f32.mxu1 %v14741_v35 }
 0x642   : > { %v12535_v36 = vpop.f32.mrf.mxu0 }
 0x643   : > { %v2947_v7 = vadd.f32 %v12535_v36, %v15911_v22 }
 0x644   : > { %v2936_v9 = vpop.f32.mrf.mxu0 }
 0x645   : > { %v2937_v31 = vadd.f32 %v2936_v9, %v15915_v56 }
 0x648   : > { %v12538_v24 = vpop.f32.mrf.mxu0 }
 0x649   : > { %v2967_v19 = vadd.f32 %v12538_v24, %v15907_v62 }
 0x64a   : > { %v2956_v37 = vpop.f32.mrf.mxu0 }
 0x64b   : > { %v2957_v25 = vadd.f32 %v2956_v37, %v15909_v48 }
 0x64c   : > { %v12565_v15 = vpop.f32.mrf.mxu1 }
 0x64d   : > { %v3104_v44 = vadd.f32 %v12565_v15, %v2947_v7 }
 0x64e   : > { %v3097_v59 = vpop.f32.mrf.mxu1 }
 0x64f   : > { %v3098_v21 = vadd.f32 %v3097_v59, %v2937_v31 }
 0x651   : > { %v12568_v51 = vpop.f32.mrf.mxu1 }
 0x652   : > { %v3116_v27 = vadd.f32 %v12568_v51, %v2967_v19 }
 0x653   : > { %v3109_v38 = vpop.f32.mrf.mxu1 }
 0x654   : > { %v3110_v28 = vadd.f32 %v3109_v38, %v2957_v25 }
 0x65e   : > { %v12595_v18 = vpop.f32.mrf.mxu0 }
 0x65f   : > { %v3219_v1 = vadd.f32 %v12595_v18, %v3104_v44 }
 0x660   : > { %v3211_v53 = vpop.f32.mrf.mxu0 }
 0x661   : > { %v3212_v13 = vadd.f32 %v3211_v53, %v3098_v21 }
 0x663   : > { %v12598_v29 = vpop.f32.mrf.mxu0 }
 0x664   : > { %v3233_v32 = vadd.f32 %v12598_v29, %v3116_v27 }
 0x665   : > { %v3225_v2 = vpop.f32.mrf.mxu0 }
 0x666   : > { %v3226_v45 = vadd.f32 %v3225_v2, %v3110_v28 }
 0x668   : > { %v12625_v10 = vpop.f32.mrf.mxu1 }
 0x669   : > { %v3326_v54 = vadd.f32 %v12625_v10, %v3219_v1 }
 0x66a   : > { %v3317_v8 = vpop.f32.mrf.mxu1 }
 0x66b   : > { %v3318_v3 = vadd.f32 %v3317_v8, %v3212_v13 }
 0x66d   : > { %v12628_v26 = vpop.f32.mrf.mxu1 }
 0x66e   : > { %v3342_v60 = vadd.f32 %v12628_v26, %v3233_v32 }
 0x66f   : > { %v3333_v39 = vpop.f32.mrf.mxu1 }
 0x670   : > { %v3334_v14 = vadd.f32 %v3333_v39, %v3226_v45 }
 0x67a   : > { %v12655_v16 = vpop.f32.mrf.mxu0 }
 0x67b   : > { %v3455_v61 = vadd.f32 %v12655_v16, %v3326_v54 }
 0x67c   : > { %v3448_v57 = vpop.f32.mrf.mxu0 }
 0x67d   : > { %v3449_v15 = vadd.f32 %v3448_v57, %v3318_v3 }
 0x67e   : > { %v12658_v58 = vpop.f32.mrf.mxu0 }
 0x67f   : > { %v3467_v36 = vadd.f32 %v12658_v58, %v3342_v60 }
 0x680   : > { %v3460_v4 = vpop.f32.mrf.mxu0 }
 0x681   : > { %v3461_v37 = vadd.f32 %v3460_v4, %v3334_v14 }
 0x682   : > { %v12685_v33 = vpop.f32.mrf.mxu1 }
 0x683   : > { %v3556_v55 = vadd.f32 %v12685_v33, %v3455_v61 }
 0x684   : > { %v3549_v46 = vpop.f32.mrf.mxu1 }
 0x685   : > { %v15919_v9 = vmax.f32 %v3556_v55, 0.0  ;;  %v3550_v51 = vadd.f32 %v3549_v46, %v3449_v15 }
 0x686   : > { %v12688_v24 = vpop.f32.mrf.mxu1 }
 0x687   : > { %v3568_v18 = vadd.f32 %v12688_v24, %v3467_v36  ;;  %3577 = vadd.xlane.f32.xlu0 %v15919_v9  ;;  %v15927_v10 = vmax.f32 %v3550_v51, 0.0  ;;  %v3584_v7 = vmul.f32 %v15919_v9, %v15919_v9 }
 0x688   : > { %v3561_v59 = vpop.f32.mrf.mxu1 }
 0x689   : > { %v15922_v38 = vmax.f32 %v3568_v18, 0.0  ;;  %v3562_v53 = vadd.f32 %v3561_v59, %v3461_v37  ;;  %v3583_v16 = vmul.f32 %v15927_v10, %v15927_v10 }
 0x68b   : > { %v15924_v29 = vmax.f32 %v3562_v53, 0.0  ;;  %3581 = vadd.xlane.f32.xlu0 %v15922_v38  ;;  %v3586_v2 = vmul.f32 %v15922_v38, %v15922_v38 }
 0x68d   : > { %3579 = vadd.xlane.f32.xlu1 %v15924_v29  ;;  %v3585_v8 = vmul.f32 %v15924_v29, %v15924_v29 }
 0x68f   : > { %3575 = vadd.xlane.f32.xlu0 %v15927_v10 }
 0x691   : > { %3593 = vadd.xlane.f32.xlu1 %v3586_v2 }
 0x693   : > { %3591 = vadd.xlane.f32.xlu0 %v3585_v8 }
 0x695   : > { %3589 = vadd.xlane.f32.xlu1 %v3584_v7 }
 0x697   : > { %3587 = vadd.xlane.f32.xlu0 %v3583_v16 }
 0x710   : > { %v3578_v44 = vpop.xlane.xlu0 %3577 }
 0x711   : > { %v15939_v57 = vmul.f32 0.0078125, %v3578_v44 }
 0x713   : > { %v3600_v21 = vmul.f32 128.0, %v15939_v57 }
 0x714   : > { %v3582_v26 = vpop.xlane.xlu0 %3581 }
 0x715   : > { %v15941_v19 = vmul.f32 0.0078125, %v3582_v26  ;;  %v3604_v55 = vmul.f32 %v3600_v21, %v15939_v57 }
 0x716   : > { %v3580_v1 = vpop.xlane.xlu1 %3579 }
 0x717   : > { %v15943_v31 = vmul.f32 0.0078125, %v3580_v1  ;;  %v3602_v25 = vmul.f32 128.0, %v15941_v19 }
 0x718   : > { %v3576_v27 = vpop.xlane.xlu0 %3575 }
 0x719   : > { %v15946_v54 = vmul.f32 0.0078125, %v3576_v27  ;;  %v3606_v39 = vmul.f32 %v3602_v25, %v15941_v19  ;;  %v3601_v58 = vmul.f32 128.0, %v15943_v31 }
 0x71a   : > { %v3594_v28 = vpop.xlane.xlu1 %3593 }
 0x71b   : > { %v3610_v32 = vsub.f32 %v3594_v28, %v3606_v39  ;;  %v3605_v61 = vmul.f32 %v3601_v58, %v15943_v31  ;;  %v3599_v13 = vmul.f32 128.0, %v15946_v54 }
 0x71c   : > { %v3592_v33 = vpop.xlane.xlu0 %3591 }
 0x71d   : > { %v3614_v45 = vmul.f32 0.007874016, %v3610_v32  ;;  %v3609_v60 = vsub.f32 %v3592_v33, %v3605_v61  ;;  %v3603_v36 = vmul.f32 %v3599_v13, %v15946_v54 }
 0x71e   : > { %v3590_v4 = vpop.xlane.xlu1 %3589 }
 0x71f   : > { %v3618_v46 = vmax.f32 %v3614_v45, 0.0  ;;  %v3613_v3 = vmul.f32 0.007874016, %v3609_v60  ;;  %v3608_v14 = vsub.f32 %v3590_v4, %v3604_v55 }
 0x720   : > { %v3588_v24 = vpop.xlane.xlu0 %3587 }
 0x721   : > { %14373 = vrsqrt.f32 %v3618_v46  ;;  %v3617_v15 = vmax.f32 %v3613_v3, 0.0  ;;  %v3612_v37 = vmul.f32 0.007874016, %v3608_v14  ;;  %v3607_v18 = vsub.f32 %v3588_v24, %v3603_v36 }
 0x722   : > { %vm3642_vm14 = vcmp.eq.f32.partialorder %v3618_v46, inf  ;;  %v3645_v7 = vand.u32 2147483648, %v3618_v46  ;;  %vm3644_vm15 = vcmp.eq.f32.partialorder %v3618_v46, 0.0  ;;  %v3651_v36 = vsub.f32 %v15922_v38, %v15941_v19 }
 0x723   : > { %14375 = vrsqrt.f32 %v3617_v15  ;;  %v3616_v59 = vmax.f32 %v3612_v37, 0.0  ;;  %v3611_v51 = vmul.f32 0.007874016, %v3607_v18  ;;  %vm3635_vm0 = vcmp.eq.f32.partialorder %v3617_v15, inf }
 0x724   : > { %v3638_v27 = vand.u32 2147483648, %v3617_v15  ;;  %vm3637_vm1 = vcmp.eq.f32.partialorder %v3617_v15, 0.0  ;;  %v3650_v18 = vsub.f32 %v15924_v29, %v15943_v31 }
 0x725   : > { %14377 = vrsqrt.f32 %v3616_v59  ;;  %v3615_v53 = vmax.f32 %v3611_v51, 0.0  ;;  %vm3628_vm4 = vcmp.eq.f32.partialorder %v3616_v59, inf  ;;  %v3631_v61 = vand.u32 2147483648, %v3616_v59 }
 0x726   : > { %vm3630_vm5 = vcmp.eq.f32.partialorder %v3616_v59, 0.0 }
 0x727   : > { %14379 = vrsqrt.f32 %v3615_v53  ;;  %vm3621_vm6 = vcmp.eq.f32.partialorder %v3615_v53, inf  ;;  %v3624_v4 = vand.u32 2147483648, %v3615_v53  ;;  %vm3623_vm7 = vcmp.eq.f32.partialorder %v3615_v53, 0.0 }
 0x72e   : > { %v14374_v2 = vpop.eup %14373 }
 0x72f   : > { %v3641_v8 = vmul.f32 %v14374_v2, %v3618_v46 }
 0x730   : > { %v14376_v16 = vpop.eup %14375 }
 0x731   : > { %v3643_v44 = vsel %vm3642_vm14, %v3618_v46, %v3641_v8  ;;  %v3634_v1 = vmul.f32 %v14376_v16, %v3617_v15  ;;  %v3649_v8 = vsub.f32 %v15919_v9, %v15939_v57 }
 0x732   : > { %v3646_v26 = vsel %vm3644_vm15, %v3645_v7, %v3643_v44  ;;  %v14378_v39 = vpop.eup %14377  ;;  %v3648_v44 = vsub.f32 %v15927_v10, %v15946_v54 }
 0x733   : > { %v3655_v25 = vadd.f32 1e-06, %v3646_v26  ;;  %v3636_v58 = vsel %vm3635_vm0, %v3617_v15, %v3634_v1  ;;  %v3627_v28 = vmul.f32 %v14378_v39, %v3616_v59  ;;  %v10892_v15 = vld [vmem:[%s18737_s11] ss:$0 sm:$0xff] }
 0x734   : > { %v3639_v21 = vsel %vm3637_vm1, %v3638_v27, %v3636_v58  ;;  %v14380_v33 = vpop.eup %14379 }
 0x735   : > { %14381 = vrcp.f32 %v3655_v25  ;;  %v3654_v32 = vadd.f32 1e-06, %v3639_v21  ;;  %v3629_v13 = vsel %vm3628_vm4, %v3616_v59, %v3627_v28  ;;  %v3620_v60 = vmul.f32 %v14380_v33, %v3615_v53  ;;  %v10893_v59 = vld [vmem:[%s18738_s12] ss:$0 sm:$0xff] }
 0x736   : > { %v3632_v45 = vsel %vm3630_vm5, %v3631_v61, %v3629_v13 }
 0x737   : > { %14383 = vrcp.f32 %v3654_v32  ;;  %v3653_v55 = vadd.f32 1e-06, %v3632_v45  ;;  %v3622_v46 = vsel %vm3621_vm6, %v3615_v53, %v3620_v60 }
 0x738   : > { %v3625_v3 = vsel %vm3623_vm7, %v3624_v4, %v3622_v46 }
 0x739   : > { %14385 = vrcp.f32 %v3653_v55  ;;  %v3652_v14 = vadd.f32 1e-06, %v3625_v3 }
 0x73b   : > { %14387 = vrcp.f32 %v3652_v14 }
 0x742   : > { %v14382_v24 = vpop.eup %14381 }
 0x743   : > { %v3663_v37 = vmul.f32 %v14382_v24, %v3651_v36 }
 0x744   : > { %v14384_v51 = vpop.eup %14383 }
 0x745   : > { %v3673_v53 = vmul.f32 %v10892_v15, %v3663_v37  ;;  %v3661_v2 = vmul.f32 %v14384_v51, %v3650_v18 }
 0x746   : > { %v14386_v19 = vpop.eup %14385 }
 0x747   : > { %v3684_v38 = vadd.f32 %v10893_v59, %v3673_v53  ;;  %v3672_v7 = vmul.f32 %v10892_v15, %v3661_v2  ;;  %v3659_v16 = vmul.f32 %v14386_v19, %v3649_v8 }
 0x748   : > { %v14388_v31 = vpop.eup %14387 }
 0x749   : > { %3711 = vrot.lane.b32.xlu1 %v3684_v38, %s18875_s30  ;;  %v3683_v29 = vadd.f32 %v10893_v59, %v3672_v7  ;;  %v3671_v26 = vmul.f32 %v10892_v15, %v3659_v16  ;;  %v3657_v1 = vmul.f32 %v14388_v31, %v3648_v44  ;;  %v15985_v28 = vand.u32 4294901760, %v3684_v38 }
 0x74b   : > { %3709 = vrot.lane.b32.xlu0 %v3683_v29, %s18875_s30  ;;  %v3682_v25 = vadd.f32 %v10893_v59, %v3671_v26  ;;  %v3670_v27 = vmul.f32 %v10892_v15, %v3657_v1  ;;  %v15990_v61 = vand.u32 4294901760, %v3683_v29  ;;  %v16009_v14 = vsub.f32 %v3684_v38, %v15985_v28 }
 0x74d   : > { %3707 = vrot.lane.b32.xlu1 %v3682_v25, %s18875_s30  ;;  %v3681_v9 = vadd.f32 %v10893_v59, %v3670_v27  ;;  %v16011_v36 = vand.u32 4294901760, %v3682_v25  ;;  %v16018_v18 = vsub.f32 %v3683_v29, %v15990_v61  ;;  %v16033_v16 = vand.u32 4294901760, %v16009_v14 }
 0x74f   : > { %3695 = vrot.lane.b32.xlu0 %v3684_v38, %s18901_s0  ;;  %v16020_v59 = vand.u32 4294901760, %v3681_v9  ;;  %v16044_v1 = vsub.f32 %v3682_v25, %v16011_v36 }
 0x751   : > { %3705 = vrot.lane.b32.xlu1 %v3681_v9, %s18875_s30 }
 0x753   : > { %3691 = vrot.lane.b32.xlu0 %v3682_v25, %s18901_s0 }
 0x755   : > { %3693 = vrot.lane.b32.xlu1 %v3683_v29, %s18901_s0 }
 0x759   : > { %3689 = vrot.lane.b32.xlu1 %v3681_v9, %s18901_s0 }
 0x7bb   : > { %v3712_v10 = vpop.permute.xlu1 %3711 }
 0x7bc   : > { %v3720_v57 = vsel %vm1103_vm2, %v3712_v10, 0.0  ;;  %v16049_v10 = vand.u32 4294901760, %v16018_v18 }
 0x7bd   : > { %v15978_v54 = vand.u32 4294901760, %v3720_v57  ;;  %v3710_v39 = vpop.permute.xlu0 %3709 }
 0x7be   : > { %v3719_v21 = vsel %vm1103_vm2, %v3710_v39, 0.0 }
 0x7bf   : > { %v15981_v58 = vsub.f32 %v3720_v57, %v15978_v54  ;;  %12689 = vmatprep.subr.mxu0 %v15978_v54  ;;  %v15987_v32 = vand.u32 4294901760, %v3719_v21  ;;  %v3708_v33 = vpop.permute.xlu1 %3707  ;;  %v16052_v57 = vsub.f32 %v3681_v9, %v16020_v59 }
 0x7c0   : > { %12690 = vmatpush3.msra.mxu0 %v15978_v54  ;;  %v3718_v60 = vsel %vm1103_vm2, %v3708_v33, 0.0 }
 0x7c1   : > { %v15993_v13 = vand.u32 4294901760, %v15981_v58  ;;  %v15996_v45 = vsub.f32 %v3719_v21, %v15987_v32  ;;  %v3696_v55 = vpop.permute.xlu0 %3695  ;;  %12691 = vmatprep.subr.mxu0 %v15987_v32  ;;  %v16000_v4 = vand.u32 4294901760, %v3718_v60 }
 0x7c2   : > { %12692 = vmatpush3.msra.mxu0 %v15987_v32  ;;  %v3704_v51 = vsel %vm1086_vm3, 0.0, %v3696_v55 }
 0x7c3   : > { %v3850_v46 = vsub.f32 %v15981_v58, %v15993_v13  ;;  %v16006_v3 = vand.u32 4294901760, %v15996_v45  ;;  %v16014_v24 = vsub.f32 %v3718_v60, %v16000_v4  ;;  %12693 = vmatprep.subr.mxu0 %v16000_v4  ;;  %v3706_v15 = vpop.permute.xlu1 %3705  ;;  %v16035_v44 = vand.u32 4294901760, %v3704_v51 }
 0x7c4   : > { %v3717_v53 = vsel %vm1103_vm2, %v3706_v15, 0.0  ;;  %12694 = vmatpush3.msra.mxu0 %v16000_v4  ;;  %v16071_v15 = vand.u32 4294901760, %v16044_v1 }
 0x7c5   : > { %v3851_v37 = vand.u32 4294901760, %v3850_v46  ;;  %v3857_v2 = vsub.f32 %v15996_v45, %v16006_v3  ;;  %v16027_v8 = vand.u32 4294901760, %v3717_v53  ;;  %v16030_v38 = vand.u32 4294901760, %v16014_v24  ;;  %v3692_v19 = vpop.permute.xlu0 %3691 }
 0x7c6   : > { %v3702_v39 = vsel %vm1086_vm3, 0.0, %v3692_v19  ;;  %v16063_v60 = vsub.f32 %v3704_v51, %v16035_v44  ;;  %v3878_v46 = vsub.f32 %v16009_v14, %v16033_v16  ;;  %v3885_v19 = vsub.f32 %v16018_v18, %v16049_v10 }
 0x7c7   : > { %12719 = vmatprep.subr.mxu1 %v3851_v37  ;;  %v3858_v7 = vand.u32 4294901760, %v3857_v2  ;;  %v16038_v29 = vsub.f32 %v3717_v53, %v16027_v8  ;;  %12695 = vmatprep.subr.mxu0 %v16027_v8  ;;  %v3694_v31 = vpop.permute.xlu1 %3693  ;;  %v3864_v26 = vsub.f32 %v16014_v24, %v16030_v38 }
 0x7c8   : > { %12720 = vmatpush3.msra.mxu1 %v3851_v37  ;;  %v3703_v27 = vsel %vm1086_vm3, 0.0, %v3694_v31  ;;  %12696 = vmatpush3.msra.mxu0 %v16027_v8  ;;  %v16073_v37 = vand.u32 4294901760, %v3702_v39 }
 0x7c9   : > { %12721 = vmatprep.subr.mxu1 %v3858_v7  ;;  %v16055_v21 = vand.u32 4294901760, %v3703_v27  ;;  %12697 = vmatprep.subr.mxu0 %v15985_v28  ;;  %v3865_v25 = vand.u32 4294901760, %v3864_v26  ;;  %v16059_v33 = vand.u32 4294901760, %v16038_v29  ;;  %v3879_v26 = vand.u32 4294901760, %v3878_v46 }
 0x7ca   : > { %12722 = vmatpush3.msra.mxu1 %v3858_v7  ;;  %12698 = vmatpush3.msra.mxu0 %v15985_v28  ;;  %v16084_v7 = vand.u32 4294901760, %v16052_v57 }
 0x7cb   : > { %12699 = vmatprep.subr.mxu0 %v15990_v61  ;;  %12723 = vmatprep.subr.mxu1 %v3865_v25  ;;  %v3690_v9 = vpop.permute.xlu1 %3689  ;;  %v3871_v55 = vsub.f32 %v16038_v29, %v16059_v33  ;;  %v16078_v51 = vsub.f32 %v3703_v27, %v16055_v21  ;;  %v3892_v27 = vsub.f32 %v16044_v1, %v16071_v15 }
 0x7cc   : > { %v3701_v53 = vsel %vm1086_vm3, 0.0, %v3690_v9  ;;  %12700 = vmatpush3.msra.mxu0 %v15990_v61  ;;  %12724 = vmatpush3.msra.mxu1 %v3865_v25  ;;  %v16093_v25 = vand.u32 4294901760, %v16063_v60  ;;  %v16096_v9 = vsub.f32 %v3702_v39, %v16073_v37  ;;  %v3899_v56 = vsub.f32 %v16052_v57, %v16084_v7 }
 0x7cd   : > { %12701 = vmatprep.subr.mxu0 %v16011_v36  ;;  %v3872_v2 = vand.u32 4294901760, %v3871_v55  ;;  %v16086_v31 = vand.u32 4294901760, %v3701_v53  ;;  %v3886_v55 = vand.u32 4294901760, %v3885_v19  ;;  %v16103_v46 = vand.u32 4294901760, %v16078_v51 }
 0x7ce   : > { %12702 = vmatpush3.msra.mxu0 %v16011_v36  ;;  %v3893_v39 = vand.u32 4294901760, %v3892_v27  ;;  %v16114_v19 = vand.u32 4294901760, %v16096_v9 }
 0x7cf   : > { %12703 = vmatprep.subr.mxu0 %v16020_v59  ;;  %12725 = vmatprep.subr.mxu1 %v3872_v2  ;;  %v16106_v22 = vsub.f32 %v3701_v53, %v16086_v31  ;;  %v3900_v53 = vand.u32 4294901760, %v3899_v56 }
 0x7d0   : > { %12704 = vmatpush3.msra.mxu0 %v16020_v59  ;;  %12726 = vmatpush3.msra.mxu1 %v3872_v2  ;;  %v3906_v2 = vsub.f32 %v16063_v60, %v16093_v25  ;;  %v3920_v48 = vsub.f32 %v16096_v9, %v16114_v19 }
 0x7d1   : > { %12705 = vmatprep.subr.mxu0 %v16035_v44  ;;  %12727 = vmatprep.subr.mxu1 %v3879_v26  ;;  %v16121_v27 = vand.u32 4294901760, %v16106_v22 }
 0x7d2   : > { %12706 = vmatpush3.msra.mxu0 %v16035_v44  ;;  %12728 = vmatpush3.msra.mxu1 %v3879_v26  ;;  %v3913_v26 = vsub.f32 %v16078_v51, %v16103_v46 }
 0x7d3   : > { %12707 = vmatprep.subr.mxu0 %v16055_v21  ;;  %12729 = vmatprep.subr.mxu1 %v3886_v55 }
 0x7d4   : > { %12708 = vmatpush3.msra.mxu0 %v16055_v21  ;;  %12730 = vmatpush3.msra.mxu1 %v3886_v55  ;;  %v3907_v55 = vand.u32 4294901760, %v3906_v2  ;;  %v3914_v56 = vand.u32 4294901760, %v3913_v26  ;;  %v3921_v2 = vand.u32 4294901760, %v3920_v48  ;;  %v18903_v48 = vld [vmem:[#allocation13_spill] sm:$0xff] }
 0x7d5   : > { %12709 = vmatprep.subr.mxu0 %v16073_v37  ;;  %12731 = vmatprep.subr.mxu1 %v3893_v39  ;;  %v18917_v26 = vld [vmem:[#allocation25_spill] sm:$0xff] }
 0x7d6   : > { %12710 = vmatpush3.msra.mxu0 %v16073_v37  ;;  %12732 = vmatpush3.msra.mxu1 %v3893_v39  ;;  %v3927_v39 = vsub.f32 %v16106_v22, %v16121_v27 }
 0x7d7   : > { %12711 = vmatprep.subr.mxu0 %v16086_v31  ;;  %12733 = vmatprep.subr.mxu1 %v3900_v53 }
 0x7d8   : > { %12712 = vmatpush3.msra.mxu0 %v16086_v31  ;;  %12734 = vmatpush3.msra.mxu1 %v3900_v53  ;;  %v3928_v53 = vand.u32 4294901760, %v3927_v39 }
 0x7d9   : > { %12714 = vmatmul.mubr.f32.vlgmr.msra.gmra.mxu0 %v14961_v42  ;;  %12735 = vmatprep.subr.mxu1 %v3907_v55 }
 0x7da   : > { %12749 = vmatprep.subr.mxu0 %v15981_v58  ;;  %12736 = vmatpush3.msra.mxu1 %v3907_v55  ;;  %v18918_v55 = vld [vmem:[#allocation23_spill] sm:$0xff] }
 0x7db   : > { %12750 = vmatpush3.msra.mxu0 %v15981_v58  ;;  %12737 = vmatprep.subr.mxu1 %v3914_v56  ;;  %v18902_v58 = vld [vmem:[#allocation11_spill] sm:$0xff] }
 0x7dc   : > { %12751 = vmatprep.subr.mxu0 %v15996_v45  ;;  %12716 = vmatprep.mubr.f32.mxu0 %v14978_v20 }
 0x7dd   : > { %12738 = vmatpush3.msra.mxu1 %v3914_v56  ;;  %12752 = vmatpush3.msra.mxu0 %v15996_v45  ;;  %v18904_v45 = vld [vmem:[#allocation14_spill] sm:$0xff] }
 0x7de   : > { %12717 = vmatmul.mubr.f32.gmra.mxu0 %v14982_v34  ;;  %12739 = vmatprep.subr.mxu1 %v3921_v2 }
 0x7df   : > { %12753 = vmatprep.subr.mxu0 %v16014_v24  ;;  %12740 = vmatpush3.msra.mxu1 %v3921_v2 }
 0x7e0   : > { %12754 = vmatpush3.msra.mxu0 %v16014_v24  ;;  %12741 = vmatprep.subr.mxu1 %v3928_v53  ;;  %v18906_v24 = vld [vmem:[#allocation12_spill] sm:$0xff] }
 0x7e1   : > { %12755 = vmatprep.subr.mxu0 %v16038_v29  ;;  %12742 = vmatpush3.msra.mxu1 %v3928_v53 }
 0x7e2   : > { %12756 = vmatpush3.msra.mxu0 %v16038_v29  ;;  %12744 = vmatmul.mubr.f32.vlgmr.msra.gmra.mxu1 %v18902_v58  ;;  %v18912_v29 = vld [vmem:[#allocation19_spill] sm:$0xff] }
 0x7e3   : > { %12757 = vmatprep.subr.mxu0 %v16009_v14  ;;  %12779 = vmatprep.subr.mxu1 %v15978_v54 }
 0x7e4   : > { %12758 = vmatpush3.msra.mxu0 %v16009_v14  ;;  %12780 = vmatpush3.msra.mxu1 %v15978_v54  ;;  %v18905_v14 = vld [vmem:[#allocation9_spill] sm:$0xff] }
 0x7e5   : > { %12759 = vmatprep.subr.mxu0 %v16018_v18  ;;  %12781 = vmatprep.subr.mxu1 %v15987_v32 }
 0x7e6   : > { %12746 = vmatprep.mubr.f32.mxu1 %v18903_v48  ;;  %12760 = vmatpush3.msra.mxu0 %v16018_v18  ;;  %v18907_v18 = vld [vmem:[#allocation16_spill] sm:$0xff] }
 0x7e7   : > { %12782 = vmatpush3.msra.mxu1 %v15987_v32  ;;  %12761 = vmatprep.subr.mxu0 %v16044_v1 }
 0x7e8   : > { %12747 = vmatmul.mubr.f32.gmra.mxu1 %v18904_v45  ;;  %12783 = vmatprep.subr.mxu1 %v16000_v4 }
 0x7e9   : > { %12762 = vmatpush3.msra.mxu0 %v16044_v1  ;;  %12784 = vmatpush3.msra.mxu1 %v16000_v4 }
 0x7ea   : > { %12763 = vmatprep.subr.mxu0 %v16052_v57  ;;  %12785 = vmatprep.subr.mxu1 %v16027_v8 }
 0x7eb   : > { %12764 = vmatpush3.msra.mxu0 %v16052_v57  ;;  %12786 = vmatpush3.msra.mxu1 %v16027_v8 }
 0x7ec   : > { %12765 = vmatprep.subr.mxu0 %v16063_v60  ;;  %12787 = vmatprep.subr.mxu1 %v15985_v28 }
 0x7ed   : > { %12766 = vmatpush3.msra.mxu0 %v16063_v60  ;;  %12788 = vmatpush3.msra.mxu1 %v15985_v28 }
 0x7ee   : > { %12767 = vmatprep.subr.mxu0 %v16078_v51  ;;  %12789 = vmatprep.subr.mxu1 %v15990_v61 }
 0x7ef   : > { %12768 = vmatpush3.msra.mxu0 %v16078_v51  ;;  %12790 = vmatpush3.msra.mxu1 %v15990_v61 }
 0x7f0   : > { %12769 = vmatprep.subr.mxu0 %v16096_v9  ;;  %12791 = vmatprep.subr.mxu1 %v16011_v36 }
 0x7f1   : > { %12770 = vmatpush3.msra.mxu0 %v16096_v9  ;;  %12792 = vmatpush3.msra.mxu1 %v16011_v36  ;;  %v18916_v9 = vld [vmem:[#allocation22_spill] sm:$0xff] }
 0x7f2   : > { %12771 = vmatprep.subr.mxu0 %v16106_v22  ;;  %12793 = vmatprep.subr.mxu1 %v16020_v59 }
 0x7f3   : > { %12772 = vmatpush3.msra.mxu0 %v16106_v22  ;;  %12773 = vmatprep.mubr.f32.mxu0 %v18905_v14  ;;  %v18908_v22 = vld [vmem:[#allocation17_spill] sm:$0xff] }
 0x7f4   : > { %12794 = vmatpush3.msra.mxu1 %v16020_v59  ;;  %12774 = vmatmul.mubr.f32.vlgmr.msra.gmra.mxu0 %v18906_v24 }
 0x7f5   : > { %12795 = vmatprep.subr.mxu1 %v16035_v44  ;;  %12809 = vmatprep.subr.mxu0 %v15993_v13 }
 0x7f6   : > { %12796 = vmatpush3.msra.mxu1 %v16035_v44  ;;  %12810 = vmatpush3.msra.mxu0 %v15993_v13  ;;  %v18909_v13 = vld [vmem:[#allocation10_spill] sm:$0xff] }
 0x7f7   : > { %12797 = vmatprep.subr.mxu1 %v16055_v21  ;;  %12811 = vmatprep.subr.mxu0 %v16006_v3 }
 0x7f8   : > { %12776 = vmatprep.mubr.f32.mxu0 %v18907_v18  ;;  %12798 = vmatpush3.msra.mxu1 %v16055_v21 }
 0x7f9   : > { %12812 = vmatpush3.msra.mxu0 %v16006_v3  ;;  %12799 = vmatprep.subr.mxu1 %v16073_v37  ;;  %v18910_v3 = vld [vmem:[#allocation15_spill] sm:$0xff] }
 0x7fa   : > { %12777 = vmatmul.mubr.f32.gmra.mxu0 %v18908_v22  ;;  %12813 = vmatprep.subr.mxu0 %v16030_v38 }
 0x7fb   : > { %12800 = vmatpush3.msra.mxu1 %v16073_v37  ;;  %12814 = vmatpush3.msra.mxu0 %v16030_v38  ;;  %v18911_v38 = vld [vmem:[#allocation18_spill] sm:$0xff] }
 0x7fc   : > { %12801 = vmatprep.subr.mxu1 %v16086_v31  ;;  %12815 = vmatprep.subr.mxu0 %v16059_v33 }
 0x7fd   : > { %12802 = vmatpush3.msra.mxu1 %v16086_v31  ;;  %12803 = vmatprep.mubr.f32.mxu1 %v18909_v13 }
 0x7fe   : > { %12816 = vmatpush3.msra.mxu0 %v16059_v33  ;;  %12804 = vmatmul.mubr.f32.vlgmr.msra.gmra.mxu1 %v18910_v3 }
 0x7ff   : > { %12817 = vmatprep.subr.mxu0 %v16033_v16  ;;  %12839 = vmatprep.subr.mxu1 %v15978_v54 }
 0x800   : > { %12818 = vmatpush3.msra.mxu0 %v16033_v16  ;;  %12840 = vmatpush3.msra.mxu1 %v15978_v54  ;;  %v18913_v54 = vld [vmem:[#allocation29_spill] sm:$0xff] }
 0x801   : > { %12819 = vmatprep.subr.mxu0 %v16049_v10  ;;  %12841 = vmatprep.subr.mxu1 %v15987_v32 }
 0x802   : > { %12806 = vmatprep.mubr.f32.mxu1 %v18911_v38  ;;  %12820 = vmatpush3.msra.mxu0 %v16049_v10 }
 0x803   : > { %12842 = vmatpush3.msra.mxu1 %v15987_v32  ;;  %12821 = vmatprep.subr.mxu0 %v16071_v15 }
 0x804   : > { %12807 = vmatmul.mubr.f32.gmra.mxu1 %v18912_v29  ;;  %12843 = vmatprep.subr.mxu1 %v16000_v4 }
 0x805   : > { %12822 = vmatpush3.msra.mxu0 %v16071_v15  ;;  %12844 = vmatpush3.msra.mxu1 %v16000_v4  ;;  %v18915_v15 = vld [vmem:[#allocation24_spill] sm:$0xff] }
 0x806   : > { %12823 = vmatprep.subr.mxu0 %v16084_v7  ;;  %12845 = vmatprep.subr.mxu1 %v16027_v8 }
 0x807   : > { %12824 = vmatpush3.msra.mxu0 %v16084_v7  ;;  %12846 = vmatpush3.msra.mxu1 %v16027_v8 }
 0x808   : > { %12825 = vmatprep.subr.mxu0 %v16093_v25  ;;  %12847 = vmatprep.subr.mxu1 %v15985_v28 }
 0x809   : > { %12826 = vmatpush3.msra.mxu0 %v16093_v25  ;;  %12848 = vmatpush3.msra.mxu1 %v15985_v28  ;;  %v18914_v28 = vld [vmem:[#allocation26_spill] sm:$0xff] }
 0x80a   : > { %12827 = vmatprep.subr.mxu0 %v16103_v46  ;;  %12849 = vmatprep.subr.mxu1 %v15990_v61 }
 0x80b   : > { %12828 = vmatpush3.msra.mxu0 %v16103_v46  ;;  %12850 = vmatpush3.msra.mxu1 %v15990_v61 }
 0x80c   : > { %12829 = vmatprep.subr.mxu0 %v16114_v19  ;;  %12851 = vmatprep.subr.mxu1 %v16011_v36 }
 0x80d   : > { %12830 = vmatpush3.msra.mxu0 %v16114_v19  ;;  %12852 = vmatpush3.msra.mxu1 %v16011_v36 }
 0x80e   : > { %12831 = vmatprep.subr.mxu0 %v16121_v27  ;;  %12853 = vmatprep.subr.mxu1 %v16020_v59 }
 0x80f   : > { %12832 = vmatpush3.msra.mxu0 %v16121_v27  ;;  %12833 = vmatprep.mubr.f32.mxu0 %v14741_v35 }
 0x810   : > { %12854 = vmatpush3.msra.mxu1 %v16020_v59  ;;  %12834 = vmatmul.mubr.f32.vlgmr.msra.gmra.mxu0 %v18902_v58 }
 0x811   : > { %12855 = vmatprep.subr.mxu1 %v16035_v44  ;;  %12836 = vmatprep.mubr.f32.mxu0 %v18903_v48 }
 0x812   : > { %12856 = vmatpush3.msra.mxu1 %v16035_v44  ;;  %12863 = vmatprep.mubr.f32.mxu1 %v14741_v35 }
 0x813   : > { %12857 = vmatprep.subr.mxu1 %v16055_v21 }
 0x814   : > { %12858 = vmatpush3.msra.mxu1 %v16055_v21  ;;  %12837 = vmatmul.mubr.f32.gmra.mxu0 %v18904_v45 }
 0x815   : > { %12859 = vmatprep.subr.mxu1 %v16073_v37  ;;  %12893 = vmatprep.mubr.f32.mxu0 %v18913_v54 }
 0x816   : > { %12860 = vmatpush3.msra.mxu1 %v16073_v37 }
 0x817   : > { %12861 = vmatprep.subr.mxu1 %v16086_v31 }
 0x818   : > { %12862 = vmatpush3.msra.mxu1 %v16086_v31 }
 0x819   : > { %12864 = vmatmul.mubr.f32.vlgmr.msra.gmra.mxu1 %v18902_v58 }
 0x81a   : > { %12866 = vmatprep.mubr.f32.mxu1 %v18903_v48 }
 0x81d   : > { %12867 = vmatmul.mubr.f32.gmra.mxu1 %v18904_v45 }
 0x81e   : > { %12923 = vmatprep.mubr.f32.mxu1 %v18914_v28 }
 0x899   : > { %v12715_v32 = vpop.f32.mrf.mxu0 }
 0x89a   : > { %v3815_v37 = vadd.f32 %v12715_v32, %v18915_v15 }
 0x89b   : > { %v3804_v61 = vpop.f32.mrf.mxu0 }
 0x89c   : > { %v3805_v27 = vadd.f32 %v3804_v61, %v18917_v26 }
 0x89e   : > { %v12718_v4 = vpop.f32.mrf.mxu0 }
 0x89f   : > { %v3835_v46 = vadd.f32 %v12718_v4, %v18916_v9 }
 0x8a0   : > { %v3824_v59 = vpop.f32.mrf.mxu0 }
 0x8a1   : > { %v3825_v56 = vadd.f32 %v3824_v59, %v18918_v55 }
 0x8a2   : > { %v12745_v36 = vpop.f32.mrf.mxu1 }
 0x8a3   : > { %v3972_v7 = vadd.f32 %v12745_v36, %v3815_v37 }
 0x8a4   : > { %v3965_v8 = vpop.f32.mrf.mxu1 }
 0x8a5   : > { %v3966_v29 = vadd.f32 %v3965_v8, %v3805_v27 }
 0x8a8   : > { %v12748_v44 = vpop.f32.mrf.mxu1 }
 0x8a9   : > { %v3984_v39 = vadd.f32 %v12748_v44, %v3835_v46 }
 0x8aa   : > { %v3977_v10 = vpop.f32.mrf.mxu1 }
 0x8ab   : > { %v3978_v38 = vadd.f32 %v3977_v10, %v3825_v56 }
 0x8b4   : > { %v12775_v16 = vpop.f32.mrf.mxu0 }
 0x8b5   : > { %v4087_v19 = vadd.f32 %v12775_v16, %v3972_v7 }
 0x8b6   : > { %v4079_v1 = vpop.f32.mrf.mxu0 }
 0x8b7   : > { %v4080_v15 = vadd.f32 %v4079_v1, %v3966_v29 }
 0x8ba   : > { %v12778_v57 = vpop.f32.mrf.mxu0 }
 0x8bb   : > { %v4101_v3 = vadd.f32 %v12778_v57, %v3984_v39 }
 0x8bc   : > { %v4093_v33 = vpop.f32.mrf.mxu0 }
 0x8bd   : > { %v4094_v36 = vadd.f32 %v4093_v33, %v3978_v38 }
 0x8be   : > { %v12805_v21 = vpop.f32.mrf.mxu1 }
 0x8bf   : > { %v4194_v2 = vadd.f32 %v12805_v21, %v4087_v19 }
 0x8c0   : > { %v4185_v60 = vpop.f32.mrf.mxu1 }
 0x8c1   : > { %v4186_v16 = vadd.f32 %v4185_v60, %v4080_v15 }
 0x8c4   : > { %v12808_v31 = vpop.f32.mrf.mxu1 }
 0x8c5   : > { %v4210_v37 = vadd.f32 %v12808_v31, %v4101_v3 }
 0x8c6   : > { %v4201_v53 = vpop.f32.mrf.mxu1 }
 0x8c7   : > { %v4202_v7 = vadd.f32 %v4201_v53, %v4094_v36 }
 0x8d0   : > { %v12835_v51 = vpop.f32.mrf.mxu0 }
 0x8d1   : > { %v4323_v13 = vadd.f32 %v12835_v51, %v4194_v2 }
 0x8d2   : > { %v4316_v25 = vpop.f32.mrf.mxu0 }
 0x8d3   : > { %v4317_v44 = vadd.f32 %v4316_v25, %v4186_v16 }
 0x8d4   : > { %v12838_v54 = vpop.f32.mrf.mxu0 }
 0x8d5   : > { %v4335_v61 = vadd.f32 %v12838_v54, %v4210_v37 }
 0x8d6   : > { %v4328_v18 = vpop.f32.mrf.mxu0 }
 0x8d7   : > { %v4329_v21 = vadd.f32 %v4328_v18, %v4202_v7 }
 0x8d9   : > { %v12865_v32 = vpop.f32.mrf.mxu1 }
 0x8da   : > { %v4424_v22 = vadd.f32 %v12865_v32, %v4323_v13 }
 0x8db   : > { %v4417_v4 = vpop.f32.mrf.mxu1 }
 0x8dc   : > { %v16253_v26 = vmax.f32 %v4424_v22, 0.0  ;;  %v4418_v10 = vadd.f32 %v4417_v4, %v4317_v44 }
 0x8dd   : > { %v12868_v59 = vpop.f32.mrf.mxu1 }
 0x8de   : > { %v4436_v46 = vadd.f32 %v12868_v59, %v4335_v61  ;;  %4445 = vadd.xlane.f32.xlu0 %v16253_v26  ;;  %v16261_v13 = vmax.f32 %v4418_v10, 0.0  ;;  %v4452_v29 = vmul.f32 %v16253_v26, %v16253_v26 }
 0x8df   : > { %v4429_v8 = vpop.f32.mrf.mxu1 }
 0x8e0   : > { %v16256_v57 = vmax.f32 %v4436_v46, 0.0  ;;  %v4430_v38 = vadd.f32 %v4429_v8, %v4329_v21  ;;  %v4451_v54 = vmul.f32 %v16261_v13, %v16261_v13 }
 0x8e2   : > { %v16258_v3 = vmax.f32 %v4430_v38, 0.0  ;;  %4449 = vadd.xlane.f32.xlu0 %v16256_v57  ;;  %v4454_v18 = vmul.f32 %v16256_v57, %v16256_v57 }
 0x8e4   : > { %4447 = vadd.xlane.f32.xlu1 %v16258_v3  ;;  %v4453_v22 = vmul.f32 %v16258_v3, %v16258_v3 }
 0x8e6   : > { %4443 = vadd.xlane.f32.xlu0 %v16261_v13 }
 0x8e8   : > { %4461 = vadd.xlane.f32.xlu1 %v4454_v18 }
 0x8ea   : > { %4459 = vadd.xlane.f32.xlu0 %v4453_v22 }
 0x8ec   : > { %4457 = vadd.xlane.f32.xlu1 %v4452_v29 }
 0x8ee   : > { %4455 = vadd.xlane.f32.xlu0 %v4451_v54 }
 0x967   : > { %v4446_v1 = vpop.xlane.xlu0 %4445 }
 0x968   : > { %v16273_v60 = vmul.f32 0.0078125, %v4446_v1 }
 0x96a   : > { %v4468_v2 = vmul.f32 128.0, %v16273_v60 }
 0x96b   : > { %v4450_v33 = vpop.xlane.xlu0 %4449 }
 0x96c   : > { %v16275_v15 = vmul.f32 0.0078125, %v4450_v33  ;;  %v4472_v61 = vmul.f32 %v4468_v2, %v16273_v60 }
 0x96d   : > { %v4448_v51 = vpop.xlane.xlu1 %4447 }
 0x96e   : > { %v16277_v31 = vmul.f32 0.0078125, %v4448_v51  ;;  %v4470_v25 = vmul.f32 128.0, %v16275_v15 }
 0x96f   : > { %v4444_v19 = vpop.xlane.xlu0 %4443 }
 0x970   : > { %v16280_v27 = vmul.f32 0.0078125, %v4444_v19  ;;  %v4474_v56 = vmul.f32 %v4470_v25, %v16275_v15  ;;  %v4469_v39 = vmul.f32 128.0, %v16277_v31 }
 0x971   : > { %v4462_v53 = vpop.xlane.xlu1 %4461 }
 0x972   : > { %v4478_v32 = vsub.f32 %v4462_v53, %v4474_v56  ;;  %v4473_v36 = vmul.f32 %v4469_v39, %v16277_v31  ;;  %v4467_v4 = vmul.f32 128.0, %v16280_v27 }
 0x973   : > { %v4460_v37 = vpop.xlane.xlu0 %4459 }
 0x974   : > { %v4482_v16 = vmul.f32 0.007874016, %v4478_v32  ;;  %v4477_v7 = vsub.f32 %v4460_v37, %v4473_v36  ;;  %v4471_v8 = vmul.f32 %v4467_v4, %v16280_v27 }
 0x975   : > { %v4458_v59 = vpop.xlane.xlu1 %4457 }
 0x976   : > { %v4486_v44 = vmax.f32 %v4482_v16, 0.0  ;;  %v4481_v21 = vmul.f32 0.007874016, %v4477_v7  ;;  %v4476_v46 = vsub.f32 %v4458_v59, %v4472_v61 }
 0x977   : > { %v4456_v10 = vpop.xlane.xlu0 %4455 }
 0x978   : > { %14389 = vrsqrt.f32 %v4486_v44  ;;  %v4485_v38 = vmax.f32 %v4481_v21, 0.0  ;;  %v4480_v18 = vmul.f32 0.007874016, %v4476_v46  ;;  %v4475_v22 = vsub.f32 %v4456_v10, %v4471_v8 }
 0x979   : > { %vm4510_vm8 = vcmp.eq.f32.partialorder %v4486_v44, inf  ;;  %v4513_v25 = vand.u32 2147483648, %v4486_v44  ;;  %vm4512_vm9 = vcmp.eq.f32.partialorder %v4486_v44, 0.0 }
 0x97a   : > { %14391 = vrsqrt.f32 %v4485_v38  ;;  %v4484_v29 = vmax.f32 %v4480_v18, 0.0  ;;  %v4479_v54 = vmul.f32 0.007874016, %v4475_v22  ;;  %vm4503_vm10 = vcmp.eq.f32.partialorder %v4485_v38, inf }
 0x97b   : > { %v4506_v32 = vand.u32 2147483648, %v4485_v38  ;;  %vm4505_vm11 = vcmp.eq.f32.partialorder %v4485_v38, 0.0 }
 0x97c   : > { %14393 = vrsqrt.f32 %v4484_v29  ;;  %v4483_v1 = vmax.f32 %v4479_v54, 0.0  ;;  %vm4496_vm14 = vcmp.eq.f32.partialorder %v4484_v29, inf  ;;  %v4499_v61 = vand.u32 2147483648, %v4484_v29 }
 0x97d   : > { %vm4498_vm15 = vcmp.eq.f32.partialorder %v4484_v29, 0.0  ;;  %v4518_v54 = vsub.f32 %v16256_v57, %v16275_v15 }
 0x97e   : > { %14395 = vrsqrt.f32 %v4483_v1  ;;  %vm4489_vm0 = vcmp.eq.f32.partialorder %v4483_v1, inf  ;;  %v4492_v10 = vand.u32 2147483648, %v4483_v1  ;;  %vm4491_vm1 = vcmp.eq.f32.partialorder %v4483_v1, 0.0 }
 0x985   : > { %v14390_v33 = vpop.eup %14389 }
 0x986   : > { %v4509_v51 = vmul.f32 %v14390_v33, %v4486_v44 }
 0x987   : > { %v14392_v19 = vpop.eup %14391 }
 0x988   : > { %v4511_v56 = vsel %vm4510_vm8, %v4486_v44, %v4509_v51  ;;  %v4502_v2 = vmul.f32 %v14392_v19, %v4485_v38  ;;  %v14453_v19 = vld [vmem:[%s18735_s9] ss:$0 sm:$0xff] }
 0x989   : > { %v4514_v39 = vsel %vm4512_vm9, %v4513_v25, %v4511_v56  ;;  %v14394_v36 = vpop.eup %14393 }
 0x98a   : > { %v4522_v53 = vadd.f32 1e-06, %v4514_v39  ;;  %v4504_v37 = vsel %vm4503_vm10, %v4485_v38, %v4502_v2  ;;  %v4495_v16 = vmul.f32 %v14394_v36, %v4484_v29  ;;  %v14454_v2 = vld [vmem:[%s18736_s10] ss:$0 sm:$0xff] }
 0x98b   : > { %v4507_v4 = vsel %vm4505_vm11, %v4506_v32, %v4504_v37  ;;  %v14396_v59 = vpop.eup %14395 }
 0x98c   : > { %14397 = vrcp.f32 %v4522_v53  ;;  %v4521_v7 = vadd.f32 1e-06, %v4507_v4  ;;  %v4497_v21 = vsel %vm4496_vm14, %v4484_v29, %v4495_v16  ;;  %v4488_v44 = vmul.f32 %v14396_v59, %v4483_v1 }
 0x98d   : > { %v4500_v46 = vsel %vm4498_vm15, %v4499_v61, %v4497_v21  ;;  %v4517_v29 = vsub.f32 %v16258_v3, %v16277_v31  ;;  %v4515_v31 = vsub.f32 %v16261_v13, %v16280_v27 }
 0x98e   : > { %14399 = vrcp.f32 %v4521_v7  ;;  %v4520_v8 = vadd.f32 1e-06, %v4500_v46  ;;  %v4490_v18 = vsel %vm4489_vm0, %v4483_v1, %v4488_v44  ;;  %v4516_v1 = vsub.f32 %v16253_v26, %v16273_v60 }
 0x98f   : > { %v4493_v22 = vsel %vm4491_vm1, %v4492_v10, %v4490_v18 }
 0x990   : > { %14401 = vrcp.f32 %v4520_v8  ;;  %v4519_v38 = vadd.f32 1e-06, %v4493_v22 }
 0x992   : > { %14403 = vrcp.f32 %v4519_v38 }
 0x999   : > { %v14398_v33 = vpop.eup %14397 }
 0x99a   : > { %v4530_v51 = vmul.f32 %v14398_v33, %v4518_v54 }
 0x99b   : > { %v14400_v25 = vpop.eup %14399 }
 0x99c   : > { %v4534_v56 = vmul.f32 %v14453_v19, %v4530_v51  ;;  %v4528_v39 = vmul.f32 %v14400_v25, %v4517_v29 }
 0x99d   : > { %v14402_v15 = vpop.eup %14401 }
 0x99e   : > { %v4538_v57 = vadd.f32 %v14454_v2, %v4534_v56  ;;  %v4533_v53 = vmul.f32 %v14453_v19, %v4528_v39  ;;  %v4526_v3 = vmul.f32 %v14402_v15, %v4516_v1 }
 0x99f   : > { %v14404_v36 = vpop.eup %14403 }
 0x9a0   : > { %4565 = vrot.lane.b32.xlu1 %v4538_v57, %s18875_s30  ;;  %v4537_v32 = vadd.f32 %v14454_v2, %v4533_v53  ;;  %v4532_v37 = vmul.f32 %v14453_v19, %v4526_v3  ;;  %v4524_v4 = vmul.f32 %v14404_v36, %v4515_v31  ;;  %v16319_v46 = vand.u32 4294901760, %v4538_v57 }
 0x9a2   : > { %4563 = vrot.lane.b32.xlu0 %v4537_v32, %s18875_s30  ;;  %v4536_v26 = vadd.f32 %v14454_v2, %v4532_v37  ;;  %v4531_v60 = vmul.f32 %v14453_v19, %v4524_v4  ;;  %v16324_v8 = vand.u32 4294901760, %v4537_v32  ;;  %v16343_v25 = vsub.f32 %v4538_v57, %v16319_v46 }
 0x9a4   : > { %4561 = vrot.lane.b32.xlu1 %v4536_v26, %s18875_s30  ;;  %v4535_v16 = vadd.f32 %v14454_v2, %v4531_v60  ;;  %v16345_v19 = vand.u32 4294901760, %v4536_v26  ;;  %v16352_v2 = vsub.f32 %v4537_v32, %v16324_v8  ;;  %v16367_v4 = vand.u32 4294901760, %v16343_v25 }
 0x9a6   : > { %4549 = vrot.lane.b32.xlu0 %v4538_v57, %s18901_s0  ;;  %v16354_v15 = vand.u32 4294901760, %v4535_v16 }
 0x9a8   : > { %4559 = vrot.lane.b32.xlu1 %v4535_v16, %s18875_s30 }
 0x9aa   : > { %4545 = vrot.lane.b32.xlu0 %v4536_v26, %s18901_s0 }
 0x9ac   : > { %4547 = vrot.lane.b32.xlu1 %v4537_v32, %s18901_s0 }
 0x9b0   : > { %4543 = vrot.lane.b32.xlu1 %v4535_v16, %s18901_s0 }
 0xa12   : > { %v4566_v13 = vpop.permute.xlu1 %4565 }
 0xa13   : > { %v4574_v27 = vsel %vm1103_vm2, %v4566_v13, 0.0 }
 0xa14   : > { %v16312_v7 = vand.u32 4294901760, %v4574_v27  ;;  %v4564_v61 = vpop.permute.xlu0 %4563 }
 0xa15   : > { %v4573_v21 = vsel %vm1103_vm2, %v4564_v61, 0.0 }
 0xa16   : > { %v16315_v59 = vsub.f32 %v4574_v27, %v16312_v7  ;;  %12869 = vmatprep.subr.mxu0 %v16312_v7  ;;  %v16321_v44 = vand.u32 4294901760, %v4573_v21  ;;  %v4562_v10 = vpop.permute.xlu1 %4561 }
 0xa17   : > { %12870 = vmatpush3.msra.mxu0 %v16312_v7  ;;  %v4572_v38 = vsel %vm1103_vm2, %v4562_v10, 0.0 }
 0xa18   : > { %v16327_v18 = vand.u32 4294901760, %v16315_v59  ;;  %v16330_v22 = vsub.f32 %v4573_v21, %v16321_v44  ;;  %12871 = vmatprep.subr.mxu0 %v16321_v44  ;;  %v4550_v54 = vpop.permute.xlu0 %4549  ;;  %v16334_v33 = vand.u32 4294901760, %v4572_v38  ;;  %v16378_v21 = vsub.f32 %v4536_v26, %v16345_v19 }
 0xa19   : > { %12872 = vmatpush3.msra.mxu0 %v16321_v44  ;;  %v4558_v53 = vsel %vm1086_vm3, 0.0, %v4550_v54  ;;  %v16386_v54 = vsub.f32 %v4535_v16, %v16354_v15 }
 0xa1a   : > { %v4704_v51 = vsub.f32 %v16315_v59, %v16327_v18  ;;  %v16340_v29 = vand.u32 4294901760, %v16330_v22  ;;  %v16348_v56 = vsub.f32 %v4572_v38, %v16334_v33  ;;  %v4560_v39 = vpop.permute.xlu1 %4559  ;;  %12873 = vmatprep.subr.mxu0 %v16334_v33  ;;  %v16369_v60 = vand.u32 4294901760, %v4558_v53 }
 0xa1b   : > { %v4571_v3 = vsel %vm1103_vm2, %v4560_v39, 0.0  ;;  %12874 = vmatpush3.msra.mxu0 %v16334_v33  ;;  %v16383_v38 = vand.u32 4294901760, %v16352_v2  ;;  %v16418_v24 = vand.u32 4294901760, %v16386_v54 }
 0xa1c   : > { %v4705_v1 = vand.u32 4294901760, %v4704_v51  ;;  %v4711_v57 = vsub.f32 %v16330_v22, %v16340_v29  ;;  %v16361_v31 = vand.u32 4294901760, %v4571_v3  ;;  %v16364_v36 = vand.u32 4294901760, %v16348_v56  ;;  %v4546_v37 = vpop.permute.xlu0 %4545 }
 0xa1d   : > { %v4556_v51 = vsel %vm1086_vm3, 0.0, %v4546_v37  ;;  %v4732_v37 = vsub.f32 %v16343_v25, %v16367_v4  ;;  %v4739_v9 = vsub.f32 %v16352_v2, %v16383_v38  ;;  %v4753_v48 = vsub.f32 %v16386_v54, %v16418_v24 }
 0xa1e   : > { %12899 = vmatprep.subr.mxu1 %v4705_v1  ;;  %v4712_v32 = vand.u32 4294901760, %v4711_v57  ;;  %v16372_v13 = vsub.f32 %v4571_v3, %v16361_v31  ;;  %v4548_v27 = vpop.permute.xlu1 %4547  ;;  %12875 = vmatprep.subr.mxu0 %v16361_v31  ;;  %v4718_v61 = vsub.f32 %v16348_v56, %v16364_v36  ;;  %v16397_v3 = vsub.f32 %v4558_v53, %v16369_v60 }
 0xa1f   : > { %12900 = vmatpush3.msra.mxu1 %v4705_v1  ;;  %v4557_v10 = vsel %vm1086_vm3, 0.0, %v4548_v27  ;;  %12876 = vmatpush3.msra.mxu0 %v16361_v31  ;;  %v16407_v27 = vand.u32 4294901760, %v4556_v51  ;;  %v4740_v45 = vand.u32 4294901760, %v4739_v9 }
 0xa20   : > { %12901 = vmatprep.subr.mxu1 %v4712_v32  ;;  %v16389_v39 = vand.u32 4294901760, %v4557_v10  ;;  %12877 = vmatprep.subr.mxu0 %v16319_v46  ;;  %v4719_v26 = vand.u32 4294901760, %v4718_v61  ;;  %v16393_v1 = vand.u32 4294901760, %v16372_v13 }
 0xa21   : > { %12902 = vmatpush3.msra.mxu1 %v4712_v32  ;;  %12878 = vmatpush3.msra.mxu0 %v16319_v46  ;;  %v16405_v32 = vand.u32 4294901760, %v16378_v21 }
 0xa22   : > { %v4544_v57 = vpop.permute.xlu1 %4543  ;;  %12879 = vmatprep.subr.mxu0 %v16324_v8  ;;  %12903 = vmatprep.subr.mxu1 %v4719_v26  ;;  %v4725_v16 = vsub.f32 %v16372_v13, %v16393_v1  ;;  %v16412_v53 = vsub.f32 %v4557_v10, %v16389_v39 }
 0xa23   : > { %v4555_v61 = vsel %vm1086_vm3, 0.0, %v4544_v57  ;;  %12880 = vmatpush3.msra.mxu0 %v16324_v8  ;;  %12904 = vmatpush3.msra.mxu1 %v4719_v26  ;;  %v4733_v26 = vand.u32 4294901760, %v4732_v37  ;;  %v4746_v10 = vsub.f32 %v16378_v21, %v16405_v32  ;;  %v16427_v57 = vand.u32 4294901760, %v16397_v3 }
 0xa24   : > { %12881 = vmatprep.subr.mxu0 %v16345_v19  ;;  %v4726_v55 = vand.u32 4294901760, %v4725_v16  ;;  %v16420_v14 = vand.u32 4294901760, %v4555_v61  ;;  %v16430_v16 = vsub.f32 %v4556_v51, %v16407_v27  ;;  %v16437_v37 = vand.u32 4294901760, %v16412_v53 }
 0xa25   : > { %12882 = vmatpush3.msra.mxu0 %v16345_v19  ;;  %v4760_v51 = vsub.f32 %v16397_v3, %v16427_v57 }
 0xa26   : > { %12883 = vmatprep.subr.mxu0 %v16354_v15  ;;  %12905 = vmatprep.subr.mxu1 %v4726_v55  ;;  %v16440_v58 = vsub.f32 %v4555_v61, %v16420_v14  ;;  %v16448_v9 = vand.u32 4294901760, %v16430_v16  ;;  %v4754_v61 = vand.u32 4294901760, %v4753_v48  ;;  %v18919_v48 = vld [vmem:[#allocation39_spill] sm:$0xff] }
 0xa27   : > { %12884 = vmatpush3.msra.mxu0 %v16354_v15  ;;  %12906 = vmatpush3.msra.mxu1 %v4726_v55  ;;  %v4747_v55 = vand.u32 4294901760, %v4746_v10 }
 0xa28   : > { %12885 = vmatprep.subr.mxu0 %v16369_v60  ;;  %12907 = vmatprep.subr.mxu1 %v4733_v26  ;;  %v16455_v10 = vand.u32 4294901760, %v16440_v58  ;;  %v4774_v34 = vsub.f32 %v16430_v16, %v16448_v9 }
 0xa29   : > { %12886 = vmatpush3.msra.mxu0 %v16369_v60  ;;  %12908 = vmatpush3.msra.mxu1 %v4733_v26  ;;  %v4767_v26 = vsub.f32 %v16412_v53, %v16437_v37 }
 0xa2a   : > { %12887 = vmatprep.subr.mxu0 %v16389_v39  ;;  %12909 = vmatprep.subr.mxu1 %v4740_v45 }
 0xa2b   : > { %12888 = vmatpush3.msra.mxu0 %v16389_v39  ;;  %12910 = vmatpush3.msra.mxu1 %v4740_v45  ;;  %v4761_v45 = vand.u32 4294901760, %v4760_v51  ;;  %v4768_v20 = vand.u32 4294901760, %v4767_v26  ;;  %v18920_v51 = vld [vmem:[#allocation40_spill] sm:$0xff] }
 0xa2c   : > { %12889 = vmatprep.subr.mxu0 %v16407_v27  ;;  %12911 = vmatprep.subr.mxu1 %v4747_v55 }
 0xa2d   : > { %12890 = vmatpush3.msra.mxu0 %v16407_v27  ;;  %12912 = vmatpush3.msra.mxu1 %v4747_v55  ;;  %v4781_v55 = vsub.f32 %v16440_v58, %v16455_v10 }
 0xa2e   : > { %12891 = vmatprep.subr.mxu0 %v16420_v14  ;;  %12913 = vmatprep.subr.mxu1 %v4754_v61 }
 0xa2f   : > { %12892 = vmatpush3.msra.mxu0 %v16420_v14  ;;  %12914 = vmatpush3.msra.mxu1 %v4754_v61  ;;  %v4775_v61 = vand.u32 4294901760, %v4774_v34  ;;  %v4782_v26 = vand.u32 4294901760, %v4781_v55  ;;  %v18924_v34 = vld [vmem:[#allocation33_spill] sm:$0xff] }
 0xa30   : > { %12894 = vmatmul.mubr.f32.vlgmr.msra.gmra.mxu0 %v18919_v48  ;;  %12915 = vmatprep.subr.mxu1 %v4761_v45  ;;  %v18921_v48 = vld [vmem:[#allocation41_spill] sm:$0xff] }
 0xa31   : > { %12929 = vmatprep.subr.mxu0 %v16315_v59  ;;  %12916 = vmatpush3.msra.mxu1 %v4761_v45 }
 0xa32   : > { %12930 = vmatpush3.msra.mxu0 %v16315_v59  ;;  %12917 = vmatprep.subr.mxu1 %v4768_v20  ;;  %v18922_v59 = vld [vmem:[#allocation30_spill] sm:$0xff] }
 0xa33   : > { %12931 = vmatprep.subr.mxu0 %v16330_v22  ;;  %12896 = vmatprep.mubr.f32.mxu0 %v18920_v51 }
 0xa34   : > { %12918 = vmatpush3.msra.mxu1 %v4768_v20  ;;  %12932 = vmatpush3.msra.mxu0 %v16330_v22  ;;  %v18923_v20 = vld [vmem:[#allocation32_spill] sm:$0xff]  ;;  %v18925_v22 = vld [vmem:[#allocation27_spill] sm:$0xff] }
 0xa35   : > { %12897 = vmatmul.mubr.f32.gmra.mxu0 %v18921_v48  ;;  %12919 = vmatprep.subr.mxu1 %v4775_v61 }
 0xa36   : > { %12933 = vmatprep.subr.mxu0 %v16348_v56  ;;  %12920 = vmatpush3.msra.mxu1 %v4775_v61 }
 0xa37   : > { %12934 = vmatpush3.msra.mxu0 %v16348_v56  ;;  %12921 = vmatprep.subr.mxu1 %v4782_v26  ;;  %v18927_v56 = vld [vmem:[#allocation34_spill] sm:$0xff] }
 0xa38   : > { %12935 = vmatprep.subr.mxu0 %v16372_v13  ;;  %12922 = vmatpush3.msra.mxu1 %v4782_v26  ;;  %v18937_v26 = vld [vmem:[#allocation45_spill] sm:$0xff] }
 0xa39   : > { %12936 = vmatpush3.msra.mxu0 %v16372_v13  ;;  %12924 = vmatmul.mubr.f32.vlgmr.msra.gmra.mxu1 %v18922_v59 }
 0xa3a   : > { %12937 = vmatprep.subr.mxu0 %v16343_v25  ;;  %12959 = vmatprep.subr.mxu1 %v16312_v7 }
 0xa3b   : > { %12938 = vmatpush3.msra.mxu0 %v16343_v25  ;;  %12960 = vmatpush3.msra.mxu1 %v16312_v7  ;;  %v18926_v25 = vld [vmem:[#allocation31_spill] sm:$0xff] }
 0xa3c   : > { %12939 = vmatprep.subr.mxu0 %v16352_v2  ;;  %12961 = vmatprep.subr.mxu1 %v16321_v44 }
 0xa3d   : > { %12926 = vmatprep.mubr.f32.mxu1 %v18923_v20  ;;  %12940 = vmatpush3.msra.mxu0 %v16352_v2  ;;  %v18931_v2 = vld [vmem:[#allocation37_spill] sm:$0xff] }
 0xa3e   : > { %12962 = vmatpush3.msra.mxu1 %v16321_v44  ;;  %12941 = vmatprep.subr.mxu0 %v16378_v21 }
 0xa3f   : > { %12927 = vmatmul.mubr.f32.gmra.mxu1 %v18924_v34  ;;  %12963 = vmatprep.subr.mxu1 %v16334_v33 }
 0xa40   : > { %12942 = vmatpush3.msra.mxu0 %v16378_v21  ;;  %12964 = vmatpush3.msra.mxu1 %v16334_v33 }
 0xa41   : > { %12943 = vmatprep.subr.mxu0 %v16386_v54  ;;  %12965 = vmatprep.subr.mxu1 %v16361_v31 }
 0xa42   : > { %12944 = vmatpush3.msra.mxu0 %v16386_v54  ;;  %12966 = vmatpush3.msra.mxu1 %v16361_v31 }
 0xa43   : > { %12945 = vmatprep.subr.mxu0 %v16397_v3  ;;  %12967 = vmatprep.subr.mxu1 %v16319_v46 }
 0xa44   : > { %12946 = vmatpush3.msra.mxu0 %v16397_v3  ;;  %12968 = vmatpush3.msra.mxu1 %v16319_v46  ;;  %v18934_v3 = vld [vmem:[#allocation42_spill] sm:$0xff] }
 0xa45   : > { %12947 = vmatprep.subr.mxu0 %v16412_v53  ;;  %12969 = vmatprep.subr.mxu1 %v16324_v8 }
 0xa46   : > { %12948 = vmatpush3.msra.mxu0 %v16412_v53  ;;  %12970 = vmatpush3.msra.mxu1 %v16324_v8 }
 0xa47   : > { %12949 = vmatprep.subr.mxu0 %v16430_v16  ;;  %12971 = vmatprep.subr.mxu1 %v16345_v19 }
 0xa48   : > { %12950 = vmatpush3.msra.mxu0 %v16430_v16  ;;  %12972 = vmatpush3.msra.mxu1 %v16345_v19 }
 0xa49   : > { %12951 = vmatprep.subr.mxu0 %v16440_v58  ;;  %12973 = vmatprep.subr.mxu1 %v16354_v15 }
 0xa4a   : > { %12952 = vmatpush3.msra.mxu0 %v16440_v58  ;;  %12953 = vmatprep.mubr.f32.mxu0 %v18925_v22  ;;  %v18928_v58 = vld [vmem:[#allocation36_spill] sm:$0xff] }
 0xa4b   : > { %12974 = vmatpush3.msra.mxu1 %v16354_v15  ;;  %12954 = vmatmul.mubr.f32.vlgmr.msra.gmra.mxu0 %v18926_v25 }
 0xa4c   : > { %12975 = vmatprep.subr.mxu1 %v16369_v60  ;;  %12989 = vmatprep.subr.mxu0 %v16327_v18 }
 0xa4d   : > { %12976 = vmatpush3.msra.mxu1 %v16369_v60  ;;  %12990 = vmatpush3.msra.mxu0 %v16327_v18  ;;  %v18929_v18 = vld [vmem:[#allocation28_spill] sm:$0xff] }
 0xa4e   : > { %12977 = vmatprep.subr.mxu1 %v16389_v39  ;;  %12991 = vmatprep.subr.mxu0 %v16340_v29 }
 0xa4f   : > { %12956 = vmatprep.mubr.f32.mxu0 %v18927_v56  ;;  %12978 = vmatpush3.msra.mxu1 %v16389_v39 }
 0xa50   : > { %12992 = vmatpush3.msra.mxu0 %v16340_v29  ;;  %12979 = vmatprep.subr.mxu1 %v16407_v27  ;;  %v18930_v29 = vld [vmem:[#allocation35_spill] sm:$0xff] }
 0xa51   : > { %12957 = vmatmul.mubr.f32.gmra.mxu0 %v18928_v58  ;;  %12993 = vmatprep.subr.mxu0 %v16364_v36 }
 0xa52   : > { %12980 = vmatpush3.msra.mxu1 %v16407_v27  ;;  %12994 = vmatpush3.msra.mxu0 %v16364_v36  ;;  %v18932_v36 = vld [vmem:[#allocation38_spill] sm:$0xff] }
 0xa53   : > { %12981 = vmatprep.subr.mxu1 %v16420_v14  ;;  %12995 = vmatprep.subr.mxu0 %v16393_v1 }
 0xa54   : > { %12982 = vmatpush3.msra.mxu1 %v16420_v14  ;;  %12983 = vmatprep.mubr.f32.mxu1 %v18929_v18 }
 0xa55   : > { %12996 = vmatpush3.msra.mxu0 %v16393_v1  ;;  %12984 = vmatmul.mubr.f32.vlgmr.msra.gmra.mxu1 %v18930_v29 }
 0xa56   : > { %12997 = vmatprep.subr.mxu0 %v16367_v4  ;;  %13019 = vmatprep.subr.mxu1 %v16312_v7 }
 0xa57   : > { %12998 = vmatpush3.msra.mxu0 %v16367_v4  ;;  %13020 = vmatpush3.msra.mxu1 %v16312_v7 }
 0xa58   : > { %12999 = vmatprep.subr.mxu0 %v16383_v38  ;;  %13021 = vmatprep.subr.mxu1 %v16321_v44 }
 0xa59   : > { %12986 = vmatprep.mubr.f32.mxu1 %v18931_v2  ;;  %13000 = vmatpush3.msra.mxu0 %v16383_v38 }
 0xa5a   : > { %13022 = vmatpush3.msra.mxu1 %v16321_v44  ;;  %13001 = vmatprep.subr.mxu0 %v16405_v32 }
 0xa5b   : > { %12987 = vmatmul.mubr.f32.gmra.mxu1 %v18932_v36  ;;  %13023 = vmatprep.subr.mxu1 %v16334_v33 }
 0xa5c   : > { %13002 = vmatpush3.msra.mxu0 %v16405_v32  ;;  %13024 = vmatpush3.msra.mxu1 %v16334_v33 }
 0xa5d   : > { %13003 = vmatprep.subr.mxu0 %v16418_v24  ;;  %13025 = vmatprep.subr.mxu1 %v16361_v31 }
 0xa5e   : > { %13004 = vmatpush3.msra.mxu0 %v16418_v24  ;;  %13026 = vmatpush3.msra.mxu1 %v16361_v31  ;;  %v18933_v24 = vld [vmem:[#allocation46_spill] sm:$0xff] }
 0xa5f   : > { %13005 = vmatprep.subr.mxu0 %v16427_v57  ;;  %13027 = vmatprep.subr.mxu1 %v16319_v46 }
 0xa60   : > { %13006 = vmatpush3.msra.mxu0 %v16427_v57  ;;  %13028 = vmatpush3.msra.mxu1 %v16319_v46 }
 0xa61   : > { %13007 = vmatprep.subr.mxu0 %v16437_v37  ;;  %13029 = vmatprep.subr.mxu1 %v16324_v8 }
 0xa62   : > { %13008 = vmatpush3.msra.mxu0 %v16437_v37  ;;  %13030 = vmatpush3.msra.mxu1 %v16324_v8 }
 0xa63   : > { %13009 = vmatprep.subr.mxu0 %v16448_v9  ;;  %13031 = vmatprep.subr.mxu1 %v16345_v19 }
 0xa64   : > { %13010 = vmatpush3.msra.mxu0 %v16448_v9  ;;  %13032 = vmatpush3.msra.mxu1 %v16345_v19  ;;  %v18936_v9 = vld [vmem:[#allocation44_spill] sm:$0xff] }
 0xa65   : > { %13011 = vmatprep.subr.mxu0 %v16455_v10  ;;  %13033 = vmatprep.subr.mxu1 %v16354_v15 }
 0xa66   : > { %13012 = vmatpush3.msra.mxu0 %v16455_v10  ;;  %13013 = vmatprep.mubr.f32.mxu0 %v18914_v28 }
 0xa67   : > { %13034 = vmatpush3.msra.mxu1 %v16354_v15  ;;  %13014 = vmatmul.mubr.f32.vlgmr.msra.gmra.mxu0 %v18922_v59 }
 0xa68   : > { %13035 = vmatprep.subr.mxu1 %v16369_v60  ;;  %13016 = vmatprep.mubr.f32.mxu0 %v18923_v20 }
 0xa69   : > { %13036 = vmatpush3.msra.mxu1 %v16369_v60  ;;  %13043 = vmatprep.mubr.f32.mxu1 %v18914_v28 }
 0xa6a   : > { %13037 = vmatprep.subr.mxu1 %v16389_v39 }
 0xa6b   : > { %13038 = vmatpush3.msra.mxu1 %v16389_v39  ;;  %13017 = vmatmul.mubr.f32.gmra.mxu0 %v18924_v34 }
 0xa6c   : > { %13039 = vmatprep.subr.mxu1 %v16407_v27  ;;  %13073 = vmatprep.mubr.f32.mxu0 %v18933_v24 }
 0xa6d   : > { %13040 = vmatpush3.msra.mxu1 %v16407_v27  ;;  %v18935_v27 = vld [vmem:[#allocation43_spill] sm:$0xff] }
 0xa6e   : > { %13041 = vmatprep.subr.mxu1 %v16420_v14 }
 0xa6f   : > { %13042 = vmatpush3.msra.mxu1 %v16420_v14 }
 0xa70   : > { %13044 = vmatmul.mubr.f32.vlgmr.msra.gmra.mxu1 %v18922_v59 }
 0xa71   : > { %13046 = vmatprep.mubr.f32.mxu1 %v18923_v20 }
 0xa74   : > { %13047 = vmatmul.mubr.f32.gmra.mxu1 %v18924_v34 }
 0xa75   : > { %13103 = vmatprep.mubr.f32.mxu1 %v15553_v52 }
 0xaf0   : > { %v12895_v7 = vpop.f32.mrf.mxu0 }
 0xaf1   : > { %v4669_v10 = vadd.f32 %v12895_v7, %v18936_v9 }
 0xaf2   : > { %v4658_v46 = vpop.f32.mrf.mxu0 }
 0xaf3   : > { %v4659_v24 = vadd.f32 %v4658_v46, %v18937_v26 }
 0xaf5   : > { %v12898_v44 = vpop.f32.mrf.mxu0 }
 0xaf6   : > { %v4689_v32 = vadd.f32 %v12898_v44, %v18934_v3 }
 0xaf7   : > { %v4678_v33 = vpop.f32.mrf.mxu0 }
 0xaf8   : > { %v4679_v53 = vadd.f32 %v4678_v33, %v18935_v27 }
 0xaf9   : > { %v12925_v8 = vpop.f32.mrf.mxu1 }
 0xafa   : > { %v4826_v36 = vadd.f32 %v12925_v8, %v4669_v10 }
 0xafb   : > { %v4819_v19 = vpop.f32.mrf.mxu1 }
 0xafc   : > { %v4820_v56 = vadd.f32 %v4819_v19, %v4659_v24 }
 0xaff   : > { %v12928_v31 = vpop.f32.mrf.mxu1 }
 0xb00   : > { %v4838_v57 = vadd.f32 %v12928_v31, %v4689_v32 }
 0xb01   : > { %v4831_v60 = vpop.f32.mrf.mxu1 }
 0xb02   : > { %v4832_v45 = vadd.f32 %v4831_v60, %v4679_v53 }
 0xb0b   : > { %v12955_v15 = vpop.f32.mrf.mxu0 }
 0xb0c   : > { %v4941_v25 = vadd.f32 %v12955_v15, %v4826_v36 }
 0xb0d   : > { %v4933_v4 = vpop.f32.mrf.mxu0 }
 0xb0e   : > { %v4934_v31 = vadd.f32 %v4933_v4, %v4820_v56 }
 0xb11   : > { %v12958_v13 = vpop.f32.mrf.mxu0 }
 0xb12   : > { %v4955_v55 = vadd.f32 %v12958_v13, %v4838_v57 }
 0xb13   : > { %v4947_v21 = vpop.f32.mrf.mxu0 }
 0xb14   : > { %v4948_v2 = vadd.f32 %v4947_v21, %v4832_v45 }
 0xb15   : > { %v12985_v14 = vpop.f32.mrf.mxu1 }
 0xb16   : > { %v5048_v32 = vadd.f32 %v12985_v14, %v4941_v25 }
 0xb17   : > { %v5039_v38 = vpop.f32.mrf.mxu1 }
 0xb18   : > { %v5040_v60 = vadd.f32 %v5039_v38, %v4934_v31 }
 0xb1b   : > { %v12988_v39 = vpop.f32.mrf.mxu1 }
 0xb1c   : > { %v5064_v29 = vadd.f32 %v12988_v39, %v4955_v55 }
 0xb1d   : > { %v5055_v16 = vpop.f32.mrf.mxu1 }
 0xb1e   : > { %v5056_v44 = vadd.f32 %v5055_v16, %v4948_v2 }
 0xb27   : > { %v13015_v54 = vpop.f32.mrf.mxu0 }
 0xb28   : > { %v5177_v13 = vadd.f32 %v13015_v54, %v5048_v32 }
 0xb29   : > { %v5170_v1 = vpop.f32.mrf.mxu0 }
 0xb2a   : > { %v5171_v46 = vadd.f32 %v5170_v1, %v5040_v60 }
 0xb2b   : > { %v13018_v37 = vpop.f32.mrf.mxu0 }
 0xb2c   : > { %v5189_v3 = vadd.f32 %v13018_v37, %v5064_v29 }
 0xb2d   : > { %v5182_v18 = vpop.f32.mrf.mxu0 }
 0xb2e   : > { %v5183_v27 = vadd.f32 %v5182_v18, %v5056_v44 }
 0xb30   : > { %v13045_v61 = vpop.f32.mrf.mxu1 }
 0xb31   : > { %v5278_v8 = vadd.f32 %v13045_v61, %v5177_v13 }
 0xb32   : > { %v5271_v58 = vpop.f32.mrf.mxu1 }
 0xb33   : > { %v5272_v21 = vadd.f32 %v5271_v58, %v5171_v46  ;;  %v16607_v15 = vand.u32 4294901760, %v5278_v8 }
 0xb34   : > { %v13048_v33 = vpop.f32.mrf.mxu1 }
 0xb35   : > { %v5290_v22 = vadd.f32 %v13048_v33, %v5189_v3  ;;  %v16641_v55 = vsub.f32 %v5278_v8, %v16607_v15 }
 0xb36   : > { %v5283_v7 = vpop.f32.mrf.mxu1 }
 0xb37   : > { %v5284_v53 = vadd.f32 %v5283_v7, %v5183_v27  ;;  %5319 = vrot.lane.b32.xlu0 %v5290_v22, %s18938_s15  ;;  %v16596_v18 = vand.u32 4294901760, %v5290_v22  ;;  %v16625_v27 = vand.u32 4294901760, %v5272_v21 }
 0xb39   : > { %5317 = vrot.lane.b32.xlu1 %v5284_v53, %s18938_s15  ;;  %v16609_v4 = vand.u32 4294901760, %v5284_v53  ;;  %v16614_v38 = vsub.f32 %v5290_v22, %v16596_v18 }
 0xb3b   : > { %5315 = vrot.lane.b32.xlu0 %v5278_v8, %s18938_s15  ;;  %v16644_v61 = vsub.f32 %v5284_v53, %v16609_v4  ;;  %v16655_v60 = vand.u32 4294901760, %v16614_v38 }
 0xb3d   : > { %5313 = vrot.lane.b32.xlu1 %v5272_v21, %s18938_s15 }
 0xb3f   : > { %5303 = vrot.lane.b32.xlu0 %v5290_v22, %s14525_s16 }
 0xb41   : > { %5301 = vrot.lane.b32.xlu1 %v5284_v53, %s14525_s16 }
 0xb43   : > { %5299 = vrot.lane.b32.xlu0 %v5278_v8, %s14525_s16  ;;  %v16665_v8 = vsub.f32 %v5272_v21, %v16625_v27 }
 0xb45   : > { %5297 = vrot.lane.b32.xlu1 %v5272_v21, %s14525_s16  ;;  %v16678_v21 = vand.u32 4294901760, %v16644_v61  ;;  %v16703_v34 = vand.u32 4294901760, %v16665_v8 }
 0xba9   : > { %v5320_v25 = vpop.permute.xlu0 %5319 }
 0xbaa   : > { %v5328_v56 = vsel %vm2808_vm12, %v5320_v25, 0.0 }
 0xbab   : > { %v16598_v29 = vand.u32 4294901760, %v5328_v56  ;;  %v5318_v58 = vpop.permute.xlu1 %5317 }
 0xbac   : > { %v5327_v2 = vsel %vm2808_vm12, %v5318_v58, 0.0 }
 0xbad   : > { %v16602_v36 = vsub.f32 %v5328_v56, %v16598_v29  ;;  %v16604_v24 = vand.u32 4294901760, %v5327_v2  ;;  %13049 = vmatprep.subr.mxu0 %v16598_v29  ;;  %v5316_v19 = vpop.permute.xlu0 %5315 }
 0xbae   : > { %v5326_v14 = vsel %vm2808_vm12, %v5316_v19, 0.0  ;;  %13050 = vmatpush3.msra.mxu0 %v16598_v29 }
 0xbaf   : > { %v16617_v54 = vsub.f32 %v5327_v2, %v16604_v24  ;;  %v16619_v39 = vand.u32 4294901760, %v5326_v14  ;;  %13051 = vmatprep.subr.mxu0 %v16604_v24  ;;  %v5314_v1 = vpop.permute.xlu1 %5313  ;;  %v16623_v3 = vand.u32 4294901760, %v16602_v36 }
 0xbb0   : > { %v5325_v57 = vsel %vm2808_vm12, %v5314_v1, 0.0  ;;  %13052 = vmatpush3.msra.mxu0 %v16604_v24 }
 0xbb1   : > { %v16630_v22 = vsub.f32 %v5326_v14, %v16619_v39  ;;  %v16632_v16 = vand.u32 4294901760, %v5325_v57  ;;  %v5304_v37 = vpop.permute.xlu0 %5303  ;;  %13053 = vmatprep.subr.mxu0 %v16619_v39  ;;  %v5458_v10 = vsub.f32 %v16602_v36, %v16623_v3  ;;  %v16638_v45 = vand.u32 4294901760, %v16617_v54 }
 0xbb2   : > { %v5312_v44 = vsel %vm2791_vm13, 0.0, %v5304_v37  ;;  %13054 = vmatpush3.msra.mxu0 %v16619_v39  ;;  %v5486_v37 = vsub.f32 %v16614_v38, %v16655_v60 }
 0xbb3   : > { %v16649_v33 = vsub.f32 %v5325_v57, %v16632_v16  ;;  %13055 = vmatprep.subr.mxu0 %v16632_v16  ;;  %v5302_v31 = vpop.permute.xlu1 %5301  ;;  %v5459_v32 = vand.u32 4294901760, %v5458_v10  ;;  %v5465_v7 = vsub.f32 %v16617_v54, %v16638_v45  ;;  %v16657_v13 = vand.u32 4294901760, %v5312_v44 }
 0xbb4   : > { %v5311_v53 = vsel %vm2791_vm13, 0.0, %v5302_v31  ;;  %13056 = vmatpush3.msra.mxu0 %v16632_v16  ;;  %v16662_v46 = vand.u32 4294901760, %v16630_v22  ;;  %v16686_v10 = vand.u32 4294901760, %v16641_v55 }
 0xbb5   : > { %13079 = vmatprep.subr.mxu1 %v5459_v32  ;;  %v5300_v25 = vpop.permute.xlu0 %5299  ;;  %13057 = vmatprep.subr.mxu0 %v16596_v18  ;;  %v5466_v56 = vand.u32 4294901760, %v5465_v7  ;;  %v16669_v58 = vand.u32 4294901760, %v16649_v33  ;;  %v16671_v2 = vand.u32 4294901760, %v5311_v53  ;;  %v16689_v31 = vsub.f32 %v5312_v44, %v16657_v13 }
 0xbb6   : > { %v5310_v19 = vsel %vm2791_vm13, 0.0, %v5300_v25  ;;  %13058 = vmatpush3.msra.mxu0 %v16596_v18  ;;  %13080 = vmatpush3.msra.mxu1 %v5459_v32  ;;  %v5472_v14 = vsub.f32 %v16630_v22, %v16662_v46  ;;  %v5493_v44 = vsub.f32 %v16644_v61, %v16678_v21 }
 0xbb7   : > { %13059 = vmatprep.subr.mxu0 %v16609_v4  ;;  %13081 = vmatprep.subr.mxu1 %v5466_v56  ;;  %v5298_v1 = vpop.permute.xlu1 %5297  ;;  %v5479_v57 = vsub.f32 %v16649_v33, %v16669_v58  ;;  %v16691_v32 = vand.u32 4294901760, %v5310_v19  ;;  %v16697_v9 = vsub.f32 %v5311_v53, %v16671_v2  ;;  %v5487_v53 = vand.u32 4294901760, %v5486_v37 }
 0xbb8   : > { %v5309_v7 = vsel %vm2791_vm13, 0.0, %v5298_v1  ;;  %13060 = vmatpush3.msra.mxu0 %v16609_v4  ;;  %13082 = vmatpush3.msra.mxu1 %v5466_v56  ;;  %v5473_v25 = vand.u32 4294901760, %v5472_v14  ;;  %v5500_v14 = vsub.f32 %v16641_v55, %v16686_v10 }
 0xbb9   : > { %13061 = vmatprep.subr.mxu0 %v16607_v15  ;;  %v5480_v26 = vand.u32 4294901760, %v5479_v57  ;;  %v16705_v1 = vand.u32 4294901760, %v5309_v7  ;;  %v16709_v56 = vsub.f32 %v5310_v19, %v16691_v32  ;;  %v16715_v57 = vand.u32 4294901760, %v16689_v31 }
 0xbba   : > { %13083 = vmatprep.subr.mxu1 %v5473_v25  ;;  %13062 = vmatpush3.msra.mxu0 %v16607_v15  ;;  %v5507_v19 = vsub.f32 %v16665_v8, %v16703_v34  ;;  %v16722_v20 = vand.u32 4294901760, %v16697_v9 }
 0xbbb   : > { %13084 = vmatpush3.msra.mxu1 %v5473_v25  ;;  %13063 = vmatprep.subr.mxu0 %v16625_v27  ;;  %v5494_v25 = vand.u32 4294901760, %v5493_v44  ;;  %v16725_v37 = vsub.f32 %v5309_v7, %v16705_v1  ;;  %v5514_v59 = vsub.f32 %v16689_v31, %v16715_v57  ;;  %v16732_v44 = vand.u32 4294901760, %v16709_v56 }
 0xbbc   : > { %13085 = vmatprep.subr.mxu1 %v5480_v26  ;;  %13064 = vmatpush3.msra.mxu0 %v16625_v27  ;;  %v5508_v7 = vand.u32 4294901760, %v5507_v19 }
 0xbbd   : > { %13086 = vmatpush3.msra.mxu1 %v5480_v26  ;;  %13065 = vmatprep.subr.mxu0 %v16657_v13  ;;  %v5501_v26 = vand.u32 4294901760, %v5500_v14  ;;  %v16740_v14 = vand.u32 4294901760, %v16725_v37  ;;  %v5515_v48 = vand.u32 4294901760, %v5514_v59 }
 0xbbe   : > { %13087 = vmatprep.subr.mxu1 %v5487_v53  ;;  %13066 = vmatpush3.msra.mxu0 %v16657_v13 }
 0xbbf   : > { %13088 = vmatpush3.msra.mxu1 %v5487_v53  ;;  %13067 = vmatprep.subr.mxu0 %v16671_v2  ;;  %v5521_v53 = vsub.f32 %v16697_v9, %v16722_v20 }
 0xbc0   : > { %13089 = vmatprep.subr.mxu1 %v5494_v25  ;;  %13068 = vmatpush3.msra.mxu0 %v16671_v2 }
 0xbc1   : > { %13090 = vmatpush3.msra.mxu1 %v5494_v25  ;;  %13069 = vmatprep.subr.mxu0 %v16691_v32  ;;  %v5528_v25 = vsub.f32 %v16709_v56, %v16732_v44  ;;  %v5522_v19 = vand.u32 4294901760, %v5521_v53 }
 0xbc2   : > { %13091 = vmatprep.subr.mxu1 %v5501_v26  ;;  %13070 = vmatpush3.msra.mxu0 %v16691_v32 }
 0xbc3   : > { %13092 = vmatpush3.msra.mxu1 %v5501_v26  ;;  %13071 = vmatprep.subr.mxu0 %v16705_v1  ;;  %v5535_v26 = vsub.f32 %v16725_v37, %v16740_v14  ;;  %v5529_v59 = vand.u32 4294901760, %v5528_v25 }
 0xbc4   : > { %13093 = vmatprep.subr.mxu1 %v5508_v7  ;;  %13072 = vmatpush3.msra.mxu0 %v16705_v1 }
 0xbc5   : > { %13094 = vmatpush3.msra.mxu1 %v5508_v7  ;;  %13074 = vmatmul.mubr.f32.vlgmr.msra.gmra.mxu0 %v15765_v11 }
 0xbc6   : > { %13095 = vmatprep.subr.mxu1 %v5515_v48  ;;  %13109 = vmatprep.subr.mxu0 %v16602_v36 }
 0xbc7   : > { %13096 = vmatpush3.msra.mxu1 %v5515_v48  ;;  %13110 = vmatpush3.msra.mxu0 %v16602_v36  ;;  %v5536_v48 = vand.u32 4294901760, %v5535_v26 }
 0xbc8   : > { %13097 = vmatprep.subr.mxu1 %v5522_v19  ;;  %13111 = vmatprep.subr.mxu0 %v16617_v54 }
 0xbc9   : > { %13076 = vmatprep.mubr.f32.mxu0 %v15782_v12  ;;  %13098 = vmatpush3.msra.mxu1 %v5522_v19 }
 0xbca   : > { %13112 = vmatpush3.msra.mxu0 %v16617_v54  ;;  %13099 = vmatprep.subr.mxu1 %v5529_v59 }
 0xbcb   : > { %13077 = vmatmul.mubr.f32.gmra.mxu0 %v15786_v6  ;;  %13113 = vmatprep.subr.mxu0 %v16630_v22 }
 0xbcc   : > { %13100 = vmatpush3.msra.mxu1 %v5529_v59  ;;  %13114 = vmatpush3.msra.mxu0 %v16630_v22 }
 0xbcd   : > { %13101 = vmatprep.subr.mxu1 %v5536_v48  ;;  %13115 = vmatprep.subr.mxu0 %v16649_v33 }
 0xbce   : > { %13102 = vmatpush3.msra.mxu1 %v5536_v48  ;;  %13116 = vmatpush3.msra.mxu0 %v16649_v33 }
 0xbcf   : > { %13104 = vmatmul.mubr.f32.vlgmr.msra.gmra.mxu1 %v15630_v17  ;;  %13117 = vmatprep.subr.mxu0 %v16614_v38 }
 0xbd0   : > { %13139 = vmatprep.subr.mxu1 %v16598_v29  ;;  %13118 = vmatpush3.msra.mxu0 %v16614_v38 }
 0xbd1   : > { %13140 = vmatpush3.msra.mxu1 %v16598_v29  ;;  %13119 = vmatprep.subr.mxu0 %v16644_v61 }
 0xbd2   : > { %13141 = vmatprep.subr.mxu1 %v16604_v24  ;;  %13106 = vmatprep.mubr.f32.mxu1 %v15680_v49 }
 0xbd3   : > { %13120 = vmatpush3.msra.mxu0 %v16644_v61  ;;  %13142 = vmatpush3.msra.mxu1 %v16604_v24  ;;  %v18939_v61 = vld [vmem:[#allocation48_spill] sm:$0xff] }
 0xbd4   : > { %13107 = vmatmul.mubr.f32.gmra.mxu1 %v15699_v0  ;;  %13121 = vmatprep.subr.mxu0 %v16641_v55 }
 0xbd5   : > { %13143 = vmatprep.subr.mxu1 %v16619_v39  ;;  %13122 = vmatpush3.msra.mxu0 %v16641_v55 }
 0xbd6   : > { %13144 = vmatpush3.msra.mxu1 %v16619_v39  ;;  %13123 = vmatprep.subr.mxu0 %v16665_v8 }
 0xbd7   : > { %13145 = vmatprep.subr.mxu1 %v16632_v16  ;;  %13124 = vmatpush3.msra.mxu0 %v16665_v8  ;;  %v18940_v8 = vld [vmem:[#allocation49_spill] sm:$0xff] }
 0xbd8   : > { %13146 = vmatpush3.msra.mxu1 %v16632_v16  ;;  %13125 = vmatprep.subr.mxu0 %v16689_v31 }
 0xbd9   : > { %13147 = vmatprep.subr.mxu1 %v16596_v18  ;;  %13126 = vmatpush3.msra.mxu0 %v16689_v31  ;;  %v18941_v31 = vld [vmem:[#allocation50_spill] sm:$0xff] }
 0xbda   : > { %13148 = vmatpush3.msra.mxu1 %v16596_v18  ;;  %13127 = vmatprep.subr.mxu0 %v16697_v9 }
 0xbdb   : > { %13149 = vmatprep.subr.mxu1 %v16609_v4  ;;  %13128 = vmatpush3.msra.mxu0 %v16697_v9 }
 0xbdc   : > { %13150 = vmatpush3.msra.mxu1 %v16609_v4  ;;  %13129 = vmatprep.subr.mxu0 %v16709_v56 }
 0xbdd   : > { %13151 = vmatprep.subr.mxu1 %v16607_v15  ;;  %13130 = vmatpush3.msra.mxu0 %v16709_v56 }
 0xbde   : > { %13152 = vmatpush3.msra.mxu1 %v16607_v15  ;;  %13131 = vmatprep.subr.mxu0 %v16725_v37 }
 0xbdf   : > { %13153 = vmatprep.subr.mxu1 %v16625_v27  ;;  %13132 = vmatpush3.msra.mxu0 %v16725_v37 }
 0xbe0   : > { %13133 = vmatprep.mubr.f32.mxu0 %v15557_v47  ;;  %13154 = vmatpush3.msra.mxu1 %v16625_v27 }
 0xbe1   : > { %13134 = vmatmul.mubr.f32.vlgmr.msra.gmra.mxu0 %v15678_v63  ;;  %13155 = vmatprep.subr.mxu1 %v16657_v13 }
 0xbe2   : > { %13169 = vmatprep.subr.mxu0 %v16623_v3  ;;  %13156 = vmatpush3.msra.mxu1 %v16657_v13 }
 0xbe3   : > { %13170 = vmatpush3.msra.mxu0 %v16623_v3  ;;  %13157 = vmatprep.subr.mxu1 %v16671_v2 }
 0xbe4   : > { %13171 = vmatprep.subr.mxu0 %v16638_v45  ;;  %13136 = vmatprep.mubr.f32.mxu0 %v15713_v41 }
 0xbe5   : > { %13158 = vmatpush3.msra.mxu1 %v16671_v2  ;;  %13172 = vmatpush3.msra.mxu0 %v16638_v45 }
 0xbe6   : > { %13137 = vmatmul.mubr.f32.gmra.mxu0 %v15728_v43  ;;  %13159 = vmatprep.subr.mxu1 %v16691_v32 }
 0xbe7   : > { %13173 = vmatprep.subr.mxu0 %v16662_v46  ;;  %13160 = vmatpush3.msra.mxu1 %v16691_v32 }
 0xbe8   : > { %13174 = vmatpush3.msra.mxu0 %v16662_v46  ;;  %13161 = vmatprep.subr.mxu1 %v16705_v1 }
 0xbe9   : > { %13175 = vmatprep.subr.mxu0 %v16669_v58  ;;  %13162 = vmatpush3.msra.mxu1 %v16705_v1 }
 0xbea   : > { %13163 = vmatprep.mubr.f32.mxu1 %v15562_v50  ;;  %13176 = vmatpush3.msra.mxu0 %v16669_v58 }
 0xbeb   : > { %13164 = vmatmul.mubr.f32.vlgmr.msra.gmra.mxu1 %v15710_v23  ;;  %13177 = vmatprep.subr.mxu0 %v16655_v60 }
 0xbec   : > { %13199 = vmatprep.subr.mxu1 %v16598_v29  ;;  %13178 = vmatpush3.msra.mxu0 %v16655_v60 }
 0xbed   : > { %13200 = vmatpush3.msra.mxu1 %v16598_v29  ;;  %13179 = vmatprep.subr.mxu0 %v16678_v21 }
 0xbee   : > { %13201 = vmatprep.subr.mxu1 %v16604_v24  ;;  %13166 = vmatprep.mubr.f32.mxu1 %v15743_v5 }
 0xbef   : > { %13180 = vmatpush3.msra.mxu0 %v16678_v21  ;;  %13202 = vmatpush3.msra.mxu1 %v16604_v24 }
 0xbf0   : > { %13167 = vmatmul.mubr.f32.gmra.mxu1 %v15756_v30  ;;  %13181 = vmatprep.subr.mxu0 %v16686_v10 }
 0xbf1   : > { %13203 = vmatprep.subr.mxu1 %v16619_v39  ;;  %13182 = vmatpush3.msra.mxu0 %v16686_v10 }
 0xbf2   : > { %13204 = vmatpush3.msra.mxu1 %v16619_v39  ;;  %13183 = vmatprep.subr.mxu0 %v16703_v34 }
 0xbf3   : > { %13205 = vmatprep.subr.mxu1 %v16632_v16  ;;  %13184 = vmatpush3.msra.mxu0 %v16703_v34 }
 0xbf4   : > { %13206 = vmatpush3.msra.mxu1 %v16632_v16  ;;  %13185 = vmatprep.subr.mxu0 %v16715_v57 }
 0xbf5   : > { %13207 = vmatprep.subr.mxu1 %v16596_v18  ;;  %13186 = vmatpush3.msra.mxu0 %v16715_v57 }
 0xbf6   : > { %13208 = vmatpush3.msra.mxu1 %v16596_v18  ;;  %13187 = vmatprep.subr.mxu0 %v16722_v20 }
 0xbf7   : > { %13209 = vmatprep.subr.mxu1 %v16609_v4  ;;  %13188 = vmatpush3.msra.mxu0 %v16722_v20 }
 0xbf8   : > { %13210 = vmatpush3.msra.mxu1 %v16609_v4  ;;  %13189 = vmatprep.subr.mxu0 %v16732_v44 }
 0xbf9   : > { %13211 = vmatprep.subr.mxu1 %v16607_v15  ;;  %13190 = vmatpush3.msra.mxu0 %v16732_v44 }
 0xbfa   : > { %13212 = vmatpush3.msra.mxu1 %v16607_v15  ;;  %13191 = vmatprep.subr.mxu0 %v16740_v14 }
 0xbfb   : > { %13213 = vmatprep.subr.mxu1 %v16625_v27  ;;  %13192 = vmatpush3.msra.mxu0 %v16740_v14 }
 0xbfc   : > { %13193 = vmatprep.mubr.f32.mxu0 %v15553_v52  ;;  %13214 = vmatpush3.msra.mxu1 %v16625_v27 }
 0xbfd   : > { %13194 = vmatmul.mubr.f32.vlgmr.msra.gmra.mxu0 %v15630_v17  ;;  %13215 = vmatprep.subr.mxu1 %v16657_v13 }
 0xbfe   : > { %13216 = vmatpush3.msra.mxu1 %v16657_v13  ;;  %13196 = vmatprep.mubr.f32.mxu0 %v15680_v49 }
 0xbff   : > { %13217 = vmatprep.subr.mxu1 %v16671_v2  ;;  %13223 = vmatprep.mubr.f32.mxu1 %v15553_v52 }
 0xc00   : > { %13218 = vmatpush3.msra.mxu1 %v16671_v2 }
 0xc01   : > { %13197 = vmatmul.mubr.f32.gmra.mxu0 %v15699_v0  ;;  %13219 = vmatprep.subr.mxu1 %v16691_v32 }
 0xc02   : > { %13220 = vmatpush3.msra.mxu1 %v16691_v32  ;;  %13253 = vmatprep.mubr.f32.mxu0 %v14763_v40 }
 0xc03   : > { %13221 = vmatprep.subr.mxu1 %v16705_v1 }
 0xc04   : > { %13222 = vmatpush3.msra.mxu1 %v16705_v1 }
 0xc05   : > { %13224 = vmatmul.mubr.f32.vlgmr.msra.gmra.mxu1 %v15630_v17 }
 0xc06   : > { %13226 = vmatprep.mubr.f32.mxu1 %v15680_v49 }
 0xc09   : > { %13227 = vmatmul.mubr.f32.gmra.mxu1 %v15699_v0 }
 0xc0a   : > { %13283 = vmatprep.mubr.f32.mxu1 %v14741_v35 }
 0xc85   : > { %v13075_v20 = vpop.f32.mrf.mxu0 }
 0xc86   : > { %v5423_v58 = vadd.f32 %v13075_v20, %v18940_v8 }
 0xc87   : > { %v5412_v34 = vpop.f32.mrf.mxu0 }
 0xc88   : > { %v5413_v32 = vadd.f32 %v5412_v34, %v18941_v31 }
 0xc8b   : > { %v13078_v9 = vpop.f32.mrf.mxu0 }
 0xc8c   : > { %v5443_v55 = vadd.f32 %v13078_v9, %v15907_v62  ;;  %v18942_v62 = vld [vmem:[#allocation20_spill] sm:$0xff] }
 0xc8d   : > { %v5432_v29 = vpop.f32.mrf.mxu0 }
 0xc8e   : > { %v5433_v33 = vadd.f32 %v5432_v29, %v18939_v61 }
 0xc8f   : > { %v13105_v18 = vpop.f32.mrf.mxu1 }
 0xc90   : > { %v5580_v1 = vadd.f32 %v13105_v18, %v5423_v58 }
 0xc91   : > { %v5573_v36 = vpop.f32.mrf.mxu1 }
 0xc92   : > { %v5574_v7 = vadd.f32 %v5573_v36, %v5413_v32 }
 0xc94   : > { %v13108_v15 = vpop.f32.mrf.mxu1 }
 0xc95   : > { %v5592_v60 = vadd.f32 %v13108_v15, %v5443_v55 }
 0xc96   : > { %v5585_v38 = vpop.f32.mrf.mxu1 }
 0xc97   : > { %v5586_v2 = vadd.f32 %v5585_v38, %v5433_v33 }
 0xca1   : > { %v13135_v24 = vpop.f32.mrf.mxu0 }
 0xca2   : > { %v5695_v53 = vadd.f32 %v13135_v24, %v5580_v1 }
 0xca3   : > { %v5687_v4 = vpop.f32.mrf.mxu0 }
 0xca4   : > { %v5688_v26 = vadd.f32 %v5687_v4, %v5574_v7 }
 0xca6   : > { %v13138_v54 = vpop.f32.mrf.mxu0 }
 0xca7   : > { %v5709_v21 = vadd.f32 %v13138_v54, %v5592_v60 }
 0xca8   : > { %v5701_v3 = vpop.f32.mrf.mxu0 }
 0xca9   : > { %v5702_v56 = vadd.f32 %v5701_v3, %v5586_v2 }
 0xcab   : > { %v13165_v39 = vpop.f32.mrf.mxu1 }
 0xcac   : > { %v5802_v59 = vadd.f32 %v13165_v39, %v5695_v53 }
 0xcad   : > { %v5793_v27 = vpop.f32.mrf.mxu1 }
 0xcae   : > { %v5794_v29 = vadd.f32 %v5793_v27, %v5688_v26 }
 0xcb0   : > { %v13168_v16 = vpop.f32.mrf.mxu1 }
 0xcb1   : > { %v5818_v57 = vadd.f32 %v13168_v16, %v5709_v21 }
 0xcb2   : > { %v5809_v13 = vpop.f32.mrf.mxu1 }
 0xcb3   : > { %v5810_v14 = vadd.f32 %v5809_v13, %v5702_v56 }
 0xcbd   : > { %v13195_v22 = vpop.f32.mrf.mxu0 }
 0xcbe   : > { %v5931_v15 = vadd.f32 %v13195_v22, %v5802_v59 }
 0xcbf   : > { %v5924_v45 = vpop.f32.mrf.mxu0 }
 0xcc0   : > { %v5925_v34 = vadd.f32 %v5924_v45, %v5794_v29 }
 0xcc1   : > { %v13198_v46 = vpop.f32.mrf.mxu0 }
 0xcc2   : > { %v5943_v25 = vadd.f32 %v13198_v46, %v5818_v57 }
 0xcc3   : > { %v5936_v37 = vpop.f32.mrf.mxu0 }
 0xcc4   : > { %v5937_v48 = vadd.f32 %v5936_v37, %v5810_v14 }
 0xcc5   : > { %v13225_v10 = vpop.f32.mrf.mxu1 }
 0xcc6   : > { %v6032_v18 = vadd.f32 %v13225_v10, %v5931_v15 }
 0xcc7   : > { %v6025_v44 = vpop.f32.mrf.mxu1 }
 0xcc8   : > { %v6026_v54 = vadd.f32 %v6025_v44, %v5925_v34  ;;  %v16891_v55 = vand.u32 4294901760, %v6032_v18 }
 0xcc9   : > { %v13228_v19 = vpop.f32.mrf.mxu1 }
 0xcca   : > { %v6044_v9 = vadd.f32 %v13228_v19, %v5943_v25  ;;  %v16909_v10 = vand.u32 4294901760, %v6026_v54  ;;  %v16925_v7 = vsub.f32 %v6032_v18, %v16891_v55 }
 0xccb   : > { %v6037_v20 = vpop.f32.mrf.mxu1 }
 0xccc   : > { %v6038_v38 = vadd.f32 %v6037_v20, %v5937_v48  ;;  %6073 = vrot.lane.b32.xlu0 %v6044_v9, %s18875_s30  ;;  %v16880_v4 = vand.u32 4294901760, %v6044_v9  ;;  %v16949_v15 = vsub.f32 %v6026_v54, %v16909_v10 }
 0xcce   : > { %6071 = vrot.lane.b32.xlu1 %v6038_v38, %s18875_s30  ;;  %v16893_v33 = vand.u32 4294901760, %v6038_v38  ;;  %v16898_v13 = vsub.f32 %v6044_v9, %v16880_v4 }
 0xcd0   : > { %6069 = vrot.lane.b32.xlu0 %v6032_v18, %s18875_s30  ;;  %v16928_v53 = vsub.f32 %v6038_v38, %v16893_v33  ;;  %v16939_v48 = vand.u32 4294901760, %v16898_v13 }
 0xcd2   : > { %6067 = vrot.lane.b32.xlu1 %v6026_v54, %s18875_s30 }
 0xcd4   : > { %6057 = vrot.lane.b32.xlu0 %v6044_v9, %s18901_s0 }
 0xcd6   : > { %6055 = vrot.lane.b32.xlu1 %v6038_v38, %s18901_s0 }
 0xcd8   : > { %6053 = vrot.lane.b32.xlu0 %v6032_v18, %s18901_s0 }
 0xcda   : > { %6051 = vrot.lane.b32.xlu1 %v6026_v54, %s18901_s0  ;;  %v16962_v54 = vand.u32 4294901760, %v16928_v53 }
 0xd3e   : > { %v6074_v36 = vpop.permute.xlu0 %6073 }
 0xd3f   : > { %v6082_v24 = vsel %vm1103_vm2, %v6074_v36, 0.0 }
 0xd40   : > { %v16882_v39 = vand.u32 4294901760, %v6082_v24  ;;  %v6072_v3 = vpop.permute.xlu1 %6071 }
 0xd41   : > { %v6081_v27 = vsel %vm1103_vm2, %v6072_v3, 0.0 }
 0xd42   : > { %v16886_v22 = vsub.f32 %v6082_v24, %v16882_v39  ;;  %v16888_v16 = vand.u32 4294901760, %v6081_v27  ;;  %13229 = vmatprep.subr.mxu0 %v16882_v39  ;;  %v6070_v45 = vpop.permute.xlu0 %6069 }
 0xd43   : > { %v6080_v60 = vsel %vm1103_vm2, %v6070_v45, 0.0  ;;  %13230 = vmatpush3.msra.mxu0 %v16882_v39 }
 0xd44   : > { %v16901_v46 = vsub.f32 %v6081_v27, %v16888_v16  ;;  %v16903_v58 = vand.u32 4294901760, %v6080_v60  ;;  %13231 = vmatprep.subr.mxu0 %v16888_v16  ;;  %v6068_v2 = vpop.permute.xlu1 %6067  ;;  %v16907_v21 = vand.u32 4294901760, %v16886_v22 }
 0xd45   : > { %v6079_v32 = vsel %vm1103_vm2, %v6068_v2, 0.0  ;;  %13232 = vmatpush3.msra.mxu0 %v16888_v16  ;;  %v16970_v2 = vand.u32 4294901760, %v16925_v7 }
 0xd46   : > { %v16914_v1 = vsub.f32 %v6080_v60, %v16903_v58  ;;  %v16916_v56 = vand.u32 4294901760, %v6079_v32  ;;  %v6058_v57 = vpop.permute.xlu0 %6057  ;;  %13233 = vmatprep.subr.mxu0 %v16903_v58  ;;  %v6212_v37 = vsub.f32 %v16886_v22, %v16907_v21  ;;  %v16922_v44 = vand.u32 4294901760, %v16901_v46 }
 0xd47   : > { %v6066_v14 = vsel %vm1086_vm3, 0.0, %v6058_v57  ;;  %13234 = vmatpush3.msra.mxu0 %v16903_v58  ;;  %v6240_v60 = vsub.f32 %v16898_v13, %v16939_v48 }
 0xd48   : > { %v16933_v25 = vsub.f32 %v6079_v32, %v16916_v56  ;;  %13235 = vmatprep.subr.mxu0 %v16916_v56  ;;  %v6056_v19 = vpop.permute.xlu1 %6055  ;;  %v6213_v26 = vand.u32 4294901760, %v6212_v37  ;;  %v6219_v59 = vsub.f32 %v16901_v46, %v16922_v44  ;;  %v16941_v9 = vand.u32 4294901760, %v6066_v14 }
 0xd49   : > { %v6065_v20 = vsel %vm1086_vm3, 0.0, %v6056_v19  ;;  %13236 = vmatpush3.msra.mxu0 %v16916_v56  ;;  %v16946_v29 = vand.u32 4294901760, %v16914_v1 }
 0xd4a   : > { %13259 = vmatprep.subr.mxu1 %v6213_v26  ;;  %v6054_v38 = vpop.permute.xlu0 %6053  ;;  %13237 = vmatprep.subr.mxu0 %v16880_v4  ;;  %v6220_v34 = vand.u32 4294901760, %v6219_v59  ;;  %v16953_v18 = vand.u32 4294901760, %v16933_v25  ;;  %v16955_v36 = vand.u32 4294901760, %v6065_v20  ;;  %v16973_v32 = vsub.f32 %v6066_v14, %v16941_v9 }
 0xd4b   : > { %v6064_v24 = vsel %vm1086_vm3, 0.0, %v6054_v38  ;;  %13238 = vmatpush3.msra.mxu0 %v16880_v4  ;;  %13260 = vmatpush3.msra.mxu1 %v6213_v26  ;;  %v6226_v3 = vsub.f32 %v16914_v1, %v16946_v29  ;;  %v6247_v14 = vsub.f32 %v16928_v53, %v16962_v54  ;;  %v16987_v38 = vand.u32 4294901760, %v16949_v15 }
 0xd4c   : > { %13239 = vmatprep.subr.mxu0 %v16893_v33  ;;  %13261 = vmatprep.subr.mxu1 %v6220_v34  ;;  %v6052_v27 = vpop.permute.xlu1 %6051  ;;  %v6233_v45 = vsub.f32 %v16933_v25, %v16953_v18  ;;  %v16975_v57 = vand.u32 4294901760, %v6064_v24  ;;  %v16981_v59 = vsub.f32 %v6065_v20, %v16955_v36  ;;  %v6241_v20 = vand.u32 4294901760, %v6240_v60 }
 0xd4d   : > { %v6063_v37 = vsel %vm1086_vm3, 0.0, %v6052_v27  ;;  %13240 = vmatpush3.msra.mxu0 %v16893_v33  ;;  %13262 = vmatpush3.msra.mxu1 %v6220_v34  ;;  %v6227_v19 = vand.u32 4294901760, %v6226_v3  ;;  %v6254_v3 = vsub.f32 %v16925_v7, %v16970_v2 }
 0xd4e   : > { %13241 = vmatprep.subr.mxu0 %v16891_v55  ;;  %v6234_v26 = vand.u32 4294901760, %v6233_v45  ;;  %v16989_v27 = vand.u32 4294901760, %v6063_v37  ;;  %v16993_v34 = vsub.f32 %v6064_v24, %v16975_v57  ;;  %v16999_v45 = vand.u32 4294901760, %v16973_v32 }
 0xd4f   : > { %13263 = vmatprep.subr.mxu1 %v6227_v19  ;;  %13242 = vmatpush3.msra.mxu0 %v16891_v55  ;;  %v6261_v24 = vsub.f32 %v16949_v15, %v16987_v38  ;;  %v17006_v31 = vand.u32 4294901760, %v16981_v59 }
 0xd50   : > { %13264 = vmatpush3.msra.mxu1 %v6227_v19  ;;  %13243 = vmatprep.subr.mxu0 %v16909_v10  ;;  %v6248_v19 = vand.u32 4294901760, %v6247_v14  ;;  %v17009_v60 = vsub.f32 %v6063_v37, %v16989_v27  ;;  %v6268_v8 = vsub.f32 %v16973_v32, %v16999_v45  ;;  %v17016_v14 = vand.u32 4294901760, %v16993_v34 }
 0xd51   : > { %13265 = vmatprep.subr.mxu1 %v6234_v26  ;;  %13244 = vmatpush3.msra.mxu0 %v16909_v10  ;;  %v6262_v37 = vand.u32 4294901760, %v6261_v24 }
 0xd52   : > { %13266 = vmatpush3.msra.mxu1 %v6234_v26  ;;  %13245 = vmatprep.subr.mxu0 %v16941_v9  ;;  %v6255_v26 = vand.u32 4294901760, %v6254_v3  ;;  %v17024_v3 = vand.u32 4294901760, %v17009_v60  ;;  %v6269_v61 = vand.u32 4294901760, %v6268_v8 }
 0xd53   : > { %13267 = vmatprep.subr.mxu1 %v6241_v20  ;;  %13246 = vmatpush3.msra.mxu0 %v16941_v9 }
 0xd54   : > { %13268 = vmatpush3.msra.mxu1 %v6241_v20  ;;  %13247 = vmatprep.subr.mxu0 %v16955_v36  ;;  %v6275_v20 = vsub.f32 %v16981_v59, %v17006_v31 }
 0xd55   : > { %13269 = vmatprep.subr.mxu1 %v6248_v19  ;;  %13248 = vmatpush3.msra.mxu0 %v16955_v36 }
 0xd56   : > { %13270 = vmatpush3.msra.mxu1 %v6248_v19  ;;  %13249 = vmatprep.subr.mxu0 %v16975_v57  ;;  %v6282_v19 = vsub.f32 %v16993_v34, %v17016_v14  ;;  %v6276_v24 = vand.u32 4294901760, %v6275_v20  ;;  %v18958_v20 = vld [vmem:[#allocation25_spill] sm:$0xff] }
 0xd57   : > { %13271 = vmatprep.subr.mxu1 %v6255_v26  ;;  %13250 = vmatpush3.msra.mxu0 %v16975_v57 }
 0xd58   : > { %13272 = vmatpush3.msra.mxu1 %v6255_v26  ;;  %13251 = vmatprep.subr.mxu0 %v16989_v27  ;;  %v6289_v26 = vsub.f32 %v17009_v60, %v17024_v3  ;;  %v6283_v8 = vand.u32 4294901760, %v6282_v19  ;;  %v18959_v19 = vld [vmem:[#allocation23_spill] sm:$0xff] }
 0xd59   : > { %13273 = vmatprep.subr.mxu1 %v6262_v37  ;;  %13252 = vmatpush3.msra.mxu0 %v16989_v27 }
 0xd5a   : > { %13274 = vmatpush3.msra.mxu1 %v6262_v37  ;;  %13254 = vmatmul.mubr.f32.vlgmr.msra.gmra.mxu0 %v14961_v42  ;;  %v18943_v37 = vld [vmem:[#allocation21_spill] sm:$0xff] }
 0xd5b   : > { %13275 = vmatprep.subr.mxu1 %v6269_v61  ;;  %13289 = vmatprep.subr.mxu0 %v16886_v22 }
 0xd5c   : > { %13276 = vmatpush3.msra.mxu1 %v6269_v61  ;;  %13290 = vmatpush3.msra.mxu0 %v16886_v22  ;;  %v6290_v61 = vand.u32 4294901760, %v6289_v26  ;;  %v18944_v22 = vld [vmem:[#allocation11_spill] sm:$0xff] }
 0xd5d   : > { %13277 = vmatprep.subr.mxu1 %v6276_v24  ;;  %13291 = vmatprep.subr.mxu0 %v16901_v46 }
 0xd5e   : > { %13256 = vmatprep.mubr.f32.mxu0 %v18942_v62  ;;  %13278 = vmatpush3.msra.mxu1 %v6276_v24 }
 0xd5f   : > { %13292 = vmatpush3.msra.mxu0 %v16901_v46  ;;  %13279 = vmatprep.subr.mxu1 %v6283_v8  ;;  %v18945_v46 = vld [vmem:[#allocation13_spill] sm:$0xff] }
 0xd60   : > { %13257 = vmatmul.mubr.f32.gmra.mxu0 %v18943_v37  ;;  %13293 = vmatprep.subr.mxu0 %v16914_v1 }
 0xd61   : > { %13280 = vmatpush3.msra.mxu1 %v6283_v8  ;;  %13294 = vmatpush3.msra.mxu0 %v16914_v1  ;;  %v18946_v1 = vld [vmem:[#allocation14_spill] sm:$0xff] }
 0xd62   : > { %13281 = vmatprep.subr.mxu1 %v6290_v61  ;;  %13295 = vmatprep.subr.mxu0 %v16933_v25 }
 0xd63   : > { %13282 = vmatpush3.msra.mxu1 %v6290_v61  ;;  %13296 = vmatpush3.msra.mxu0 %v16933_v25  ;;  %v18950_v25 = vld [vmem:[#allocation17_spill] sm:$0xff] }
 0xd64   : > { %13284 = vmatmul.mubr.f32.vlgmr.msra.gmra.mxu1 %v18944_v22  ;;  %13297 = vmatprep.subr.mxu0 %v16898_v13 }
 0xd65   : > { %13319 = vmatprep.subr.mxu1 %v16882_v39  ;;  %13298 = vmatpush3.msra.mxu0 %v16898_v13  ;;  %v18947_v13 = vld [vmem:[#allocation9_spill] sm:$0xff] }
 0xd66   : > { %13320 = vmatpush3.msra.mxu1 %v16882_v39  ;;  %13299 = vmatprep.subr.mxu0 %v16928_v53 }
 0xd67   : > { %13321 = vmatprep.subr.mxu1 %v16888_v16  ;;  %13286 = vmatprep.mubr.f32.mxu1 %v18945_v46 }
 0xd68   : > { %13300 = vmatpush3.msra.mxu0 %v16928_v53  ;;  %13322 = vmatpush3.msra.mxu1 %v16888_v16  ;;  %v18949_v53 = vld [vmem:[#allocation16_spill] sm:$0xff] }
 0xd69   : > { %13287 = vmatmul.mubr.f32.gmra.mxu1 %v18946_v1  ;;  %13301 = vmatprep.subr.mxu0 %v16925_v7 }
 0xd6a   : > { %13323 = vmatprep.subr.mxu1 %v16903_v58  ;;  %13302 = vmatpush3.msra.mxu0 %v16925_v7  ;;  %v18948_v7 = vld [vmem:[#allocation12_spill] sm:$0xff] }
 0xd6b   : > { %13324 = vmatpush3.msra.mxu1 %v16903_v58  ;;  %13303 = vmatprep.subr.mxu0 %v16949_v15 }
 0xd6c   : > { %13325 = vmatprep.subr.mxu1 %v16916_v56  ;;  %13304 = vmatpush3.msra.mxu0 %v16949_v15  ;;  %v18954_v15 = vld [vmem:[#allocation19_spill] sm:$0xff] }
 0xd6d   : > { %13326 = vmatpush3.msra.mxu1 %v16916_v56  ;;  %13305 = vmatprep.subr.mxu0 %v16973_v32 }
 0xd6e   : > { %13327 = vmatprep.subr.mxu1 %v16880_v4  ;;  %13306 = vmatpush3.msra.mxu0 %v16973_v32  ;;  %v18956_v32 = vld [vmem:[#allocation24_spill] sm:$0xff] }
 0xd6f   : > { %13328 = vmatpush3.msra.mxu1 %v16880_v4  ;;  %13307 = vmatprep.subr.mxu0 %v16981_v59 }
 0xd70   : > { %13329 = vmatprep.subr.mxu1 %v16893_v33  ;;  %13308 = vmatpush3.msra.mxu0 %v16981_v59 }
 0xd71   : > { %13330 = vmatpush3.msra.mxu1 %v16893_v33  ;;  %13309 = vmatprep.subr.mxu0 %v16993_v34 }
 0xd72   : > { %13331 = vmatprep.subr.mxu1 %v16891_v55  ;;  %13310 = vmatpush3.msra.mxu0 %v16993_v34 }
 0xd73   : > { %13332 = vmatpush3.msra.mxu1 %v16891_v55  ;;  %13311 = vmatprep.subr.mxu0 %v17009_v60 }
 0xd74   : > { %13333 = vmatprep.subr.mxu1 %v16909_v10  ;;  %13312 = vmatpush3.msra.mxu0 %v17009_v60 }
 0xd75   : > { %13313 = vmatprep.mubr.f32.mxu0 %v18947_v13  ;;  %13334 = vmatpush3.msra.mxu1 %v16909_v10 }
 0xd76   : > { %13314 = vmatmul.mubr.f32.vlgmr.msra.gmra.mxu0 %v18948_v7  ;;  %13335 = vmatprep.subr.mxu1 %v16941_v9 }
 0xd77   : > { %13349 = vmatprep.subr.mxu0 %v16907_v21  ;;  %13336 = vmatpush3.msra.mxu1 %v16941_v9 }
 0xd78   : > { %13350 = vmatpush3.msra.mxu0 %v16907_v21  ;;  %13337 = vmatprep.subr.mxu1 %v16955_v36  ;;  %v18951_v21 = vld [vmem:[#allocation10_spill] sm:$0xff] }
 0xd79   : > { %13351 = vmatprep.subr.mxu0 %v16922_v44  ;;  %13316 = vmatprep.mubr.f32.mxu0 %v18949_v53 }
 0xd7a   : > { %13338 = vmatpush3.msra.mxu1 %v16955_v36  ;;  %13352 = vmatpush3.msra.mxu0 %v16922_v44  ;;  %v18952_v44 = vld [vmem:[#allocation15_spill] sm:$0xff] }
 0xd7b   : > { %13317 = vmatmul.mubr.f32.gmra.mxu0 %v18950_v25  ;;  %13339 = vmatprep.subr.mxu1 %v16975_v57 }
 0xd7c   : > { %13353 = vmatprep.subr.mxu0 %v16946_v29  ;;  %13340 = vmatpush3.msra.mxu1 %v16975_v57 }
 0xd7d   : > { %13354 = vmatpush3.msra.mxu0 %v16946_v29  ;;  %13341 = vmatprep.subr.mxu1 %v16989_v27  ;;  %v18953_v29 = vld [vmem:[#allocation18_spill] sm:$0xff] }
 0xd7e   : > { %13355 = vmatprep.subr.mxu0 %v16953_v18  ;;  %13342 = vmatpush3.msra.mxu1 %v16989_v27 }
 0xd7f   : > { %13343 = vmatprep.mubr.f32.mxu1 %v18951_v21  ;;  %13356 = vmatpush3.msra.mxu0 %v16953_v18 }
 0xd80   : > { %13344 = vmatmul.mubr.f32.vlgmr.msra.gmra.mxu1 %v18952_v44  ;;  %13357 = vmatprep.subr.mxu0 %v16939_v48 }
 0xd81   : > { %13379 = vmatprep.subr.mxu1 %v16882_v39  ;;  %13358 = vmatpush3.msra.mxu0 %v16939_v48 }
 0xd82   : > { %13380 = vmatpush3.msra.mxu1 %v16882_v39  ;;  %13359 = vmatprep.subr.mxu0 %v16962_v54 }
 0xd83   : > { %13381 = vmatprep.subr.mxu1 %v16888_v16  ;;  %13346 = vmatprep.mubr.f32.mxu1 %v18953_v29 }
 0xd84   : > { %13360 = vmatpush3.msra.mxu0 %v16962_v54  ;;  %13382 = vmatpush3.msra.mxu1 %v16888_v16 }
 0xd85   : > { %13347 = vmatmul.mubr.f32.gmra.mxu1 %v18954_v15  ;;  %13361 = vmatprep.subr.mxu0 %v16970_v2 }
 0xd86   : > { %13383 = vmatprep.subr.mxu1 %v16903_v58  ;;  %13362 = vmatpush3.msra.mxu0 %v16970_v2 }
 0xd87   : > { %13384 = vmatpush3.msra.mxu1 %v16903_v58  ;;  %13363 = vmatprep.subr.mxu0 %v16987_v38 }
 0xd88   : > { %13385 = vmatprep.subr.mxu1 %v16916_v56  ;;  %13364 = vmatpush3.msra.mxu0 %v16987_v38 }
 0xd89   : > { %13386 = vmatpush3.msra.mxu1 %v16916_v56  ;;  %13365 = vmatprep.subr.mxu0 %v16999_v45 }
 0xd8a   : > { %13387 = vmatprep.subr.mxu1 %v16880_v4  ;;  %13366 = vmatpush3.msra.mxu0 %v16999_v45  ;;  %v18957_v45 = vld [vmem:[#allocation22_spill] sm:$0xff] }
 0xd8b   : > { %13388 = vmatpush3.msra.mxu1 %v16880_v4  ;;  %13367 = vmatprep.subr.mxu0 %v17006_v31 }
 0xd8c   : > { %13389 = vmatprep.subr.mxu1 %v16893_v33  ;;  %13368 = vmatpush3.msra.mxu0 %v17006_v31  ;;  %v18955_v31 = vld [vmem:[#allocation29_spill] sm:$0xff] }
 0xd8d   : > { %13390 = vmatpush3.msra.mxu1 %v16893_v33  ;;  %13369 = vmatprep.subr.mxu0 %v17016_v14 }
 0xd8e   : > { %13391 = vmatprep.subr.mxu1 %v16891_v55  ;;  %13370 = vmatpush3.msra.mxu0 %v17016_v14 }
 0xd8f   : > { %13392 = vmatpush3.msra.mxu1 %v16891_v55  ;;  %13371 = vmatprep.subr.mxu0 %v17024_v3 }
 0xd90   : > { %13393 = vmatprep.subr.mxu1 %v16909_v10  ;;  %13372 = vmatpush3.msra.mxu0 %v17024_v3 }
 0xd91   : > { %13373 = vmatprep.mubr.f32.mxu0 %v14741_v35  ;;  %13394 = vmatpush3.msra.mxu1 %v16909_v10 }
 0xd92   : > { %13374 = vmatmul.mubr.f32.vlgmr.msra.gmra.mxu0 %v18944_v22  ;;  %13395 = vmatprep.subr.mxu1 %v16941_v9 }
 0xd93   : > { %13396 = vmatpush3.msra.mxu1 %v16941_v9  ;;  %13376 = vmatprep.mubr.f32.mxu0 %v18945_v46 }
 0xd94   : > { %13397 = vmatprep.subr.mxu1 %v16955_v36  ;;  %13403 = vmatprep.mubr.f32.mxu1 %v14741_v35 }
 0xd95   : > { %13398 = vmatpush3.msra.mxu1 %v16955_v36 }
 0xd96   : > { %13377 = vmatmul.mubr.f32.gmra.mxu0 %v18946_v1  ;;  %13399 = vmatprep.subr.mxu1 %v16975_v57 }
 0xd97   : > { %13400 = vmatpush3.msra.mxu1 %v16975_v57  ;;  %13433 = vmatprep.mubr.f32.mxu0 %v18955_v31 }
 0xd98   : > { %13401 = vmatprep.subr.mxu1 %v16989_v27 }
 0xd99   : > { %13402 = vmatpush3.msra.mxu1 %v16989_v27 }
 0xd9a   : > { %13404 = vmatmul.mubr.f32.vlgmr.msra.gmra.mxu1 %v18944_v22 }
 0xd9b   : > { %13406 = vmatprep.mubr.f32.mxu1 %v18945_v46 }
 0xd9e   : > { %13407 = vmatmul.mubr.f32.gmra.mxu1 %v18946_v1 }
 0xd9f   : > { %13463 = vmatprep.mubr.f32.mxu1 %v18914_v28 }
 0xe1a   : > { %v13255_v4 = vpop.f32.mrf.mxu0 }
 0xe1b   : > { %v6177_v57 = vadd.f32 %v13255_v4, %v18956_v32 }
 0xe1c   : > { %v6166_v39 = vpop.f32.mrf.mxu0 }
 0xe1d   : > { %v6167_v3 = vadd.f32 %v6166_v39, %v18958_v20 }
 0xe20   : > { %v13258_v16 = vpop.f32.mrf.mxu0 }
 0xe21   : > { %v6197_v60 = vadd.f32 %v13258_v16, %v18957_v45 }
 0xe22   : > { %v6186_v33 = vpop.f32.mrf.mxu0 }
 0xe23   : > { %v6187_v24 = vadd.f32 %v6186_v33, %v18959_v19 }
 0xe24   : > { %v13285_v55 = vpop.f32.mrf.mxu1 }
 0xe25   : > { %v6334_v38 = vadd.f32 %v13285_v55, %v6177_v57 }
 0xe26   : > { %v6327_v58 = vpop.f32.mrf.mxu1 }
 0xe27   : > { %v6328_v15 = vadd.f32 %v6327_v58, %v6167_v3 }
 0xe29   : > { %v13288_v56 = vpop.f32.mrf.mxu1 }
 0xe2a   : > { %v6346_v26 = vadd.f32 %v13288_v56, %v6197_v60 }
 0xe2b   : > { %v6339_v9 = vpop.f32.mrf.mxu1 }
 0xe2c   : > { %v6340_v29 = vadd.f32 %v6339_v9, %v6187_v24 }
 0xe36   : > { %v13315_v10 = vpop.f32.mrf.mxu0 }
 0xe37   : > { %v6449_v14 = vadd.f32 %v13315_v10, %v6334_v38 }
 0xe38   : > { %v6441_v48 = vpop.f32.mrf.mxu0 }
 0xe39   : > { %v6442_v32 = vadd.f32 %v6441_v48, %v6328_v15 }
 0xe3b   : > { %v13318_v18 = vpop.f32.mrf.mxu0 }
 0xe3c   : > { %v6463_v44 = vadd.f32 %v13318_v18, %v6346_v26 }
 0xe3d   : > { %v6455_v54 = vpop.f32.mrf.mxu0 }
 0xe3e   : > { %v6456_v55 = vadd.f32 %v6455_v54, %v6340_v29 }
 0xe40   : > { %v13345_v36 = vpop.f32.mrf.mxu1 }
 0xe41   : > { %v6556_v8 = vadd.f32 %v13345_v36, %v6449_v14 }
 0xe42   : > { %v6547_v2 = vpop.f32.mrf.mxu1 }
 0xe43   : > { %v6548_v10 = vadd.f32 %v6547_v2, %v6442_v32 }
 0xe45   : > { %v13348_v27 = vpop.f32.mrf.mxu1 }
 0xe46   : > { %v6572_v57 = vadd.f32 %v13348_v27, %v6463_v44 }
 0xe47   : > { %v6563_v61 = vpop.f32.mrf.mxu1 }
 0xe48   : > { %v6564_v38 = vadd.f32 %v6563_v61, %v6456_v55 }
 0xe52   : > { %v13375_v59 = vpop.f32.mrf.mxu0 }
 0xe53   : > { %v6685_v21 = vadd.f32 %v13375_v59, %v6556_v8 }
 0xe54   : > { %v6678_v34 = vpop.f32.mrf.mxu0 }
 0xe55   : > { %v6679_v56 = vadd.f32 %v6678_v34, %v6548_v10 }
 0xe56   : > { %v13378_v31 = vpop.f32.mrf.mxu0 }
 0xe57   : > { %v6697_v39 = vadd.f32 %v13378_v31, %v6572_v57 }
 0xe58   : > { %v6690_v53 = vpop.f32.mrf.mxu0 }
 0xe59   : > { %v6691_v36 = vadd.f32 %v6690_v53, %v6564_v38 }
 0xe5a   : > { %v13405_v4 = vpop.f32.mrf.mxu1 }
 0xe5b   : > { %v6786_v25 = vadd.f32 %v13405_v4, %v6685_v21 }
 0xe5c   : > { %v6779_v16 = vpop.f32.mrf.mxu1 }
 0xe5d   : > { %v17155_v20 = vmax.f32 %v6786_v25, 0.0  ;;  %v6780_v9 = vadd.f32 %v6779_v16, %v6679_v56 }
 0xe5e   : > { %v13408_v33 = vpop.f32.mrf.mxu1 }
 0xe5f   : > { %v6798_v60 = vadd.f32 %v13408_v33, %v6697_v39  ;;  %6807 = vadd.xlane.f32.xlu0 %v17155_v20  ;;  %v17163_v21 = vmax.f32 %v6780_v9, 0.0  ;;  %v6814_v15 = vmul.f32 %v17155_v20, %v17155_v20 }
 0xe60   : > { %v6791_v58 = vpop.f32.mrf.mxu1 }
 0xe61   : > { %v17158_v18 = vmax.f32 %v6798_v60, 0.0  ;;  %v6792_v29 = vadd.f32 %v6791_v58, %v6691_v36  ;;  %v6813_v31 = vmul.f32 %v17163_v21, %v17163_v21 }
 0xe63   : > { %v17160_v44 = vmax.f32 %v6792_v29, 0.0  ;;  %6811 = vadd.xlane.f32.xlu0 %v17158_v18  ;;  %v6816_v53 = vmul.f32 %v17158_v18, %v17158_v18 }
 0xe65   : > { %6809 = vadd.xlane.f32.xlu1 %v17160_v44  ;;  %v6815_v25 = vmul.f32 %v17160_v44, %v17160_v44 }
 0xe67   : > { %6805 = vadd.xlane.f32.xlu0 %v17163_v21 }
 0xe69   : > { %6823 = vadd.xlane.f32.xlu1 %v6816_v53 }
 0xe6b   : > { %6821 = vadd.xlane.f32.xlu0 %v6815_v25 }
 0xe6d   : > { %6819 = vadd.xlane.f32.xlu1 %v6814_v15 }
 0xe6f   : > { %6817 = vadd.xlane.f32.xlu0 %v6813_v31 }
 0xee8   : > { %v6808_v48 = vpop.xlane.xlu0 %6807 }
 0xee9   : > { %v17175_v2 = vmul.f32 0.0078125, %v6808_v48 }
 0xeeb   : > { %v6830_v8 = vmul.f32 128.0, %v17175_v2 }
 0xeec   : > { %v6812_v54 = vpop.xlane.xlu0 %6811 }
 0xeed   : > { %v17177_v32 = vmul.f32 0.0078125, %v6812_v54  ;;  %v6834_v39 = vmul.f32 %v6830_v8, %v17175_v2 }
 0xeee   : > { %v6810_v59 = vpop.xlane.xlu1 %6809 }
 0xeef   : > { %v17179_v27 = vmul.f32 0.0078125, %v6810_v59  ;;  %v6832_v34 = vmul.f32 128.0, %v17177_v32 }
 0xef0   : > { %v6806_v14 = vpop.xlane.xlu0 %6805 }
 0xef1   : > { %v17182_v3 = vmul.f32 0.0078125, %v6806_v14  ;;  %v6836_v24 = vmul.f32 %v6832_v34, %v17177_v32  ;;  %v6831_v26 = vmul.f32 128.0, %v17179_v27 }
 0xef2   : > { %v6824_v61 = vpop.xlane.xlu1 %6823 }
 0xef3   : > { %v6840_v4 = vsub.f32 %v6824_v61, %v6836_v24  ;;  %v6835_v55 = vmul.f32 %v6831_v26, %v17179_v27  ;;  %v6829_v16 = vmul.f32 128.0, %v17182_v3 }
 0xef4   : > { %v6822_v57 = vpop.xlane.xlu0 %6821 }
 0xef5   : > { %v6844_v10 = vmul.f32 0.007874016, %v6840_v4  ;;  %v6839_v38 = vsub.f32 %v6822_v57, %v6835_v55  ;;  %v6833_v58 = vmul.f32 %v6829_v16, %v17182_v3 }
 0xef6   : > { %v6820_v33 = vpop.xlane.xlu1 %6819 }
 0xef7   : > { %v6848_v56 = vmax.f32 %v6844_v10, 0.0  ;;  %v6843_v36 = vmul.f32 0.007874016, %v6839_v38  ;;  %v6838_v60 = vsub.f32 %v6820_v33, %v6834_v39 }
 0xef8   : > { %v6818_v9 = vpop.xlane.xlu0 %6817 }
 0xef9   : > { %14405 = vrsqrt.f32 %v6848_v56  ;;  %v6847_v29 = vmax.f32 %v6843_v36, 0.0  ;;  %v6842_v53 = vmul.f32 0.007874016, %v6838_v60  ;;  %v6837_v25 = vsub.f32 %v6818_v9, %v6833_v58 }
 0xefa   : > { %vm6872_vm4 = vcmp.eq.f32.partialorder %v6848_v56, inf  ;;  %v6875_v34 = vand.u32 2147483648, %v6848_v56  ;;  %vm6874_vm5 = vcmp.eq.f32.partialorder %v6848_v56, 0.0 }
 0xefb   : > { %14407 = vrsqrt.f32 %v6847_v29  ;;  %v6846_v15 = vmax.f32 %v6842_v53, 0.0  ;;  %v6841_v31 = vmul.f32 0.007874016, %v6837_v25  ;;  %vm6865_vm6 = vcmp.eq.f32.partialorder %v6847_v29, inf }
 0xefc   : > { %v6868_v4 = vand.u32 2147483648, %v6847_v29  ;;  %vm6867_vm7 = vcmp.eq.f32.partialorder %v6847_v29, 0.0 }
 0xefd   : > { %14409 = vrsqrt.f32 %v6846_v15  ;;  %v6845_v48 = vmax.f32 %v6841_v31, 0.0  ;;  %vm6858_vm8 = vcmp.eq.f32.partialorder %v6846_v15, inf  ;;  %v6861_v39 = vand.u32 2147483648, %v6846_v15 }
 0xefe   : > { %vm6860_vm9 = vcmp.eq.f32.partialorder %v6846_v15, 0.0  ;;  %v6880_v31 = vsub.f32 %v17158_v18, %v17177_v32 }
 0xeff   : > { %14411 = vrsqrt.f32 %v6845_v48  ;;  %vm6851_vm10 = vcmp.eq.f32.partialorder %v6845_v48, inf  ;;  %v6854_v9 = vand.u32 2147483648, %v6845_v48  ;;  %vm6853_vm11 = vcmp.eq.f32.partialorder %v6845_v48, 0.0 }
 0xf06   : > { %v14406_v54 = vpop.eup %14405 }
 0xf07   : > { %v6871_v59 = vmul.f32 %v14406_v54, %v6848_v56 }
 0xf08   : > { %v14408_v14 = vpop.eup %14407 }
 0xf09   : > { %v6873_v24 = vsel %vm6872_vm4, %v6848_v56, %v6871_v59  ;;  %v6864_v8 = vmul.f32 %v14408_v14, %v6847_v29  ;;  %v14455_v14 = vld [vmem:[%s18735_s9] ss:$0 sm:$0xff] }
 0xf0a   : > { %v6876_v26 = vsel %vm6874_vm5, %v6875_v34, %v6873_v24  ;;  %v14410_v55 = vpop.eup %14409 }
 0xf0b   : > { %v6884_v61 = vadd.f32 1e-06, %v6876_v26  ;;  %v6866_v57 = vsel %vm6865_vm6, %v6847_v29, %v6864_v8  ;;  %v6857_v10 = vmul.f32 %v14410_v55, %v6846_v15  ;;  %v14456_v8 = vld [vmem:[%s18736_s10] ss:$0 sm:$0xff] }
 0xf0c   : > { %v6869_v16 = vsel %vm6867_vm7, %v6868_v4, %v6866_v57  ;;  %v14412_v33 = vpop.eup %14411 }
 0xf0d   : > { %14413 = vrcp.f32 %v6884_v61  ;;  %v6883_v38 = vadd.f32 1e-06, %v6869_v16  ;;  %v6859_v36 = vsel %vm6858_vm8, %v6846_v15, %v6857_v10  ;;  %v6850_v56 = vmul.f32 %v14412_v33, %v6845_v48 }
 0xf0e   : > { %v6862_v60 = vsel %vm6860_vm9, %v6861_v39, %v6859_v36  ;;  %v6879_v15 = vsub.f32 %v17160_v44, %v17179_v27  ;;  %v6877_v27 = vsub.f32 %v17163_v21, %v17182_v3 }
 0xf0f   : > { %14415 = vrcp.f32 %v6883_v38  ;;  %v6882_v58 = vadd.f32 1e-06, %v6862_v60  ;;  %v6852_v53 = vsel %vm6851_vm10, %v6845_v48, %v6850_v56  ;;  %v6878_v48 = vsub.f32 %v17155_v20, %v17175_v2 }
 0xf10   : > { %v6855_v25 = vsel %vm6853_vm11, %v6854_v9, %v6852_v53 }
 0xf11   : > { %14417 = vrcp.f32 %v6882_v58  ;;  %v6881_v29 = vadd.f32 1e-06, %v6855_v25 }
 0xf13   : > { %14419 = vrcp.f32 %v6881_v29 }
 0xf1a   : > { %v14414_v54 = vpop.eup %14413 }
 0xf1b   : > { %v6892_v59 = vmul.f32 %v14414_v54, %v6880_v31 }
 0xf1c   : > { %v14416_v34 = vpop.eup %14415 }
 0xf1d   : > { %v6896_v24 = vmul.f32 %v14455_v14, %v6892_v59  ;;  %v6890_v26 = vmul.f32 %v14416_v34, %v6879_v15 }
 0xf1e   : > { %v14418_v32 = vpop.eup %14417 }
 0xf1f   : > { %v6900_v18 = vadd.f32 %v14456_v8, %v6896_v24  ;;  %v6895_v61 = vmul.f32 %v14455_v14, %v6890_v26  ;;  %v6888_v44 = vmul.f32 %v14418_v32, %v6878_v48 }
 0xf20   : > { %v14420_v55 = vpop.eup %14419 }
 0xf21   : > { %6927 = vrot.lane.b32.xlu1 %v6900_v18, %s18875_s30  ;;  %v6899_v4 = vadd.f32 %v14456_v8, %v6895_v61  ;;  %v6894_v57 = vmul.f32 %v14455_v14, %v6888_v44  ;;  %v6886_v16 = vmul.f32 %v14420_v55, %v6877_v27  ;;  %v17221_v60 = vand.u32 4294901760, %v6900_v18 }
 0xf23   : > { %6925 = vrot.lane.b32.xlu0 %v6899_v4, %s18875_s30  ;;  %v6898_v20 = vadd.f32 %v14456_v8, %v6894_v57  ;;  %v6893_v2 = vmul.f32 %v14455_v14, %v6886_v16  ;;  %v17226_v58 = vand.u32 4294901760, %v6899_v4  ;;  %v17245_v34 = vsub.f32 %v6900_v18, %v17221_v60 }
 0xf25   : > { %6923 = vrot.lane.b32.xlu1 %v6898_v20, %s18875_s30  ;;  %v6897_v10 = vadd.f32 %v14456_v8, %v6893_v2  ;;  %v17247_v14 = vand.u32 4294901760, %v6898_v20  ;;  %v17254_v8 = vsub.f32 %v6899_v4, %v17226_v58  ;;  %v17269_v16 = vand.u32 4294901760, %v17245_v34 }
 0xf27   : > { %6911 = vrot.lane.b32.xlu0 %v6900_v18, %s18901_s0  ;;  %v17256_v32 = vand.u32 4294901760, %v6897_v10 }
 0xf29   : > { %6921 = vrot.lane.b32.xlu1 %v6897_v10, %s18875_s30 }
 0xf2b   : > { %6907 = vrot.lane.b32.xlu0 %v6898_v20, %s18901_s0 }
 0xf2d   : > { %6909 = vrot.lane.b32.xlu1 %v6899_v4, %s18901_s0 }
 0xf31   : > { %6905 = vrot.lane.b32.xlu1 %v6897_v10, %s18901_s0 }
 0xf93   : > { %v6928_v21 = vpop.permute.xlu1 %6927 }
 0xf94   : > { %v6936_v3 = vsel %vm1103_vm2, %v6928_v21, 0.0 }
 0xf95   : > { %v17214_v38 = vand.u32 4294901760, %v6936_v3  ;;  %v6926_v39 = vpop.permute.xlu0 %6925 }
 0xf96   : > { %v6935_v36 = vsel %vm1103_vm2, %v6926_v39, 0.0 }
 0xf97   : > { %v17217_v33 = vsub.f32 %v6936_v3, %v17214_v38  ;;  %13409 = vmatprep.subr.mxu0 %v17214_v38  ;;  %v17223_v56 = vand.u32 4294901760, %v6935_v36  ;;  %v6924_v9 = vpop.permute.xlu1 %6923 }
 0xf98   : > { %13410 = vmatpush3.msra.mxu0 %v17214_v38  ;;  %v6934_v29 = vsel %vm1103_vm2, %v6924_v9, 0.0 }
 0xf99   : > { %v17229_v53 = vand.u32 4294901760, %v17217_v33  ;;  %v17232_v25 = vsub.f32 %v6935_v36, %v17223_v56  ;;  %13411 = vmatprep.subr.mxu0 %v17223_v56  ;;  %v6912_v31 = vpop.permute.xlu0 %6911  ;;  %v17236_v54 = vand.u32 4294901760, %v6934_v29  ;;  %v17280_v36 = vsub.f32 %v6898_v20, %v17247_v14 }
 0xf9a   : > { %13412 = vmatpush3.msra.mxu0 %v17223_v56  ;;  %v6920_v61 = vsel %vm1086_vm3, 0.0, %v6912_v31  ;;  %v17288_v31 = vsub.f32 %v6897_v10, %v17256_v32 }
 0xf9b   : > { %v7066_v59 = vsub.f32 %v17217_v33, %v17229_v53  ;;  %v17242_v15 = vand.u32 4294901760, %v17232_v25  ;;  %v17250_v24 = vsub.f32 %v6934_v29, %v17236_v54  ;;  %v6922_v26 = vpop.permute.xlu1 %6921  ;;  %13413 = vmatprep.subr.mxu0 %v17236_v54  ;;  %v17271_v2 = vand.u32 4294901760, %v6920_v61 }
 0xf9c   : > { %v6933_v44 = vsel %vm1103_vm2, %v6922_v26, 0.0  ;;  %13414 = vmatpush3.msra.mxu0 %v17236_v54  ;;  %v17285_v29 = vand.u32 4294901760, %v17254_v8  ;;  %v17320_v7 = vand.u32 4294901760, %v17288_v31 }
 0xf9d   : > { %v7067_v48 = vand.u32 4294901760, %v7066_v59  ;;  %v7073_v18 = vsub.f32 %v17232_v25, %v17242_v15  ;;  %v17263_v27 = vand.u32 4294901760, %v6933_v44  ;;  %v17266_v55 = vand.u32 4294901760, %v17250_v24  ;;  %v6908_v57 = vpop.permute.xlu0 %6907 }
 0xf9e   : > { %v6918_v59 = vsel %vm1086_vm3, 0.0, %v6908_v57  ;;  %v7094_v57 = vsub.f32 %v17245_v34, %v17269_v16  ;;  %v7101_v45 = vsub.f32 %v17254_v8, %v17285_v29  ;;  %v7115_v46 = vsub.f32 %v17288_v31, %v17320_v7 }
 0xf9f   : > { %13439 = vmatprep.subr.mxu1 %v7067_v48  ;;  %v7074_v4 = vand.u32 4294901760, %v7073_v18  ;;  %v17274_v21 = vsub.f32 %v6933_v44, %v17263_v27  ;;  %v6910_v3 = vpop.permute.xlu1 %6909  ;;  %13415 = vmatprep.subr.mxu0 %v17263_v27  ;;  %v7080_v39 = vsub.f32 %v17250_v24, %v17266_v55  ;;  %v17299_v44 = vsub.f32 %v6920_v61, %v17271_v2 }
 0xfa0   : > { %13440 = vmatpush3.msra.mxu1 %v7067_v48  ;;  %v6919_v9 = vsel %vm1086_vm3, 0.0, %v6910_v3  ;;  %13416 = vmatpush3.msra.mxu0 %v17263_v27  ;;  %v17309_v3 = vand.u32 4294901760, %v6918_v59  ;;  %v7102_v1 = vand.u32 4294901760, %v7101_v45 }
 0xfa1   : > { %13441 = vmatprep.subr.mxu1 %v7074_v4  ;;  %v17291_v26 = vand.u32 4294901760, %v6919_v9  ;;  %13417 = vmatprep.subr.mxu0 %v17221_v60  ;;  %v7081_v20 = vand.u32 4294901760, %v7080_v39  ;;  %v17295_v48 = vand.u32 4294901760, %v17274_v21 }
 0xfa2   : > { %13442 = vmatpush3.msra.mxu1 %v7074_v4  ;;  %13418 = vmatpush3.msra.mxu0 %v17221_v60  ;;  %v17307_v4 = vand.u32 4294901760, %v17280_v36 }
 0xfa3   : > { %v6906_v18 = vpop.permute.xlu1 %6905  ;;  %13419 = vmatprep.subr.mxu0 %v17226_v58  ;;  %13443 = vmatprep.subr.mxu1 %v7081_v20  ;;  %v7087_v10 = vsub.f32 %v17274_v21, %v17295_v48  ;;  %v17314_v61 = vsub.f32 %v6919_v9, %v17291_v26 }
 0xfa4   : > { %v6917_v39 = vsel %vm1086_vm3, 0.0, %v6906_v18  ;;  %13420 = vmatpush3.msra.mxu0 %v17226_v58  ;;  %13444 = vmatpush3.msra.mxu1 %v7081_v20  ;;  %v7095_v20 = vand.u32 4294901760, %v7094_v57  ;;  %v7108_v9 = vsub.f32 %v17280_v36, %v17307_v4  ;;  %v17329_v18 = vand.u32 4294901760, %v17299_v44 }
 0xfa5   : > { %13421 = vmatprep.subr.mxu0 %v17247_v14  ;;  %v7088_v19 = vand.u32 4294901760, %v7087_v10  ;;  %v17322_v13 = vand.u32 4294901760, %v6917_v39  ;;  %v17332_v10 = vsub.f32 %v6918_v59, %v17309_v3  ;;  %v17339_v57 = vand.u32 4294901760, %v17314_v61 }
 0xfa6   : > { %13422 = vmatpush3.msra.mxu0 %v17247_v14  ;;  %v7122_v59 = vsub.f32 %v17299_v44, %v17329_v18 }
 0xfa7   : > { %13423 = vmatprep.subr.mxu0 %v17256_v32  ;;  %13445 = vmatprep.subr.mxu1 %v7088_v19  ;;  %v17342_v22 = vsub.f32 %v6917_v39, %v17322_v13  ;;  %v17350_v45 = vand.u32 4294901760, %v17332_v10  ;;  %v7116_v39 = vand.u32 4294901760, %v7115_v46  ;;  %v18960_v46 = vld [vmem:[#allocation39_spill] sm:$0xff] }
 0xfa8   : > { %13424 = vmatpush3.msra.mxu0 %v17256_v32  ;;  %13446 = vmatpush3.msra.mxu1 %v7088_v19  ;;  %v7109_v19 = vand.u32 4294901760, %v7108_v9 }
 0xfa9   : > { %13425 = vmatprep.subr.mxu0 %v17271_v2  ;;  %13447 = vmatprep.subr.mxu1 %v7095_v20  ;;  %v17357_v9 = vand.u32 4294901760, %v17342_v22  ;;  %v7136_v37 = vsub.f32 %v17332_v10, %v17350_v45 }
 0xfaa   : > { %13426 = vmatpush3.msra.mxu0 %v17271_v2  ;;  %13448 = vmatpush3.msra.mxu1 %v7095_v20  ;;  %v7129_v20 = vsub.f32 %v17314_v61, %v17339_v57 }
 0xfab   : > { %13427 = vmatprep.subr.mxu0 %v17291_v26  ;;  %13449 = vmatprep.subr.mxu1 %v7102_v1 }
 0xfac   : > { %13428 = vmatpush3.msra.mxu0 %v17291_v26  ;;  %13450 = vmatpush3.msra.mxu1 %v7102_v1  ;;  %v7123_v1 = vand.u32 4294901760, %v7122_v59  ;;  %v7130_v62 = vand.u32 4294901760, %v7129_v20  ;;  %v7137_v59 = vand.u32 4294901760, %v7136_v37  ;;  %v18964_v37 = vld [vmem:[#allocation33_spill] sm:$0xff] }
 0xfad   : > { %13429 = vmatprep.subr.mxu0 %v17309_v3  ;;  %13451 = vmatprep.subr.mxu1 %v7109_v19 }
 0xfae   : > { %13430 = vmatpush3.msra.mxu0 %v17309_v3  ;;  %13452 = vmatpush3.msra.mxu1 %v7109_v19  ;;  %v7143_v19 = vsub.f32 %v17342_v22, %v17357_v9 }
 0xfaf   : > { %13431 = vmatprep.subr.mxu0 %v17322_v13  ;;  %13453 = vmatprep.subr.mxu1 %v7116_v39 }
 0xfb0   : > { %13432 = vmatpush3.msra.mxu0 %v17322_v13  ;;  %13454 = vmatpush3.msra.mxu1 %v7116_v39  ;;  %v18961_v39 = vld [vmem:[#allocation41_spill] sm:$0xff]  ;;  %v7144_v20 = vand.u32 4294901760, %v7143_v19 }
 0xfb1   : > { %13434 = vmatmul.mubr.f32.vlgmr.msra.gmra.mxu0 %v18960_v46  ;;  %13455 = vmatprep.subr.mxu1 %v7123_v1 }
 0xfb2   : > { %13469 = vmatprep.subr.mxu0 %v17217_v33  ;;  %13456 = vmatpush3.msra.mxu1 %v7123_v1 }
 0xfb3   : > { %13470 = vmatpush3.msra.mxu0 %v17217_v33  ;;  %13457 = vmatprep.subr.mxu1 %v7130_v62  ;;  %v18962_v33 = vld [vmem:[#allocation30_spill] sm:$0xff] }
 0xfb4   : > { %13471 = vmatprep.subr.mxu0 %v17232_v25  ;;  %13436 = vmatprep.mubr.f32.mxu0 %v18920_v51 }
 0xfb5   : > { %13458 = vmatpush3.msra.mxu1 %v7130_v62  ;;  %13472 = vmatpush3.msra.mxu0 %v17232_v25  ;;  %v18963_v62 = vld [vmem:[#allocation32_spill] sm:$0xff]  ;;  %v18965_v25 = vld [vmem:[#allocation27_spill] sm:$0xff] }
 0xfb6   : > { %13437 = vmatmul.mubr.f32.gmra.mxu0 %v18961_v39  ;;  %13459 = vmatprep.subr.mxu1 %v7137_v59 }
 0xfb7   : > { %13473 = vmatprep.subr.mxu0 %v17250_v24  ;;  %13460 = vmatpush3.msra.mxu1 %v7137_v59 }
 0xfb8   : > { %13474 = vmatpush3.msra.mxu0 %v17250_v24  ;;  %13461 = vmatprep.subr.mxu1 %v7144_v20  ;;  %v18967_v24 = vld [vmem:[#allocation34_spill] sm:$0xff] }
 0xfb9   : > { %13475 = vmatprep.subr.mxu0 %v17274_v21  ;;  %13462 = vmatpush3.msra.mxu1 %v7144_v20  ;;  %v18977_v20 = vld [vmem:[#allocation45_spill] sm:$0xff] }
 0xfba   : > { %13476 = vmatpush3.msra.mxu0 %v17274_v21  ;;  %13464 = vmatmul.mubr.f32.vlgmr.msra.gmra.mxu1 %v18962_v33 }
 0xfbb   : > { %13477 = vmatprep.subr.mxu0 %v17245_v34  ;;  %13499 = vmatprep.subr.mxu1 %v17214_v38 }
 0xfbc   : > { %13478 = vmatpush3.msra.mxu0 %v17245_v34  ;;  %13500 = vmatpush3.msra.mxu1 %v17214_v38  ;;  %v18966_v34 = vld [vmem:[#allocation31_spill] sm:$0xff] }
 0xfbd   : > { %13479 = vmatprep.subr.mxu0 %v17254_v8  ;;  %13501 = vmatprep.subr.mxu1 %v17223_v56 }
 0xfbe   : > { %13466 = vmatprep.mubr.f32.mxu1 %v18963_v62  ;;  %13480 = vmatpush3.msra.mxu0 %v17254_v8  ;;  %v18971_v8 = vld [vmem:[#allocation37_spill] sm:$0xff] }
 0xfbf   : > { %13502 = vmatpush3.msra.mxu1 %v17223_v56  ;;  %13481 = vmatprep.subr.mxu0 %v17280_v36 }
 0xfc0   : > { %13467 = vmatmul.mubr.f32.gmra.mxu1 %v18964_v37  ;;  %13503 = vmatprep.subr.mxu1 %v17236_v54 }
 0xfc1   : > { %13482 = vmatpush3.msra.mxu0 %v17280_v36  ;;  %13504 = vmatpush3.msra.mxu1 %v17236_v54 }
 0xfc2   : > { %13483 = vmatprep.subr.mxu0 %v17288_v31  ;;  %13505 = vmatprep.subr.mxu1 %v17263_v27 }
 0xfc3   : > { %13484 = vmatpush3.msra.mxu0 %v17288_v31  ;;  %13506 = vmatpush3.msra.mxu1 %v17263_v27 }
 0xfc4   : > { %13485 = vmatprep.subr.mxu0 %v17299_v44  ;;  %13507 = vmatprep.subr.mxu1 %v17221_v60 }
 0xfc5   : > { %13486 = vmatpush3.msra.mxu0 %v17299_v44  ;;  %13508 = vmatpush3.msra.mxu1 %v17221_v60  ;;  %v18974_v44 = vld [vmem:[#allocation42_spill] sm:$0xff] }
 0xfc6   : > { %13487 = vmatprep.subr.mxu0 %v17314_v61  ;;  %13509 = vmatprep.subr.mxu1 %v17226_v58 }
 0xfc7   : > { %13488 = vmatpush3.msra.mxu0 %v17314_v61  ;;  %13510 = vmatpush3.msra.mxu1 %v17226_v58 }
 0xfc8   : > { %13489 = vmatprep.subr.mxu0 %v17332_v10  ;;  %13511 = vmatprep.subr.mxu1 %v17247_v14 }
 0xfc9   : > { %13490 = vmatpush3.msra.mxu0 %v17332_v10  ;;  %13512 = vmatpush3.msra.mxu1 %v17247_v14 }
 0xfca   : > { %13491 = vmatprep.subr.mxu0 %v17342_v22  ;;  %13513 = vmatprep.subr.mxu1 %v17256_v32 }
 0xfcb   : > { %13492 = vmatpush3.msra.mxu0 %v17342_v22  ;;  %13493 = vmatprep.mubr.f32.mxu0 %v18965_v25  ;;  %v18968_v22 = vld [vmem:[#allocation36_spill] sm:$0xff] }
 0xfcc   : > { %13514 = vmatpush3.msra.mxu1 %v17256_v32  ;;  %13494 = vmatmul.mubr.f32.vlgmr.msra.gmra.mxu0 %v18966_v34 }
 0xfcd   : > { %13515 = vmatprep.subr.mxu1 %v17271_v2  ;;  %13529 = vmatprep.subr.mxu0 %v17229_v53 }
 0xfce   : > { %13516 = vmatpush3.msra.mxu1 %v17271_v2  ;;  %13530 = vmatpush3.msra.mxu0 %v17229_v53  ;;  %v18969_v53 = vld [vmem:[#allocation28_spill] sm:$0xff] }
 0xfcf   : > { %13517 = vmatprep.subr.mxu1 %v17291_v26  ;;  %13531 = vmatprep.subr.mxu0 %v17242_v15 }
 0xfd0   : > { %13496 = vmatprep.mubr.f32.mxu0 %v18967_v24  ;;  %13518 = vmatpush3.msra.mxu1 %v17291_v26 }
 0xfd1   : > { %13532 = vmatpush3.msra.mxu0 %v17242_v15  ;;  %13519 = vmatprep.subr.mxu1 %v17309_v3  ;;  %v18970_v15 = vld [vmem:[#allocation35_spill] sm:$0xff] }
 0xfd2   : > { %13497 = vmatmul.mubr.f32.gmra.mxu0 %v18968_v22  ;;  %13533 = vmatprep.subr.mxu0 %v17266_v55 }
 0xfd3   : > { %13520 = vmatpush3.msra.mxu1 %v17309_v3  ;;  %13534 = vmatpush3.msra.mxu0 %v17266_v55  ;;  %v18972_v55 = vld [vmem:[#allocation38_spill] sm:$0xff] }
 0xfd4   : > { %13521 = vmatprep.subr.mxu1 %v17322_v13  ;;  %13535 = vmatprep.subr.mxu0 %v17295_v48 }
 0xfd5   : > { %13522 = vmatpush3.msra.mxu1 %v17322_v13  ;;  %13523 = vmatprep.mubr.f32.mxu1 %v18969_v53 }
 0xfd6   : > { %13536 = vmatpush3.msra.mxu0 %v17295_v48  ;;  %13524 = vmatmul.mubr.f32.vlgmr.msra.gmra.mxu1 %v18970_v15 }
 0xfd7   : > { %13537 = vmatprep.subr.mxu0 %v17269_v16  ;;  %13559 = vmatprep.subr.mxu1 %v17214_v38 }
 0xfd8   : > { %13538 = vmatpush3.msra.mxu0 %v17269_v16  ;;  %13560 = vmatpush3.msra.mxu1 %v17214_v38 }
 0xfd9   : > { %13539 = vmatprep.subr.mxu0 %v17285_v29  ;;  %13561 = vmatprep.subr.mxu1 %v17223_v56 }
 0xfda   : > { %13526 = vmatprep.mubr.f32.mxu1 %v18971_v8  ;;  %13540 = vmatpush3.msra.mxu0 %v17285_v29 }
 0xfdb   : > { %13562 = vmatpush3.msra.mxu1 %v17223_v56  ;;  %13541 = vmatprep.subr.mxu0 %v17307_v4 }
 0xfdc   : > { %13527 = vmatmul.mubr.f32.gmra.mxu1 %v18972_v55  ;;  %13563 = vmatprep.subr.mxu1 %v17236_v54 }
 0xfdd   : > { %13542 = vmatpush3.msra.mxu0 %v17307_v4  ;;  %13564 = vmatpush3.msra.mxu1 %v17236_v54 }
 0xfde   : > { %13543 = vmatprep.subr.mxu0 %v17320_v7  ;;  %13565 = vmatprep.subr.mxu1 %v17263_v27 }
 0xfdf   : > { %13544 = vmatpush3.msra.mxu0 %v17320_v7  ;;  %13566 = vmatpush3.msra.mxu1 %v17263_v27  ;;  %v18973_v7 = vld [vmem:[#allocation46_spill] sm:$0xff] }
 0xfe0   : > { %13545 = vmatprep.subr.mxu0 %v17329_v18  ;;  %13567 = vmatprep.subr.mxu1 %v17221_v60 }
 0xfe1   : > { %13546 = vmatpush3.msra.mxu0 %v17329_v18  ;;  %13568 = vmatpush3.msra.mxu1 %v17221_v60 }
 0xfe2   : > { %13547 = vmatprep.subr.mxu0 %v17339_v57  ;;  %13569 = vmatprep.subr.mxu1 %v17226_v58 }
 0xfe3   : > { %13548 = vmatpush3.msra.mxu0 %v17339_v57  ;;  %13570 = vmatpush3.msra.mxu1 %v17226_v58 }
 0xfe4   : > { %13549 = vmatprep.subr.mxu0 %v17350_v45  ;;  %13571 = vmatprep.subr.mxu1 %v17247_v14 }
 0xfe5   : > { %13550 = vmatpush3.msra.mxu0 %v17350_v45  ;;  %13572 = vmatpush3.msra.mxu1 %v17247_v14  ;;  %v18976_v45 = vld [vmem:[#allocation44_spill] sm:$0xff] }
 0xfe6   : > { %13551 = vmatprep.subr.mxu0 %v17357_v9  ;;  %13573 = vmatprep.subr.mxu1 %v17256_v32 }
 0xfe7   : > { %13552 = vmatpush3.msra.mxu0 %v17357_v9  ;;  %13553 = vmatprep.mubr.f32.mxu0 %v18914_v28 }
 0xfe8   : > { %13574 = vmatpush3.msra.mxu1 %v17256_v32  ;;  %13554 = vmatmul.mubr.f32.vlgmr.msra.gmra.mxu0 %v18962_v33 }
 0xfe9   : > { %13575 = vmatprep.subr.mxu1 %v17271_v2  ;;  %13556 = vmatprep.mubr.f32.mxu0 %v18963_v62 }
 0xfea   : > { %13576 = vmatpush3.msra.mxu1 %v17271_v2  ;;  %13583 = vmatprep.mubr.f32.mxu1 %v18914_v28 }
 0xfeb   : > { %13577 = vmatprep.subr.mxu1 %v17291_v26 }
 0xfec   : > { %13578 = vmatpush3.msra.mxu1 %v17291_v26  ;;  %13557 = vmatmul.mubr.f32.gmra.mxu0 %v18964_v37 }
 0xfed   : > { %13579 = vmatprep.subr.mxu1 %v17309_v3  ;;  %13613 = vmatprep.mubr.f32.mxu0 %v18973_v7 }
 0xfee   : > { %13580 = vmatpush3.msra.mxu1 %v17309_v3  ;;  %v18975_v3 = vld [vmem:[#allocation43_spill] sm:$0xff] }
 0xfef   : > { %13581 = vmatprep.subr.mxu1 %v17322_v13 }
 0xff0   : > { %13582 = vmatpush3.msra.mxu1 %v17322_v13 }
 0xff1   : > { %13584 = vmatmul.mubr.f32.vlgmr.msra.gmra.mxu1 %v18962_v33 }
 0xff2   : > { %13586 = vmatprep.mubr.f32.mxu1 %v18963_v62 }
 0xff5   : > { %13587 = vmatmul.mubr.f32.gmra.mxu1 %v18964_v37 }
 0xff6   : > { %13643 = vmatprep.mubr.f32.mxu1 %v15553_v52 }
0x1071   : > { %v13435_v38 = vpop.f32.mrf.mxu0 }
0x1072   : > { %v7031_v9 = vadd.f32 %v13435_v38, %v18976_v45 }
0x1073   : > { %v7020_v60 = vpop.f32.mrf.mxu0 }
0x1074   : > { %v7021_v7 = vadd.f32 %v7020_v60, %v18977_v20 }
0x1076   : > { %v13438_v56 = vpop.f32.mrf.mxu0 }
0x1077   : > { %v7051_v4 = vadd.f32 %v13438_v56, %v18974_v44 }
0x1078   : > { %v7040_v54 = vpop.f32.mrf.mxu0 }
0x1079   : > { %v7041_v61 = vadd.f32 %v7040_v54, %v18975_v3 }
0x107a   : > { %v13465_v58 = vpop.f32.mrf.mxu1 }
0x107b   : > { %v7188_v55 = vadd.f32 %v13465_v58, %v7031_v9 }
0x107c   : > { %v7181_v14 = vpop.f32.mrf.mxu1 }
0x107d   : > { %v7182_v24 = vadd.f32 %v7181_v14, %v7021_v7 }
0x1080   : > { %v13468_v27 = vpop.f32.mrf.mxu1 }
0x1081   : > { %v7200_v18 = vadd.f32 %v13468_v27, %v7051_v4 }
0x1082   : > { %v7193_v2 = vpop.f32.mrf.mxu1 }
0x1083   : > { %v7194_v1 = vadd.f32 %v7193_v2, %v7041_v61 }
0x108c   : > { %v13495_v32 = vpop.f32.mrf.mxu0 }
0x108d   : > { %v7303_v34 = vadd.f32 %v13495_v32, %v7188_v55 }
0x108e   : > { %v7295_v16 = vpop.f32.mrf.mxu0 }
0x108f   : > { %v7296_v27 = vadd.f32 %v7295_v16, %v7182_v24 }
0x1092   : > { %v13498_v21 = vpop.f32.mrf.mxu0 }
0x1093   : > { %v7317_v19 = vadd.f32 %v13498_v21, %v7200_v18 }
0x1094   : > { %v7309_v36 = vpop.f32.mrf.mxu0 }
0x1095   : > { %v7310_v8 = vadd.f32 %v7309_v36, %v7194_v1 }
0x1096   : > { %v13525_v13 = vpop.f32.mrf.mxu1 }
0x1097   : > { %v7410_v4 = vadd.f32 %v13525_v13, %v7303_v34 }
0x1098   : > { %v7401_v29 = vpop.f32.mrf.mxu1 }
0x1099   : > { %v7402_v2 = vadd.f32 %v7401_v29, %v7296_v27 }
0x109c   : > { %v13528_v26 = vpop.f32.mrf.mxu1 }
0x109d   : > { %v7426_v15 = vadd.f32 %v13528_v26, %v7317_v19 }
0x109e   : > { %v7417_v10 = vpop.f32.mrf.mxu1 }
0x109f   : > { %v7418_v56 = vadd.f32 %v7417_v10, %v7310_v8 }
0x10a8   : > { %v13555_v31 = vpop.f32.mrf.mxu0 }
0x10a9   : > { %v7539_v21 = vadd.f32 %v13555_v31, %v7410_v4 }
0x10aa   : > { %v7532_v48 = vpop.f32.mrf.mxu0 }
0x10ab   : > { %v7533_v60 = vadd.f32 %v7532_v48, %v7402_v2 }
0x10ac   : > { %v13558_v57 = vpop.f32.mrf.mxu0 }
0x10ad   : > { %v7551_v44 = vadd.f32 %v13558_v57, %v7426_v15 }
0x10ae   : > { %v7544_v53 = vpop.f32.mrf.mxu0 }
0x10af   : > { %v7545_v3 = vadd.f32 %v7544_v53, %v7418_v56 }
0x10b1   : > { %v13585_v59 = vpop.f32.mrf.mxu1 }
0x10b2   : > { %v7640_v58 = vadd.f32 %v13585_v59, %v7539_v21 }
0x10b3   : > { %v7633_v22 = vpop.f32.mrf.mxu1 }
0x10b4   : > { %v7634_v36 = vadd.f32 %v7633_v22, %v7533_v60  ;;  %v17509_v32 = vand.u32 4294901760, %v7640_v58 }
0x10b5   : > { %v13588_v54 = vpop.f32.mrf.mxu1 }
0x10b6   : > { %v7652_v25 = vadd.f32 %v13588_v54, %v7551_v44  ;;  %v17543_v19 = vsub.f32 %v7640_v58, %v17509_v32 }
0x10b7   : > { %v7645_v38 = vpop.f32.mrf.mxu1 }
0x10b8   : > { %v7646_v61 = vadd.f32 %v7645_v38, %v7545_v3  ;;  %7681 = vrot.lane.b32.xlu0 %v7652_v25, %s18938_s15  ;;  %v17498_v53 = vand.u32 4294901760, %v7652_v25  ;;  %v17527_v3 = vand.u32 4294901760, %v7634_v36 }
0x10ba   : > { %7679 = vrot.lane.b32.xlu1 %v7646_v61, %s18938_s15  ;;  %v17511_v16 = vand.u32 4294901760, %v7646_v61  ;;  %v17516_v29 = vsub.f32 %v7652_v25, %v17498_v53 }
0x10bc   : > { %7677 = vrot.lane.b32.xlu0 %v7640_v58, %s18938_s15  ;;  %v17546_v59 = vsub.f32 %v7646_v61, %v17511_v16  ;;  %v17557_v2 = vand.u32 4294901760, %v17516_v29 }
0x10be   : > { %7675 = vrot.lane.b32.xlu1 %v7634_v36, %s18938_s15 }
0x10c0   : > { %7665 = vrot.lane.b32.xlu0 %v7652_v25, %s14525_s16 }
0x10c2   : > { %7663 = vrot.lane.b32.xlu1 %v7646_v61, %s14525_s16 }
0x10c4   : > { %7661 = vrot.lane.b32.xlu0 %v7640_v58, %s14525_s16  ;;  %v17567_v58 = vsub.f32 %v7634_v36, %v17527_v3 }
0x10c6   : > { %7659 = vrot.lane.b32.xlu1 %v7634_v36, %s14525_s16  ;;  %v17580_v36 = vand.u32 4294901760, %v17546_v59  ;;  %v17605_v37 = vand.u32 4294901760, %v17567_v58 }
0x112a   : > { %v7682_v34 = vpop.permute.xlu0 %7681 }
0x112b   : > { %v7690_v24 = vsel %vm2808_vm12, %v7682_v34, 0.0 }
0x112c   : > { %v17500_v15 = vand.u32 4294901760, %v7690_v24  ;;  %v7680_v22 = vpop.permute.xlu1 %7679 }
0x112d   : > { %v7689_v8 = vsel %vm2808_vm12, %v7680_v22, 0.0 }
0x112e   : > { %v17504_v55 = vsub.f32 %v7690_v24, %v17500_v15  ;;  %v17506_v7 = vand.u32 4294901760, %v7689_v8  ;;  %13589 = vmatprep.subr.mxu0 %v17500_v15  ;;  %v7678_v14 = vpop.permute.xlu0 %7677 }
0x112f   : > { %v7688_v13 = vsel %vm2808_vm12, %v7678_v14, 0.0  ;;  %13590 = vmatpush3.msra.mxu0 %v17500_v15 }
0x1130   : > { %v17519_v31 = vsub.f32 %v7689_v8, %v17506_v7  ;;  %v17521_v26 = vand.u32 4294901760, %v7688_v13  ;;  %13591 = vmatprep.subr.mxu0 %v17506_v7  ;;  %v7676_v48 = vpop.permute.xlu1 %7675  ;;  %v17525_v44 = vand.u32 4294901760, %v17504_v55 }
0x1131   : > { %v7687_v18 = vsel %vm2808_vm12, %v7676_v48, 0.0  ;;  %13592 = vmatpush3.msra.mxu0 %v17506_v7 }
0x1132   : > { %v17532_v25 = vsub.f32 %v7688_v13, %v17521_v26  ;;  %v17534_v10 = vand.u32 4294901760, %v7687_v18  ;;  %v7666_v57 = vpop.permute.xlu0 %7665  ;;  %13593 = vmatprep.subr.mxu0 %v17521_v26  ;;  %v7820_v9 = vsub.f32 %v17504_v55, %v17525_v44  ;;  %v17540_v1 = vand.u32 4294901760, %v17519_v31 }
0x1133   : > { %v7674_v56 = vsel %vm2791_vm13, 0.0, %v7666_v57  ;;  %13594 = vmatpush3.msra.mxu0 %v17521_v26  ;;  %v7848_v57 = vsub.f32 %v17516_v29, %v17557_v2 }
0x1134   : > { %v17551_v54 = vsub.f32 %v7687_v18, %v17534_v10  ;;  %13595 = vmatprep.subr.mxu0 %v17534_v10  ;;  %v7664_v27 = vpop.permute.xlu1 %7663  ;;  %v7821_v4 = vand.u32 4294901760, %v7820_v9  ;;  %v7827_v38 = vsub.f32 %v17519_v31, %v17540_v1  ;;  %v17559_v21 = vand.u32 4294901760, %v7674_v56 }
0x1135   : > { %v7673_v61 = vsel %vm2791_vm13, 0.0, %v7664_v27  ;;  %13596 = vmatpush3.msra.mxu0 %v17534_v10  ;;  %v17564_v60 = vand.u32 4294901760, %v17532_v25  ;;  %v17588_v9 = vand.u32 4294901760, %v17543_v19 }
0x1136   : > { %13619 = vmatprep.subr.mxu1 %v7821_v4  ;;  %v7662_v34 = vpop.permute.xlu0 %7661  ;;  %13597 = vmatprep.subr.mxu0 %v17498_v53  ;;  %v7828_v24 = vand.u32 4294901760, %v7827_v38  ;;  %v17571_v22 = vand.u32 4294901760, %v17551_v54  ;;  %v17573_v8 = vand.u32 4294901760, %v7673_v61  ;;  %v17591_v27 = vsub.f32 %v7674_v56, %v17559_v21 }
0x1137   : > { %v7672_v14 = vsel %vm2791_vm13, 0.0, %v7662_v34  ;;  %13598 = vmatpush3.msra.mxu0 %v17498_v53  ;;  %13620 = vmatpush3.msra.mxu1 %v7821_v4  ;;  %v7834_v13 = vsub.f32 %v17532_v25, %v17564_v60  ;;  %v7855_v56 = vsub.f32 %v17546_v59, %v17580_v36 }
0x1138   : > { %13599 = vmatprep.subr.mxu0 %v17511_v16  ;;  %13621 = vmatprep.subr.mxu1 %v7828_v24  ;;  %v7660_v48 = vpop.permute.xlu1 %7659  ;;  %v7841_v18 = vsub.f32 %v17551_v54, %v17571_v22  ;;  %v17593_v4 = vand.u32 4294901760, %v7672_v14  ;;  %v17599_v45 = vsub.f32 %v7673_v61, %v17573_v8  ;;  %v7849_v61 = vand.u32 4294901760, %v7848_v57 }
0x1139   : > { %v7671_v38 = vsel %vm2791_vm13, 0.0, %v7660_v48  ;;  %13600 = vmatpush3.msra.mxu0 %v17511_v16  ;;  %13622 = vmatpush3.msra.mxu1 %v7828_v24  ;;  %v7835_v34 = vand.u32 4294901760, %v7834_v13  ;;  %v7862_v13 = vsub.f32 %v17543_v19, %v17588_v9 }
0x113a   : > { %13601 = vmatprep.subr.mxu0 %v17509_v32  ;;  %v7842_v20 = vand.u32 4294901760, %v7841_v18  ;;  %v17607_v48 = vand.u32 4294901760, %v7671_v38  ;;  %v17611_v24 = vsub.f32 %v7672_v14, %v17593_v4  ;;  %v17617_v18 = vand.u32 4294901760, %v17591_v27 }
0x113b   : > { %13623 = vmatprep.subr.mxu1 %v7835_v34  ;;  %13602 = vmatpush3.msra.mxu0 %v17509_v32  ;;  %v7869_v14 = vsub.f32 %v17567_v58, %v17605_v37  ;;  %v17624_v62 = vand.u32 4294901760, %v17599_v45 }
0x113c   : > { %13624 = vmatpush3.msra.mxu1 %v7835_v34  ;;  %13603 = vmatprep.subr.mxu0 %v17527_v3  ;;  %v7856_v34 = vand.u32 4294901760, %v7855_v56  ;;  %v17627_v57 = vsub.f32 %v7671_v38, %v17607_v48  ;;  %v7876_v33 = vsub.f32 %v17591_v27, %v17617_v18  ;;  %v17634_v56 = vand.u32 4294901760, %v17611_v24 }
0x113d   : > { %13625 = vmatprep.subr.mxu1 %v7842_v20  ;;  %13604 = vmatpush3.msra.mxu0 %v17527_v3  ;;  %v7870_v38 = vand.u32 4294901760, %v7869_v14 }
0x113e   : > { %13626 = vmatpush3.msra.mxu1 %v7842_v20  ;;  %13605 = vmatprep.subr.mxu0 %v17559_v21  ;;  %v7863_v20 = vand.u32 4294901760, %v7862_v13  ;;  %v17642_v13 = vand.u32 4294901760, %v17627_v57  ;;  %v7877_v39 = vand.u32 4294901760, %v7876_v33 }
0x113f   : > { %13627 = vmatprep.subr.mxu1 %v7849_v61  ;;  %13606 = vmatpush3.msra.mxu0 %v17559_v21 }
0x1140   : > { %13628 = vmatpush3.msra.mxu1 %v7849_v61  ;;  %13607 = vmatprep.subr.mxu0 %v17573_v8  ;;  %v7883_v61 = vsub.f32 %v17599_v45, %v17624_v62 }
0x1141   : > { %13629 = vmatprep.subr.mxu1 %v7856_v34  ;;  %13608 = vmatpush3.msra.mxu0 %v17573_v8 }
0x1142   : > { %13630 = vmatpush3.msra.mxu1 %v7856_v34  ;;  %13609 = vmatprep.subr.mxu0 %v17593_v4  ;;  %v7890_v34 = vsub.f32 %v17611_v24, %v17634_v56  ;;  %v7884_v14 = vand.u32 4294901760, %v7883_v61 }
0x1143   : > { %13631 = vmatprep.subr.mxu1 %v7863_v20  ;;  %13610 = vmatpush3.msra.mxu0 %v17593_v4 }
0x1144   : > { %13632 = vmatpush3.msra.mxu1 %v7863_v20  ;;  %13611 = vmatprep.subr.mxu0 %v17607_v48  ;;  %v7897_v20 = vsub.f32 %v17627_v57, %v17642_v13  ;;  %v7891_v33 = vand.u32 4294901760, %v7890_v34 }
0x1145   : > { %13633 = vmatprep.subr.mxu1 %v7870_v38  ;;  %13612 = vmatpush3.msra.mxu0 %v17607_v48 }
0x1146   : > { %13634 = vmatpush3.msra.mxu1 %v7870_v38  ;;  %13614 = vmatmul.mubr.f32.vlgmr.msra.gmra.mxu0 %v15765_v11 }
0x1147   : > { %13635 = vmatprep.subr.mxu1 %v7877_v39  ;;  %13649 = vmatprep.subr.mxu0 %v17504_v55 }
0x1148   : > { %13636 = vmatpush3.msra.mxu1 %v7877_v39  ;;  %13650 = vmatpush3.msra.mxu0 %v17504_v55  ;;  %v7898_v39 = vand.u32 4294901760, %v7897_v20 }
0x1149   : > { %13637 = vmatprep.subr.mxu1 %v7884_v14  ;;  %13651 = vmatprep.subr.mxu0 %v17519_v31 }
0x114a   : > { %13616 = vmatprep.mubr.f32.mxu0 %v15782_v12  ;;  %13638 = vmatpush3.msra.mxu1 %v7884_v14 }
0x114b   : > { %13652 = vmatpush3.msra.mxu0 %v17519_v31  ;;  %13639 = vmatprep.subr.mxu1 %v7891_v33 }
0x114c   : > { %13617 = vmatmul.mubr.f32.gmra.mxu0 %v15786_v6  ;;  %13653 = vmatprep.subr.mxu0 %v17532_v25 }
0x114d   : > { %13640 = vmatpush3.msra.mxu1 %v7891_v33  ;;  %13654 = vmatpush3.msra.mxu0 %v17532_v25 }
0x114e   : > { %13641 = vmatprep.subr.mxu1 %v7898_v39  ;;  %13655 = vmatprep.subr.mxu0 %v17551_v54 }
0x114f   : > { %13642 = vmatpush3.msra.mxu1 %v7898_v39  ;;  %13656 = vmatpush3.msra.mxu0 %v17551_v54 }
0x1150   : > { %13644 = vmatmul.mubr.f32.vlgmr.msra.gmra.mxu1 %v15630_v17  ;;  %13657 = vmatprep.subr.mxu0 %v17516_v29 }
0x1151   : > { %13679 = vmatprep.subr.mxu1 %v17500_v15  ;;  %13658 = vmatpush3.msra.mxu0 %v17516_v29 }
0x1152   : > { %13680 = vmatpush3.msra.mxu1 %v17500_v15  ;;  %13659 = vmatprep.subr.mxu0 %v17546_v59 }
0x1153   : > { %13681 = vmatprep.subr.mxu1 %v17506_v7  ;;  %13646 = vmatprep.mubr.f32.mxu1 %v15680_v49 }
0x1154   : > { %13660 = vmatpush3.msra.mxu0 %v17546_v59  ;;  %13682 = vmatpush3.msra.mxu1 %v17506_v7  ;;  %v18979_v59 = vld [vmem:[#allocation48_spill] sm:$0xff] }
0x1155   : > { %13647 = vmatmul.mubr.f32.gmra.mxu1 %v15699_v0  ;;  %13661 = vmatprep.subr.mxu0 %v17543_v19 }
0x1156   : > { %13683 = vmatprep.subr.mxu1 %v17521_v26  ;;  %13662 = vmatpush3.msra.mxu0 %v17543_v19 }
0x1157   : > { %13684 = vmatpush3.msra.mxu1 %v17521_v26  ;;  %13663 = vmatprep.subr.mxu0 %v17567_v58 }
0x1158   : > { %13685 = vmatprep.subr.mxu1 %v17534_v10  ;;  %13664 = vmatpush3.msra.mxu0 %v17567_v58  ;;  %v18980_v58 = vld [vmem:[#allocation49_spill] sm:$0xff] }
0x1159   : > { %13686 = vmatpush3.msra.mxu1 %v17534_v10  ;;  %13665 = vmatprep.subr.mxu0 %v17591_v27 }
0x115a   : > { %13687 = vmatprep.subr.mxu1 %v17498_v53  ;;  %13666 = vmatpush3.msra.mxu0 %v17591_v27  ;;  %v18981_v27 = vld [vmem:[#allocation50_spill] sm:$0xff] }
0x115b   : > { %13688 = vmatpush3.msra.mxu1 %v17498_v53  ;;  %13667 = vmatprep.subr.mxu0 %v17599_v45 }
0x115c   : > { %13689 = vmatprep.subr.mxu1 %v17511_v16  ;;  %13668 = vmatpush3.msra.mxu0 %v17599_v45 }
0x115d   : > { %13690 = vmatpush3.msra.mxu1 %v17511_v16  ;;  %13669 = vmatprep.subr.mxu0 %v17611_v24 }
0x115e   : > { %13691 = vmatprep.subr.mxu1 %v17509_v32  ;;  %13670 = vmatpush3.msra.mxu0 %v17611_v24 }
0x115f   : > { %13692 = vmatpush3.msra.mxu1 %v17509_v32  ;;  %13671 = vmatprep.subr.mxu0 %v17627_v57 }
0x1160   : > { %13693 = vmatprep.subr.mxu1 %v17527_v3  ;;  %13672 = vmatpush3.msra.mxu0 %v17627_v57 }
0x1161   : > { %13673 = vmatprep.mubr.f32.mxu0 %v15557_v47  ;;  %13694 = vmatpush3.msra.mxu1 %v17527_v3 }
0x1162   : > { %13674 = vmatmul.mubr.f32.vlgmr.msra.gmra.mxu0 %v15678_v63  ;;  %13695 = vmatprep.subr.mxu1 %v17559_v21 }
0x1163   : > { %13709 = vmatprep.subr.mxu0 %v17525_v44  ;;  %13696 = vmatpush3.msra.mxu1 %v17559_v21 }
0x1164   : > { %13710 = vmatpush3.msra.mxu0 %v17525_v44  ;;  %13697 = vmatprep.subr.mxu1 %v17573_v8 }
0x1165   : > { %13711 = vmatprep.subr.mxu0 %v17540_v1  ;;  %13676 = vmatprep.mubr.f32.mxu0 %v15713_v41 }
0x1166   : > { %13698 = vmatpush3.msra.mxu1 %v17573_v8  ;;  %13712 = vmatpush3.msra.mxu0 %v17540_v1  ;;  %v18978_v1 = vld [vmem:[#allocation47_spill] sm:$0xff] }
0x1167   : > { %13677 = vmatmul.mubr.f32.gmra.mxu0 %v15728_v43  ;;  %13699 = vmatprep.subr.mxu1 %v17593_v4 }
0x1168   : > { %13713 = vmatprep.subr.mxu0 %v17564_v60  ;;  %13700 = vmatpush3.msra.mxu1 %v17593_v4 }
0x1169   : > { %13714 = vmatpush3.msra.mxu0 %v17564_v60  ;;  %13701 = vmatprep.subr.mxu1 %v17607_v48 }
0x116a   : > { %13715 = vmatprep.subr.mxu0 %v17571_v22  ;;  %13702 = vmatpush3.msra.mxu1 %v17607_v48 }
0x116b   : > { %13703 = vmatprep.mubr.f32.mxu1 %v15562_v50  ;;  %13716 = vmatpush3.msra.mxu0 %v17571_v22 }
0x116c   : > { %13704 = vmatmul.mubr.f32.vlgmr.msra.gmra.mxu1 %v15710_v23  ;;  %13717 = vmatprep.subr.mxu0 %v17557_v2 }
0x116d   : > { %13739 = vmatprep.subr.mxu1 %v17500_v15  ;;  %13718 = vmatpush3.msra.mxu0 %v17557_v2 }
0x116e   : > { %13740 = vmatpush3.msra.mxu1 %v17500_v15  ;;  %13719 = vmatprep.subr.mxu0 %v17580_v36 }
0x116f   : > { %13741 = vmatprep.subr.mxu1 %v17506_v7  ;;  %13706 = vmatprep.mubr.f32.mxu1 %v15743_v5 }
0x1170   : > { %13720 = vmatpush3.msra.mxu0 %v17580_v36  ;;  %13742 = vmatpush3.msra.mxu1 %v17506_v7 }
0x1171   : > { %13707 = vmatmul.mubr.f32.gmra.mxu1 %v15756_v30  ;;  %13721 = vmatprep.subr.mxu0 %v17588_v9 }
0x1172   : > { %13743 = vmatprep.subr.mxu1 %v17521_v26  ;;  %13722 = vmatpush3.msra.mxu0 %v17588_v9 }
0x1173   : > { %13744 = vmatpush3.msra.mxu1 %v17521_v26  ;;  %13723 = vmatprep.subr.mxu0 %v17605_v37 }
0x1174   : > { %13745 = vmatprep.subr.mxu1 %v17534_v10  ;;  %13724 = vmatpush3.msra.mxu0 %v17605_v37 }
0x1175   : > { %13746 = vmatpush3.msra.mxu1 %v17534_v10  ;;  %13725 = vmatprep.subr.mxu0 %v17617_v18 }
0x1176   : > { %13747 = vmatprep.subr.mxu1 %v17498_v53  ;;  %13726 = vmatpush3.msra.mxu0 %v17617_v18 }
0x1177   : > { %13748 = vmatpush3.msra.mxu1 %v17498_v53  ;;  %13727 = vmatprep.subr.mxu0 %v17624_v62 }
0x1178   : > { %13749 = vmatprep.subr.mxu1 %v17511_v16  ;;  %13728 = vmatpush3.msra.mxu0 %v17624_v62 }
0x1179   : > { %13750 = vmatpush3.msra.mxu1 %v17511_v16  ;;  %13729 = vmatprep.subr.mxu0 %v17634_v56 }
0x117a   : > { %13751 = vmatprep.subr.mxu1 %v17509_v32  ;;  %13730 = vmatpush3.msra.mxu0 %v17634_v56 }
0x117b   : > { %13752 = vmatpush3.msra.mxu1 %v17509_v32  ;;  %13731 = vmatprep.subr.mxu0 %v17642_v13 }
0x117c   : > { %13753 = vmatprep.subr.mxu1 %v17527_v3  ;;  %13732 = vmatpush3.msra.mxu0 %v17642_v13 }
0x117d   : > { %13733 = vmatprep.mubr.f32.mxu0 %v15553_v52  ;;  %13754 = vmatpush3.msra.mxu1 %v17527_v3 }
0x117e   : > { %13734 = vmatmul.mubr.f32.vlgmr.msra.gmra.mxu0 %v15630_v17  ;;  %13755 = vmatprep.subr.mxu1 %v17559_v21 }
0x117f   : > { %13756 = vmatpush3.msra.mxu1 %v17559_v21  ;;  %13736 = vmatprep.mubr.f32.mxu0 %v15680_v49 }
0x1180   : > { %13757 = vmatprep.subr.mxu1 %v17573_v8  ;;  %13763 = vmatprep.mubr.f32.mxu1 %v15553_v52 }
0x1181   : > { %13758 = vmatpush3.msra.mxu1 %v17573_v8 }
0x1182   : > { %13737 = vmatmul.mubr.f32.gmra.mxu0 %v15699_v0  ;;  %13759 = vmatprep.subr.mxu1 %v17593_v4 }
0x1183   : > { %13760 = vmatpush3.msra.mxu1 %v17593_v4  ;;  %13793 = vmatprep.mubr.f32.mxu0 %v14763_v40 }
0x1184   : > { %13761 = vmatprep.subr.mxu1 %v17607_v48 }
0x1185   : > { %13762 = vmatpush3.msra.mxu1 %v17607_v48 }
0x1186   : > { %13764 = vmatmul.mubr.f32.vlgmr.msra.gmra.mxu1 %v15630_v17 }
0x1187   : > { %13766 = vmatprep.mubr.f32.mxu1 %v15680_v49 }
0x118a   : > { %13767 = vmatmul.mubr.f32.gmra.mxu1 %v15699_v0 }
0x118b   : > { %13823 = vmatprep.mubr.f32.mxu1 %v14741_v35 }
0x1206   : > { %v13615_v62 = vpop.f32.mrf.mxu0 }
0x1207   : > { %v7785_v22 = vadd.f32 %v13615_v62, %v18980_v58  ;;  %v18982_v58 = vld [vmem:[#allocation20_spill] sm:$0xff] }
0x1208   : > { %v7774_v37 = vpop.f32.mrf.mxu0 }
0x1209   : > { %v7775_v4 = vadd.f32 %v7774_v37, %v18981_v27 }
0x120c   : > { %v13618_v45 = vpop.f32.mrf.mxu0 }
0x120d   : > { %v7805_v19 = vadd.f32 %v13618_v45, %v18978_v1 }
0x120e   : > { %v7794_v15 = vpop.f32.mrf.mxu0 }
0x120f   : > { %v7795_v54 = vadd.f32 %v7794_v15, %v18979_v59 }
0x1210   : > { %v13645_v53 = vpop.f32.mrf.mxu1 }
0x1211   : > { %v7942_v48 = vadd.f32 %v13645_v53, %v7785_v22 }
0x1212   : > { %v7935_v55 = vpop.f32.mrf.mxu1 }
0x1213   : > { %v7936_v38 = vadd.f32 %v7935_v55, %v7775_v4 }
0x1215   : > { %v13648_v40 = vpop.f32.mrf.mxu1 }
0x1216   : > { %v7954_v2 = vadd.f32 %v13648_v40, %v7805_v19 }
0x1217   : > { %v7947_v16 = vpop.f32.mrf.mxu1 }
0x1218   : > { %v7948_v8 = vadd.f32 %v7947_v16, %v7795_v54 }
0x1222   : > { %v13675_v7 = vpop.f32.mrf.mxu0 }
0x1223   : > { %v8057_v61 = vadd.f32 %v13675_v7, %v7942_v48 }
0x1224   : > { %v8049_v32 = vpop.f32.mrf.mxu0 }
0x1225   : > { %v8050_v20 = vadd.f32 %v8049_v32, %v7936_v38 }
0x1227   : > { %v13678_v29 = vpop.f32.mrf.mxu0 }
0x1228   : > { %v8071_v36 = vadd.f32 %v13678_v29, %v7954_v2 }
0x1229   : > { %v8063_v26 = vpop.f32.mrf.mxu0 }
0x122a   : > { %v8064_v24 = vadd.f32 %v8063_v26, %v7948_v8 }
0x122c   : > { %v13705_v31 = vpop.f32.mrf.mxu1 }
0x122d   : > { %v8164_v33 = vadd.f32 %v13705_v31, %v8057_v61 }
0x122e   : > { %v8155_v44 = vpop.f32.mrf.mxu1 }
0x122f   : > { %v8156_v15 = vadd.f32 %v8155_v44, %v8050_v20 }
0x1231   : > { %v13708_v25 = vpop.f32.mrf.mxu1 }
0x1232   : > { %v8180_v18 = vadd.f32 %v13708_v25, %v8071_v36 }
0x1233   : > { %v8171_v21 = vpop.f32.mrf.mxu1 }
0x1234   : > { %v8172_v13 = vadd.f32 %v8171_v21, %v8064_v24 }
0x123e   : > { %v13735_v3 = vpop.f32.mrf.mxu0 }
0x123f   : > { %v8293_v40 = vadd.f32 %v13735_v3, %v8164_v33 }
0x1240   : > { %v8286_v10 = vpop.f32.mrf.mxu0 }
0x1241   : > { %v8287_v37 = vadd.f32 %v8286_v10, %v8156_v15 }
0x1242   : > { %v13738_v60 = vpop.f32.mrf.mxu0 }
0x1243   : > { %v8305_v34 = vadd.f32 %v13738_v60, %v8180_v18 }
0x1244   : > { %v8298_v57 = vpop.f32.mrf.mxu0 }
0x1245   : > { %v8299_v39 = vadd.f32 %v8298_v57, %v8172_v13 }
0x1246   : > { %v13765_v9 = vpop.f32.mrf.mxu1 }
0x1247   : > { %v8394_v53 = vadd.f32 %v13765_v9, %v8293_v40 }
0x1248   : > { %v8387_v56 = vpop.f32.mrf.mxu1 }
0x1249   : > { %v8388_v29 = vadd.f32 %v8387_v56, %v8287_v37  ;;  %v17793_v19 = vand.u32 4294901760, %v8394_v53 }
0x124a   : > { %v13768_v14 = vpop.f32.mrf.mxu1 }
0x124b   : > { %v8406_v45 = vadd.f32 %v13768_v14, %v8305_v34  ;;  %v17811_v9 = vand.u32 4294901760, %v8388_v29  ;;  %v17827_v38 = vsub.f32 %v8394_v53, %v17793_v19 }
0x124c   : > { %v8399_v62 = vpop.f32.mrf.mxu1 }
0x124d   : > { %v8400_v16 = vadd.f32 %v8399_v62, %v8299_v39  ;;  %8435 = vrot.lane.b32.xlu0 %v8406_v45, %s18875_s30  ;;  %v17782_v32 = vand.u32 4294901760, %v8406_v45  ;;  %v17851_v40 = vsub.f32 %v8388_v29, %v17811_v9 }
0x124f   : > { %8433 = vrot.lane.b32.xlu1 %v8400_v16, %s18875_s30  ;;  %v17795_v54 = vand.u32 4294901760, %v8400_v16  ;;  %v17800_v21 = vsub.f32 %v8406_v45, %v17782_v32 }
0x1251   : > { %8431 = vrot.lane.b32.xlu0 %v8394_v53, %s18875_s30  ;;  %v17830_v61 = vsub.f32 %v8400_v16, %v17795_v54  ;;  %v17841_v39 = vand.u32 4294901760, %v17800_v21 }
0x1253   : > { %8429 = vrot.lane.b32.xlu1 %v8388_v29, %s18875_s30 }
0x1255   : > { %8419 = vrot.lane.b32.xlu0 %v8406_v45, %s18901_s0 }
0x1257   : > { %8417 = vrot.lane.b32.xlu1 %v8400_v16, %s18901_s0 }
0x1259   : > { %8415 = vrot.lane.b32.xlu0 %v8394_v53, %s18901_s0 }
0x125b   : > { %8413 = vrot.lane.b32.xlu1 %v8388_v29, %s18901_s0  ;;  %v17864_v29 = vand.u32 4294901760, %v17830_v61 }
0x12bf   : > { %v8436_v55 = vpop.permute.xlu0 %8435 }
0x12c0   : > { %v8444_v7 = vsel %vm1103_vm2, %v8436_v55, 0.0 }
0x12c1   : > { %v17784_v31 = vand.u32 4294901760, %v8444_v7  ;;  %v8434_v26 = vpop.permute.xlu1 %8433 }
0x12c2   : > { %v8443_v44 = vsel %vm1103_vm2, %v8434_v26, 0.0 }
0x12c3   : > { %v17788_v3 = vsub.f32 %v8444_v7, %v17784_v31  ;;  %v17790_v25 = vand.u32 4294901760, %v8443_v44  ;;  %13769 = vmatprep.subr.mxu0 %v17784_v31  ;;  %v8432_v10 = vpop.permute.xlu0 %8431 }
0x12c4   : > { %v8442_v2 = vsel %vm1103_vm2, %v8432_v10, 0.0  ;;  %13770 = vmatpush3.msra.mxu0 %v17784_v31 }
0x12c5   : > { %v17803_v60 = vsub.f32 %v8443_v44, %v17790_v25  ;;  %v17805_v22 = vand.u32 4294901760, %v8442_v2  ;;  %13771 = vmatprep.subr.mxu0 %v17790_v25  ;;  %v8430_v8 = vpop.permute.xlu1 %8429  ;;  %v17809_v36 = vand.u32 4294901760, %v17788_v3 }
0x12c6   : > { %v8441_v4 = vsel %vm1103_vm2, %v8430_v8, 0.0  ;;  %13772 = vmatpush3.msra.mxu0 %v17790_v25  ;;  %v17872_v8 = vand.u32 4294901760, %v17827_v38 }
0x12c7   : > { %v17816_v48 = vsub.f32 %v8442_v2, %v17805_v22  ;;  %v17818_v24 = vand.u32 4294901760, %v8441_v4  ;;  %v8420_v18 = vpop.permute.xlu0 %8419  ;;  %13773 = vmatprep.subr.mxu0 %v17805_v22  ;;  %v8574_v57 = vsub.f32 %v17788_v3, %v17809_v36  ;;  %v17824_v56 = vand.u32 4294901760, %v17803_v60 }
0x12c8   : > { %v8428_v13 = vsel %vm1086_vm3, 0.0, %v8420_v18  ;;  %13774 = vmatpush3.msra.mxu0 %v17805_v22  ;;  %v8602_v2 = vsub.f32 %v17800_v21, %v17841_v39 }
0x12c9   : > { %v17835_v34 = vsub.f32 %v8441_v4, %v17818_v24  ;;  %13775 = vmatprep.subr.mxu0 %v17818_v24  ;;  %v8418_v14 = vpop.permute.xlu1 %8417  ;;  %v8575_v20 = vand.u32 4294901760, %v8574_v57  ;;  %v8581_v33 = vsub.f32 %v17803_v60, %v17824_v56  ;;  %v17843_v45 = vand.u32 4294901760, %v8428_v13 }
0x12ca   : > { %v8427_v62 = vsel %vm1086_vm3, 0.0, %v8418_v14  ;;  %13776 = vmatpush3.msra.mxu0 %v17818_v24  ;;  %v17848_v15 = vand.u32 4294901760, %v17816_v48 }
0x12cb   : > { %13799 = vmatprep.subr.mxu1 %v8575_v20  ;;  %v8416_v16 = vpop.permute.xlu0 %8415  ;;  %13777 = vmatprep.subr.mxu0 %v17782_v32  ;;  %v8582_v37 = vand.u32 4294901760, %v8581_v33  ;;  %v17855_v53 = vand.u32 4294901760, %v17835_v34  ;;  %v17857_v55 = vand.u32 4294901760, %v8427_v62  ;;  %v17875_v4 = vsub.f32 %v8428_v13, %v17843_v45 }
0x12cc   : > { %v8426_v7 = vsel %vm1086_vm3, 0.0, %v8416_v16  ;;  %13778 = vmatpush3.msra.mxu0 %v17782_v32  ;;  %13800 = vmatpush3.msra.mxu1 %v8575_v20  ;;  %v8588_v26 = vsub.f32 %v17816_v48, %v17848_v15  ;;  %v8609_v13 = vsub.f32 %v17830_v61, %v17864_v29  ;;  %v17889_v16 = vand.u32 4294901760, %v17851_v40 }
0x12cd   : > { %13779 = vmatprep.subr.mxu0 %v17795_v54  ;;  %13801 = vmatprep.subr.mxu1 %v8582_v37  ;;  %v8414_v44 = vpop.permute.xlu1 %8413  ;;  %v8595_v10 = vsub.f32 %v17835_v34, %v17855_v53  ;;  %v17877_v18 = vand.u32 4294901760, %v8426_v7  ;;  %v17883_v33 = vsub.f32 %v8427_v62, %v17857_v55  ;;  %v8603_v62 = vand.u32 4294901760, %v8602_v2 }
0x12ce   : > { %v8425_v57 = vsel %vm1086_vm3, 0.0, %v8414_v44  ;;  %13780 = vmatpush3.msra.mxu0 %v17795_v54  ;;  %13802 = vmatpush3.msra.mxu1 %v8582_v37  ;;  %v8589_v14 = vand.u32 4294901760, %v8588_v26  ;;  %v8616_v26 = vsub.f32 %v17827_v38, %v17872_v8 }
0x12cf   : > { %13781 = vmatprep.subr.mxu0 %v17793_v19  ;;  %v8596_v20 = vand.u32 4294901760, %v8595_v10  ;;  %v17891_v44 = vand.u32 4294901760, %v8425_v57  ;;  %v17895_v37 = vsub.f32 %v8426_v7, %v17877_v18  ;;  %v17901_v10 = vand.u32 4294901760, %v17875_v4 }
0x12d0   : > { %13803 = vmatprep.subr.mxu1 %v8589_v14  ;;  %13782 = vmatpush3.msra.mxu0 %v17793_v19  ;;  %v8623_v7 = vsub.f32 %v17851_v40, %v17889_v16  ;;  %v17908_v59 = vand.u32 4294901760, %v17883_v33 }
0x12d1   : > { %13804 = vmatpush3.msra.mxu1 %v8589_v14  ;;  %13783 = vmatprep.subr.mxu0 %v17811_v9  ;;  %v8610_v14 = vand.u32 4294901760, %v8609_v13  ;;  %v17911_v2 = vsub.f32 %v8425_v57, %v17891_v44  ;;  %v8630_v1 = vsub.f32 %v17875_v4, %v17901_v10  ;;  %v17918_v13 = vand.u32 4294901760, %v17895_v37 }
0x12d2   : > { %13805 = vmatprep.subr.mxu1 %v8596_v20  ;;  %13784 = vmatpush3.msra.mxu0 %v17811_v9  ;;  %v8624_v57 = vand.u32 4294901760, %v8623_v7 }
0x12d3   : > { %13806 = vmatpush3.msra.mxu1 %v8596_v20  ;;  %13785 = vmatprep.subr.mxu0 %v17843_v45  ;;  %v8617_v20 = vand.u32 4294901760, %v8616_v26  ;;  %v17926_v26 = vand.u32 4294901760, %v17911_v2  ;;  %v8631_v27 = vand.u32 4294901760, %v8630_v1 }
0x12d4   : > { %13807 = vmatprep.subr.mxu1 %v8603_v62  ;;  %13786 = vmatpush3.msra.mxu0 %v17843_v45 }
0x12d5   : > { %13808 = vmatpush3.msra.mxu1 %v8603_v62  ;;  %13787 = vmatprep.subr.mxu0 %v17857_v55  ;;  %v8637_v62 = vsub.f32 %v17883_v33, %v17908_v59 }
0x12d6   : > { %13809 = vmatprep.subr.mxu1 %v8610_v14  ;;  %13788 = vmatpush3.msra.mxu0 %v17857_v55 }
0x12d7   : > { %13810 = vmatpush3.msra.mxu1 %v8610_v14  ;;  %13789 = vmatprep.subr.mxu0 %v17877_v18  ;;  %v8644_v14 = vsub.f32 %v17895_v37, %v17918_v13  ;;  %v8638_v7 = vand.u32 4294901760, %v8637_v62 }
0x12d8   : > { %13811 = vmatprep.subr.mxu1 %v8617_v20  ;;  %13790 = vmatpush3.msra.mxu0 %v17877_v18 }
0x12d9   : > { %13812 = vmatpush3.msra.mxu1 %v8617_v20  ;;  %13791 = vmatprep.subr.mxu0 %v17891_v44  ;;  %v8651_v20 = vsub.f32 %v17911_v2, %v17926_v26  ;;  %v8645_v1 = vand.u32 4294901760, %v8644_v14 }
0x12da   : > { %13813 = vmatprep.subr.mxu1 %v8624_v57  ;;  %13792 = vmatpush3.msra.mxu0 %v17891_v44 }
0x12db   : > { %13814 = vmatpush3.msra.mxu1 %v8624_v57  ;;  %13794 = vmatmul.mubr.f32.vlgmr.msra.gmra.mxu0 %v14961_v42  ;;  %v18983_v42 = vld [vmem:[#allocation21_spill] sm:$0xff]  ;;  %v18999_v57 = vld [vmem:[#allocation23_spill] sm:$0xff] }
0x12dc   : > { %13815 = vmatprep.subr.mxu1 %v8631_v27  ;;  %13829 = vmatprep.subr.mxu0 %v17788_v3 }
0x12dd   : > { %13816 = vmatpush3.msra.mxu1 %v8631_v27  ;;  %13830 = vmatpush3.msra.mxu0 %v17788_v3  ;;  %v8652_v27 = vand.u32 4294901760, %v8651_v20  ;;  %v18984_v3 = vld [vmem:[#allocation11_spill] sm:$0xff] }
0x12de   : > { %13817 = vmatprep.subr.mxu1 %v8638_v7  ;;  %13831 = vmatprep.subr.mxu0 %v17803_v60 }
0x12df   : > { %13796 = vmatprep.mubr.f32.mxu0 %v18982_v58  ;;  %13818 = vmatpush3.msra.mxu1 %v8638_v7  ;;  %v18985_v58 = vld [vmem:[#allocation13_spill] sm:$0xff] }
0x12e0   : > { %13832 = vmatpush3.msra.mxu0 %v17803_v60  ;;  %13819 = vmatprep.subr.mxu1 %v8645_v1  ;;  %v18986_v60 = vld [vmem:[#allocation14_spill] sm:$0xff] }
0x12e1   : > { %13797 = vmatmul.mubr.f32.gmra.mxu0 %v18983_v42  ;;  %13833 = vmatprep.subr.mxu0 %v17816_v48 }
0x12e2   : > { %13820 = vmatpush3.msra.mxu1 %v8645_v1  ;;  %13834 = vmatpush3.msra.mxu0 %v17816_v48  ;;  %v18988_v48 = vld [vmem:[#allocation12_spill] sm:$0xff] }
0x12e3   : > { %13821 = vmatprep.subr.mxu1 %v8652_v27  ;;  %13835 = vmatprep.subr.mxu0 %v17835_v34 }
0x12e4   : > { %13822 = vmatpush3.msra.mxu1 %v8652_v27  ;;  %13836 = vmatpush3.msra.mxu0 %v17835_v34  ;;  %v18993_v34 = vld [vmem:[#allocation18_spill] sm:$0xff] }
0x12e5   : > { %13824 = vmatmul.mubr.f32.vlgmr.msra.gmra.mxu1 %v18984_v3  ;;  %13837 = vmatprep.subr.mxu0 %v17800_v21 }
0x12e6   : > { %13859 = vmatprep.subr.mxu1 %v17784_v31  ;;  %13838 = vmatpush3.msra.mxu0 %v17800_v21  ;;  %v18987_v21 = vld [vmem:[#allocation9_spill] sm:$0xff] }
0x12e7   : > { %13860 = vmatpush3.msra.mxu1 %v17784_v31  ;;  %13839 = vmatprep.subr.mxu0 %v17830_v61 }
0x12e8   : > { %13861 = vmatprep.subr.mxu1 %v17790_v25  ;;  %13826 = vmatprep.mubr.f32.mxu1 %v18985_v58 }
0x12e9   : > { %13840 = vmatpush3.msra.mxu0 %v17830_v61  ;;  %13862 = vmatpush3.msra.mxu1 %v17790_v25  ;;  %v18990_v61 = vld [vmem:[#allocation17_spill] sm:$0xff] }
0x12ea   : > { %13827 = vmatmul.mubr.f32.gmra.mxu1 %v18986_v60  ;;  %13841 = vmatprep.subr.mxu0 %v17827_v38 }
0x12eb   : > { %13863 = vmatprep.subr.mxu1 %v17805_v22  ;;  %13842 = vmatpush3.msra.mxu0 %v17827_v38  ;;  %v18989_v38 = vld [vmem:[#allocation16_spill] sm:$0xff] }
0x12ec   : > { %13864 = vmatpush3.msra.mxu1 %v17805_v22  ;;  %13843 = vmatprep.subr.mxu0 %v17851_v40 }
0x12ed   : > { %13865 = vmatprep.subr.mxu1 %v17818_v24  ;;  %13844 = vmatpush3.msra.mxu0 %v17851_v40 }
0x12ee   : > { %13866 = vmatpush3.msra.mxu1 %v17818_v24  ;;  %13845 = vmatprep.subr.mxu0 %v17875_v4 }
0x12ef   : > { %13867 = vmatprep.subr.mxu1 %v17782_v32  ;;  %13846 = vmatpush3.msra.mxu0 %v17875_v4 }
0x12f0   : > { %13868 = vmatpush3.msra.mxu1 %v17782_v32  ;;  %13847 = vmatprep.subr.mxu0 %v17883_v33 }
0x12f1   : > { %13869 = vmatprep.subr.mxu1 %v17795_v54  ;;  %13848 = vmatpush3.msra.mxu0 %v17883_v33 }
0x12f2   : > { %13870 = vmatpush3.msra.mxu1 %v17795_v54  ;;  %13849 = vmatprep.subr.mxu0 %v17895_v37 }
0x12f3   : > { %13871 = vmatprep.subr.mxu1 %v17793_v19  ;;  %13850 = vmatpush3.msra.mxu0 %v17895_v37 }
0x12f4   : > { %13872 = vmatpush3.msra.mxu1 %v17793_v19  ;;  %13851 = vmatprep.subr.mxu0 %v17911_v2 }
0x12f5   : > { %13873 = vmatprep.subr.mxu1 %v17811_v9  ;;  %13852 = vmatpush3.msra.mxu0 %v17911_v2  ;;  %v18998_v2 = vld [vmem:[#allocation25_spill] sm:$0xff] }
0x12f6   : > { %13853 = vmatprep.mubr.f32.mxu0 %v18987_v21  ;;  %13874 = vmatpush3.msra.mxu1 %v17811_v9 }
0x12f7   : > { %13854 = vmatmul.mubr.f32.vlgmr.msra.gmra.mxu0 %v18988_v48  ;;  %13875 = vmatprep.subr.mxu1 %v17843_v45 }
0x12f8   : > { %13889 = vmatprep.subr.mxu0 %v17809_v36  ;;  %13876 = vmatpush3.msra.mxu1 %v17843_v45 }
0x12f9   : > { %13890 = vmatpush3.msra.mxu0 %v17809_v36  ;;  %13877 = vmatprep.subr.mxu1 %v17857_v55  ;;  %v18991_v36 = vld [vmem:[#allocation10_spill] sm:$0xff] }
0x12fa   : > { %13891 = vmatprep.subr.mxu0 %v17824_v56  ;;  %13856 = vmatprep.mubr.f32.mxu0 %v18989_v38 }
0x12fb   : > { %13878 = vmatpush3.msra.mxu1 %v17857_v55  ;;  %13892 = vmatpush3.msra.mxu0 %v17824_v56  ;;  %v18992_v56 = vld [vmem:[#allocation15_spill] sm:$0xff] }
0x12fc   : > { %13857 = vmatmul.mubr.f32.gmra.mxu0 %v18990_v61  ;;  %13879 = vmatprep.subr.mxu1 %v17877_v18 }
0x12fd   : > { %13893 = vmatprep.subr.mxu0 %v17848_v15  ;;  %13880 = vmatpush3.msra.mxu1 %v17877_v18 }
0x12fe   : > { %13894 = vmatpush3.msra.mxu0 %v17848_v15  ;;  %13881 = vmatprep.subr.mxu1 %v17891_v44  ;;  %v18994_v15 = vld [vmem:[#allocation19_spill] sm:$0xff] }
0x12ff   : > { %13895 = vmatprep.subr.mxu0 %v17855_v53  ;;  %13882 = vmatpush3.msra.mxu1 %v17891_v44 }
0x1300   : > { %13883 = vmatprep.mubr.f32.mxu1 %v18991_v36  ;;  %13896 = vmatpush3.msra.mxu0 %v17855_v53 }
0x1301   : > { %13884 = vmatmul.mubr.f32.vlgmr.msra.gmra.mxu1 %v18992_v56  ;;  %13897 = vmatprep.subr.mxu0 %v17841_v39 }
0x1302   : > { %13919 = vmatprep.subr.mxu1 %v17784_v31  ;;  %13898 = vmatpush3.msra.mxu0 %v17841_v39 }
0x1303   : > { %13920 = vmatpush3.msra.mxu1 %v17784_v31  ;;  %13899 = vmatprep.subr.mxu0 %v17864_v29 }
0x1304   : > { %13921 = vmatprep.subr.mxu1 %v17790_v25  ;;  %13886 = vmatprep.mubr.f32.mxu1 %v18993_v34 }
0x1305   : > { %13900 = vmatpush3.msra.mxu0 %v17864_v29  ;;  %13922 = vmatpush3.msra.mxu1 %v17790_v25  ;;  %v18996_v29 = vld [vmem:[#allocation24_spill] sm:$0xff] }
0x1306   : > { %13887 = vmatmul.mubr.f32.gmra.mxu1 %v18994_v15  ;;  %13901 = vmatprep.subr.mxu0 %v17872_v8 }
0x1307   : > { %13923 = vmatprep.subr.mxu1 %v17805_v22  ;;  %13902 = vmatpush3.msra.mxu0 %v17872_v8 }
0x1308   : > { %13924 = vmatpush3.msra.mxu1 %v17805_v22  ;;  %13903 = vmatprep.subr.mxu0 %v17889_v16 }
0x1309   : > { %13925 = vmatprep.subr.mxu1 %v17818_v24  ;;  %13904 = vmatpush3.msra.mxu0 %v17889_v16 }
0x130a   : > { %13926 = vmatpush3.msra.mxu1 %v17818_v24  ;;  %13905 = vmatprep.subr.mxu0 %v17901_v10 }
0x130b   : > { %13927 = vmatprep.subr.mxu1 %v17782_v32  ;;  %13906 = vmatpush3.msra.mxu0 %v17901_v10 }
0x130c   : > { %13928 = vmatpush3.msra.mxu1 %v17782_v32  ;;  %13907 = vmatprep.subr.mxu0 %v17908_v59 }
0x130d   : > { %13929 = vmatprep.subr.mxu1 %v17795_v54  ;;  %13908 = vmatpush3.msra.mxu0 %v17908_v59  ;;  %v18995_v59 = vld [vmem:[#allocation29_spill] sm:$0xff] }
0x130e   : > { %13930 = vmatpush3.msra.mxu1 %v17795_v54  ;;  %13909 = vmatprep.subr.mxu0 %v17918_v13 }
0x130f   : > { %13931 = vmatprep.subr.mxu1 %v17793_v19  ;;  %13910 = vmatpush3.msra.mxu0 %v17918_v13 }
0x1310   : > { %13932 = vmatpush3.msra.mxu1 %v17793_v19  ;;  %13911 = vmatprep.subr.mxu0 %v17926_v26 }
0x1311   : > { %13933 = vmatprep.subr.mxu1 %v17811_v9  ;;  %13912 = vmatpush3.msra.mxu0 %v17926_v26 }
0x1312   : > { %13913 = vmatprep.mubr.f32.mxu0 %v14741_v35  ;;  %13934 = vmatpush3.msra.mxu1 %v17811_v9 }
0x1313   : > { %13914 = vmatmul.mubr.f32.vlgmr.msra.gmra.mxu0 %v18984_v3  ;;  %13935 = vmatprep.subr.mxu1 %v17843_v45 }
0x1314   : > { %13936 = vmatpush3.msra.mxu1 %v17843_v45  ;;  %13916 = vmatprep.mubr.f32.mxu0 %v18985_v58 }
0x1315   : > { %13937 = vmatprep.subr.mxu1 %v17857_v55  ;;  %13943 = vmatprep.mubr.f32.mxu1 %v14741_v35 }
0x1316   : > { %13938 = vmatpush3.msra.mxu1 %v17857_v55 }
0x1317   : > { %13917 = vmatmul.mubr.f32.gmra.mxu0 %v18986_v60  ;;  %13939 = vmatprep.subr.mxu1 %v17877_v18 }
0x1318   : > { %13940 = vmatpush3.msra.mxu1 %v17877_v18  ;;  %13973 = vmatprep.mubr.f32.mxu0 %v18995_v59 }
0x1319   : > { %13941 = vmatprep.subr.mxu1 %v17891_v44 }
0x131a   : > { %13942 = vmatpush3.msra.mxu1 %v17891_v44  ;;  %v18997_v44 = vld [vmem:[#allocation22_spill] sm:$0xff] }
0x131b   : > { %13944 = vmatmul.mubr.f32.vlgmr.msra.gmra.mxu1 %v18984_v3 }
0x131c   : > { %13946 = vmatprep.mubr.f32.mxu1 %v18985_v58 }
0x131f   : > { %13947 = vmatmul.mubr.f32.gmra.mxu1 %v18986_v60 }
0x1320   : > { %14003 = vmatprep.mubr.f32.mxu1 %v18914_v28 }
0x139b   : > { %v13795_v35 = vpop.f32.mrf.mxu0 }
0x139c   : > { %v8539_v8 = vadd.f32 %v13795_v35, %v18996_v29 }
0x139d   : > { %v8528_v32 = vpop.f32.mrf.mxu0 }
0x139e   : > { %v8529_v13 = vadd.f32 %v8528_v32, %v18998_v2 }
0x13a1   : > { %v13798_v31 = vpop.f32.mrf.mxu0 }
0x13a2   : > { %v8559_v37 = vadd.f32 %v13798_v31, %v18997_v44 }
0x13a3   : > { %v8548_v19 = vpop.f32.mrf.mxu0 }
0x13a4   : > { %v8549_v62 = vadd.f32 %v8548_v19, %v18999_v57 }
0x13a5   : > { %v13825_v25 = vpop.f32.mrf.mxu1 }
0x13a6   : > { %v8696_v18 = vadd.f32 %v13825_v25, %v8539_v8 }
0x13a7   : > { %v8689_v54 = vpop.f32.mrf.mxu1 }
0x13a8   : > { %v8690_v1 = vadd.f32 %v8689_v54, %v8529_v13 }
0x13aa   : > { %v13828_v9 = vpop.f32.mrf.mxu1 }
0x13ab   : > { %v8708_v26 = vadd.f32 %v13828_v9, %v8559_v37 }
0x13ac   : > { %v8701_v39 = vpop.f32.mrf.mxu1 }
0x13ad   : > { %v8702_v42 = vadd.f32 %v8701_v39, %v8549_v62 }
0x13b7   : > { %v13855_v22 = vpop.f32.mrf.mxu0 }
0x13b8   : > { %v8811_v10 = vadd.f32 %v13855_v22, %v8696_v18 }
0x13b9   : > { %v8803_v24 = vpop.f32.mrf.mxu0 }
0x13ba   : > { %v8804_v60 = vadd.f32 %v8803_v24, %v8690_v1 }
0x13bc   : > { %v13858_v45 = vpop.f32.mrf.mxu0 }
0x13bd   : > { %v8825_v27 = vadd.f32 %v13858_v45, %v8708_v26 }
0x13be   : > { %v8817_v53 = vpop.f32.mrf.mxu0 }
0x13bf   : > { %v8818_v21 = vadd.f32 %v8817_v53, %v8702_v42 }
0x13c1   : > { %v13885_v40 = vpop.f32.mrf.mxu1 }
0x13c2   : > { %v8918_v14 = vadd.f32 %v13885_v40, %v8811_v10 }
0x13c3   : > { %v8909_v55 = vpop.f32.mrf.mxu1 }
0x13c4   : > { %v8910_v56 = vadd.f32 %v8909_v55, %v8804_v60 }
0x13c6   : > { %v13888_v33 = vpop.f32.mrf.mxu1 }
0x13c7   : > { %v8934_v48 = vadd.f32 %v13888_v33, %v8825_v27 }
0x13c8   : > { %v8925_v7 = vpop.f32.mrf.mxu1 }
0x13c9   : > { %v8926_v34 = vadd.f32 %v8925_v7, %v8818_v21 }
0x13d3   : > { %v13915_v4 = vpop.f32.mrf.mxu0 }
0x13d4   : > { %v9047_v3 = vadd.f32 %v13915_v4, %v8918_v14 }
0x13d5   : > { %v9040_v16 = vpop.f32.mrf.mxu0 }
0x13d6   : > { %v9041_v32 = vadd.f32 %v9040_v16, %v8910_v56 }
0x13d7   : > { %v13918_v20 = vpop.f32.mrf.mxu0 }
0x13d8   : > { %v9059_v15 = vadd.f32 %v13918_v20, %v8934_v48 }
0x13d9   : > { %v9052_v61 = vpop.f32.mrf.mxu0 }
0x13da   : > { %v9053_v31 = vadd.f32 %v9052_v61, %v8926_v34 }
0x13db   : > { %v13945_v58 = vpop.f32.mrf.mxu1 }
0x13dc   : > { %v9148_v38 = vadd.f32 %v13945_v58, %v9047_v3 }
0x13dd   : > { %v9141_v36 = vpop.f32.mrf.mxu1 }
0x13de   : > { %v18057_v59 = vmax.f32 %v9148_v38, 0.0  ;;  %v9142_v54 = vadd.f32 %v9141_v36, %v9041_v32 }
0x13df   : > { %v13948_v35 = vpop.f32.mrf.mxu1 }
0x13e0   : > { %v9160_v25 = vadd.f32 %v13948_v35, %v9059_v15  ;;  %9169 = vadd.xlane.f32.xlu0 %v18057_v59  ;;  %v18065_v39 = vmax.f32 %v9142_v54, 0.0  ;;  %v9176_v53 = vmul.f32 %v18057_v59, %v18057_v59 }
0x13e1   : > { %v9153_v19 = vpop.f32.mrf.mxu1 }
0x13e2   : > { %v18060_v22 = vmax.f32 %v9160_v25, 0.0  ;;  %v9154_v9 = vadd.f32 %v9153_v19, %v9053_v31  ;;  %v9175_v55 = vmul.f32 %v18065_v39, %v18065_v39 }
0x13e4   : > { %v18062_v24 = vmax.f32 %v9154_v9, 0.0  ;;  %9173 = vadd.xlane.f32.xlu0 %v18060_v22  ;;  %v9178_v45 = vmul.f32 %v18060_v22, %v18060_v22 }
0x13e6   : > { %9171 = vadd.xlane.f32.xlu1 %v18062_v24  ;;  %v9177_v40 = vmul.f32 %v18062_v24, %v18062_v24 }
0x13e8   : > { %9167 = vadd.xlane.f32.xlu0 %v18065_v39 }
0x13ea   : > { %9185 = vadd.xlane.f32.xlu1 %v9178_v45 }
0x13ec   : > { %9183 = vadd.xlane.f32.xlu0 %v9177_v40 }
0x13ee   : > { %9181 = vadd.xlane.f32.xlu1 %v9176_v53 }
0x13f0   : > { %9179 = vadd.xlane.f32.xlu0 %v9175_v55 }
0x1469   : > { %v9170_v29 = vpop.xlane.xlu0 %9169 }
0x146a   : > { %v18077_v4 = vmul.f32 0.0078125, %v9170_v29 }
0x146c   : > { %v9192_v57 = vmul.f32 128.0, %v18077_v4 }
0x146d   : > { %v9174_v8 = vpop.xlane.xlu0 %9173 }
0x146e   : > { %v18079_v18 = vmul.f32 0.0078125, %v9174_v8  ;;  %v9196_v27 = vmul.f32 %v9192_v57, %v18077_v4 }
0x146f   : > { %v9172_v33 = vpop.xlane.xlu1 %9171 }
0x1470   : > { %v18081_v16 = vmul.f32 0.0078125, %v9172_v33  ;;  %v9194_v44 = vmul.f32 128.0, %v18079_v18 }
0x1471   : > { %v9168_v37 = vpop.xlane.xlu0 %9167 }
0x1472   : > { %v18084_v10 = vmul.f32 0.0078125, %v9168_v37  ;;  %v9198_v2 = vmul.f32 %v9194_v44, %v18079_v18  ;;  %v9193_v13 = vmul.f32 128.0, %v18081_v16 }
0x1473   : > { %v9186_v62 = vpop.xlane.xlu1 %9185 }
0x1474   : > { %v9202_v26 = vsub.f32 %v9186_v62, %v9198_v2  ;;  %v9197_v14 = vmul.f32 %v9193_v13, %v18081_v16  ;;  %v9191_v20 = vmul.f32 128.0, %v18084_v10 }
0x1475   : > { %v9184_v7 = vpop.xlane.xlu0 %9183 }
0x1476   : > { %v9206_v1 = vmul.f32 0.007874016, %v9202_v26  ;;  %v9201_v42 = vsub.f32 %v9184_v7, %v9197_v14  ;;  %v9195_v48 = vmul.f32 %v9191_v20, %v18084_v10 }
0x1477   : > { %v9182_v3 = vpop.xlane.xlu1 %9181 }
0x1478   : > { %v9210_v58 = vmax.f32 %v9206_v1, 0.0  ;;  %v9205_v60 = vmul.f32 0.007874016, %v9201_v42  ;;  %v9200_v21 = vsub.f32 %v9182_v3, %v9196_v27  ;;  %v9242_v42 = vsub.f32 %v18060_v22, %v18079_v18 }
0x1479   : > { %v9180_v38 = vpop.xlane.xlu0 %9179 }
0x147a   : > { %14421 = vrsqrt.f32 %v9210_v58  ;;  %v9209_v61 = vmax.f32 %v9205_v60, 0.0  ;;  %v9204_v36 = vmul.f32 0.007874016, %v9200_v21  ;;  %v9199_v56 = vsub.f32 %v9180_v38, %v9195_v48  ;;  %v14457_v21 = vld [vmem:[%s18735_s9] ss:$0 sm:$0xff] }
0x147b   : > { %vm9234_vm14 = vcmp.eq.f32.partialorder %v9210_v58, inf  ;;  %v9237_v25 = vand.u32 2147483648, %v9210_v58  ;;  %vm9236_vm15 = vcmp.eq.f32.partialorder %v9210_v58, 0.0 }
0x147c   : > { %14423 = vrsqrt.f32 %v9209_v61  ;;  %v9208_v34 = vmax.f32 %v9204_v36, 0.0  ;;  %v9203_v15 = vmul.f32 0.007874016, %v9199_v56  ;;  %vm9227_vm0 = vcmp.eq.f32.partialorder %v9209_v61, inf  ;;  %v14458_v36 = vld [vmem:[%s18736_s10] ss:$0 sm:$0xff] }
0x147d   : > { %v9230_v53 = vand.u32 2147483648, %v9209_v61  ;;  %vm9229_vm1 = vcmp.eq.f32.partialorder %v9209_v61, 0.0 }
0x147e   : > { %14425 = vrsqrt.f32 %v9208_v34  ;;  %v9207_v35 = vmax.f32 %v9203_v15, 0.0  ;;  %vm9220_vm4 = vcmp.eq.f32.partialorder %v9208_v34, inf  ;;  %v9223_v37 = vand.u32 2147483648, %v9208_v34 }
0x147f   : > { %vm9222_vm5 = vcmp.eq.f32.partialorder %v9208_v34, 0.0 }
0x1480   : > { %14427 = vrsqrt.f32 %v9207_v35  ;;  %vm9213_vm6 = vcmp.eq.f32.partialorder %v9207_v35, inf  ;;  %v9216_v14 = vand.u32 2147483648, %v9207_v35  ;;  %vm9215_vm7 = vcmp.eq.f32.partialorder %v9207_v35, 0.0 }
0x1487   : > { %v14422_v32 = vpop.eup %14421 }
0x1488   : > { %v9233_v31 = vmul.f32 %v14422_v32, %v9210_v58 }
0x1489   : > { %v14424_v19 = vpop.eup %14423 }
0x148a   : > { %v9235_v54 = vsel %vm9234_vm14, %v9210_v58, %v9233_v31  ;;  %v9226_v45 = vmul.f32 %v14424_v19, %v9209_v61  ;;  %v9241_v58 = vsub.f32 %v18062_v24, %v18081_v16  ;;  %v9239_v16 = vsub.f32 %v18065_v39, %v18084_v10 }
0x148b   : > { %v9238_v9 = vsel %vm9236_vm15, %v9237_v25, %v9235_v54  ;;  %v14426_v55 = vpop.eup %14425 }
0x148c   : > { %v9246_v40 = vadd.f32 1e-06, %v9238_v9  ;;  %v9228_v29 = vsel %vm9227_vm0, %v9209_v61, %v9226_v45  ;;  %v9219_v33 = vmul.f32 %v14426_v55, %v9208_v34  ;;  %v9240_v61 = vsub.f32 %v18057_v59, %v18077_v4 }
0x148d   : > { %v9231_v8 = vsel %vm9229_vm1, %v9230_v53, %v9228_v29  ;;  %v14428_v2 = vpop.eup %14427 }
0x148e   : > { %14429 = vrcp.f32 %v9246_v40  ;;  %v9245_v44 = vadd.f32 1e-06, %v9231_v8  ;;  %v9221_v13 = vsel %vm9220_vm4, %v9208_v34, %v9219_v33  ;;  %v9212_v62 = vmul.f32 %v14428_v2, %v9207_v35 }
0x148f   : > { %v9224_v57 = vsel %vm9222_vm5, %v9223_v37, %v9221_v13 }
0x1490   : > { %14431 = vrcp.f32 %v9245_v44  ;;  %v9244_v26 = vadd.f32 1e-06, %v9224_v57  ;;  %v9214_v7 = vsel %vm9213_vm6, %v9207_v35, %v9212_v62 }
0x1491   : > { %v9217_v20 = vsel %vm9215_vm7, %v9216_v14, %v9214_v7 }
0x1492   : > { %14433 = vrcp.f32 %v9244_v26  ;;  %v9243_v1 = vadd.f32 1e-06, %v9217_v20 }
0x1494   : > { %14435 = vrcp.f32 %v9243_v1 }
0x149b   : > { %v14430_v27 = vpop.eup %14429 }
0x149c   : > { %v9254_v3 = vmul.f32 %v14430_v27, %v9242_v42 }
0x149d   : > { %v14432_v60 = vpop.eup %14431 }
0x149e   : > { %v9258_v48 = vmul.f32 %v14457_v21, %v9254_v3  ;;  %v9252_v38 = vmul.f32 %v14432_v60, %v9241_v58 }
0x149f   : > { %v14434_v18 = vpop.eup %14433 }
0x14a0   : > { %v9262_v22 = vadd.f32 %v14458_v36, %v9258_v48  ;;  %v9257_v56 = vmul.f32 %v14457_v21, %v9252_v38  ;;  %v9250_v24 = vmul.f32 %v14434_v18, %v9240_v61 }
0x14a1   : > { %v14436_v15 = vpop.eup %14435 }
0x14a2   : > { %9289 = vrot.lane.b32.xlu1 %v9262_v22, %s18875_s30  ;;  %v9261_v34 = vadd.f32 %v14458_v36, %v9257_v56  ;;  %v9256_v35 = vmul.f32 %v14457_v21, %v9250_v24  ;;  %v9248_v32 = vmul.f32 %v14436_v15, %v9239_v16  ;;  %v18123_v45 = vand.u32 4294901760, %v9262_v22 }
0x14a4   : > { %9287 = vrot.lane.b32.xlu0 %v9261_v34, %s18875_s30  ;;  %v9260_v59 = vadd.f32 %v14458_v36, %v9256_v35  ;;  %v9255_v4 = vmul.f32 %v14457_v21, %v9248_v32  ;;  %v18128_v53 = vand.u32 4294901760, %v9261_v34  ;;  %v18147_v57 = vsub.f32 %v9262_v22, %v18123_v45 }
0x14a6   : > { %9285 = vrot.lane.b32.xlu1 %v9260_v59, %s18875_s30  ;;  %v9259_v31 = vadd.f32 %v14458_v36, %v9255_v4  ;;  %v18149_v62 = vand.u32 4294901760, %v9260_v59  ;;  %v18156_v20 = vsub.f32 %v9261_v34, %v18128_v53  ;;  %v18171_v38 = vand.u32 4294901760, %v18147_v57 }
0x14a8   : > { %9273 = vrot.lane.b32.xlu0 %v9262_v22, %s18901_s0  ;;  %v18158_v1 = vand.u32 4294901760, %v9259_v31  ;;  %v18182_v56 = vsub.f32 %v9260_v59, %v18149_v62  ;;  %v18187_v16 = vand.u32 4294901760, %v18156_v20 }
0x14aa   : > { %9283 = vrot.lane.b32.xlu1 %v9259_v31, %s18875_s30  ;;  %s431_s30 = sand.u32 1, %s14511_s26  }
0x14ab   : > { %s18686_s29 = scalar_lea.sflag [#allocation3], %s431_s30 }
0x14ac   : > { %9269 = vrot.lane.b32.xlu0 %v9260_v59, %s18901_s0 }
0x14ae   : > { %9271 = vrot.lane.b32.xlu1 %v9261_v34, %s18901_s0  ;;  %v18190_v34 = vsub.f32 %v9259_v31, %v18158_v1 }
0x14b2   : > { %9267 = vrot.lane.b32.xlu1 %v9259_v31, %s18901_s0 }
0x1514   : > { %v9290_v39 = vpop.permute.xlu1 %9289 }
0x1515   : > { %v9298_v10 = vsel %vm1103_vm2, %v9290_v39, 0.0 }
0x1516   : > { %v18116_v25 = vand.u32 4294901760, %v9298_v10  ;;  %v9288_v19 = vpop.permute.xlu0 %9287 }
0x1517   : > { %v9297_v9 = vsel %vm1103_vm2, %v9288_v19, 0.0  ;;  %v18209_v19 = vand.u32 4294901760, %v18182_v56 }
0x1518   : > { %v18119_v54 = vsub.f32 %v9298_v10, %v18116_v25  ;;  %13949 = vmatprep.subr.mxu0 %v18116_v25  ;;  %v18125_v40 = vand.u32 4294901760, %v9297_v9  ;;  %v9286_v55 = vpop.permute.xlu1 %9285  ;;  %v9456_v10 = vsub.f32 %v18147_v57, %v18171_v38 }
0x1519   : > { %13950 = vmatpush3.msra.mxu0 %v18116_v25  ;;  %v9296_v33 = vsel %vm1103_vm2, %v9286_v55, 0.0 }
0x151a   : > { %v18131_v29 = vand.u32 4294901760, %v18119_v54  ;;  %v18134_v8 = vsub.f32 %v9297_v9, %v18125_v40  ;;  %13951 = vmatprep.subr.mxu0 %v18125_v40  ;;  %v9274_v44 = vpop.permute.xlu0 %9273  ;;  %v18138_v37 = vand.u32 4294901760, %v9296_v33 }
0x151b   : > { %13952 = vmatpush3.msra.mxu0 %v18125_v40  ;;  %v9282_v42 = vsel %vm1086_vm3, 0.0, %v9274_v44 }
0x151c   : > { %v9428_v2 = vsub.f32 %v18119_v54, %v18131_v29  ;;  %v18144_v13 = vand.u32 4294901760, %v18134_v8  ;;  %v18152_v26 = vsub.f32 %v9296_v33, %v18138_v37  ;;  %v9284_v14 = vpop.permute.xlu1 %9283  ;;  %13953 = vmatprep.subr.mxu0 %v18138_v37  ;;  %v18173_v61 = vand.u32 4294901760, %v9282_v42 }
0x151d   : > { %v9295_v27 = vsel %vm1103_vm2, %v9284_v14, 0.0  ;;  %13954 = vmatpush3.msra.mxu0 %v18138_v37  ;;  %v18222_v14 = vand.u32 4294901760, %v18190_v34 }
0x151e   : > { %v9429_v7 = vand.u32 4294901760, %v9428_v2  ;;  %v9435_v3 = vsub.f32 %v18134_v8, %v18144_v13  ;;  %v18165_v58 = vand.u32 4294901760, %v9295_v27  ;;  %v18168_v60 = vand.u32 4294901760, %v18152_v26  ;;  %v9270_v21 = vpop.permute.xlu0 %9269 }
0x151f   : > { %v9280_v15 = vsel %vm1086_vm3, 0.0, %v9270_v21  ;;  %v18201_v4 = vsub.f32 %v9282_v42, %v18173_v61  ;;  %v9463_v2 = vsub.f32 %v18156_v20, %v18187_v16  ;;  %v9457_v42 = vand.u32 4294901760, %v9456_v10 }
0x1520   : > { %13979 = vmatprep.subr.mxu1 %v9429_v7  ;;  %v9436_v48 = vand.u32 4294901760, %v9435_v3  ;;  %v18176_v36 = vsub.f32 %v9295_v27, %v18165_v58  ;;  %v9272_v22 = vpop.permute.xlu1 %9271  ;;  %13955 = vmatprep.subr.mxu0 %v18165_v58  ;;  %v9442_v18 = vsub.f32 %v18152_v26, %v18168_v60  ;;  %v18211_v9 = vand.u32 4294901760, %v9280_v15 }
0x1521   : > { %13980 = vmatpush3.msra.mxu1 %v9429_v7  ;;  %v9281_v24 = vsel %vm1086_vm3, 0.0, %v9272_v22  ;;  %13956 = vmatpush3.msra.mxu0 %v18165_v58  ;;  %v9470_v27 = vsub.f32 %v18182_v56, %v18209_v19  ;;  %v18231_v3 = vand.u32 4294901760, %v18201_v4  ;;  %v9477_v22 = vsub.f32 %v18190_v34, %v18222_v14 }
0x1522   : > { %13981 = vmatprep.subr.mxu1 %v9436_v48  ;;  %v18193_v35 = vand.u32 4294901760, %v9281_v24  ;;  %13957 = vmatprep.subr.mxu0 %v18123_v45  ;;  %v9443_v32 = vand.u32 4294901760, %v9442_v18  ;;  %v18197_v59 = vand.u32 4294901760, %v18176_v36  ;;  %v18234_v21 = vsub.f32 %v9280_v15, %v18211_v9 }
0x1523   : > { %13982 = vmatpush3.msra.mxu1 %v9436_v48  ;;  %13958 = vmatpush3.msra.mxu0 %v18123_v45  ;;  %v9464_v48 = vand.u32 4294901760, %v9463_v2  ;;  %v9471_v15 = vand.u32 4294901760, %v9470_v27 }
0x1524   : > { %v9268_v39 = vpop.permute.xlu1 %9267  ;;  %13959 = vmatprep.subr.mxu0 %v18128_v53  ;;  %13983 = vmatprep.subr.mxu1 %v9443_v32  ;;  %v9449_v31 = vsub.f32 %v18176_v36, %v18197_v59  ;;  %v18216_v33 = vsub.f32 %v9281_v24, %v18193_v35 }
0x1525   : > { %v9279_v55 = vsel %vm1086_vm3, 0.0, %v9268_v39  ;;  %13960 = vmatpush3.msra.mxu0 %v18128_v53  ;;  %13984 = vmatpush3.msra.mxu1 %v9443_v32  ;;  %v9484_v32 = vsub.f32 %v18201_v4, %v18231_v3  ;;  %v18252_v39 = vand.u32 4294901760, %v18234_v21 }
0x1526   : > { %13961 = vmatprep.subr.mxu0 %v18149_v62  ;;  %v9450_v44 = vand.u32 4294901760, %v9449_v31  ;;  %v18224_v7 = vand.u32 4294901760, %v9279_v55  ;;  %v18241_v18 = vand.u32 4294901760, %v18216_v33  ;;  %v9478_v31 = vand.u32 4294901760, %v9477_v22 }
0x1527   : > { %13962 = vmatpush3.msra.mxu0 %v18149_v62  ;;  %v9498_v2 = vsub.f32 %v18234_v21, %v18252_v39 }
0x1528   : > { %13963 = vmatprep.subr.mxu0 %v18158_v1  ;;  %13985 = vmatprep.subr.mxu1 %v9450_v44  ;;  %v18244_v24 = vsub.f32 %v9279_v55, %v18224_v7  ;;  %v9491_v10 = vsub.f32 %v18216_v33, %v18241_v18 }
0x1529   : > { %13964 = vmatpush3.msra.mxu0 %v18158_v1  ;;  %13986 = vmatpush3.msra.mxu1 %v9450_v44  ;;  %v9485_v44 = vand.u32 4294901760, %v9484_v32 }
0x152a   : > { %13965 = vmatprep.subr.mxu0 %v18173_v61  ;;  %13987 = vmatprep.subr.mxu1 %v9457_v42  ;;  %v18259_v55 = vand.u32 4294901760, %v18244_v24 }
0x152b   : > { %13966 = vmatpush3.msra.mxu0 %v18173_v61  ;;  %13988 = vmatpush3.msra.mxu1 %v9457_v42  ;;  %v9492_v42 = vand.u32 4294901760, %v9491_v10 }
0x152c   : > { %13967 = vmatprep.subr.mxu0 %v18193_v35  ;;  %13989 = vmatprep.subr.mxu1 %v9464_v48  ;;  %v9505_v27 = vsub.f32 %v18244_v24, %v18259_v55 }
0x152d   : > { %13968 = vmatpush3.msra.mxu0 %v18193_v35  ;;  %13990 = vmatpush3.msra.mxu1 %v9464_v48  ;;  %v9499_v48 = vand.u32 4294901760, %v9498_v2 }
0x152e   : > { %13969 = vmatprep.subr.mxu0 %v18211_v9  ;;  %13991 = vmatprep.subr.mxu1 %v9471_v15  ;;  %v9506_v22 = vand.u32 4294901760, %v9505_v27 }
0x152f   : > { %13970 = vmatpush3.msra.mxu0 %v18211_v9  ;;  %13992 = vmatpush3.msra.mxu1 %v9471_v15  ;;  %v19015_v15 = vld [vmem:[#allocation44_spill] sm:$0xff] }
0x1530   : > { %13971 = vmatprep.subr.mxu0 %v18224_v7  ;;  %13993 = vmatprep.subr.mxu1 %v9478_v31 }
0x1531   : > { %13972 = vmatpush3.msra.mxu0 %v18224_v7  ;;  %13994 = vmatpush3.msra.mxu1 %v9478_v31 }
0x1532   : > { %13974 = vmatmul.mubr.f32.vlgmr.msra.gmra.mxu0 %v18960_v46  ;;  %13995 = vmatprep.subr.mxu1 %v9485_v44  ;;  %v19000_v46 = vld [vmem:[#allocation41_spill] sm:$0xff] }
0x1533   : > { %14009 = vmatprep.subr.mxu0 %v18119_v54  ;;  %13996 = vmatpush3.msra.mxu1 %v9485_v44 }
0x1534   : > { %14010 = vmatpush3.msra.mxu0 %v18119_v54  ;;  %13997 = vmatprep.subr.mxu1 %v9492_v42  ;;  %v19002_v54 = vld [vmem:[#allocation32_spill] sm:$0xff] }
0x1535   : > { %14011 = vmatprep.subr.mxu0 %v18134_v8  ;;  %13976 = vmatprep.mubr.f32.mxu0 %v18920_v51  ;;  %v19001_v51 = vld [vmem:[#allocation30_spill] sm:$0xff] }
0x1536   : > { %13998 = vmatpush3.msra.mxu1 %v9492_v42  ;;  %14012 = vmatpush3.msra.mxu0 %v18134_v8  ;;  %v19003_v8 = vld [vmem:[#allocation33_spill] sm:$0xff] }
0x1537   : > { %13977 = vmatmul.mubr.f32.gmra.mxu0 %v19000_v46  ;;  %13999 = vmatprep.subr.mxu1 %v9499_v48 }
0x1538   : > { %14013 = vmatprep.subr.mxu0 %v18152_v26  ;;  %14000 = vmatpush3.msra.mxu1 %v9499_v48 }
0x1539   : > { %14014 = vmatpush3.msra.mxu0 %v18152_v26  ;;  %14001 = vmatprep.subr.mxu1 %v9506_v22  ;;  %v19005_v26 = vld [vmem:[#allocation31_spill] sm:$0xff] }
0x153a   : > { %14015 = vmatprep.subr.mxu0 %v18176_v36  ;;  %14002 = vmatpush3.msra.mxu1 %v9506_v22 }
0x153b   : > { %14016 = vmatpush3.msra.mxu0 %v18176_v36  ;;  %14004 = vmatmul.mubr.f32.vlgmr.msra.gmra.mxu1 %v19001_v51  ;;  %v19007_v36 = vld [vmem:[#allocation36_spill] sm:$0xff] }
0x153c   : > { %14017 = vmatprep.subr.mxu0 %v18147_v57  ;;  %14039 = vmatprep.subr.mxu1 %v18116_v25 }
0x153d   : > { %14018 = vmatpush3.msra.mxu0 %v18147_v57  ;;  %14040 = vmatpush3.msra.mxu1 %v18116_v25  ;;  %v19004_v57 = vld [vmem:[#allocation27_spill] sm:$0xff] }
0x153e   : > { %14019 = vmatprep.subr.mxu0 %v18156_v20  ;;  %14041 = vmatprep.subr.mxu1 %v18125_v40 }
0x153f   : > { %14006 = vmatprep.mubr.f32.mxu1 %v19002_v54  ;;  %14020 = vmatpush3.msra.mxu0 %v18156_v20  ;;  %v19006_v20 = vld [vmem:[#allocation34_spill] sm:$0xff] }
0x1540   : > { %14042 = vmatpush3.msra.mxu1 %v18125_v40  ;;  %14021 = vmatprep.subr.mxu0 %v18182_v56 }
0x1541   : > { %14007 = vmatmul.mubr.f32.gmra.mxu1 %v19003_v8  ;;  %14043 = vmatprep.subr.mxu1 %v18138_v37 }
0x1542   : > { %14022 = vmatpush3.msra.mxu0 %v18182_v56  ;;  %14044 = vmatpush3.msra.mxu1 %v18138_v37  ;;  %v19011_v56 = vld [vmem:[#allocation38_spill] sm:$0xff] }
0x1543   : > { %14023 = vmatprep.subr.mxu0 %v18190_v34  ;;  %14045 = vmatprep.subr.mxu1 %v18165_v58 }
0x1544   : > { %14024 = vmatpush3.msra.mxu0 %v18190_v34  ;;  %14046 = vmatpush3.msra.mxu1 %v18165_v58 }
0x1545   : > { %14025 = vmatprep.subr.mxu0 %v18201_v4  ;;  %14047 = vmatprep.subr.mxu1 %v18123_v45 }
0x1546   : > { %14026 = vmatpush3.msra.mxu0 %v18201_v4  ;;  %14048 = vmatpush3.msra.mxu1 %v18123_v45 }
0x1547   : > { %14027 = vmatprep.subr.mxu0 %v18216_v33  ;;  %14049 = vmatprep.subr.mxu1 %v18128_v53 }
0x1548   : > { %14028 = vmatpush3.msra.mxu0 %v18216_v33  ;;  %14050 = vmatpush3.msra.mxu1 %v18128_v53  ;;  %v19013_v33 = vld [vmem:[#allocation42_spill] sm:$0xff] }
0x1549   : > { %14029 = vmatprep.subr.mxu0 %v18234_v21  ;;  %14051 = vmatprep.subr.mxu1 %v18149_v62 }
0x154a   : > { %14030 = vmatpush3.msra.mxu0 %v18234_v21  ;;  %14052 = vmatpush3.msra.mxu1 %v18149_v62 }
0x154b   : > { %14031 = vmatprep.subr.mxu0 %v18244_v24  ;;  %14053 = vmatprep.subr.mxu1 %v18158_v1 }
0x154c   : > { %14032 = vmatpush3.msra.mxu0 %v18244_v24  ;;  %14033 = vmatprep.mubr.f32.mxu0 %v19004_v57 }
0x154d   : > { %14054 = vmatpush3.msra.mxu1 %v18158_v1  ;;  %14034 = vmatmul.mubr.f32.vlgmr.msra.gmra.mxu0 %v19005_v26 }
0x154e   : > { %14055 = vmatprep.subr.mxu1 %v18173_v61  ;;  %14069 = vmatprep.subr.mxu0 %v18131_v29 }
0x154f   : > { %14056 = vmatpush3.msra.mxu1 %v18173_v61  ;;  %14070 = vmatpush3.msra.mxu0 %v18131_v29  ;;  %v19008_v29 = vld [vmem:[#allocation28_spill] sm:$0xff] }
0x1550   : > { %14057 = vmatprep.subr.mxu1 %v18193_v35  ;;  %14071 = vmatprep.subr.mxu0 %v18144_v13 }
0x1551   : > { %14036 = vmatprep.mubr.f32.mxu0 %v19006_v20  ;;  %14058 = vmatpush3.msra.mxu1 %v18193_v35 }
0x1552   : > { %14072 = vmatpush3.msra.mxu0 %v18144_v13  ;;  %14059 = vmatprep.subr.mxu1 %v18211_v9  ;;  %v19009_v13 = vld [vmem:[#allocation35_spill] sm:$0xff] }
0x1553   : > { %14037 = vmatmul.mubr.f32.gmra.mxu0 %v19007_v36  ;;  %14073 = vmatprep.subr.mxu0 %v18168_v60 }
0x1554   : > { %14060 = vmatpush3.msra.mxu1 %v18211_v9  ;;  %14074 = vmatpush3.msra.mxu0 %v18168_v60  ;;  %v19010_v60 = vld [vmem:[#allocation37_spill] sm:$0xff] }
0x1555   : > { %14061 = vmatprep.subr.mxu1 %v18224_v7  ;;  %14075 = vmatprep.subr.mxu0 %v18197_v59 }
0x1556   : > { %14062 = vmatpush3.msra.mxu1 %v18224_v7  ;;  %14063 = vmatprep.mubr.f32.mxu1 %v19008_v29 }
0x1557   : > { %14076 = vmatpush3.msra.mxu0 %v18197_v59  ;;  %14064 = vmatmul.mubr.f32.vlgmr.msra.gmra.mxu1 %v19009_v13 }
0x1558   : > { %14077 = vmatprep.subr.mxu0 %v18171_v38  ;;  %14099 = vmatprep.subr.mxu1 %v18116_v25 }
0x1559   : > { %14078 = vmatpush3.msra.mxu0 %v18171_v38  ;;  %14100 = vmatpush3.msra.mxu1 %v18116_v25  ;;  %v19012_v25 = vld [vmem:[#allocation46_spill] sm:$0xff] }
0x155a   : > { %14079 = vmatprep.subr.mxu0 %v18187_v16  ;;  %14101 = vmatprep.subr.mxu1 %v18125_v40 }
0x155b   : > { %14066 = vmatprep.mubr.f32.mxu1 %v19010_v60  ;;  %14080 = vmatpush3.msra.mxu0 %v18187_v16 }
0x155c   : > { %14102 = vmatpush3.msra.mxu1 %v18125_v40  ;;  %14081 = vmatprep.subr.mxu0 %v18209_v19 }
0x155d   : > { %14067 = vmatmul.mubr.f32.gmra.mxu1 %v19011_v56  ;;  %14103 = vmatprep.subr.mxu1 %v18138_v37 }
0x155e   : > { %14082 = vmatpush3.msra.mxu0 %v18209_v19  ;;  %14104 = vmatpush3.msra.mxu1 %v18138_v37 }
0x155f   : > { %14083 = vmatprep.subr.mxu0 %v18222_v14  ;;  %14105 = vmatprep.subr.mxu1 %v18165_v58 }
0x1560   : > { %14084 = vmatpush3.msra.mxu0 %v18222_v14  ;;  %14106 = vmatpush3.msra.mxu1 %v18165_v58 }
0x1561   : > { %14085 = vmatprep.subr.mxu0 %v18231_v3  ;;  %14107 = vmatprep.subr.mxu1 %v18123_v45 }
0x1562   : > { %14086 = vmatpush3.msra.mxu0 %v18231_v3  ;;  %14108 = vmatpush3.msra.mxu1 %v18123_v45 }
0x1563   : > { %14087 = vmatprep.subr.mxu0 %v18241_v18  ;;  %14109 = vmatprep.subr.mxu1 %v18128_v53 }
0x1564   : > { %14088 = vmatpush3.msra.mxu0 %v18241_v18  ;;  %14110 = vmatpush3.msra.mxu1 %v18128_v53 }
0x1565   : > { %14089 = vmatprep.subr.mxu0 %v18252_v39  ;;  %14111 = vmatprep.subr.mxu1 %v18149_v62 }
0x1566   : > { %14090 = vmatpush3.msra.mxu0 %v18252_v39  ;;  %14112 = vmatpush3.msra.mxu1 %v18149_v62 }
0x1567   : > { %14091 = vmatprep.subr.mxu0 %v18259_v55  ;;  %14113 = vmatprep.subr.mxu1 %v18158_v1 }
0x1568   : > { %14092 = vmatpush3.msra.mxu0 %v18259_v55  ;;  %14093 = vmatprep.mubr.f32.mxu0 %v18914_v28  ;;  %v19016_v55 = vld [vmem:[#allocation45_spill] sm:$0xff] }
0x1569   : > { %14114 = vmatpush3.msra.mxu1 %v18158_v1  ;;  %14094 = vmatmul.mubr.f32.vlgmr.msra.gmra.mxu0 %v19001_v51 }
0x156a   : > { %14115 = vmatprep.subr.mxu1 %v18173_v61  ;;  %14096 = vmatprep.mubr.f32.mxu0 %v19002_v54 }
0x156b   : > { %14116 = vmatpush3.msra.mxu1 %v18173_v61  ;;  %14123 = vmatprep.mubr.f32.mxu1 %v18914_v28 }
0x156c   : > { %14117 = vmatprep.subr.mxu1 %v18193_v35 }
0x156d   : > { %14118 = vmatpush3.msra.mxu1 %v18193_v35  ;;  %14097 = vmatmul.mubr.f32.gmra.mxu0 %v19003_v8 }
0x156e   : > { %14119 = vmatprep.subr.mxu1 %v18211_v9  ;;  %14153 = vmatprep.mubr.f32.mxu0 %v19012_v25 }
0x156f   : > { %14120 = vmatpush3.msra.mxu1 %v18211_v9 }
0x1570   : > { %14121 = vmatprep.subr.mxu1 %v18224_v7 }
0x1571   : > { %14122 = vmatpush3.msra.mxu1 %v18224_v7  ;;  %v19014_v7 = vld [vmem:[#allocation43_spill] sm:$0xff] }
0x1572   : > { %14124 = vmatmul.mubr.f32.vlgmr.msra.gmra.mxu1 %v19001_v51 }
0x1573   : > { %14126 = vmatprep.mubr.f32.mxu1 %v19002_v54 }
0x1576   : > { %14127 = vmatmul.mubr.f32.gmra.mxu1 %v19003_v8 }
0x1577   : > { %14183 = vmatprep.mubr.f32.mxu1 %v15553_v52 }
0x15f2   : > { %v13975_v28 = vpop.f32.mrf.mxu0 }
0x15f3   : > { %v9393_v32 = vadd.f32 %v13975_v28, %v19015_v15 }
0x15f4   : > { %v9382_v45 = vpop.f32.mrf.mxu0 }
0x15f5   : > { %v9383_v44 = vadd.f32 %v9382_v45, %v19016_v55 }
0x15f7   : > { %v13978_v40 = vpop.f32.mrf.mxu0 }
0x15f8   : > { %v9413_v14 = vadd.f32 %v13978_v40, %v19013_v33 }
0x15f9   : > { %v9402_v37 = vpop.f32.mrf.mxu0 }
0x15fa   : > { %v9403_v3 = vadd.f32 %v9402_v37, %v19014_v7 }
0x15fb   : > { %v14005_v53 = vpop.f32.mrf.mxu1 }
0x15fc   : > { %v9550_v2 = vadd.f32 %v14005_v53, %v9393_v32 }
0x15fd   : > { %v9543_v62 = vpop.f32.mrf.mxu1 }
0x15fe   : > { %v9544_v22 = vadd.f32 %v9543_v62, %v9383_v44 }
0x1601   : > { %v14008_v58 = vpop.f32.mrf.mxu1 }
0x1602   : > { %v9562_v21 = vadd.f32 %v14008_v58, %v9413_v14 }
0x1603   : > { %v9555_v61 = vpop.f32.mrf.mxu1 }
0x1604   : > { %v9556_v39 = vadd.f32 %v9555_v61, %v9403_v3 }
0x160d   : > { %v14035_v1 = vpop.f32.mrf.mxu0 }
0x160e   : > { %v9665_v51 = vadd.f32 %v14035_v1, %v9550_v2 }
0x160f   : > { %v9657_v38 = vpop.f32.mrf.mxu0 }
0x1610   : > { %v9658_v26 = vadd.f32 %v9657_v38, %v9544_v22 }
0x1613   : > { %v14038_v16 = vpop.f32.mrf.mxu0 }
0x1614   : > { %v9679_v31 = vadd.f32 %v14038_v16, %v9562_v21 }
0x1615   : > { %v9671_v35 = vpop.f32.mrf.mxu0 }
0x1616   : > { %v9672_v42 = vadd.f32 %v9671_v35, %v9556_v39 }
0x1617   : > { %v14065_v34 = vpop.f32.mrf.mxu1 }
0x1618   : > { %v9772_v20 = vadd.f32 %v14065_v34, %v9665_v51 }
0x1619   : > { %v9763_v59 = vpop.f32.mrf.mxu1 }
0x161a   : > { %v9764_v60 = vadd.f32 %v9763_v59, %v9658_v26 }
0x161d   : > { %v14068_v19 = vpop.f32.mrf.mxu1 }
0x161e   : > { %v9788_v27 = vadd.f32 %v14068_v19, %v9679_v31 }
0x161f   : > { %v9779_v18 = vpop.f32.mrf.mxu1 }
0x1620   : > { %v9780_v54 = vadd.f32 %v9779_v18, %v9672_v42 }
0x1629   : > { %v14095_v4 = vpop.f32.mrf.mxu0 }
0x162a   : > { %v9901_v56 = vadd.f32 %v14095_v4, %v9772_v20 }
0x162b   : > { %v9894_v9 = vpop.f32.mrf.mxu0 }
0x162c   : > { %v9895_v28 = vadd.f32 %v9894_v9, %v9764_v60 }
0x162d   : > { %v14098_v24 = vpop.f32.mrf.mxu0 }
0x162e   : > { %v9913_v8 = vadd.f32 %v14098_v24, %v9788_v27 }
0x162f   : > { %v9906_v48 = vpop.f32.mrf.mxu0 }
0x1630   : > { %v9907_v36 = vadd.f32 %v9906_v48, %v9780_v54 }
0x1632   : > { %v14125_v10 = vpop.f32.mrf.mxu1 }
0x1633   : > { %v10002_v45 = vadd.f32 %v14125_v10, %v9901_v56 }
0x1634   : > { %v9995_v46 = vpop.f32.mrf.mxu1 }
0x1635   : > { %v9996_v40 = vadd.f32 %v9995_v46, %v9895_v28  ;;  %v18411_v35 = vand.u32 4294901760, %v10002_v45 }
0x1636   : > { %v14128_v57 = vpop.f32.mrf.mxu1 }
0x1637   : > { %v10014_v29 = vadd.f32 %v14128_v57, %v9913_v8  ;;  %v18429_v3 = vand.u32 4294901760, %v9996_v40  ;;  %v18445_v31 = vsub.f32 %v10002_v45, %v18411_v35 }
0x1638   : > { %v10007_v13 = vpop.f32.mrf.mxu1 }
0x1639   : > { %v10008_v25 = vadd.f32 %v10007_v13, %v9907_v36  ;;  %10043 = vrot.lane.b32.xlu0 %v10014_v29, %s18938_s15  ;;  %v18400_v62 = vand.u32 4294901760, %v10014_v29  ;;  %v18469_v54 = vsub.f32 %v9996_v40, %v18429_v3  ;;  %v18490_v28 = vand.u32 4294901760, %v18445_v31 }
0x163b   : > { %10041 = vrot.lane.b32.xlu1 %v10008_v25, %s18938_s15  ;;  %v18413_v59 = vand.u32 4294901760, %v10008_v25  ;;  %v18418_v19 = vsub.f32 %v10014_v29, %v18400_v62 }
0x163d   : > { %10039 = vrot.lane.b32.xlu0 %v10002_v45, %s18938_s15  ;;  %v18448_v10 = vsub.f32 %v10008_v25, %v18413_v59  ;;  %v18459_v48 = vand.u32 4294901760, %v18418_v19 }
0x163f   : > { %10037 = vrot.lane.b32.xlu1 %v9996_v40, %s18938_s15  ;;  %v18482_v13 = vand.u32 4294901760, %v18448_v10 }
0x1641   : > { %10027 = vrot.lane.b32.xlu0 %v10014_v29, %s14525_s16 }
0x1643   : > { %10025 = vrot.lane.b32.xlu1 %v10008_v25, %s14525_s16  ;;  %v10210_v25 = vsub.f32 %v18418_v19, %v18459_v48 }
0x1645   : > { %10023 = vrot.lane.b32.xlu0 %v10002_v45, %s14525_s16 }
0x1647   : > { %10021 = vrot.lane.b32.xlu1 %v9996_v40, %s14525_s16  ;;  %s10887_s16 = sshll.u32 %s431_s30, 5 }
0x1648   : > { %s433_s0 = scalar_lea.vmem [#allocation2], %s10887_s16  ;;  %s14463_s16 = sshll.u32 %s14526_s22, 4  ;;  %s14464_s16 = int_to_ptr.vmem [resolvable:$false] %s14463_s16 }
0x1649   : > { %s10821_s15 = sshll.u32 %s433_s0, 4  ;;  %s14465_s20 = scalar_lea.vmem %s14464_s16, 1024  ;;  %s18678_s15 = int_to_ptr.vmem [resolvable:$true] %s10821_s15 }
0x164a   : > { %s14459_s21 = scalar_lea.vmem %s18678_s15, 512  ;;  %p14466_p0 = scmp.lt.s32.totalorder %s18678_s15, %s14464_s16 }
0x164b   : > { %p14460_p11 = scmp.ne.s32.totalorder %s18678_s15, %s14459_s21  ;;  %p14467_p1 = scmp.lt.s32.totalorder %s14465_s20, %s14459_s21 }
0x164d   : > { %p14461_p12 = pnand %p14460_p11, %p14637_p5  ;;  %p14468_p2 = por %p14467_p1, %p14466_p0 }
0x164f   : > { %p14462_p13 = pneg %p14461_p12 }
0x1651   : > { %p14469_p3 = pnand %p14468_p2, %p14462_p13 }
0x16ab   : > { %v10044_v53 = vpop.permute.xlu0 %10043 }
0x16ac   : > { %v10052_v37 = vsel %vm2808_vm12, %v10044_v53, 0.0 }
0x16ad   : > { %v18402_v1 = vand.u32 4294901760, %v10052_v37  ;;  %v10042_v58 = vpop.permute.xlu1 %10041 }
0x16ae   : > { %v10051_v38 = vsel %vm2808_vm12, %v10042_v58, 0.0 }
0x16af   : > { %v18406_v61 = vsub.f32 %v10052_v37, %v18402_v1  ;;  %v18408_v16 = vand.u32 4294901760, %v10051_v38  ;;  %14129 = vmatprep.subr.mxu0 %v18402_v1  ;;  %v10040_v34 = vpop.permute.xlu0 %10039 }
0x16b0   : > { %v10050_v4 = vsel %vm2808_vm12, %v10040_v34, 0.0  ;;  %14130 = vmatpush3.msra.mxu0 %v18402_v1  ;;  %v10217_v34 = vsub.f32 %v18448_v10, %v18482_v13 }
0x16b1   : > { %v18421_v9 = vsub.f32 %v10051_v38, %v18408_v16  ;;  %v18423_v33 = vand.u32 4294901760, %v10050_v4  ;;  %14131 = vmatprep.subr.mxu0 %v18408_v16  ;;  %v10038_v14 = vpop.permute.xlu1 %10037  ;;  %v18427_v7 = vand.u32 4294901760, %v18406_v61 }
0x16b2   : > { %v10049_v21 = vsel %vm2808_vm12, %v10038_v14, 0.0  ;;  %14132 = vmatpush3.msra.mxu0 %v18408_v16 }
0x16b3   : > { %v18434_v18 = vsub.f32 %v10050_v4, %v18423_v33  ;;  %v18436_v24 = vand.u32 4294901760, %v10049_v21  ;;  %v10028_v15 = vpop.permute.xlu0 %10027  ;;  %14133 = vmatprep.subr.mxu0 %v18423_v33  ;;  %v10182_v32 = vsub.f32 %v18406_v61, %v18427_v7  ;;  %v18442_v39 = vand.u32 4294901760, %v18421_v9 }
0x16b4   : > { %v10036_v55 = vsel %vm2791_vm13, 0.0, %v10028_v15  ;;  %14134 = vmatpush3.msra.mxu0 %v18423_v33  ;;  %v18507_v4 = vand.u32 4294901760, %v18469_v54  ;;  %v10211_v15 = vand.u32 4294901760, %v10210_v25 }
0x16b5   : > { %v18453_v44 = vsub.f32 %v10049_v21, %v18436_v24  ;;  %14135 = vmatprep.subr.mxu0 %v18436_v24  ;;  %v10026_v2 = vpop.permute.xlu1 %10025  ;;  %v10183_v42 = vand.u32 4294901760, %v10182_v32  ;;  %v10189_v27 = vsub.f32 %v18421_v9, %v18442_v39  ;;  %v18461_v46 = vand.u32 4294901760, %v10036_v55 }
0x16b6   : > { %v10035_v22 = vsel %vm2791_vm13, 0.0, %v10026_v2  ;;  %14136 = vmatpush3.msra.mxu0 %v18436_v24  ;;  %v18466_v51 = vand.u32 4294901760, %v18434_v18  ;;  %v10224_v32 = vsub.f32 %v18445_v31, %v18490_v28  ;;  %v10218_v2 = vand.u32 4294901760, %v10217_v34 }
0x16b7   : > { %14159 = vmatprep.subr.mxu1 %v10183_v42  ;;  %v10024_v8 = vpop.permute.xlu0 %10023  ;;  %14137 = vmatprep.subr.mxu0 %v18400_v62  ;;  %v10190_v57 = vand.u32 4294901760, %v10189_v27  ;;  %v18473_v26 = vand.u32 4294901760, %v18453_v44  ;;  %v18475_v20 = vand.u32 4294901760, %v10035_v22  ;;  %v18493_v45 = vsub.f32 %v10036_v55, %v18461_v46 }
0x16b8   : > { %v10034_v36 = vsel %vm2791_vm13, 0.0, %v10024_v8  ;;  %14138 = vmatpush3.msra.mxu0 %v18400_v62  ;;  %14160 = vmatpush3.msra.mxu1 %v10183_v42  ;;  %v10196_v29 = vsub.f32 %v18434_v18, %v18466_v51  ;;  %v10231_v42 = vsub.f32 %v18469_v54, %v18507_v4  ;;  %v10225_v8 = vand.u32 4294901760, %v10224_v32 }
0x16b9   : > { %14139 = vmatprep.subr.mxu0 %v18413_v59  ;;  %14161 = vmatprep.subr.mxu1 %v10190_v57  ;;  %v10022_v60 = vpop.permute.xlu1 %10021  ;;  %v10203_v56 = vsub.f32 %v18453_v44, %v18473_v26  ;;  %v18495_v40 = vand.u32 4294901760, %v10034_v36  ;;  %v18501_v38 = vsub.f32 %v10035_v22, %v18475_v20  ;;  %v18519_v55 = vand.u32 4294901760, %v18493_v45 }
0x16ba   : > { %v10033_v53 = vsel %vm2791_vm13, 0.0, %v10022_v60  ;;  %14140 = vmatpush3.msra.mxu0 %v18413_v59  ;;  %14162 = vmatpush3.msra.mxu1 %v10190_v57  ;;  %v10197_v37 = vand.u32 4294901760, %v10196_v29  ;;  %v10232_v29 = vand.u32 4294901760, %v10231_v42 }
0x16bb   : > { %14141 = vmatprep.subr.mxu0 %v18411_v35  ;;  %v10204_v58 = vand.u32 4294901760, %v10203_v56  ;;  %v18509_v14 = vand.u32 4294901760, %v10033_v53  ;;  %v18513_v21 = vsub.f32 %v10034_v36, %v18495_v40  ;;  %v18526_v27 = vand.u32 4294901760, %v18501_v38 }
0x16bc   : > { %14163 = vmatprep.subr.mxu1 %v10197_v37  ;;  %14142 = vmatpush3.msra.mxu0 %v18411_v35  ;;  %v10238_v57 = vsub.f32 %v18493_v45, %v18519_v55 }
0x16bd   : > { %14164 = vmatpush3.msra.mxu1 %v10197_v37  ;;  %14143 = vmatprep.subr.mxu0 %v18429_v3  ;;  %v18529_v22 = vsub.f32 %v10033_v53, %v18509_v14  ;;  %v18536_v36 = vand.u32 4294901760, %v18513_v21  ;;  %v10245_v60 = vsub.f32 %v18501_v38, %v18526_v27 }
0x16be   : > { %14165 = vmatprep.subr.mxu1 %v10204_v58  ;;  %14144 = vmatpush3.msra.mxu0 %v18429_v3  ;;  %v10239_v25 = vand.u32 4294901760, %v10238_v57 }
0x16bf   : > { %14166 = vmatpush3.msra.mxu1 %v10204_v58  ;;  %14145 = vmatprep.subr.mxu0 %v18461_v46  ;;  %v18544_v56 = vand.u32 4294901760, %v18529_v22  ;;  %v10252_v53 = vsub.f32 %v18513_v21, %v18536_v36  ;;  %v10246_v37 = vand.u32 4294901760, %v10245_v60 }
0x16c0   : > { %14167 = vmatprep.subr.mxu1 %v10211_v15  ;;  %14146 = vmatpush3.msra.mxu0 %v18461_v46 }
0x16c1   : > { %14168 = vmatpush3.msra.mxu1 %v10211_v15  ;;  %14147 = vmatprep.subr.mxu0 %v18475_v20  ;;  %v10259_v58 = vsub.f32 %v18529_v22, %v18544_v56  ;;  %v10253_v34 = vand.u32 4294901760, %v10252_v53 }
0x16c2   : > { %14169 = vmatprep.subr.mxu1 %v10218_v2  ;;  %14148 = vmatpush3.msra.mxu0 %v18475_v20 }
0x16c3   : > { %14170 = vmatpush3.msra.mxu1 %v10218_v2  ;;  %14149 = vmatprep.subr.mxu0 %v18495_v40 }
0x16c4   : > { %14171 = vmatprep.subr.mxu1 %v10225_v8  ;;  %14150 = vmatpush3.msra.mxu0 %v18495_v40 }
0x16c5   : > { %14172 = vmatpush3.msra.mxu1 %v10225_v8  ;;  %14151 = vmatprep.subr.mxu0 %v18509_v14 }
0x16c6   : > { %14173 = vmatprep.subr.mxu1 %v10232_v29  ;;  %14152 = vmatpush3.msra.mxu0 %v18509_v14 }
0x16c7   : > { %14174 = vmatpush3.msra.mxu1 %v10232_v29  ;;  %14154 = vmatmul.mubr.f32.vlgmr.msra.gmra.mxu0 %v15765_v11  ;;  %v10260_v11 = vand.u32 4294901760, %v10259_v58 }
0x16c8   : > { %14175 = vmatprep.subr.mxu1 %v10239_v25  ;;  %14189 = vmatprep.subr.mxu0 %v18406_v61 }
0x16c9   : > { %14176 = vmatpush3.msra.mxu1 %v10239_v25  ;;  %14190 = vmatpush3.msra.mxu0 %v18406_v61 }
0x16ca   : > { %14177 = vmatprep.subr.mxu1 %v10246_v37  ;;  %14191 = vmatprep.subr.mxu0 %v18421_v9 }
0x16cb   : > { %14156 = vmatprep.mubr.f32.mxu0 %v15782_v12  ;;  %14178 = vmatpush3.msra.mxu1 %v10246_v37 }
0x16cc   : > { %14192 = vmatpush3.msra.mxu0 %v18421_v9  ;;  %14179 = vmatprep.subr.mxu1 %v10253_v34 }
0x16cd   : > { %14157 = vmatmul.mubr.f32.gmra.mxu0 %v15786_v6  ;;  %14193 = vmatprep.subr.mxu0 %v18434_v18 }
0x16ce   : > { %14180 = vmatpush3.msra.mxu1 %v10253_v34  ;;  %14194 = vmatpush3.msra.mxu0 %v18434_v18 }
0x16cf   : > { %14181 = vmatprep.subr.mxu1 %v10260_v11  ;;  %14195 = vmatprep.subr.mxu0 %v18453_v44 }
0x16d0   : > { %14182 = vmatpush3.msra.mxu1 %v10260_v11  ;;  %14196 = vmatpush3.msra.mxu0 %v18453_v44 }
0x16d1   : > { %14184 = vmatmul.mubr.f32.vlgmr.msra.gmra.mxu1 %v15630_v17  ;;  %14197 = vmatprep.subr.mxu0 %v18418_v19 }
0x16d2   : > { %14219 = vmatprep.subr.mxu1 %v18402_v1  ;;  %14198 = vmatpush3.msra.mxu0 %v18418_v19 }
0x16d3   : > { %14220 = vmatpush3.msra.mxu1 %v18402_v1  ;;  %14199 = vmatprep.subr.mxu0 %v18448_v10 }
0x16d4   : > { %14221 = vmatprep.subr.mxu1 %v18408_v16  ;;  %14186 = vmatprep.mubr.f32.mxu1 %v15680_v49 }
0x16d5   : > { %14200 = vmatpush3.msra.mxu0 %v18448_v10  ;;  %14222 = vmatpush3.msra.mxu1 %v18408_v16 }
0x16d6   : > { %14187 = vmatmul.mubr.f32.gmra.mxu1 %v15699_v0  ;;  %14201 = vmatprep.subr.mxu0 %v18445_v31 }
0x16d7   : > { %14223 = vmatprep.subr.mxu1 %v18423_v33  ;;  %14202 = vmatpush3.msra.mxu0 %v18445_v31 }
0x16d8   : > { %14224 = vmatpush3.msra.mxu1 %v18423_v33  ;;  %14203 = vmatprep.subr.mxu0 %v18469_v54 }
0x16d9   : > { %14225 = vmatprep.subr.mxu1 %v18436_v24  ;;  %14204 = vmatpush3.msra.mxu0 %v18469_v54 }
0x16da   : > { %14226 = vmatpush3.msra.mxu1 %v18436_v24  ;;  %14205 = vmatprep.subr.mxu0 %v18493_v45 }
0x16db   : > { %14227 = vmatprep.subr.mxu1 %v18400_v62  ;;  %14206 = vmatpush3.msra.mxu0 %v18493_v45 }
0x16dc   : > { %14228 = vmatpush3.msra.mxu1 %v18400_v62  ;;  %14207 = vmatprep.subr.mxu0 %v18501_v38 }
0x16dd   : > { %14229 = vmatprep.subr.mxu1 %v18413_v59  ;;  %14208 = vmatpush3.msra.mxu0 %v18501_v38 }
0x16de   : > { %14230 = vmatpush3.msra.mxu1 %v18413_v59  ;;  %14209 = vmatprep.subr.mxu0 %v18513_v21 }
0x16df   : > { %14231 = vmatprep.subr.mxu1 %v18411_v35  ;;  %14210 = vmatpush3.msra.mxu0 %v18513_v21 }
0x16e0   : > { %14232 = vmatpush3.msra.mxu1 %v18411_v35  ;;  %14211 = vmatprep.subr.mxu0 %v18529_v22 }
0x16e1   : > { %14233 = vmatprep.subr.mxu1 %v18429_v3  ;;  %14212 = vmatpush3.msra.mxu0 %v18529_v22 }
0x16e2   : > { %14213 = vmatprep.mubr.f32.mxu0 %v15557_v47  ;;  %14234 = vmatpush3.msra.mxu1 %v18429_v3 }
0x16e3   : > { %14214 = vmatmul.mubr.f32.vlgmr.msra.gmra.mxu0 %v15678_v63  ;;  %14235 = vmatprep.subr.mxu1 %v18461_v46 }
0x16e4   : > { %14249 = vmatprep.subr.mxu0 %v18427_v7  ;;  %14236 = vmatpush3.msra.mxu1 %v18461_v46 }
0x16e5   : > { %14250 = vmatpush3.msra.mxu0 %v18427_v7  ;;  %14237 = vmatprep.subr.mxu1 %v18475_v20 }
0x16e6   : > { %14251 = vmatprep.subr.mxu0 %v18442_v39  ;;  %14216 = vmatprep.mubr.f32.mxu0 %v15713_v41 }
0x16e7   : > { %14238 = vmatpush3.msra.mxu1 %v18475_v20  ;;  %14252 = vmatpush3.msra.mxu0 %v18442_v39 }
0x16e8   : > { %14217 = vmatmul.mubr.f32.gmra.mxu0 %v15728_v43  ;;  %14239 = vmatprep.subr.mxu1 %v18495_v40 }
0x16e9   : > { %14253 = vmatprep.subr.mxu0 %v18466_v51  ;;  %14240 = vmatpush3.msra.mxu1 %v18495_v40 }
0x16ea   : > { %14254 = vmatpush3.msra.mxu0 %v18466_v51  ;;  %14241 = vmatprep.subr.mxu1 %v18509_v14 }
0x16eb   : > { %14255 = vmatprep.subr.mxu0 %v18473_v26  ;;  %14242 = vmatpush3.msra.mxu1 %v18509_v14 }
0x16ec   : > { %14243 = vmatprep.mubr.f32.mxu1 %v15562_v50  ;;  %14256 = vmatpush3.msra.mxu0 %v18473_v26 }
0x16ed   : > { %14244 = vmatmul.mubr.f32.vlgmr.msra.gmra.mxu1 %v15710_v23  ;;  %14257 = vmatprep.subr.mxu0 %v18459_v48 }
0x16ee   : > { %14279 = vmatprep.subr.mxu1 %v18402_v1  ;;  %14258 = vmatpush3.msra.mxu0 %v18459_v48 }
0x16ef   : > { %14280 = vmatpush3.msra.mxu1 %v18402_v1  ;;  %14259 = vmatprep.subr.mxu0 %v18482_v13 }
0x16f0   : > { %14281 = vmatprep.subr.mxu1 %v18408_v16  ;;  %14246 = vmatprep.mubr.f32.mxu1 %v15743_v5 }
0x16f1   : > { %14260 = vmatpush3.msra.mxu0 %v18482_v13  ;;  %14282 = vmatpush3.msra.mxu1 %v18408_v16  ;;  %v19017_v16 = vld [vmem:[#allocation49_spill] sm:$0xff] }
0x16f2   : > { %14247 = vmatmul.mubr.f32.gmra.mxu1 %v15756_v30  ;;  %14261 = vmatprep.subr.mxu0 %v18490_v28 }
0x16f3   : > { %14283 = vmatprep.subr.mxu1 %v18423_v33  ;;  %14262 = vmatpush3.msra.mxu0 %v18490_v28 }
0x16f4   : > { %14284 = vmatpush3.msra.mxu1 %v18423_v33  ;;  %14263 = vmatprep.subr.mxu0 %v18507_v4  ;;  %v19019_v33 = vld [vmem:[#allocation47_spill] sm:$0xff] }
0x16f5   : > { %14285 = vmatprep.subr.mxu1 %v18436_v24  ;;  %14264 = vmatpush3.msra.mxu0 %v18507_v4 }
0x16f6   : > { %14286 = vmatpush3.msra.mxu1 %v18436_v24  ;;  %14265 = vmatprep.subr.mxu0 %v18519_v55  ;;  %v19020_v24 = vld [vmem:[#allocation48_spill] sm:$0xff] }
0x16f7   : > { %14287 = vmatprep.subr.mxu1 %v18400_v62  ;;  %14266 = vmatpush3.msra.mxu0 %v18519_v55 }
0x16f8   : > { %14288 = vmatpush3.msra.mxu1 %v18400_v62  ;;  %14267 = vmatprep.subr.mxu0 %v18526_v27 }
0x16f9   : > { %14289 = vmatprep.subr.mxu1 %v18413_v59  ;;  %14268 = vmatpush3.msra.mxu0 %v18526_v27 }
0x16fa   : > { %14290 = vmatpush3.msra.mxu1 %v18413_v59  ;;  %14269 = vmatprep.subr.mxu0 %v18536_v36 }
0x16fb   : > { %14291 = vmatprep.subr.mxu1 %v18411_v35  ;;  %14270 = vmatpush3.msra.mxu0 %v18536_v36 }
0x16fc   : > { %14292 = vmatpush3.msra.mxu1 %v18411_v35  ;;  %14271 = vmatprep.subr.mxu0 %v18544_v56 }
0x16fd   : > { %14293 = vmatprep.subr.mxu1 %v18429_v3  ;;  %14272 = vmatpush3.msra.mxu0 %v18544_v56 }
0x16fe   : > { %14273 = vmatprep.mubr.f32.mxu0 %v15553_v52  ;;  %14294 = vmatpush3.msra.mxu1 %v18429_v3 }
0x16ff   : > { %14274 = vmatmul.mubr.f32.vlgmr.msra.gmra.mxu0 %v15630_v17  ;;  %14295 = vmatprep.subr.mxu1 %v18461_v46 }
0x1700   : > { %14296 = vmatpush3.msra.mxu1 %v18461_v46  ;;  %14276 = vmatprep.mubr.f32.mxu0 %v15680_v49 }
0x1701   : > { %14297 = vmatprep.subr.mxu1 %v18475_v20  ;;  %14303 = vmatprep.mubr.f32.mxu1 %v15553_v52 }
0x1702   : > { %14298 = vmatpush3.msra.mxu1 %v18475_v20 }
0x1703   : > { %14277 = vmatmul.mubr.f32.gmra.mxu0 %v15699_v0  ;;  %14299 = vmatprep.subr.mxu1 %v18495_v40 }
0x1704   : > { %14300 = vmatpush3.msra.mxu1 %v18495_v40 }
0x1705   : > { %14301 = vmatprep.subr.mxu1 %v18509_v14 }
0x1706   : > { %14302 = vmatpush3.msra.mxu1 %v18509_v14 }
0x1707   : > { %14304 = vmatmul.mubr.f32.vlgmr.msra.gmra.mxu1 %v15630_v17 }
0x1708   : > { %14306 = vmatprep.mubr.f32.mxu1 %v15680_v49  ;;  %v19018_v49 = vld [vmem:[#allocation50_spill] sm:$0xff] }
0x170b   : > { %14307 = vmatmul.mubr.f32.gmra.mxu1 %v15699_v0 }
0x1787   : > { %v14155_v6 = vpop.f32.mrf.mxu0 }
0x1788   : > { %v10147_v17 = vadd.f32 %v14155_v6, %v19017_v16 }
0x1789   : > { %v10136_v23 = vpop.f32.mrf.mxu0 }
0x178a   : > { %v10137_v59 = vadd.f32 %v10136_v23, %v19018_v49 }
0x178d   : > { %v14158_v30 = vpop.f32.mrf.mxu0 }
0x178e   : > { %v10167_v7 = vadd.f32 %v14158_v30, %v19019_v33 }
0x178f   : > { %v10156_v52 = vpop.f32.mrf.mxu0 }
0x1790   : > { %v10157_v39 = vadd.f32 %v10156_v52, %v19020_v24 }
0x1791   : > { %v14185_v41 = vpop.f32.mrf.mxu1 }
0x1792   : > { %v10304_v0 = vadd.f32 %v14185_v41, %v10147_v17  ;;  %v19023_v17 = vld [vmem:[#allocation5_spill] sm:$0xff] }
0x1793   : > { %v10297_v47 = vpop.f32.mrf.mxu1 }
0x1794   : > { %v10298_v3 = vadd.f32 %v10297_v47, %v10137_v59  ;;  %v19024_v59 = vld [vmem:[#allocation6_spill] sm:$0xff] }
0x1796   : > { %v14188_v63 = vpop.f32.mrf.mxu1 }
0x1797   : > { %v10316_v31 = vadd.f32 %v14188_v63, %v10167_v7  ;;  %v19021_v63 = vld [vmem:[#allocation7_spill] sm:$0xff] }
0x1798   : > { %v10309_v5 = vpop.f32.mrf.mxu1 }
0x1799   : > { %v10310_v51 = vadd.f32 %v10309_v5, %v10157_v39 }
0x17a3   : > { %v14215_v50 = vpop.f32.mrf.mxu0 }
0x17a4   : > { %v10419_v18 = vadd.f32 %v14215_v50, %v10304_v0 }
0x17a5   : > { %v10411_v43 = vpop.f32.mrf.mxu0 }
0x17a6   : > { %v10412_v10 = vadd.f32 %v10411_v43, %v10298_v3 }
0x17a8   : > { %v14218_v12 = vpop.f32.mrf.mxu0 }
0x17a9   : > { %v10433_v54 = vadd.f32 %v14218_v12, %v10316_v31 }
0x17aa   : > { %v10425_v1 = vpop.f32.mrf.mxu0 }
0x17ab   : > { %v10426_v28 = vadd.f32 %v10425_v1, %v10310_v51 }
0x17ad   : > { %v14245_v62 = vpop.f32.mrf.mxu1 }
0x17ae   : > { %v10526_v44 = vadd.f32 %v14245_v62, %v10419_v18  ;;  %v19022_v62 = vld [vmem:[#allocation8_spill] sm:$0xff] }
0x17af   : > { %v10517_v61 = vpop.f32.mrf.mxu1 }
0x17b0   : > { %v10518_v26 = vadd.f32 %v10517_v61, %v10412_v10 }
0x17b2   : > { %v14248_v19 = vpop.f32.mrf.mxu1 }
0x17b3   : > { %v10542_v45 = vadd.f32 %v14248_v19, %v10433_v54 }
0x17b4   : > { %v10533_v48 = vpop.f32.mrf.mxu1 }
0x17b5   : > { %v10534_v21 = vadd.f32 %v10533_v48, %v10426_v28 }
0x17bf   : > { %v14275_v35 = vpop.f32.mrf.mxu0 }
0x17c0   : > { %v10655_v20 = vadd.f32 %v14275_v35, %v10526_v44 }
0x17c1   : > { %v10648_v9 = vpop.f32.mrf.mxu0 }
0x17c2   : > { %v10649_v40 = vadd.f32 %v10648_v9, %v10518_v26 }
0x17c3   : > { %v14278_v46 = vpop.f32.mrf.mxu0 }
0x17c4   : > { %v10667_v15 = vadd.f32 %v14278_v46, %v10542_v45 }
0x17c5   : > { %v10660_v4 = vpop.f32.mrf.mxu0 }
0x17c6   : > { %v10661_v42 = vadd.f32 %v10660_v4, %v10534_v21 }
0x17c7   : > { %v14305_v13 = vpop.f32.mrf.mxu1 }
0x17c8   : > { %v10756_v38 = vadd.f32 %v14305_v13, %v10655_v20 }
0x17c9   : > { %v10749_v14 = vpop.f32.mrf.mxu1 }
0x17ca   : > { %v10772_v32 = vsub.f32 0.0, %v10756_v38  ;;  %v10750_v55 = vadd.f32 %v10749_v14, %v10649_v40 }
0x17cb   : > { %v14308_v2 = vpop.f32.mrf.mxu1 }
0x17cc   : > { %v10777_v27 = vmul.f32 1.442695, %v10772_v32  ;;  %v10771_v22 = vsub.f32 0.0, %v10750_v55  ;;  %v10768_v8 = vadd.f32 %v14308_v2, %v10667_v15 }
0x17cd   : > { %v10761_v57 = vpop.f32.mrf.mxu1 }
0x17ce   : > { %14437 = vpow2.f32 %v10777_v27  ;;  %v10775_v36 = vmul.f32 1.442695, %v10771_v22  ;;  %v10774_v29 = vsub.f32 0.0, %v10768_v8  ;;  %v10762_v60 = vadd.f32 %v10761_v57, %v10661_v42 }
0x17d0   : > { %14439 = vpow2.f32 %v10775_v36  ;;  %v10781_v56 = vmul.f32 1.442695, %v10774_v29  ;;  %v10773_v25 = vsub.f32 0.0, %v10762_v60 }
0x17d2   : > { %14441 = vpow2.f32 %v10781_v56  ;;  %v10779_v53 = vmul.f32 1.442695, %v10773_v25 }
0x17d4   : > { %14443 = vpow2.f32 %v10779_v53 }
0x17db   : > { %v14438_v37 = vpop.eup %14437 }
0x17dc   : > { %v10784_v58 = vadd.f32 1.0, %v14438_v37 }
0x17dd   : > { %v14440_v34 = vpop.eup %14439 }
0x17de   : > { %14445 = vrcp.f32 %v10784_v58  ;;  %v10783_v11 = vadd.f32 1.0, %v14440_v34 }
0x17df   : > { %v14442_v6 = vpop.eup %14441 }
0x17e0   : > { %14447 = vrcp.f32 %v10783_v11  ;;  %v10786_v23 = vadd.f32 1.0, %v14442_v6 }
0x17e1   : > { %v14444_v30 = vpop.eup %14443 }
0x17e2   : > { %14449 = vrcp.f32 %v10786_v23  ;;  %v10785_v41 = vadd.f32 1.0, %v14444_v30 }
0x17e4   : > { %14451 = vrcp.f32 %v10785_v41 }
0x17eb   : > { %v14446_v52 = vpop.eup %14445 }
0x17ec   : > { %v10796_v47 = vmul.f32 %v14446_v52, %v10756_v38 }
0x17ed   : > { %v14448_v50 = vpop.eup %14447 }
0x17ee   : > { %v10800_v43 = vadd.f32 %v10796_v47, %v19021_v63  ;;  %v10795_v5 = vmul.f32 %v14448_v50, %v10750_v55 }
0x17ef   : > { %v14450_v12 = vpop.eup %14449 }
0x17f0   : > { %10804 = vst [vmem:[%s433_s0 + $0x8] sm:$0xff] %v10800_v43  ;;  %v10799_v1 = vadd.f32 %v10795_v5, %v19022_v62  ;;  %v10798_v61 = vmul.f32 %v14450_v12, %v10768_v8 }
0x17f1   : > { %v14452_v16 = vpop.eup %14451 }
0x17f2   : > { %10803 = vst [vmem:[%s433_s0] sm:$0xff] %v10799_v1  ;;  %v10802_v35 = vadd.f32 %v10798_v61, %v19023_v17  ;;  %v10797_v49 = vmul.f32 %v14452_v16, %v10762_v60 }
0x17f4   : > { %10806 = vst [vmem:[%s433_s0 + $0x18] sm:$0xff] %v10802_v35  ;;  %v10801_v0 = vadd.f32 %v10797_v49, %v19024_v59 }
0x17f6   : > { %10805 = vst [vmem:[%s433_s0 + $0x10] sm:$0xff] %v10801_v0 }
0x17f7   : > { %14472 = shalt.err (!%p14469_p3)
}
0x17f8   : > { %s14473_s30 = scalar_lea.hbm %s18683_s24, 512  ;;  %s14477_s23 = scalar_lea.hbm %s18739_s13, 1024 }
0x17f9   : > { %p14474_p4 = scmp.ne.s32.totalorder %s18683_s24, %s14473_s30  ;;  %p14478_p9 = scmp.lt.s32.totalorder %s18683_s24, %s18739_s13 }
0x17fa   : > { %p14479_p10 = scmp.lt.s32.totalorder %s14477_s23, %s14473_s30 }
0x17fb   : > { %p14475_p7 = pnand %p14474_p4, %p14637_p5 }
0x17fc   : > { %p14480_p11 = por %p14479_p10, %p14478_p9 }
0x17fd   : > { %p14476_p8 = pneg %p14475_p7 }
0x17ff   : > { %p14481_p12 = pnand %p14480_p11, %p14476_p8 }
0x1801   : > { %14484 = shalt.err (!%p14481_p12)
}
0x1802   : > { %s14527_s21 = smov 128   ;;  %s14528_s16 = smov 8  }
0x1803   : > { %14309 = dma.vmem_to_hbm [thread:$0]  (%p14637_p5), %s18678_s15, 512, %s18683_s24, %s18686_s29, %s14527_s21, %s14527_s21, %s14528_s16  }
0x1804 PF: > { %p14315_p13 = scmp.ge.s32.totalorder %s14519_s28, 2  ;;  %s10836_s20 = sand.u32 1, %s14507_s25  }
0x1805   : > { %s10837_s2 = scalar_lea.sflag [#allocation3], %s10836_s20 }
0x1806   : > { %p14312_p0 = pnand %p14315_p13, %p14641_p6 }
0x1808   : > { %p14313_p1 = pneg %p14312_p0 }
0x180a   : > { %14502 = dma.done.wait (%p14313_p1), %s10837_s2, 512  }
0x180b   : > { %14504 = vsyncadd (%p14313_p1), %s10837_s2, 4294966784  ;;  %p23_p2 = scmp.ge.s32.totalorder %s14624_s14, 4   ;;  %s19025_s25 = smov %s14511_s26 }
0x180c   : > { %s19026_s26 = smov %s14515_s27  ;;  %s19027_s27 = smov %s14635_s17 }
0x180d   : > { %s19028_s28 = smov %s14624_s14  ;;  %25 = sbr.rel (!%p23_p2) target bundleno = 7 (0x7), region = 107 }
0x1812   :  { %10842 = vsyncpa [#allocation3], 1 }
0x1813   :  { %10844 = vsyncpa [#allocation3 + $0x1], 1 }

</bundles_post_ra>
